<compile_context>
chip_gen: v7x
topology: tpu7x:2x2x1
jax: 0.10.0
libtpu: 0.0.40
codegen_flags: <defaults>
</compile_context>

<pallas_src>
import math
import numpy as np
import jax
import jax.numpy as jnp
from jax.experimental import pallas as pl
from jax.experimental.pallas import tpu as pltpu

N_NODES = 6
N_EDGES = 6
N_IN = 4          # per-keypoint features: (x, y, confidence, label)
N_HID = 512
EDGE_TYPES = 2
MSG_OUT = 512
BN_EPS = 1e-5

# (name, shape).  PyTorch nn.Linear weights (out,in) are stored transposed as (in,out).
# Wide first-layer weights are pre-split (receiver / sender / skip, x / agg halves) so the
# kernel never concatenates along non-128-aligned lane offsets; the math is identical.
PARAM_SHAPES = [
    ("mlp1_w1", (N_IN, N_HID)),         ("mlp1_b1", (1, N_HID)),
    ("mlp1_w2", (N_HID, N_HID)),        ("mlp1_b2", (1, N_HID)),
    ("mlp2_w1r", (N_HID, N_HID)), ("mlp2_w1s", (N_HID, N_HID)), ("mlp2_b1", (1, N_HID)),
    ("mlp2_w2", (N_HID, N_HID)),        ("mlp2_b2", (1, N_HID)),
    ("mlp3_w1", (N_HID, N_HID)),        ("mlp3_b1", (1, N_HID)),
    ("mlp3_w2", (N_HID, N_HID)),        ("mlp3_b2", (1, N_HID)),
    ("mlp4_w1r", (N_HID, N_HID)), ("mlp4_w1s", (N_HID, N_HID)), ("mlp4_w1k", (N_HID, N_HID)),
    ("mlp4_b1", (1, N_HID)),
    ("mlp4_w2", (N_HID, N_HID)),        ("mlp4_b2", (1, N_HID)),
    ("fc_out_w", (N_HID, N_IN)),        ("fc_out_b", (1, N_IN)),
    ("msg1_0_wr", (N_IN, N_HID)), ("msg1_0_ws", (N_IN, N_HID)), ("msg1_0_b", (1, N_HID)),
    ("msg2_0_w", (N_HID, MSG_OUT)),     ("msg2_0_b", (1, MSG_OUT)),
    ("msg1_1_wr", (N_IN, N_HID)), ("msg1_1_ws", (N_IN, N_HID)), ("msg1_1_b", (1, N_HID)),
    ("msg2_1_w", (N_HID, MSG_OUT)),     ("msg2_1_b", (1, MSG_OUT)),
    ("ofc1_wx", (N_IN, N_HID)), ("ofc1_wa", (MSG_OUT, N_HID)), ("ofc1_b", (1, N_HID)),
    ("ofc2_w", (N_HID, N_HID)),         ("ofc2_b", (1, N_HID)),
    ("ofc3_w", (N_HID, N_IN)),          ("ofc3_b", (1, N_IN)),
]
PARAM_ORDER = [n for n, _ in PARAM_SHAPES]


def _is_bias(name):
    return "_b" in name


def _pipeline_kernel(*refs):
    """Encoder + softmax + decoder, all VMEM-resident, single invocation (no grid)."""
    x_ref = refs[0]
    p = dict(zip(PARAM_ORDER, refs[1:1 + len(PARAM_ORDER)]))
    logits_ref, kgnn_ref = refs[1 + len(PARAM_ORDER):]

    M = x_ref.shape[0]                       # B * 6 (static)
    node_id = jax.lax.broadcasted_iota(jnp.int32, (M, 1), 0) % N_NODES

    def bdot(h, wname):
        # bf16 x bf16 MXU matmul, f32 accumulation.
        return jnp.dot(h.astype(jnp.bfloat16), p[wname][...],
                       preferred_element_type=jnp.float32)

    def bias(bname):
        return p[bname][...]                 # biases stay f32

    def elu(h):
        return jnp.where(h > 0, h, jnp.exp(h) - 1.0)

    def bn(h):
        # nn.BatchNorm1d, training-mode batch stats, weight=1, bias=0, biased variance.
        m = jnp.mean(h, axis=0, keepdims=True)
        v = jnp.mean(h * h, axis=0, keepdims=True) - m * m
        return (h - m) * jax.lax.rsqrt(v + BN_EPS)

    def mlp_tail(pre, prefix):
        # TODO(synk): dropout(p=0.5) between fc1 and fc2 omitted (stochastic).
        h = elu(pre)
        h = elu(bdot(h, prefix + "_w2") + bias(prefix + "_b2"))
        return bn(h)

    def next_node(h):
        # Per graph: out[b, k] = h[b, (k+1) % 6]   (== blockdiag(rel_rec) @ h).
        a = jnp.roll(h, M - 1, axis=0)            # h[(r+1) % M]
        b = jnp.roll(h, N_NODES - 1, axis=0)      # h[(r-5) % M]
        return jnp.where(node_id == N_NODES - 1, b, a)

    def prev_node(h):
        # Per graph: out[b, k] = h[b, (k-1) % 6]   (== blockdiag(rel_rec).T @ h).
        a = jnp.roll(h, 1, axis=0)                # h[(r-1) % M]
        b = jnp.roll(h, M - (N_NODES - 1), axis=0)  # h[(r+5) % M]
        return jnp.where(node_id == 0, b, a)

    x = x_ref[...]                                # (B*6, 4) f32

    # ---------------- GraphEncoder ----------------
    # node2edge's "send" side is the identity for this ring graph (rel_send[e] == onehot(e)).
    h1 = mlp_tail(bdot(x, "mlp1_w1") + bias("mlp1_b1"), "mlp1")                      # (M,512)
    h2 = mlp_tail(bdot(next_node(h1), "mlp2_w1r") + bdot(h1, "mlp2_w1s")
                  + bias("mlp2_b1"), "mlp2")                                         # (M,512)
    inc = prev_node(h2)                        # edge2node; the 1/6 is folded into mlp3_w1
    h3 = mlp_tail(bdot(inc, "mlp3_w1") + bias("mlp3_b1"), "mlp3")                    # (M,512)
    h4 = mlp_tail(bdot(next_node(h3), "mlp4_w1r") + bdot(h3, "mlp4_w1s")
                  + bdot(h2, "mlp4_w1k") + bias("mlp4_b1"), "mlp4")                  # (M,512)
    logits = bdot(h4, "fc_out_w") + bias("fc_out_b")                                 # (M,4)
    logits_ref[...] = logits

    # ---------------- my_softmax over the last axis ----------------
    mx = jnp.max(logits, axis=1, keepdims=True)
    ex = jnp.exp(logits - mx)
    edges = ex / jnp.sum(ex, axis=1, keepdims=True)

    # ---------------- GraphDecoder.single_step_forward ----------------
    recv = next_node(x)                        # receivers; senders == x
    all_msgs = None
    for i in range(EDGE_TYPES):
        # TODO(synk): dropout(p=0.5) between msg_fc1 and msg_fc2 omitted (stochastic).
        msg = bdot(recv, f"msg1_{i}_wr") + bdot(x, f"msg1_{i}_ws") + bias(f"msg1_{i}_b")
        msg = jnp.maximum(msg, 0.0)
        msg = jnp.maximum(bdot(msg, f"msg2_{i}_w") + bias(f"msg2_{i}_b"), 0.0)
        msg = msg * edges[:, i:i + 1]
        all_msgs = msg if all_msgs is None else all_msgs + msg
    agg = prev_node(all_msgs)                  # (M, 512)
    pred = jnp.maximum(bdot(x, "ofc1_wx") + bdot(agg, "ofc1_wa") + bias("ofc1_b"), 0.0)
    # TODO(synk): dropout(p=0.5) after out_fc1 / out_fc2 omitted (stochastic).
    pred = jnp.maximum(bdot(pred, "ofc2_w") + bias("ofc2_b"), 0.0)
    pred = bdot(pred, "ofc3_w") + bias("ofc3_b")
    kgnn_ref[...] = x + pred


def _pick_vmem_limit(input_bytes, n_rows):
    """Derive the VMEM budget from the device (v7x: 64 MiB) instead of hard-coding it."""
    try:
        cap = int(pltpu.get_tpu_info().vmem_capacity_bytes)
    except Exception:
        cap = 64 * 1024 * 1024                 # most conservative (v7x per-TensorCore)
    act_bytes = 16 * n_rows * N_HID * 4        # generous bound on live f32 activations
    want = input_bytes + act_bytes + 8 * 1024 * 1024   # + compiler scratch headroom
    hi = max(cap - 16 * 1024 * 1024, 24 * 1024 * 1024)
    return int(min(max(want, 16 * 1024 * 1024), hi))


def keypoint_graph_forward(batch_x, params):
    """batch_x: (B, 6, 4).  Returns (logits (B,6,4), KGNN2D (B,6,4))."""
    B = batch_x.shape[0]
    M = B * N_NODES
    x2 = batch_x.reshape(M, N_IN).astype(jnp.float32)

    kparams = []
    for name, _ in PARAM_SHAPES:
        w = params[name]
        if name == "mlp3_w1":
            w = w * (1.0 / N_NODES)            # fold edge2node's /num_nodes into the weight
        kparams.append(w.astype(jnp.float32 if _is_bias(name) else jnp.bfloat16))

    inputs = [x2] + kparams
    input_bytes = sum(int(a.size) * a.dtype.itemsize for a in inputs)
    vmem = pl.BlockSpec(memory_space=pltpu.MemorySpace.VMEM)
    out_shape = (jax.ShapeDtypeStruct((M, N_IN), jnp.float32),
                 jax.ShapeDtypeStruct((M, N_IN), jnp.float32))
    # TODO(synk): for large B, switch to a row-block grid (multiple of 8 sublanes and 6
    #             nodes) with a two-pass BN and a "parallel" core axis for v7x megacore.
    logits2, kgnn2 = pl.pallas_call(
        _pipeline_kernel,
        out_shape=out_shape,
        in_specs=[vmem] * len(inputs),
        out_specs=(vmem, vmem),
        compiler_params=pltpu.CompilerParams(
            vmem_limit_bytes=_pick_vmem_limit(input_bytes, M)),
    )(*inputs)
    return logits2.reshape(B, N_EDGES, N_IN), kgnn2.reshape(B, N_NODES, N_IN)


def build_rel(num_nodes=N_NODES):
    off = np.zeros((num_nodes, num_nodes))
    for i in range(num_nodes):
        off[i, (i + 1) % num_nodes] = 1
    recv = np.where(off)[1]
    send = np.where(off)[0]
    rel_rec = np.eye(num_nodes, dtype=np.float32)[recv]     # == encode_onehot(recv)
    rel_send = np.eye(num_nodes, dtype=np.float32)[send]    # == encode_onehot(send)
    return jnp.asarray(rel_rec), jnp.asarray(rel_send)


def init_params(key):
    params = {}
    keys = jax.random.split(key, len(PARAM_SHAPES))
    for k, (name, shape) in zip(keys, PARAM_SHAPES):
        if _is_bias(name):
            params[name] = jnp.full(shape, 0.1, jnp.float32)      # bias.fill_(0.1)
        else:
            std = math.sqrt(2.0 / (shape[0] + shape[1]))          # xavier_normal_
            params[name] = std * jax.random.normal(k, shape, jnp.float32)
    return params


def reference_forward(batch_x, params, rel_rec, rel_send):
    """Pure-JAX f32 mirror using the literal dense rel_rec / rel_send matmuls."""
    B = batch_x.shape[0]
    x = batch_x.reshape(B * N_NODES, N_IN).astype(jnp.float32)
    rr = jnp.kron(jnp.eye(B, dtype=jnp.float32), rel_rec)    # (B*E, B*N)
    rs = jnp.kron(jnp.eye(B, dtype=jnp.float32), rel_send)
    p = params

    def elu(h): return jnp.where(h > 0, h, jnp.exp(h) - 1.0)

    def bn(h):
        m = jnp.mean(h, axis=0, keepdims=True)
        v = jnp.mean((h - m) ** 2, axis=0, keepdims=True)
        return (h - m) / jnp.sqrt(v + BN_EPS)

    def mlp_tail(pre, prefix):
        h = elu(pre)
        h = elu(h @ p[prefix + "_w2"] + p[prefix + "_b2"])
        return bn(h)

    h1 = mlp_tail(x @ p["mlp1_w1"] + p["mlp1_b1"], "mlp1")
    r1, s1 = rr @ h1, rs @ h1
    h2 = mlp_tail(r1 @ p["mlp2_w1r"] + s1 @ p["mlp2_w1s"] + p["mlp2_b1"], "mlp2")
    inc = (rr.T @ h2) / float(N_NODES)
    h3 = mlp_tail(inc @ p["mlp3_w1"] + p["mlp3_b1"], "mlp3")
    r3, s3 = rr @ h3, rs @ h3
    h4 = mlp_tail(r3 @ p["mlp4_w1r"] + s3 @ p["mlp4_w1s"] + h2 @ p["mlp4_w1k"]
                  + p["mlp4_b1"], "mlp4")
    logits = h4 @ p["fc_out_w"] + p["fc_out_b"]
    edges = jax.nn.softmax(logits, axis=-1)

    recv, send = rr @ x, rs @ x
    all_msgs = jnp.zeros((recv.shape[0], MSG_OUT), jnp.float32)
    for i in range(EDGE_TYPES):
        msg = jax.nn.relu(recv @ p[f"msg1_{i}_wr"] + send @ p[f"msg1_{i}_ws"]
                          + p[f"msg1_{i}_b"])
        msg = jax.nn.relu(msg @ p[f"msg2_{i}_w"] + p[f"msg2_{i}_b"])
        all_msgs = all_msgs + msg * edges[:, i:i + 1]
    agg = rr.T @ all_msgs
    pred = jax.nn.relu(x @ p["ofc1_wx"] + agg @ p["ofc1_wa"] + p["ofc1_b"])
    pred = jax.nn.relu(pred @ p["ofc2_w"] + p["ofc2_b"])
    pred = pred @ p["ofc3_w"] + p["ofc3_b"]
    kgnn = x + pred
    return logits.reshape(B, N_EDGES, N_IN), kgnn.reshape(B, N_NODES, N_IN)


if __name__ == "__main__":
    key = jax.random.PRNGKey(0)
    kp_key, p_key = jax.random.split(key)
    B = 2
    # Synthetic output of the (untranslatable) Keypoint-RCNN stage: 6 keypoints per image,
    # coordinates already normalized to [-1, 1] as keypoints_to_graph would produce.
    batch_x = jax.random.uniform(kp_key, (B, N_NODES, N_IN), jnp.float32, -1.0, 1.0)
    params = init_params(p_key)
    rel_rec, rel_send = build_rel(N_NODES)

    logits, kgnn2d = keypoint_graph_forward(batch_x, params)
    jax.block_until_ready((logits, kgnn2d))

    ref_logits, ref_kgnn = reference_forward(batch_x, params, rel_rec, rel_send)
    assert logits.shape == (B, N_EDGES, N_IN) and kgnn2d.shape == (B, N_NODES, N_IN)
    d_logits = float(jnp.max(jnp.abs(logits - ref_logits)))
    d_kgnn = float(jnp.max(jnp.abs(kgnn2d - ref_kgnn)))
    # Tolerance sized for bf16 weights / bf16 MXU operands vs. the all-f32 reference.
    assert jnp.allclose(logits, ref_logits, atol=5e-2, rtol=5e-2), f"logits max|d|={d_logits}"
    assert jnp.allclose(kgnn2d, ref_kgnn, atol=5e-2, rtol=5e-2), f"KGNN2D max|d|={d_kgnn}"
    print("KERNEL_OK")
</pallas_src>

<mosaic_0001>
module attributes {stable_mosaic.version = 11 : i64} {
  func.func @_pipeline_kernel(%arg0: memref<12x4xf32, #tpu.memory_space<vmem>>, %arg1: memref<4x512xbf16, #tpu.memory_space<vmem>>, %arg2: memref<1x512xf32, #tpu.memory_space<vmem>>, %arg3: memref<512x512xbf16, #tpu.memory_space<vmem>>, %arg4: memref<1x512xf32, #tpu.memory_space<vmem>>, %arg5: memref<512x512xbf16, #tpu.memory_space<vmem>>, %arg6: memref<512x512xbf16, #tpu.memory_space<vmem>>, %arg7: memref<1x512xf32, #tpu.memory_space<vmem>>, %arg8: memref<512x512xbf16, #tpu.memory_space<vmem>>, %arg9: memref<1x512xf32, #tpu.memory_space<vmem>>, %arg10: memref<512x512xbf16, #tpu.memory_space<vmem>>, %arg11: memref<1x512xf32, #tpu.memory_space<vmem>>, %arg12: memref<512x512xbf16, #tpu.memory_space<vmem>>, %arg13: memref<1x512xf32, #tpu.memory_space<vmem>>, %arg14: memref<512x512xbf16, #tpu.memory_space<vmem>>, %arg15: memref<512x512xbf16, #tpu.memory_space<vmem>>, %arg16: memref<512x512xbf16, #tpu.memory_space<vmem>>, %arg17: memref<1x512xf32, #tpu.memory_space<vmem>>, %arg18: memref<512x512xbf16, #tpu.memory_space<vmem>>, %arg19: memref<1x512xf32, #tpu.memory_space<vmem>>, %arg20: memref<512x4xbf16, #tpu.memory_space<vmem>>, %arg21: memref<1x4xf32, #tpu.memory_space<vmem>>, %arg22: memref<4x512xbf16, #tpu.memory_space<vmem>>, %arg23: memref<4x512xbf16, #tpu.memory_space<vmem>>, %arg24: memref<1x512xf32, #tpu.memory_space<vmem>>, %arg25: memref<512x512xbf16, #tpu.memory_space<vmem>>, %arg26: memref<1x512xf32, #tpu.memory_space<vmem>>, %arg27: memref<4x512xbf16, #tpu.memory_space<vmem>>, %arg28: memref<4x512xbf16, #tpu.memory_space<vmem>>, %arg29: memref<1x512xf32, #tpu.memory_space<vmem>>, %arg30: memref<512x512xbf16, #tpu.memory_space<vmem>>, %arg31: memref<1x512xf32, #tpu.memory_space<vmem>>, %arg32: memref<4x512xbf16, #tpu.memory_space<vmem>>, %arg33: memref<512x512xbf16, #tpu.memory_space<vmem>>, %arg34: memref<1x512xf32, #tpu.memory_space<vmem>>, %arg35: memref<512x512xbf16, #tpu.memory_space<vmem>>, %arg36: memref<1x512xf32, #tpu.memory_space<vmem>>, %arg37: memref<512x4xbf16, #tpu.memory_space<vmem>>, %arg38: memref<1x4xf32, #tpu.memory_space<vmem>>, %arg39: memref<12x4xf32, #tpu.memory_space<vmem>>, %arg40: memref<12x4xf32, #tpu.memory_space<vmem>>) attributes {dimension_semantics = [], scalar_prefetch = 0 : i64, scratch_operands = 0 : i64, tpu.core_type = #tpu.core_type<tc>} {
    %0 = tpu.iota {dimensions = array<i32: 0>} : vector<12x1xi32>
    %c6_i32 = arith.constant 6 : i32
    %c0_i32 = arith.constant 0 : i32
    %1 = arith.cmpi eq, %c6_i32, %c0_i32 : i32
    %c1_i32 = arith.constant 1 : i32
    %2 = arith.select %1, %c1_i32, %c6_i32 : i32
    %3 = vector.broadcast %2 : i32 to vector<12x1xi32>
    %4 = arith.remsi %0, %3 : vector<12x1xi32>
    %c0_i32_0 = arith.constant 0 : i32
    %5 = vector.broadcast %c0_i32_0 : i32 to vector<12x1xi32>
    %6 = arith.cmpi ne, %4, %5 : vector<12x1xi32>
    %c0_i32_1 = arith.constant 0 : i32
    %7 = vector.broadcast %c0_i32_1 : i32 to vector<12x1xi32>
    %8 = arith.cmpi slt, %4, %7 : vector<12x1xi32>
    %c0_i32_2 = arith.constant 0 : i32
    %9 = arith.cmpi slt, %2, %c0_i32_2 : i32
    %10 = vector.broadcast %9 : i1 to vector<12x1xi1>
    %11 = vector.broadcast %10 : vector<12x1xi1> to vector<12x1xi1>
    %12 = arith.xori %8, %11 : vector<12x1xi1>
    %13 = arith.andi %12, %6 : vector<12x1xi1>
    %14 = vector.broadcast %2 : i32 to vector<12x1xi32>
    %15 = arith.addi %4, %14 : vector<12x1xi32>
    %16 = arith.select %13, %15, %4 : vector<12x1xi1>, vector<12x1xi32>
    %c0 = arith.constant 0 : index
    %c0_3 = arith.constant 0 : index
    %17 = vector.load %arg0[%c0, %c0_3] : memref<12x4xf32, #tpu.memory_space<vmem>>, vector<12x4xf32>
    %18 = arith.truncf %17 : vector<12x4xf32> to vector<12x4xbf16>
    %c0_4 = arith.constant 0 : index
    %c0_5 = arith.constant 0 : index
    %19 = vector.load %arg1[%c0_4, %c0_5] : memref<4x512xbf16, #tpu.memory_space<vmem>>, vector<4x512xbf16>
    %cst = arith.constant dense<0.000000e+00> : vector<12x512xf32>
    %20 = tpu.matmul %18, %19, %cst {dimension_numbers = #tpu.dot_dimension_numbers<[1], [0], [0], [1], [0, 0, 1, 1], [], []>} : vector<12x4xbf16>, vector<4x512xbf16>, vector<12x512xf32> -> vector<12x512xf32>
    %c0_6 = arith.constant 0 : index
    %c0_7 = arith.constant 0 : index
    %21 = vector.load %arg2[%c0_6, %c0_7] : memref<1x512xf32, #tpu.memory_space<vmem>>, vector<1x512xf32>
    %22 = vector.broadcast %21 : vector<1x512xf32> to vector<12x512xf32>
    %23 = arith.addf %20, %22 : vector<12x512xf32>
    %cst_8 = arith.constant 0.000000e+00 : f32
    %24 = vector.broadcast %cst_8 : f32 to vector<12x512xf32>
    %25 = arith.cmpf ogt, %23, %24 : vector<12x512xf32>
    %26 = math.exp %23 : vector<12x512xf32>
    %cst_9 = arith.constant 1.000000e+00 : f32
    %27 = vector.broadcast %cst_9 : f32 to vector<12x512xf32>
    %28 = arith.subf %26, %27 : vector<12x512xf32>
    %29 = arith.select %25, %23, %28 : vector<12x512xi1>, vector<12x512xf32>
    %30 = arith.truncf %29 : vector<12x512xf32> to vector<12x512xbf16>
    %c0_10 = arith.constant 0 : index
    %c0_11 = arith.constant 0 : index
    %31 = vector.load %arg3[%c0_10, %c0_11] : memref<512x512xbf16, #tpu.memory_space<vmem>>, vector<512x512xbf16>
    %cst_12 = arith.constant dense<0.000000e+00> : vector<12x512xf32>
    %32 = tpu.matmul %30, %31, %cst_12 {dimension_numbers = #tpu.dot_dimension_numbers<[1], [0], [0], [1], [0, 0, 1, 1], [], []>} : vector<12x512xbf16>, vector<512x512xbf16>, vector<12x512xf32> -> vector<12x512xf32>
    %c0_13 = arith.constant 0 : index
    %c0_14 = arith.constant 0 : index
    %33 = vector.load %arg4[%c0_13, %c0_14] : memref<1x512xf32, #tpu.memory_space<vmem>>, vector<1x512xf32>
    %34 = vector.broadcast %33 : vector<1x512xf32> to vector<12x512xf32>
    %35 = arith.addf %32, %34 : vector<12x512xf32>
    %cst_15 = arith.constant 0.000000e+00 : f32
    %36 = vector.broadcast %cst_15 : f32 to vector<12x512xf32>
    %37 = arith.cmpf ogt, %35, %36 : vector<12x512xf32>
    %38 = math.exp %35 : vector<12x512xf32>
    %cst_16 = arith.constant 1.000000e+00 : f32
    %39 = vector.broadcast %cst_16 : f32 to vector<12x512xf32>
    %40 = arith.subf %38, %39 : vector<12x512xf32>
    %41 = arith.select %37, %35, %40 : vector<12x512xi1>, vector<12x512xf32>
    %cst_17 = arith.constant dense<0.000000e+00> : vector<512xf32>
    %42 = vector.multi_reduction <add>, %41, %cst_17 [0] : vector<12x512xf32> to vector<512xf32>
    %43 = vector.shape_cast %42 : vector<512xf32> to vector<1x512xf32>
    %cst_18 = arith.constant 1.200000e+01 : f32
    %44 = vector.broadcast %cst_18 : f32 to vector<1x512xf32>
    %45 = arith.divf %43, %44 : vector<1x512xf32>
    %46 = arith.mulf %41, %41 : vector<12x512xf32>
    %cst_19 = arith.constant dense<0.000000e+00> : vector<512xf32>
    %47 = vector.multi_reduction <add>, %46, %cst_19 [0] : vector<12x512xf32> to vector<512xf32>
    %48 = vector.shape_cast %47 : vector<512xf32> to vector<1x512xf32>
    %cst_20 = arith.constant 1.200000e+01 : f32
    %49 = vector.broadcast %cst_20 : f32 to vector<1x512xf32>
    %50 = arith.divf %48, %49 : vector<1x512xf32>
    %51 = arith.mulf %45, %45 : vector<1x512xf32>
    %52 = arith.subf %50, %51 : vector<1x512xf32>
    %53 = vector.broadcast %45 : vector<1x512xf32> to vector<12x512xf32>
    %54 = arith.subf %41, %53 : vector<12x512xf32>
    %cst_21 = arith.constant 9.99999974E-6 : f32
    %55 = vector.broadcast %cst_21 : f32 to vector<1x512xf32>
    %56 = arith.addf %52, %55 : vector<1x512xf32>
    %57 = math.rsqrt %56 : vector<1x512xf32>
    %58 = vector.broadcast %57 : vector<1x512xf32> to vector<12x512xf32>
    %59 = arith.mulf %54, %58 : vector<12x512xf32>
    %60 = vector.extract_strided_slice %59 {offsets = [1, 0], sizes = [11, 512], strides = [1, 1]} : vector<12x512xf32> to vector<11x512xf32>
    %61 = vector.extract_strided_slice %59 {offsets = [0, 0], sizes = [1, 512], strides = [1, 1]} : vector<12x512xf32> to vector<1x512xf32>
    %62 = tpu.concatenate %60, %61 in 0 : vector<11x512xf32>, vector<1x512xf32> -> vector<12x512xf32>
    %63 = vector.extract_strided_slice %59 {offsets = [7, 0], sizes = [5, 512], strides = [1, 1]} : vector<12x512xf32> to vector<5x512xf32>
    %64 = vector.extract_strided_slice %59 {offsets = [0, 0], sizes = [7, 512], strides = [1, 1]} : vector<12x512xf32> to vector<7x512xf32>
    %65 = tpu.concatenate %63, %64 in 0 : vector<5x512xf32>, vector<7x512xf32> -> vector<12x512xf32>
    %c5_i32 = arith.constant 5 : i32
    %66 = vector.broadcast %c5_i32 : i32 to vector<12x1xi32>
    %67 = arith.cmpi eq, %16, %66 : vector<12x1xi32>
    %68 = vector.shape_cast %67 : vector<12x1xi1> to vector<12x1xi1>
    %69 = vector.broadcast %68 : vector<12x1xi1> to vector<12x512xi1>
    %70 = arith.select %69, %65, %62 : vector<12x512xi1>, vector<12x512xf32>
    %71 = arith.truncf %70 : vector<12x512xf32> to vector<12x512xbf16>
    %c0_22 = arith.constant 0 : index
    %c0_23 = arith.constant 0 : index
    %72 = vector.load %arg5[%c0_22, %c0_23] : memref<512x512xbf16, #tpu.memory_space<vmem>>, vector<512x512xbf16>
    %cst_24 = arith.constant dense<0.000000e+00> : vector<12x512xf32>
    %73 = tpu.matmul %71, %72, %cst_24 {dimension_numbers = #tpu.dot_dimension_numbers<[1], [0], [0], [1], [0, 0, 1, 1], [], []>} : vector<12x512xbf16>, vector<512x512xbf16>, vector<12x512xf32> -> vector<12x512xf32>
    %74 = arith.truncf %59 : vector<12x512xf32> to vector<12x512xbf16>
    %c0_25 = arith.constant 0 : index
    %c0_26 = arith.constant 0 : index
    %75 = vector.load %arg6[%c0_25, %c0_26] : memref<512x512xbf16, #tpu.memory_space<vmem>>, vector<512x512xbf16>
    %cst_27 = arith.constant dense<0.000000e+00> : vector<12x512xf32>
    %76 = tpu.matmul %74, %75, %cst_27 {dimension_numbers = #tpu.dot_dimension_numbers<[1], [0], [0], [1], [0, 0, 1, 1], [], []>} : vector<12x512xbf16>, vector<512x512xbf16>, vector<12x512xf32> -> vector<12x512xf32>
    %77 = arith.addf %73, %76 : vector<12x512xf32>
    %c0_28 = arith.constant 0 : index
    %c0_29 = arith.constant 0 : index
    %78 = vector.load %arg7[%c0_28, %c0_29] : memref<1x512xf32, #tpu.memory_space<vmem>>, vector<1x512xf32>
    %79 = vector.broadcast %78 : vector<1x512xf32> to vector<12x512xf32>
    %80 = arith.addf %77, %79 : vector<12x512xf32>
    %cst_30 = arith.constant 0.000000e+00 : f32
    %81 = vector.broadcast %cst_30 : f32 to vector<12x512xf32>
    %82 = arith.cmpf ogt, %80, %81 : vector<12x512xf32>
    %83 = math.exp %80 : vector<12x512xf32>
    %cst_31 = arith.constant 1.000000e+00 : f32
    %84 = vector.broadcast %cst_31 : f32 to vector<12x512xf32>
    %85 = arith.subf %83, %84 : vector<12x512xf32>
    %86 = arith.select %82, %80, %85 : vector<12x512xi1>, vector<12x512xf32>
    %87 = arith.truncf %86 : vector<12x512xf32> to vector<12x512xbf16>
    %c0_32 = arith.constant 0 : index
    %c0_33 = arith.constant 0 : index
    %88 = vector.load %arg8[%c0_32, %c0_33] : memref<512x512xbf16, #tpu.memory_space<vmem>>, vector<512x512xbf16>
    %cst_34 = arith.constant dense<0.000000e+00> : vector<12x512xf32>
    %89 = tpu.matmul %87, %88, %cst_34 {dimension_numbers = #tpu.dot_dimension_numbers<[1], [0], [0], [1], [0, 0, 1, 1], [], []>} : vector<12x512xbf16>, vector<512x512xbf16>, vector<12x512xf32> -> vector<12x512xf32>
    %c0_35 = arith.constant 0 : index
    %c0_36 = arith.constant 0 : index
    %90 = vector.load %arg9[%c0_35, %c0_36] : memref<1x512xf32, #tpu.memory_space<vmem>>, vector<1x512xf32>
    %91 = vector.broadcast %90 : vector<1x512xf32> to vector<12x512xf32>
    %92 = arith.addf %89, %91 : vector<12x512xf32>
    %cst_37 = arith.constant 0.000000e+00 : f32
    %93 = vector.broadcast %cst_37 : f32 to vector<12x512xf32>
    %94 = arith.cmpf ogt, %92, %93 : vector<12x512xf32>
    %95 = math.exp %92 : vector<12x512xf32>
    %cst_38 = arith.constant 1.000000e+00 : f32
    %96 = vector.broadcast %cst_38 : f32 to vector<12x512xf32>
    %97 = arith.subf %95, %96 : vector<12x512xf32>
    %98 = arith.select %94, %92, %97 : vector<12x512xi1>, vector<12x512xf32>
    %cst_39 = arith.constant dense<0.000000e+00> : vector<512xf32>
    %99 = vector.multi_reduction <add>, %98, %cst_39 [0] : vector<12x512xf32> to vector<512xf32>
    %100 = vector.shape_cast %99 : vector<512xf32> to vector<1x512xf32>
    %cst_40 = arith.constant 1.200000e+01 : f32
    %101 = vector.broadcast %cst_40 : f32 to vector<1x512xf32>
    %102 = arith.divf %100, %101 : vector<1x512xf32>
    %103 = arith.mulf %98, %98 : vector<12x512xf32>
    %cst_41 = arith.constant dense<0.000000e+00> : vector<512xf32>
    %104 = vector.multi_reduction <add>, %103, %cst_41 [0] : vector<12x512xf32> to vector<512xf32>
    %105 = vector.shape_cast %104 : vector<512xf32> to vector<1x512xf32>
    %cst_42 = arith.constant 1.200000e+01 : f32
    %106 = vector.broadcast %cst_42 : f32 to vector<1x512xf32>
    %107 = arith.divf %105, %106 : vector<1x512xf32>
    %108 = arith.mulf %102, %102 : vector<1x512xf32>
    %109 = arith.subf %107, %108 : vector<1x512xf32>
    %110 = vector.broadcast %102 : vector<1x512xf32> to vector<12x512xf32>
    %111 = arith.subf %98, %110 : vector<12x512xf32>
    %cst_43 = arith.constant 9.99999974E-6 : f32
    %112 = vector.broadcast %cst_43 : f32 to vector<1x512xf32>
    %113 = arith.addf %109, %112 : vector<1x512xf32>
    %114 = math.rsqrt %113 : vector<1x512xf32>
    %115 = vector.broadcast %114 : vector<1x512xf32> to vector<12x512xf32>
    %116 = arith.mulf %111, %115 : vector<12x512xf32>
    %117 = vector.extract_strided_slice %116 {offsets = [11, 0], sizes = [1, 512], strides = [1, 1]} : vector<12x512xf32> to vector<1x512xf32>
    %118 = vector.extract_strided_slice %116 {offsets = [0, 0], sizes = [11, 512], strides = [1, 1]} : vector<12x512xf32> to vector<11x512xf32>
    %119 = tpu.concatenate %117, %118 in 0 : vector<1x512xf32>, vector<11x512xf32> -> vector<12x512xf32>
    %120 = vector.extract_strided_slice %116 {offsets = [5, 0], sizes = [7, 512], strides = [1, 1]} : vector<12x512xf32> to vector<7x512xf32>
    %121 = vector.extract_strided_slice %116 {offsets = [0, 0], sizes = [5, 512], strides = [1, 1]} : vector<12x512xf32> to vector<5x512xf32>
    %122 = tpu.concatenate %120, %121 in 0 : vector<7x512xf32>, vector<5x512xf32> -> vector<12x512xf32>
    %c0_i32_44 = arith.constant 0 : i32
    %123 = vector.broadcast %c0_i32_44 : i32 to vector<12x1xi32>
    %124 = arith.cmpi eq, %16, %123 : vector<12x1xi32>
    %125 = vector.shape_cast %124 : vector<12x1xi1> to vector<12x1xi1>
    %126 = vector.broadcast %125 : vector<12x1xi1> to vector<12x512xi1>
    %127 = arith.select %126, %122, %119 : vector<12x512xi1>, vector<12x512xf32>
    %128 = arith.truncf %127 : vector<12x512xf32> to vector<12x512xbf16>
    %c0_45 = arith.constant 0 : index
    %c0_46 = arith.constant 0 : index
    %129 = vector.load %arg10[%c0_45, %c0_46] : memref<512x512xbf16, #tpu.memory_space<vmem>>, vector<512x512xbf16>
    %cst_47 = arith.constant dense<0.000000e+00> : vector<12x512xf32>
    %130 = tpu.matmul %128, %129, %cst_47 {dimension_numbers = #tpu.dot_dimension_numbers<[1], [0], [0], [1], [0, 0, 1, 1], [], []>} : vector<12x512xbf16>, vector<512x512xbf16>, vector<12x512xf32> -> vector<12x512xf32>
    %c0_48 = arith.constant 0 : index
    %c0_49 = arith.constant 0 : index
    %131 = vector.load %arg11[%c0_48, %c0_49] : memref<1x512xf32, #tpu.memory_space<vmem>>, vector<1x512xf32>
    %132 = vector.broadcast %131 : vector<1x512xf32> to vector<12x512xf32>
    %133 = arith.addf %130, %132 : vector<12x512xf32>
    %cst_50 = arith.constant 0.000000e+00 : f32
    %134 = vector.broadcast %cst_50 : f32 to vector<12x512xf32>
    %135 = arith.cmpf ogt, %133, %134 : vector<12x512xf32>
    %136 = math.exp %133 : vector<12x512xf32>
    %cst_51 = arith.constant 1.000000e+00 : f32
    %137 = vector.broadcast %cst_51 : f32 to vector<12x512xf32>
    %138 = arith.subf %136, %137 : vector<12x512xf32>
    %139 = arith.select %135, %133, %138 : vector<12x512xi1>, vector<12x512xf32>
    %140 = arith.truncf %139 : vector<12x512xf32> to vector<12x512xbf16>
    %c0_52 = arith.constant 0 : index
    %c0_53 = arith.constant 0 : index
    %141 = vector.load %arg12[%c0_52, %c0_53] : memref<512x512xbf16, #tpu.memory_space<vmem>>, vector<512x512xbf16>
    %cst_54 = arith.constant dense<0.000000e+00> : vector<12x512xf32>
    %142 = tpu.matmul %140, %141, %cst_54 {dimension_numbers = #tpu.dot_dimension_numbers<[1], [0], [0], [1], [0, 0, 1, 1], [], []>} : vector<12x512xbf16>, vector<512x512xbf16>, vector<12x512xf32> -> vector<12x512xf32>
    %c0_55 = arith.constant 0 : index
    %c0_56 = arith.constant 0 : index
    %143 = vector.load %arg13[%c0_55, %c0_56] : memref<1x512xf32, #tpu.memory_space<vmem>>, vector<1x512xf32>
    %144 = vector.broadcast %143 : vector<1x512xf32> to vector<12x512xf32>
    %145 = arith.addf %142, %144 : vector<12x512xf32>
    %cst_57 = arith.constant 0.000000e+00 : f32
    %146 = vector.broadcast %cst_57 : f32 to vector<12x512xf32>
    %147 = arith.cmpf ogt, %145, %146 : vector<12x512xf32>
    %148 = math.exp %145 : vector<12x512xf32>
    %cst_58 = arith.constant 1.000000e+00 : f32
    %149 = vector.broadcast %cst_58 : f32 to vector<12x512xf32>
    %150 = arith.subf %148, %149 : vector<12x512xf32>
    %151 = arith.select %147, %145, %150 : vector<12x512xi1>, vector<12x512xf32>
    %cst_59 = arith.constant dense<0.000000e+00> : vector<512xf32>
    %152 = vector.multi_reduction <add>, %151, %cst_59 [0] : vector<12x512xf32> to vector<512xf32>
    %153 = vector.shape_cast %152 : vector<512xf32> to vector<1x512xf32>
    %cst_60 = arith.constant 1.200000e+01 : f32
    %154 = vector.broadcast %cst_60 : f32 to vector<1x512xf32>
    %155 = arith.divf %153, %154 : vector<1x512xf32>
    %156 = arith.mulf %151, %151 : vector<12x512xf32>
    %cst_61 = arith.constant dense<0.000000e+00> : vector<512xf32>
    %157 = vector.multi_reduction <add>, %156, %cst_61 [0] : vector<12x512xf32> to vector<512xf32>
    %158 = vector.shape_cast %157 : vector<512xf32> to vector<1x512xf32>
    %cst_62 = arith.constant 1.200000e+01 : f32
    %159 = vector.broadcast %cst_62 : f32 to vector<1x512xf32>
    %160 = arith.divf %158, %159 : vector<1x512xf32>
    %161 = arith.mulf %155, %155 : vector<1x512xf32>
    %162 = arith.subf %160, %161 : vector<1x512xf32>
    %163 = vector.broadcast %155 : vector<1x512xf32> to vector<12x512xf32>
    %164 = arith.subf %151, %163 : vector<12x512xf32>
    %cst_63 = arith.constant 9.99999974E-6 : f32
    %165 = vector.broadcast %cst_63 : f32 to vector<1x512xf32>
    %166 = arith.addf %162, %165 : vector<1x512xf32>
    %167 = math.rsqrt %166 : vector<1x512xf32>
    %168 = vector.broadcast %167 : vector<1x512xf32> to vector<12x512xf32>
    %169 = arith.mulf %164, %168 : vector<12x512xf32>
    %170 = vector.extract_strided_slice %169 {offsets = [1, 0], sizes = [11, 512], strides = [1, 1]} : vector<12x512xf32> to vector<11x512xf32>
    %171 = vector.extract_strided_slice %169 {offsets = [0, 0], sizes = [1, 512], strides = [1, 1]} : vector<12x512xf32> to vector<1x512xf32>
    %172 = tpu.concatenate %170, %171 in 0 : vector<11x512xf32>, vector<1x512xf32> -> vector<12x512xf32>
    %173 = vector.extract_strided_slice %169 {offsets = [7, 0], sizes = [5, 512], strides = [1, 1]} : vector<12x512xf32> to vector<5x512xf32>
    %174 = vector.extract_strided_slice %169 {offsets = [0, 0], sizes = [7, 512], strides = [1, 1]} : vector<12x512xf32> to vector<7x512xf32>
    %175 = tpu.concatenate %173, %174 in 0 : vector<5x512xf32>, vector<7x512xf32> -> vector<12x512xf32>
    %c5_i32_64 = arith.constant 5 : i32
    %176 = vector.broadcast %c5_i32_64 : i32 to vector<12x1xi32>
    %177 = arith.cmpi eq, %16, %176 : vector<12x1xi32>
    %178 = vector.shape_cast %177 : vector<12x1xi1> to vector<12x1xi1>
    %179 = vector.broadcast %178 : vector<12x1xi1> to vector<12x512xi1>
    %180 = arith.select %179, %175, %172 : vector<12x512xi1>, vector<12x512xf32>
    %181 = arith.truncf %180 : vector<12x512xf32> to vector<12x512xbf16>
    %c0_65 = arith.constant 0 : index
    %c0_66 = arith.constant 0 : index
    %182 = vector.load %arg14[%c0_65, %c0_66] : memref<512x512xbf16, #tpu.memory_space<vmem>>, vector<512x512xbf16>
    %cst_67 = arith.constant dense<0.000000e+00> : vector<12x512xf32>
    %183 = tpu.matmul %181, %182, %cst_67 {dimension_numbers = #tpu.dot_dimension_numbers<[1], [0], [0], [1], [0, 0, 1, 1], [], []>} : vector<12x512xbf16>, vector<512x512xbf16>, vector<12x512xf32> -> vector<12x512xf32>
    %184 = arith.truncf %169 : vector<12x512xf32> to vector<12x512xbf16>
    %c0_68 = arith.constant 0 : index
    %c0_69 = arith.constant 0 : index
    %185 = vector.load %arg15[%c0_68, %c0_69] : memref<512x512xbf16, #tpu.memory_space<vmem>>, vector<512x512xbf16>
    %cst_70 = arith.constant dense<0.000000e+00> : vector<12x512xf32>
    %186 = tpu.matmul %184, %185, %cst_70 {dimension_numbers = #tpu.dot_dimension_numbers<[1], [0], [0], [1], [0, 0, 1, 1], [], []>} : vector<12x512xbf16>, vector<512x512xbf16>, vector<12x512xf32> -> vector<12x512xf32>
    %187 = arith.addf %183, %186 : vector<12x512xf32>
    %188 = arith.truncf %116 : vector<12x512xf32> to vector<12x512xbf16>
    %c0_71 = arith.constant 0 : index
    %c0_72 = arith.constant 0 : index
    %189 = vector.load %arg16[%c0_71, %c0_72] : memref<512x512xbf16, #tpu.memory_space<vmem>>, vector<512x512xbf16>
    %cst_73 = arith.constant dense<0.000000e+00> : vector<12x512xf32>
    %190 = tpu.matmul %188, %189, %cst_73 {dimension_numbers = #tpu.dot_dimension_numbers<[1], [0], [0], [1], [0, 0, 1, 1], [], []>} : vector<12x512xbf16>, vector<512x512xbf16>, vector<12x512xf32> -> vector<12x512xf32>
    %191 = arith.addf %187, %190 : vector<12x512xf32>
    %c0_74 = arith.constant 0 : index
    %c0_75 = arith.constant 0 : index
    %192 = vector.load %arg17[%c0_74, %c0_75] : memref<1x512xf32, #tpu.memory_space<vmem>>, vector<1x512xf32>
    %193 = vector.broadcast %192 : vector<1x512xf32> to vector<12x512xf32>
    %194 = arith.addf %191, %193 : vector<12x512xf32>
    %cst_76 = arith.constant 0.000000e+00 : f32
    %195 = vector.broadcast %cst_76 : f32 to vector<12x512xf32>
    %196 = arith.cmpf ogt, %194, %195 : vector<12x512xf32>
    %197 = math.exp %194 : vector<12x512xf32>
    %cst_77 = arith.constant 1.000000e+00 : f32
    %198 = vector.broadcast %cst_77 : f32 to vector<12x512xf32>
    %199 = arith.subf %197, %198 : vector<12x512xf32>
    %200 = arith.select %196, %194, %199 : vector<12x512xi1>, vector<12x512xf32>
    %201 = arith.truncf %200 : vector<12x512xf32> to vector<12x512xbf16>
    %c0_78 = arith.constant 0 : index
    %c0_79 = arith.constant 0 : index
    %202 = vector.load %arg18[%c0_78, %c0_79] : memref<512x512xbf16, #tpu.memory_space<vmem>>, vector<512x512xbf16>
    %cst_80 = arith.constant dense<0.000000e+00> : vector<12x512xf32>
    %203 = tpu.matmul %201, %202, %cst_80 {dimension_numbers = #tpu.dot_dimension_numbers<[1], [0], [0], [1], [0, 0, 1, 1], [], []>} : vector<12x512xbf16>, vector<512x512xbf16>, vector<12x512xf32> -> vector<12x512xf32>
    %c0_81 = arith.constant 0 : index
    %c0_82 = arith.constant 0 : index
    %204 = vector.load %arg19[%c0_81, %c0_82] : memref<1x512xf32, #tpu.memory_space<vmem>>, vector<1x512xf32>
    %205 = vector.broadcast %204 : vector<1x512xf32> to vector<12x512xf32>
    %206 = arith.addf %203, %205 : vector<12x512xf32>
    %cst_83 = arith.constant 0.000000e+00 : f32
    %207 = vector.broadcast %cst_83 : f32 to vector<12x512xf32>
    %208 = arith.cmpf ogt, %206, %207 : vector<12x512xf32>
    %209 = math.exp %206 : vector<12x512xf32>
    %cst_84 = arith.constant 1.000000e+00 : f32
    %210 = vector.broadcast %cst_84 : f32 to vector<12x512xf32>
    %211 = arith.subf %209, %210 : vector<12x512xf32>
    %212 = arith.select %208, %206, %211 : vector<12x512xi1>, vector<12x512xf32>
    %cst_85 = arith.constant dense<0.000000e+00> : vector<512xf32>
    %213 = vector.multi_reduction <add>, %212, %cst_85 [0] : vector<12x512xf32> to vector<512xf32>
    %214 = vector.shape_cast %213 : vector<512xf32> to vector<1x512xf32>
    %cst_86 = arith.constant 1.200000e+01 : f32
    %215 = vector.broadcast %cst_86 : f32 to vector<1x512xf32>
    %216 = arith.divf %214, %215 : vector<1x512xf32>
    %217 = arith.mulf %212, %212 : vector<12x512xf32>
    %cst_87 = arith.constant dense<0.000000e+00> : vector<512xf32>
    %218 = vector.multi_reduction <add>, %217, %cst_87 [0] : vector<12x512xf32> to vector<512xf32>
    %219 = vector.shape_cast %218 : vector<512xf32> to vector<1x512xf32>
    %cst_88 = arith.constant 1.200000e+01 : f32
    %220 = vector.broadcast %cst_88 : f32 to vector<1x512xf32>
    %221 = arith.divf %219, %220 : vector<1x512xf32>
    %222 = arith.mulf %216, %216 : vector<1x512xf32>
    %223 = arith.subf %221, %222 : vector<1x512xf32>
    %224 = vector.broadcast %216 : vector<1x512xf32> to vector<12x512xf32>
    %225 = arith.subf %212, %224 : vector<12x512xf32>
    %cst_89 = arith.constant 9.99999974E-6 : f32
    %226 = vector.broadcast %cst_89 : f32 to vector<1x512xf32>
    %227 = arith.addf %223, %226 : vector<1x512xf32>
    %228 = math.rsqrt %227 : vector<1x512xf32>
    %229 = vector.broadcast %228 : vector<1x512xf32> to vector<12x512xf32>
    %230 = arith.mulf %225, %229 : vector<12x512xf32>
    %231 = arith.truncf %230 : vector<12x512xf32> to vector<12x512xbf16>
    %c0_90 = arith.constant 0 : index
    %c0_91 = arith.constant 0 : index
    %232 = vector.load %arg20[%c0_90, %c0_91] : memref<512x4xbf16, #tpu.memory_space<vmem>>, vector<512x4xbf16>
    %cst_92 = arith.constant dense<0.000000e+00> : vector<12x4xf32>
    %233 = tpu.matmul %231, %232, %cst_92 {dimension_numbers = #tpu.dot_dimension_numbers<[1], [0], [0], [1], [0, 0, 1, 1], [], []>} : vector<12x512xbf16>, vector<512x4xbf16>, vector<12x4xf32> -> vector<12x4xf32>
    %c0_93 = arith.constant 0 : index
    %c0_94 = arith.constant 0 : index
    %234 = vector.load %arg21[%c0_93, %c0_94] : memref<1x4xf32, #tpu.memory_space<vmem>>, vector<1x4xf32>
    %235 = vector.broadcast %234 : vector<1x4xf32> to vector<12x4xf32>
    %236 = arith.addf %233, %235 : vector<12x4xf32>
    %c0_95 = arith.constant 0 : index
    %c0_96 = arith.constant 0 : index
    %237 = vector.load %arg39[%c0_95, %c0_96] : memref<12x4xf32, #tpu.memory_space<vmem>>, vector<12x4xf32>
    tpu.vector_store %arg39[%c0_95, %c0_96], %236 {strides = array<i32>} : memref<12x4xf32, #tpu.memory_space<vmem>>, vector<12x4xf32>,
    %cst_97 = arith.constant dense<0xFF800000> : vector<12xf32>
    %238 = vector.multi_reduction <maximumf>, %236, %cst_97 [1] : vector<12x4xf32> to vector<12xf32>
    %239 = vector.shape_cast %238 : vector<12xf32> to vector<12x1xf32>
    %240 = vector.broadcast %239 : vector<12x1xf32> to vector<12x4xf32>
    %241 = arith.subf %236, %240 : vector<12x4xf32>
    %242 = math.exp %241 : vector<12x4xf32>
    %cst_98 = arith.constant dense<0.000000e+00> : vector<12xf32>
    %243 = vector.multi_reduction <add>, %242, %cst_98 [1] : vector<12x4xf32> to vector<12xf32>
    %244 = vector.shape_cast %243 : vector<12xf32> to vector<12x1xf32>
    %245 = vector.broadcast %244 : vector<12x1xf32> to vector<12x4xf32>
    %246 = arith.divf %242, %245 : vector<12x4xf32>
    %247 = vector.extract_strided_slice %17 {offsets = [1, 0], sizes = [11, 4], strides = [1, 1]} : vector<12x4xf32> to vector<11x4xf32>
    %248 = vector.extract_strided_slice %17 {offsets = [0, 0], sizes = [1, 4], strides = [1, 1]} : vector<12x4xf32> to vector<1x4xf32>
    %249 = tpu.concatenate %247, %248 in 0 : vector<11x4xf32>, vector<1x4xf32> -> vector<12x4xf32>
    %250 = vector.extract_strided_slice %17 {offsets = [7, 0], sizes = [5, 4], strides = [1, 1]} : vector<12x4xf32> to vector<5x4xf32>
    %251 = vector.extract_strided_slice %17 {offsets = [0, 0], sizes = [7, 4], strides = [1, 1]} : vector<12x4xf32> to vector<7x4xf32>
    %252 = tpu.concatenate %250, %251 in 0 : vector<5x4xf32>, vector<7x4xf32> -> vector<12x4xf32>
    %c5_i32_99 = arith.constant 5 : i32
    %253 = vector.broadcast %c5_i32_99 : i32 to vector<12x1xi32>
    %254 = arith.cmpi eq, %16, %253 : vector<12x1xi32>
    %255 = vector.shape_cast %254 : vector<12x1xi1> to vector<12x1xi1>
    %256 = vector.broadcast %255 : vector<12x1xi1> to vector<12x4xi1>
    %257 = arith.select %256, %252, %249 : vector<12x4xi1>, vector<12x4xf32>
    %258 = arith.truncf %257 : vector<12x4xf32> to vector<12x4xbf16>
    %c0_100 = arith.constant 0 : index
    %c0_101 = arith.constant 0 : index
    %259 = vector.load %arg22[%c0_100, %c0_101] : memref<4x512xbf16, #tpu.memory_space<vmem>>, vector<4x512xbf16>
    %cst_102 = arith.constant dense<0.000000e+00> : vector<12x512xf32>
    %260 = tpu.matmul %258, %259, %cst_102 {dimension_numbers = #tpu.dot_dimension_numbers<[1], [0], [0], [1], [0, 0, 1, 1], [], []>} : vector<12x4xbf16>, vector<4x512xbf16>, vector<12x512xf32> -> vector<12x512xf32>
    %261 = arith.truncf %17 : vector<12x4xf32> to vector<12x4xbf16>
    %c0_103 = arith.constant 0 : index
    %c0_104 = arith.constant 0 : index
    %262 = vector.load %arg23[%c0_103, %c0_104] : memref<4x512xbf16, #tpu.memory_space<vmem>>, vector<4x512xbf16>
    %cst_105 = arith.constant dense<0.000000e+00> : vector<12x512xf32>
    %263 = tpu.matmul %261, %262, %cst_105 {dimension_numbers = #tpu.dot_dimension_numbers<[1], [0], [0], [1], [0, 0, 1, 1], [], []>} : vector<12x4xbf16>, vector<4x512xbf16>, vector<12x512xf32> -> vector<12x512xf32>
    %264 = arith.addf %260, %263 : vector<12x512xf32>
    %c0_106 = arith.constant 0 : index
    %c0_107 = arith.constant 0 : index
    %265 = vector.load %arg24[%c0_106, %c0_107] : memref<1x512xf32, #tpu.memory_space<vmem>>, vector<1x512xf32>
    %266 = vector.broadcast %265 : vector<1x512xf32> to vector<12x512xf32>
    %267 = arith.addf %264, %266 : vector<12x512xf32>
    %cst_108 = arith.constant 0.000000e+00 : f32
    %268 = vector.broadcast %cst_108 : f32 to vector<12x512xf32>
    %269 = arith.maximumf %267, %268 : vector<12x512xf32>
    %270 = arith.truncf %269 : vector<12x512xf32> to vector<12x512xbf16>
    %c0_109 = arith.constant 0 : index
    %c0_110 = arith.constant 0 : index
    %271 = vector.load %arg25[%c0_109, %c0_110] : memref<512x512xbf16, #tpu.memory_space<vmem>>, vector<512x512xbf16>
    %cst_111 = arith.constant dense<0.000000e+00> : vector<12x512xf32>
    %272 = tpu.matmul %270, %271, %cst_111 {dimension_numbers = #tpu.dot_dimension_numbers<[1], [0], [0], [1], [0, 0, 1, 1], [], []>} : vector<12x512xbf16>, vector<512x512xbf16>, vector<12x512xf32> -> vector<12x512xf32>
    %c0_112 = arith.constant 0 : index
    %c0_113 = arith.constant 0 : index
    %273 = vector.load %arg26[%c0_112, %c0_113] : memref<1x512xf32, #tpu.memory_space<vmem>>, vector<1x512xf32>
    %274 = vector.broadcast %273 : vector<1x512xf32> to vector<12x512xf32>
    %275 = arith.addf %272, %274 : vector<12x512xf32>
    %cst_114 = arith.constant 0.000000e+00 : f32
    %276 = vector.broadcast %cst_114 : f32 to vector<12x512xf32>
    %277 = arith.maximumf %275, %276 : vector<12x512xf32>
    %278 = vector.extract_strided_slice %246 {offsets = [0, 0], sizes = [12, 1], strides = [1, 1]} : vector<12x4xf32> to vector<12x1xf32>
    %279 = vector.broadcast %278 : vector<12x1xf32> to vector<12x512xf32>
    %280 = arith.mulf %277, %279 : vector<12x512xf32>
    %281 = arith.truncf %257 : vector<12x4xf32> to vector<12x4xbf16>
    %c0_115 = arith.constant 0 : index
    %c0_116 = arith.constant 0 : index
    %282 = vector.load %arg27[%c0_115, %c0_116] : memref<4x512xbf16, #tpu.memory_space<vmem>>, vector<4x512xbf16>
    %cst_117 = arith.constant dense<0.000000e+00> : vector<12x512xf32>
    %283 = tpu.matmul %281, %282, %cst_117 {dimension_numbers = #tpu.dot_dimension_numbers<[1], [0], [0], [1], [0, 0, 1, 1], [], []>} : vector<12x4xbf16>, vector<4x512xbf16>, vector<12x512xf32> -> vector<12x512xf32>
    %284 = arith.truncf %17 : vector<12x4xf32> to vector<12x4xbf16>
    %c0_118 = arith.constant 0 : index
    %c0_119 = arith.constant 0 : index
    %285 = vector.load %arg28[%c0_118, %c0_119] : memref<4x512xbf16, #tpu.memory_space<vmem>>, vector<4x512xbf16>
    %cst_120 = arith.constant dense<0.000000e+00> : vector<12x512xf32>
    %286 = tpu.matmul %284, %285, %cst_120 {dimension_numbers = #tpu.dot_dimension_numbers<[1], [0], [0], [1], [0, 0, 1, 1], [], []>} : vector<12x4xbf16>, vector<4x512xbf16>, vector<12x512xf32> -> vector<12x512xf32>
    %287 = arith.addf %283, %286 : vector<12x512xf32>
    %c0_121 = arith.constant 0 : index
    %c0_122 = arith.constant 0 : index
    %288 = vector.load %arg29[%c0_121, %c0_122] : memref<1x512xf32, #tpu.memory_space<vmem>>, vector<1x512xf32>
    %289 = vector.broadcast %288 : vector<1x512xf32> to vector<12x512xf32>
    %290 = arith.addf %287, %289 : vector<12x512xf32>
    %cst_123 = arith.constant 0.000000e+00 : f32
    %291 = vector.broadcast %cst_123 : f32 to vector<12x512xf32>
    %292 = arith.maximumf %290, %291 : vector<12x512xf32>
    %293 = arith.truncf %292 : vector<12x512xf32> to vector<12x512xbf16>
    %c0_124 = arith.constant 0 : index
    %c0_125 = arith.constant 0 : index
    %294 = vector.load %arg30[%c0_124, %c0_125] : memref<512x512xbf16, #tpu.memory_space<vmem>>, vector<512x512xbf16>
    %cst_126 = arith.constant dense<0.000000e+00> : vector<12x512xf32>
    %295 = tpu.matmul %293, %294, %cst_126 {dimension_numbers = #tpu.dot_dimension_numbers<[1], [0], [0], [1], [0, 0, 1, 1], [], []>} : vector<12x512xbf16>, vector<512x512xbf16>, vector<12x512xf32> -> vector<12x512xf32>
    %c0_127 = arith.constant 0 : index
    %c0_128 = arith.constant 0 : index
    %296 = vector.load %arg31[%c0_127, %c0_128] : memref<1x512xf32, #tpu.memory_space<vmem>>, vector<1x512xf32>
    %297 = vector.broadcast %296 : vector<1x512xf32> to vector<12x512xf32>
    %298 = arith.addf %295, %297 : vector<12x512xf32>
    %cst_129 = arith.constant 0.000000e+00 : f32
    %299 = vector.broadcast %cst_129 : f32 to vector<12x512xf32>
    %300 = arith.maximumf %298, %299 : vector<12x512xf32>
    %301 = vector.extract_strided_slice %246 {offsets = [0, 1], sizes = [12, 1], strides = [1, 1]} : vector<12x4xf32> to vector<12x1xf32>
    %302 = vector.broadcast %301 : vector<12x1xf32> to vector<12x512xf32>
    %303 = arith.mulf %300, %302 : vector<12x512xf32>
    %304 = arith.addf %280, %303 : vector<12x512xf32>
    %305 = vector.extract_strided_slice %304 {offsets = [11, 0], sizes = [1, 512], strides = [1, 1]} : vector<12x512xf32> to vector<1x512xf32>
    %306 = vector.extract_strided_slice %304 {offsets = [0, 0], sizes = [11, 512], strides = [1, 1]} : vector<12x512xf32> to vector<11x512xf32>
    %307 = tpu.concatenate %305, %306 in 0 : vector<1x512xf32>, vector<11x512xf32> -> vector<12x512xf32>
    %308 = vector.extract_strided_slice %304 {offsets = [5, 0], sizes = [7, 512], strides = [1, 1]} : vector<12x512xf32> to vector<7x512xf32>
    %309 = vector.extract_strided_slice %304 {offsets = [0, 0], sizes = [5, 512], strides = [1, 1]} : vector<12x512xf32> to vector<5x512xf32>
    %310 = tpu.concatenate %308, %309 in 0 : vector<7x512xf32>, vector<5x512xf32> -> vector<12x512xf32>
    %c0_i32_130 = arith.constant 0 : i32
    %311 = vector.broadcast %c0_i32_130 : i32 to vector<12x1xi32>
    %312 = arith.cmpi eq, %16, %311 : vector<12x1xi32>
    %313 = vector.shape_cast %312 : vector<12x1xi1> to vector<12x1xi1>
    %314 = vector.broadcast %313 : vector<12x1xi1> to vector<12x512xi1>
    %315 = arith.select %314, %310, %307 : vector<12x512xi1>, vector<12x512xf32>
    %316 = arith.truncf %17 : vector<12x4xf32> to vector<12x4xbf16>
    %c0_131 = arith.constant 0 : index
    %c0_132 = arith.constant 0 : index
    %317 = vector.load %arg32[%c0_131, %c0_132] : memref<4x512xbf16, #tpu.memory_space<vmem>>, vector<4x512xbf16>
    %cst_133 = arith.constant dense<0.000000e+00> : vector<12x512xf32>
    %318 = tpu.matmul %316, %317, %cst_133 {dimension_numbers = #tpu.dot_dimension_numbers<[1], [0], [0], [1], [0, 0, 1, 1], [], []>} : vector<12x4xbf16>, vector<4x512xbf16>, vector<12x512xf32> -> vector<12x512xf32>
    %319 = arith.truncf %315 : vector<12x512xf32> to vector<12x512xbf16>
    %c0_134 = arith.constant 0 : index
    %c0_135 = arith.constant 0 : index
    %320 = vector.load %arg33[%c0_134, %c0_135] : memref<512x512xbf16, #tpu.memory_space<vmem>>, vector<512x512xbf16>
    %cst_136 = arith.constant dense<0.000000e+00> : vector<12x512xf32>
    %321 = tpu.matmul %319, %320, %cst_136 {dimension_numbers = #tpu.dot_dimension_numbers<[1], [0], [0], [1], [0, 0, 1, 1], [], []>} : vector<12x512xbf16>, vector<512x512xbf16>, vector<12x512xf32> -> vector<12x512xf32>
    %322 = arith.addf %318, %321 : vector<12x512xf32>
    %c0_137 = arith.constant 0 : index
    %c0_138 = arith.constant 0 : index
    %323 = vector.load %arg34[%c0_137, %c0_138] : memref<1x512xf32, #tpu.memory_space<vmem>>, vector<1x512xf32>
    %324 = vector.broadcast %323 : vector<1x512xf32> to vector<12x512xf32>
    %325 = arith.addf %322, %324 : vector<12x512xf32>
    %cst_139 = arith.constant 0.000000e+00 : f32
    %326 = vector.broadcast %cst_139 : f32 to vector<12x512xf32>
    %327 = arith.maximumf %325, %326 : vector<12x512xf32>
    %328 = arith.truncf %327 : vector<12x512xf32> to vector<12x512xbf16>
    %c0_140 = arith.constant 0 : index
    %c0_141 = arith.constant 0 : index
    %329 = vector.load %arg35[%c0_140, %c0_141] : memref<512x512xbf16, #tpu.memory_space<vmem>>, vector<512x512xbf16>
    %cst_142 = arith.constant dense<0.000000e+00> : vector<12x512xf32>
    %330 = tpu.matmul %328, %329, %cst_142 {dimension_numbers = #tpu.dot_dimension_numbers<[1], [0], [0], [1], [0, 0, 1, 1], [], []>} : vector<12x512xbf16>, vector<512x512xbf16>, vector<12x512xf32> -> vector<12x512xf32>
    %c0_143 = arith.constant 0 : index
    %c0_144 = arith.constant 0 : index
    %331 = vector.load %arg36[%c0_143, %c0_144] : memref<1x512xf32, #tpu.memory_space<vmem>>, vector<1x512xf32>
    %332 = vector.broadcast %331 : vector<1x512xf32> to vector<12x512xf32>
    %333 = arith.addf %330, %332 : vector<12x512xf32>
    %cst_145 = arith.constant 0.000000e+00 : f32
    %334 = vector.broadcast %cst_145 : f32 to vector<12x512xf32>
    %335 = arith.maximumf %333, %334 : vector<12x512xf32>
    %336 = arith.truncf %335 : vector<12x512xf32> to vector<12x512xbf16>
    %c0_146 = arith.constant 0 : index
    %c0_147 = arith.constant 0 : index
    %337 = vector.load %arg37[%c0_146, %c0_147] : memref<512x4xbf16, #tpu.memory_space<vmem>>, vector<512x4xbf16>
    %cst_148 = arith.constant dense<0.000000e+00> : vector<12x4xf32>
    %338 = tpu.matmul %336, %337, %cst_148 {dimension_numbers = #tpu.dot_dimension_numbers<[1], [0], [0], [1], [0, 0, 1, 1], [], []>} : vector<12x512xbf16>, vector<512x4xbf16>, vector<12x4xf32> -> vector<12x4xf32>
    %c0_149 = arith.constant 0 : index
    %c0_150 = arith.constant 0 : index
    %339 = vector.load %arg38[%c0_149, %c0_150] : memref<1x4xf32, #tpu.memory_space<vmem>>, vector<1x4xf32>
    %340 = vector.broadcast %339 : vector<1x4xf32> to vector<12x4xf32>
    %341 = arith.addf %338, %340 : vector<12x4xf32>
    %342 = arith.addf %17, %341 : vector<12x4xf32>
    %c0_151 = arith.constant 0 : index
    %c0_152 = arith.constant 0 : index
    %343 = vector.load %arg40[%c0_151, %c0_152] : memref<12x4xf32, #tpu.memory_space<vmem>>, vector<12x4xf32>
    tpu.vector_store %arg40[%c0_151, %c0_152], %342 {strides = array<i32>} : memref<12x4xf32, #tpu.memory_space<vmem>>, vector<12x4xf32>,
    return
  }
}

</mosaic_0001>

<bundles_post_ra>
// kernel: tpu_custom_call.1
= control target key start
LH: loop header
LB: loop body
LE: loop exit
PB: predicated region body
PF: predicated region fallthrough
CT: control target
= control target key end

     0   :  { %s22239_s6 = smov 1   ;;  %s22240_s10 = smov 2   ;;  %s23578_s0 = inlined_call_operand.smem [shape: u32[41], index: -1, kind: input, shape index: {}] }
   0x1   :  { %s22306_s5 = sld [smem:[%s23578_s0]]   ;;  %s22241_s14 = smov 3  }
   0x2   :  { %s22311_s9 = sld [smem:[%s23578_s0 + %s22239_s6]]   ;;  %s22242_s18 = smov 4  }
   0x3   :  { %s22316_s13 = sld [smem:[%s23578_s0 + %s22240_s10]]   ;;  %s22243_s22 = smov 5  }
   0x4   :  { %s22321_s17 = sld [smem:[%s23578_s0 + %s22241_s14]]   ;;  %s22244_s26 = smov 6  }
   0x5   :  { %s22326_s21 = sld [smem:[%s23578_s0 + %s22242_s18]]   ;;  %s22245_s30 = smov 7  }
   0x6   :  { %s22331_s25 = sld [smem:[%s23578_s0 + %s22243_s22]]   ;;  %s22246_s4 = smov 8  }
   0x7   :  { %23584 = sst [smem:[#allocation32_spill]] %s22306_s5  ;;  %s22247_s10 = smov 9  }
   0x8   :  { %23585 = sst [smem:[#allocation33_spill]] %s22311_s9  ;;  %s22248_s15 = smov 10  }
   0x9   :  { %23586 = sst [smem:[#allocation34_spill]] %s22316_s13  ;;  %s22249_s20 = smov 11  }
   0xa   :  { %s22336_s29 = sld [smem:[%s23578_s0 + %s22244_s26]]   ;;  %s22250_s26 = smov 12  }
   0xb   :  { %23587 = sst [smem:[#allocation35_spill]] %s22326_s21  ;;  %s22251_s1 = smov 13  }
   0xc   :  { %s22341_s3 = sld [smem:[%s23578_s0 + %s22245_s30]]   ;;  %s22252_s7 = smov 14  }
   0xd   :  { %s22346_s8 = sld [smem:[%s23578_s0 + %s22246_s4]]   ;;  %s22254_s22 = smov 16  }
   0xe   :  { %s22351_s14 = sld [smem:[%s23578_s0 + %s22247_s10]]   ;;  %s22255_s28 = smov 17  }
   0xf   :  { %s22356_s19 = sld [smem:[%s23578_s0 + %s22248_s15]]   ;;  %s22253_s15 = smov 15  }
  0x10   :  { %s22361_s24 = sld [smem:[%s23578_s0 + %s22249_s20]]  }
  0x11   :  { %s22366_s30 = sld [smem:[%s23578_s0 + %s22250_s26]]  }
  0x12   :  { %23588 = sst [smem:[#allocation36_spill]] %s22341_s3 }
  0x13   :  { %s22371_s6 = sld [smem:[%s23578_s0 + %s22251_s1]]  }
  0x14   :  { %23589 = sst [smem:[#allocation37_spill]] %s22351_s14 }
  0x15   :  { %s22376_s12 = sld [smem:[%s23578_s0 + %s22252_s7]]   ;;  %s22256_s7 = smov 18  }
  0x16   :  { %23590 = sst [smem:[#allocation38_spill]] %s22361_s24 }
  0x17   :  { %s22381_s20 = sld [smem:[%s23578_s0 + %s22253_s15]]   ;;  %s22257_s15 = smov 19  }
  0x18   :  { %s22386_s27 = sld [smem:[%s23578_s0 + %s22254_s22]]   ;;  %s22258_s22 = smov 20  }
  0x19   :  { %23591 = sst [smem:[#allocation39_spill]] %s22371_s6 }
  0x1a   :  { %s22391_s4 = sld [smem:[%s23578_s0 + %s22255_s28]]   ;;  %s22259_s28 = smov 21  }
  0x1b   :  { %s22396_s6 = sld [smem:[%s23578_s0 + %s22256_s7]]   ;;  %s22260_s7 = smov 22  }
  0x1c   :  { %s22401_s24 = sld [smem:[%s23578_s0 + %s22257_s15]]   ;;  %s22261_s15 = smov 23  }
  0x1d   :  { %s22406_s14 = sld [smem:[%s23578_s0 + %s22258_s22]]   ;;  %s22262_s22 = smov 24  }
  0x1e   :  { %s22416_s3 = sld [smem:[%s23578_s0 + %s22260_s7]]   ;;  %s22264_s7 = smov 26  }
  0x20   :  { %23592 = sst [smem:[#allocation40_spill]] %s22391_s4 }
  0x21   :  { %s22411_s4 = sld [smem:[%s23578_s0 + %s22259_s28]]   ;;  %s22263_s28 = smov 25  }
  0x22   :  { %23593 = sst [smem:[#allocation41_spill]] %s22401_s24 }
  0x23   :  { %23594 = sst [smem:[#allocation42_spill]] %s22406_s14 }
  0x24   :  { %23596 = sst [smem:[#allocation44_spill]] %s22416_s3 }
  0x25   :  { %s22421_s24 = sld [smem:[%s23578_s0 + %s22261_s15]]   ;;  %s22265_s15 = smov 27  }
  0x26   :  { %s22426_s14 = sld [smem:[%s23578_s0 + %s22262_s22]]   ;;  %s22266_s22 = smov 28  }
  0x27   :  { %23595 = sst [smem:[#allocation43_spill]] %s22411_s4 }
  0x28   :  { %s22431_s4 = sld [smem:[%s23578_s0 + %s22263_s28]]   ;;  %s22267_s28 = smov 29  }
  0x29   :  { %s22436_s3 = sld [smem:[%s23578_s0 + %s22264_s7]]   ;;  %s22268_s7 = smov 30  }
  0x2a   :  { %s22451_s21 = sld [smem:[%s23578_s0 + %s22267_s28]]   ;;  %s22271_s28 = smov 33  }
  0x2b   :  { %23597 = sst [smem:[#allocation45_spill]] %s22421_s24 }
  0x2c   :  { %23598 = sst [smem:[#allocation46_spill]] %s22426_s14 }
  0x2d   :  { %s22441_s24 = sld [smem:[%s23578_s0 + %s22265_s15]]   ;;  %s22269_s15 = smov 31  }
  0x2e   :  { %s22446_s14 = sld [smem:[%s23578_s0 + %s22266_s22]]   ;;  %s22270_s22 = smov 32  }
  0x2f   :  { %23599 = sst [smem:[#allocation47_spill]] %s22436_s3 }
  0x30   :  { %23602 = sst [smem:[#allocation50_spill]] %s22451_s21 }
  0x31   :  { %s22456_s3 = sld [smem:[%s23578_s0 + %s22268_s7]]   ;;  %s22272_s7 = smov 34  }
  0x32   :  { %s22471_s21 = sld [smem:[%s23578_s0 + %s22271_s28]]   ;;  %s22275_s28 = smov 37  }
  0x33   :  { %23600 = sst [smem:[#allocation48_spill]] %s22441_s24 }
  0x34   :  { %23601 = sst [smem:[#allocation49_spill]] %s22446_s14 }
  0x35   :  { %s22461_s24 = sld [smem:[%s23578_s0 + %s22269_s15]]   ;;  %s22273_s15 = smov 35  }
  0x36   :  { %s22466_s14 = sld [smem:[%s23578_s0 + %s22270_s22]]   ;;  %s22274_s22 = smov 36  }
  0x37   :  { %s22476_s13 = sld [smem:[%s23578_s0 + %s22272_s7]]   ;;  %s22276_s7 = smov 38  }
  0x38   :  { %s22491_s5 = sld [smem:[%s23578_s0 + %s22275_s28]]  }
  0x3b   :  { %23603 = sst [smem:[#allocation51_spill]] %s22461_s24 }
  0x3c   :  { %23604 = sst [smem:[#allocation52_spill]] %s22466_s14 }
  0x3d   :  { %23605 = sst [smem:[#allocation53_spill]] %s22476_s13 }
  0x3e   :  { %s22481_s24 = sld [smem:[%s23578_s0 + %s22273_s15]]   ;;  %s22277_s15 = smov 39  }
  0x3f   :  { %s22486_s14 = sld [smem:[%s23578_s0 + %s22274_s22]]   ;;  %s22278_s22 = smov 40  }
  0x40   :  { %s22496_s13 = sld [smem:[%s23578_s0 + %s22276_s7]]  }
  0x41   :  { %s22501_s9 = sld [smem:[%s23578_s0 + %s22277_s15]]  }
  0x45   :  { %23606 = sst [smem:[#allocation54_spill]] %s22486_s14 }
  0x46   :  { %s22506_s14 = sld [smem:[%s23578_s0 + %s22278_s22]]  }
  0x47   :  { %87 = vsyncpa [#allocation3], 0 }
  0x48   :  { %88 = vsyncpa [#allocation5], 0 }
  0x49   :  { %89 = vsyncpa [#allocation8], 0 }
  0x4a   :  { %90 = vsyncpa [#allocation11], 0 }
  0x4b   :  { %91 = vsyncpa [#allocation14], 0 }
  0x4c   :  { %92 = vsyncpa [#allocation17], 0 }
  0x4d   :  { %93 = vsyncpa [#allocation20], 0 }
  0x4e   :  { %94 = vsyncpa [#allocation23], 0  ;;  %s22279_s28 = smov [#allocation4]   ;;  %s22280_s2 = smov [#allocation7]  }
  0x4f   :  { %s120_s1 = sshll.u32 %s22279_s28, 4  ;;  %s146_s7 = sshll.u32 %s22280_s2, 4  ;;  %s121_s1 = int_to_ptr.vmem [resolvable:$true] %s120_s1  ;;  %s22508_s7 = int_to_ptr.vmem [resolvable:$true] %s146_s7 }
  0x50   :  { %s21915_s0 = scalar_lea.hbm %s22331_s25, 16384 }
  0x51   :  { %p21916_p0 = scmp.ne.s32.totalorder %s22331_s25, %s21915_s0  ;;  %p21919_p1 = scmp.lt.u32.totalorder %s21915_s0, %s22331_s25 }
  0x53   :  { %p21921_p2 = pnand %p21919_p1, %p21916_p0 }
  0x55   :  { %21924 = shalt.err (!%p21921_p2)
}
  0x56   :  { %s21925_s10 = scalar_lea.vmem %s121_s1, 16384  ;;  %p21930_p4 = scmp.lt.s32.totalorder %s121_s1, %s121_s1 }
  0x57   :  { %p21926_p3 = scmp.ne.s32.totalorder %s121_s1, %s21925_s10  ;;  %p21931_p5 = scmp.lt.s32.totalorder %s21925_s10, %s21925_s10 }
  0x59   :  { %p21932_p6 = por %p21931_p5, %p21930_p4 }
  0x5b   :  { %p21933_p7 = pnand %p21932_p6, %p21926_p3 }
  0x5d   :  { %21936 = shalt.err (!%p21933_p7)
}
  0x5e   :  { %s22281_s11 = smov 256   ;;  %s22282_s15 = smov 16  }
  0x5f   :  { %126 = dma.hbm_to_vmem [thread:$0]  %s22331_s25, 16384, %s121_s1, [#allocation5], %s22281_s11, %s22281_s11, %s22282_s15  }
  0x60   :  { %s21937_s16 = scalar_lea.hbm %s22346_s8, 16384 }
  0x61   :  { %p21938_p8 = scmp.ne.s32.totalorder %s22346_s8, %s21937_s16  ;;  %p21941_p9 = scmp.lt.u32.totalorder %s21937_s16, %s22346_s8 }
  0x63   :  { %p21943_p10 = pnand %p21941_p9, %p21938_p8 }
  0x65   :  { %21946 = shalt.err (!%p21943_p10)
}
  0x66   :  { %s21947_s18 = scalar_lea.vmem %s22508_s7, 16384  ;;  %p21952_p12 = scmp.lt.s32.totalorder %s22508_s7, %s22508_s7 }
  0x67   :  { %p21948_p11 = scmp.ne.s32.totalorder %s22508_s7, %s21947_s18  ;;  %p21953_p13 = scmp.lt.s32.totalorder %s21947_s18, %s21947_s18 }
  0x69   :  { %p21954_p0 = por %p21953_p13, %p21952_p12 }
  0x6b   :  { %p21955_p1 = pnand %p21954_p0, %p21948_p11 }
  0x6d   :  { %21958 = shalt.err (!%p21955_p1)
}
  0x6e   :  { %152 = dma.hbm_to_vmem [thread:$0]  %s22346_s8, 16384, %s22508_s7, [#allocation8], %s22281_s11, %s22281_s11, %s22282_s15  }
  0x6f   :  { %s22283_s25 = smov [#allocation10]   ;;  %s22284_s23 = smov [#allocation13]  }
  0x70   :  { %s174_s22 = sshll.u32 %s22283_s25, 4  ;;  %s200_s26 = sshll.u32 %s22284_s23, 4  ;;  %s175_s22 = int_to_ptr.vmem [resolvable:$true] %s174_s22  ;;  %s22529_s26 = int_to_ptr.vmem [resolvable:$true] %s200_s26 }
  0x71   :  { %s21959_s28 = scalar_lea.hbm %s22366_s30, 16384 }
  0x72   :  { %p21960_p2 = scmp.ne.s32.totalorder %s22366_s30, %s21959_s28  ;;  %p21963_p3 = scmp.lt.u32.totalorder %s21959_s28, %s22366_s30 }
  0x74   :  { %p21965_p4 = pnand %p21963_p3, %p21960_p2 }
  0x76   :  { %21968 = shalt.err (!%p21965_p4)
}
  0x77   :  { %s21969_s1 = scalar_lea.vmem %s175_s22, 16384  ;;  %p21974_p6 = scmp.lt.s32.totalorder %s175_s22, %s175_s22 }
  0x78   :  { %p21970_p5 = scmp.ne.s32.totalorder %s175_s22, %s21969_s1  ;;  %p21975_p7 = scmp.lt.s32.totalorder %s21969_s1, %s21969_s1 }
  0x7a   :  { %p21976_p8 = por %p21975_p7, %p21974_p6 }
  0x7c   :  { %p21977_p9 = pnand %p21976_p8, %p21970_p5 }
  0x7e   :  { %21980 = shalt.err (!%p21977_p9)
}
  0x7f   :  { %180 = dma.hbm_to_vmem [thread:$0]  %s22366_s30, 16384, %s175_s22, [#allocation11], %s22281_s11, %s22281_s11, %s22282_s15  }
  0x80   :  { %s21981_s8 = scalar_lea.hbm %s22381_s20, 16384 }
  0x81   :  { %p21982_p10 = scmp.ne.s32.totalorder %s22381_s20, %s21981_s8  ;;  %p21985_p11 = scmp.lt.u32.totalorder %s21981_s8, %s22381_s20 }
  0x83   :  { %p21987_p12 = pnand %p21985_p11, %p21982_p10 }
  0x85   :  { %21990 = shalt.err (!%p21987_p12)
}
  0x86   :  { %s21991_s2 = scalar_lea.vmem %s22529_s26, 16384  ;;  %p21996_p0 = scmp.lt.s32.totalorder %s22529_s26, %s22529_s26 }
  0x87   :  { %p21992_p13 = scmp.ne.s32.totalorder %s22529_s26, %s21991_s2  ;;  %p21997_p1 = scmp.lt.s32.totalorder %s21991_s2, %s21991_s2 }
  0x89   :  { %p21998_p2 = por %p21997_p1, %p21996_p0 }
  0x8b   :  { %p21999_p3 = pnand %p21998_p2, %p21992_p13 }
  0x8d   :  { %22002 = shalt.err (!%p21999_p3)
}
  0x8e   :  { %206 = dma.hbm_to_vmem [thread:$0]  %s22381_s20, 16384, %s22529_s26, [#allocation14], %s22281_s11, %s22281_s11, %s22282_s15  }
  0x8f   :  { %s22285_s30 = smov [#allocation16]   ;;  %s22286_s0 = smov [#allocation19]  }
  0x90   :  { %s226_s7 = sshll.u32 %s22285_s30, 4  ;;  %s270_s10 = sshll.u32 %s22286_s0, 4  ;;  %s227_s7 = int_to_ptr.vmem [resolvable:$true] %s226_s7  ;;  %s22550_s10 = int_to_ptr.vmem [resolvable:$true] %s270_s10 }
  0x91   :  { %s22003_s16 = scalar_lea.hbm %s22396_s6, 16384 }
  0x92   :  { %p22004_p4 = scmp.ne.s32.totalorder %s22396_s6, %s22003_s16  ;;  %p22007_p5 = scmp.lt.u32.totalorder %s22003_s16, %s22396_s6 }
  0x94   :  { %p22009_p6 = pnand %p22007_p5, %p22004_p4 }
  0x96   :  { %22012 = shalt.err (!%p22009_p6)
}
  0x97   :  { %s22013_s18 = scalar_lea.vmem %s227_s7, 16384  ;;  %p22018_p8 = scmp.lt.s32.totalorder %s227_s7, %s227_s7 }
  0x98   :  { %p22014_p7 = scmp.ne.s32.totalorder %s227_s7, %s22013_s18  ;;  %p22019_p9 = scmp.lt.s32.totalorder %s22013_s18, %s22013_s18 }
  0x9a   :  { %p22020_p10 = por %p22019_p9, %p22018_p8 }
  0x9c   :  { %p22021_p11 = pnand %p22020_p10, %p22014_p7 }
  0x9e   :  { %22024 = shalt.err (!%p22021_p11)
}
  0x9f   :  { %232 = dma.hbm_to_vmem [thread:$0]  %s22396_s6, 16384, %s227_s7, [#allocation17], %s22281_s11, %s22281_s11, %s22282_s15  }
  0xa0   :  { %s22025_s20 = scalar_lea.hbm %s22456_s3, 16384 }
  0xa1   :  { %p22026_p12 = scmp.ne.s32.totalorder %s22456_s3, %s22025_s20  ;;  %p22029_p13 = scmp.lt.u32.totalorder %s22025_s20, %s22456_s3 }
  0xa3   :  { %p22031_p0 = pnand %p22029_p13, %p22026_p12 }
  0xa5   :  { %22034 = shalt.err (!%p22031_p0)
}
  0xa6   :  { %s22035_s25 = scalar_lea.vmem %s22550_s10, 16384  ;;  %p22040_p2 = scmp.lt.s32.totalorder %s22550_s10, %s22550_s10 }
  0xa7   :  { %p22036_p1 = scmp.ne.s32.totalorder %s22550_s10, %s22035_s25  ;;  %p22041_p3 = scmp.lt.s32.totalorder %s22035_s25, %s22035_s25 }
  0xa9   :  { %p22042_p4 = por %p22041_p3, %p22040_p2 }
  0xab   :  { %p22043_p5 = pnand %p22042_p4, %p22036_p1 }
  0xad   :  { %22046 = shalt.err (!%p22043_p5)
}
  0xae   :  { %276 = dma.hbm_to_vmem [thread:$0]  %s22456_s3, 16384, %s22550_s10, [#allocation20], %s22281_s11, %s22281_s11, %s22282_s15  }
  0xaf   :  { %s22287_s6 = smov [#allocation2]   ;;  %s22288_s23 = smov [#allocation6]  }
  0xb0   :  { %s106_s22 = sshll.u32 %s22287_s6, 4  ;;  %s132_s26 = sshll.u32 %s22288_s23, 4  ;;  %s107_s22 = int_to_ptr.vmem [resolvable:$true] %s106_s22  ;;  %s22571_s26 = int_to_ptr.vmem [resolvable:$true] %s132_s26 }
  0xb1   :  { %s22047_s28 = scalar_lea.hbm %s22321_s17, 16384 }
  0xb2   :  { %p22048_p6 = scmp.ne.s32.totalorder %s22321_s17, %s22047_s28  ;;  %p22051_p7 = scmp.lt.u32.totalorder %s22047_s28, %s22321_s17 }
  0xb4   :  { %p22053_p8 = pnand %p22051_p7, %p22048_p6 }
  0xb6   :  { %22056 = shalt.err (!%p22053_p8)
}
  0xb7   :  { %s22057_s1 = scalar_lea.vmem %s107_s22, 16384  ;;  %p22062_p10 = scmp.lt.s32.totalorder %s107_s22, %s107_s22 }
  0xb8   :  { %p22058_p9 = scmp.ne.s32.totalorder %s107_s22, %s22057_s1  ;;  %p22063_p11 = scmp.lt.s32.totalorder %s22057_s1, %s22057_s1 }
  0xba   :  { %p22064_p12 = por %p22063_p11, %p22062_p10 }
  0xbc   :  { %p22065_p13 = pnand %p22064_p12, %p22058_p9 }
  0xbe   :  { %22068 = shalt.err (!%p22065_p13)
}
  0xbf   :  { %112 = dma.hbm_to_vmem [thread:$0]  %s22321_s17, 16384, %s107_s22, [#allocation3], %s22281_s11, %s22281_s11, %s22282_s15  }
  0xc0   :  { %s22069_s3 = scalar_lea.hbm %s22336_s29, 16384 }
  0xc1   :  { %p22070_p0 = scmp.ne.s32.totalorder %s22336_s29, %s22069_s3  ;;  %p22073_p1 = scmp.lt.u32.totalorder %s22069_s3, %s22336_s29 }
  0xc3   :  { %p22075_p2 = pnand %p22073_p1, %p22070_p0 }
  0xc5   :  { %22078 = shalt.err (!%p22075_p2)
}
  0xc6   :  { %s22079_s8 = scalar_lea.vmem %s22571_s26, 16384  ;;  %p22084_p4 = scmp.lt.s32.totalorder %s22571_s26, %s22571_s26 }
  0xc7   :  { %p22080_p3 = scmp.ne.s32.totalorder %s22571_s26, %s22079_s8  ;;  %p22085_p5 = scmp.lt.s32.totalorder %s22079_s8, %s22079_s8 }
  0xc9   :  { %p22086_p6 = por %p22085_p5, %p22084_p4 }
  0xcb   :  { %p22087_p7 = pnand %p22086_p6, %p22080_p3 }
  0xcd   :  { %22090 = shalt.err (!%p22087_p7)
}
  0xce   :  { %138 = dma.hbm_to_vmem [thread:$0]  %s22336_s29, 16384, %s22571_s26, [#allocation5], %s22281_s11, %s22281_s11, %s22282_s15  }
  0xcf   :  { %s22289_s17 = smov [#allocation9]   ;;  %s22290_s30 = smov [#allocation12]  }
  0xd0   :  { %s160_s2 = sshll.u32 %s22289_s17, 4  ;;  %s188_s7 = sshll.u32 %s22290_s30, 4  ;;  %s161_s2 = int_to_ptr.vmem [resolvable:$true] %s160_s2  ;;  %s22592_s7 = int_to_ptr.vmem [resolvable:$true] %s188_s7 }
  0xd1   :  { %s22091_s0 = scalar_lea.hbm %s22356_s19, 16384 }
  0xd2   :  { %p22092_p8 = scmp.ne.s32.totalorder %s22356_s19, %s22091_s0  ;;  %p22095_p9 = scmp.lt.u32.totalorder %s22091_s0, %s22356_s19 }
  0xd4   :  { %p22097_p10 = pnand %p22095_p9, %p22092_p8 }
  0xd6   :  { %22100 = shalt.err (!%p22097_p10)
}
  0xd7   :  { %s22101_s10 = scalar_lea.vmem %s161_s2, 16384  ;;  %p22106_p12 = scmp.lt.s32.totalorder %s161_s2, %s161_s2 }
  0xd8   :  { %p22102_p11 = scmp.ne.s32.totalorder %s161_s2, %s22101_s10  ;;  %p22107_p13 = scmp.lt.s32.totalorder %s22101_s10, %s22101_s10 }
  0xda   :  { %p22108_p0 = por %p22107_p13, %p22106_p12 }
  0xdc   :  { %p22109_p1 = pnand %p22108_p0, %p22102_p11 }
  0xde   :  { %22112 = shalt.err (!%p22109_p1)
}
  0xdf   :  { %166 = dma.hbm_to_vmem [thread:$0]  %s22356_s19, 16384, %s161_s2, [#allocation8], %s22281_s11, %s22281_s11, %s22282_s15  }
  0xe0   :  { %s22113_s29 = scalar_lea.hbm %s22376_s12, 16384 }
  0xe1   :  { %p22114_p2 = scmp.ne.s32.totalorder %s22376_s12, %s22113_s29  ;;  %p22117_p3 = scmp.lt.u32.totalorder %s22113_s29, %s22376_s12 }
  0xe3   :  { %p22119_p4 = pnand %p22117_p3, %p22114_p2 }
  0xe5   :  { %22122 = shalt.err (!%p22119_p4)
}
  0xe6   :  { %s22123_s16 = scalar_lea.vmem %s22592_s7, 16384  ;;  %p22128_p6 = scmp.lt.s32.totalorder %s22592_s7, %s22592_s7 }
  0xe7   :  { %p22124_p5 = scmp.ne.s32.totalorder %s22592_s7, %s22123_s16  ;;  %p22129_p7 = scmp.lt.s32.totalorder %s22123_s16, %s22123_s16 }
  0xe9   :  { %p22130_p8 = por %p22129_p7, %p22128_p6 }
  0xeb   :  { %p22131_p9 = pnand %p22130_p8, %p22124_p5 }
  0xed   :  { %22134 = shalt.err (!%p22131_p9)
}
  0xee   :  { %194 = dma.hbm_to_vmem [thread:$0]  %s22376_s12, 16384, %s22592_s7, [#allocation11], %s22281_s11, %s22281_s11, %s22282_s15  }
  0xef   :  { %s22291_s19 = smov [#allocation15]   ;;  %s22292_s20 = smov [#allocation18]  }
  0xf0   :  { %s212_s18 = sshll.u32 %s22291_s19, 4  ;;  %s250_s25 = sshll.u32 %s22292_s20, 4  ;;  %s213_s18 = int_to_ptr.vmem [resolvable:$true] %s212_s18  ;;  %s22613_s25 = int_to_ptr.vmem [resolvable:$true] %s250_s25 }
  0xf1   :  { %s22135_s6 = scalar_lea.hbm %s22386_s27, 16384 }
  0xf2   :  { %p22136_p10 = scmp.ne.s32.totalorder %s22386_s27, %s22135_s6  ;;  %p22139_p11 = scmp.lt.u32.totalorder %s22135_s6, %s22386_s27 }
  0xf4   :  { %p22141_p12 = pnand %p22139_p11, %p22136_p10 }
  0xf6   :  { %22144 = shalt.err (!%p22141_p12)
}
  0xf7   :  { %s22145_s22 = scalar_lea.vmem %s213_s18, 16384  ;;  %p22150_p0 = scmp.lt.s32.totalorder %s213_s18, %s213_s18 }
  0xf8   :  { %p22146_p13 = scmp.ne.s32.totalorder %s213_s18, %s22145_s22  ;;  %p22151_p1 = scmp.lt.s32.totalorder %s22145_s22, %s22145_s22 }
  0xfa   :  { %p22152_p2 = por %p22151_p1, %p22150_p0 }
  0xfc   :  { %p22153_p3 = pnand %p22152_p2, %p22146_p13 }
  0xfe   :  { %22156 = shalt.err (!%p22153_p3)
}
  0xff   :  { %218 = dma.hbm_to_vmem [thread:$0]  %s22386_s27, 16384, %s213_s18, [#allocation14], %s22281_s11, %s22281_s11, %s22282_s15  }
 0x100   :  { %s22157_s12 = scalar_lea.hbm %s22431_s4, 16384 }
 0x101   :  { %p22158_p4 = scmp.ne.s32.totalorder %s22431_s4, %s22157_s12  ;;  %p22161_p5 = scmp.lt.u32.totalorder %s22157_s12, %s22431_s4 }
 0x103   :  { %p22163_p6 = pnand %p22161_p5, %p22158_p4 }
 0x105   :  { %22166 = shalt.err (!%p22163_p6)
}
 0x106   :  { %s22167_s23 = scalar_lea.vmem %s22613_s25, 16384  ;;  %p22172_p8 = scmp.lt.s32.totalorder %s22613_s25, %s22613_s25 }
 0x107   :  { %p22168_p7 = scmp.ne.s32.totalorder %s22613_s25, %s22167_s23  ;;  %p22173_p9 = scmp.lt.s32.totalorder %s22167_s23, %s22167_s23 }
 0x109   :  { %p22174_p10 = por %p22173_p9, %p22172_p8 }
 0x10b   :  { %p22175_p11 = pnand %p22174_p10, %p22168_p7 }
 0x10d   :  { %22178 = shalt.err (!%p22175_p11)
}
 0x10e   :  { %256 = dma.hbm_to_vmem [thread:$0]  %s22431_s4, 16384, %s22613_s25, [#allocation17], %s22281_s11, %s22281_s11, %s22282_s15  }
 0x10f   :  { %s22293_s27 = smov [#allocation21]   ;;  %s22294_s28 = smov [#allocation22]  }
 0x110   :  { %s286_s26 = sshll.u32 %s22293_s27, 4  ;;  %s300_s1 = sshll.u32 %s22294_s28, 4  ;;  %s287_s26 = int_to_ptr.vmem [resolvable:$true] %s286_s26  ;;  %s22634_s1 = int_to_ptr.vmem [resolvable:$true] %s300_s1 }
 0x111   :  { %s22179_s3 = scalar_lea.hbm %s22471_s21, 16384 }
 0x112   :  { %p22180_p12 = scmp.ne.s32.totalorder %s22471_s21, %s22179_s3  ;;  %p22183_p13 = scmp.lt.u32.totalorder %s22179_s3, %s22471_s21 }
 0x114   :  { %p22185_p0 = pnand %p22183_p13, %p22180_p12 }
 0x116   :  { %22188 = shalt.err (!%p22185_p0)
}
 0x117   :  { %s22189_s8 = scalar_lea.vmem %s287_s26, 16384  ;;  %p22194_p2 = scmp.lt.s32.totalorder %s287_s26, %s287_s26 }
 0x118   :  { %p22190_p1 = scmp.ne.s32.totalorder %s287_s26, %s22189_s8  ;;  %p22195_p3 = scmp.lt.s32.totalorder %s22189_s8, %s22189_s8 }
 0x11a   :  { %p22196_p4 = por %p22195_p3, %p22194_p2 }
 0x11c   :  { %p22197_p5 = pnand %p22196_p4, %p22190_p1 }
 0x11e   :  { %22200 = shalt.err (!%p22197_p5)
}
 0x11f   :  { %292 = dma.hbm_to_vmem [thread:$0]  %s22471_s21, 16384, %s287_s26, [#allocation20], %s22281_s11, %s22281_s11, %s22282_s15  }
 0x120   :  { %s22201_s4 = scalar_lea.hbm %s22481_s24, 16384 }
 0x121   :  { %p22202_p6 = scmp.ne.s32.totalorder %s22481_s24, %s22201_s4  ;;  %p22205_p7 = scmp.lt.u32.totalorder %s22201_s4, %s22481_s24 }
 0x123   :  { %p22207_p8 = pnand %p22205_p7, %p22202_p6 }
 0x125   :  { %22210 = shalt.err (!%p22207_p8)
}
 0x126   :  { %s22211_s17 = scalar_lea.vmem %s22634_s1, 16384  ;;  %p22216_p10 = scmp.lt.s32.totalorder %s22634_s1, %s22634_s1 }
 0x127   :  { %p22212_p9 = scmp.ne.s32.totalorder %s22634_s1, %s22211_s17  ;;  %p22217_p11 = scmp.lt.s32.totalorder %s22211_s17, %s22211_s17 }
 0x129   :  { %p22218_p12 = por %p22217_p11, %p22216_p10 }
 0x12b   :  { %p22219_p13 = pnand %p22218_p12, %p22212_p9 }
 0x12d   :  { %22222 = shalt.err (!%p22219_p13)
}
 0x12e   :  { %306 = dma.hbm_to_vmem [thread:$0]  %s22481_s24, 16384, %s22634_s1, [#allocation23], %s22281_s11, %s22281_s11, %s22282_s15  }
 0x12f   :  { %22223 = dma.done.wait [#allocation3], 16384  }
 0x130   :  { %22224 = vsyncadd [#allocation3], 4294950912 }
 0x131   :  { %22225 = dma.done.wait [#allocation5], 32768  }
 0x132   :  { %22226 = vsyncadd [#allocation5], 4294934528 }
 0x133   :  { %22227 = dma.done.wait [#allocation8], 32768  }
 0x134   :  { %22228 = vsyncadd [#allocation8], 4294934528 }
 0x135   :  { %22229 = dma.done.wait [#allocation11], 32768  }
 0x136   :  { %22230 = vsyncadd [#allocation11], 4294934528 }
 0x137   :  { %22231 = dma.done.wait [#allocation14], 32768  }
 0x138   :  { %22232 = vsyncadd [#allocation14], 4294934528 }
 0x139   :  { %22233 = dma.done.wait [#allocation17], 32768  }
 0x13a   :  { %22234 = vsyncadd [#allocation17], 4294934528 }
 0x13b   :  { %22235 = dma.done.wait [#allocation20], 32768  }
 0x13c   :  { %22236 = vsyncadd [#allocation20], 4294934528 }
 0x13d   :  { %22237 = dma.done.wait [#allocation23], 16384  }
 0x13e   :  { %22238 = vsyncadd [#allocation23], 4294950912  ;;  %s23607_s21 = sld [smem:[#allocation33_spill]]  ;;  %s23608_s2 = sld [smem:[#allocation32_spill]]  ;;  %v356_v0 = vlaneseq  ;;  %v22295_v1 = vmov 1983009808  }
 0x13f   :  { %v420_v2 = vunpack.c.l.s4 %v22295_v1  ;;  %v22296_v3 = vmov 0   ;;  %vm439_vm0 = vcmask 1041408   ;;  %v18988_v15 = vld [vmem:[#allocation2 + $0x4] ss:$16 sps:$4 sm:$0xff]   ;;  %v18991_v19 = vld [vmem:[#allocation2 + $0xc] ss:$16 sps:$4 sm:$0xff]  }
 0x140   :  { %484 = vmatprep.mubr.bf16.mxu0 %v22296_v3  ;;  %527 = vmatprep.mubr.bf16.mxu1 %v22296_v3  ;;  %v22657_v4 = vshrl.u32 %v356_v0, 7  ;;  %vm23581_vm1 = vcmask 31744   ;;  %v18986_v20 = vld [vmem:[#allocation2] ss:$16 sps:$4 sm:$0xff]   ;;  %v18994_v21 = vld [vmem:[#allocation2 + $0x24] ss:$16 sps:$4 sm:$0xff]  }
 0x141   :  { %18980 = vset.pattern.permute.xlu0 %v22296_v3  ;;  %v421_v5 = vunpack.c.0.s8 %v420_v2  ;;  %v18989_v22 = vld [vmem:[#allocation2 + $0x8] ss:$16 sps:$4 sm:$0xff]   ;;  %v18997_v23 = vld [vmem:[#allocation2 + $0x2c] ss:$16 sps:$4 sm:$0xff]   ;;  %v18992_v24 = vld [vmem:[#allocation2 + $0x20] ss:$16 sps:$4 sm:$0xff]  }
 0x142   :  { %v19000_v25 = vld [vmem:[#allocation2 + $0x44] ss:$16 sps:$4 sm:$0xff]   ;;  %v18995_v26 = vld [vmem:[#allocation2 + $0x28] ss:$16 sps:$4 sm:$0xff]   ;;  %v19003_v27 = vld [vmem:[#allocation2 + $0x4c] ss:$16 sps:$4 sm:$0xff]  }
 0x143   :  { %v22661_v6 = vsub.s32 %v421_v5, %v22657_v4  ;;  %v18998_v28 = vld [vmem:[#allocation2 + $0x40] ss:$16 sps:$4 sm:$0xff]   ;;  %v19006_v29 = vld [vmem:[#allocation2 + $0x64] ss:$16 sps:$4 sm:$0xff]   ;;  %v19001_v30 = vld [vmem:[#allocation2 + $0x48] ss:$16 sps:$4 sm:$0xff]  }
 0x144   :  { %v394_v7 = vld [vmem:[%s23607_s21] sm:$0xff]  ;;  %v392_v11 = vld [vmem:[%s23608_s2 + $0x8] sm:$0xf]  ;;  %v19009_v31 = vld [vmem:[#allocation2 + $0x6c] ss:$16 sps:$4 sm:$0xff]   ;;  %s23609_s24 = sld [smem:[#allocation34_spill]] }
 0x145   :  { %v425_v8 = vrot.slane %v394_v7, %v22661_v6  ;;  %v391_v9 = vld [vmem:[%s23608_s2] sm:$0xff]  ;;  %v418_v10 = vcombine.high %v394_v7, %v394_v7  ;;  %v19007_v34 = vld [vmem:[#allocation2 + $0x68] ss:$16 sps:$4 sm:$0xff]   ;;  %v19015_v35 = vld [vmem:[#allocation2 + $0x8c] ss:$16 sps:$4 sm:$0xff]   ;;  %s23610_s11 = sld [smem:[#allocation35_spill]] }
 0x146   :  { %v22670_v16 = vpack.c.bf16 %v392_v11, %v391_v9  ;;  %v19004_v32 = vld [vmem:[#allocation2 + $0x60] ss:$16 sps:$4 sm:$0xff]   ;;  %v19012_v33 = vld [vmem:[#allocation2 + $0x84] ss:$16 sps:$4 sm:$0xff]   ;;  %v19013_v38 = vld [vmem:[#allocation2 + $0x88] ss:$16 sps:$4 sm:$0xff]  }
 0x147   :  { %v433_v12 = vcombine.high %v425_v8, %v425_v8  ;;  %v441_v13 = vsel %vm439_vm0, %v425_v8, 0  ;;  %v432_v14 = vrot.slane %v418_v10, %v22661_v6  ;;  %v19010_v36 = vld [vmem:[#allocation2 + $0x80] ss:$16 sps:$4 sm:$0xff]   ;;  %v19018_v37 = vld [vmem:[#allocation2 + $0xa4] ss:$16 sps:$4 sm:$0xff]   ;;  %vm1584_vm10 = vcmask 1043456  }
 0x148   :  { %v19021_v39 = vld [vmem:[#allocation2 + $0xac] ss:$16 sps:$4 sm:$0xff]   ;;  %v19016_v40 = vld [vmem:[#allocation2 + $0xa0] ss:$16 sps:$4 sm:$0xff]   ;;  %v19019_v41 = vld [vmem:[#allocation2 + $0xa8] ss:$16 sps:$4 sm:$0xff]  }
 0x149   :  { %16659 = vmatprep.subr.msk.bf16.mxu0 %vm439_vm0, %v433_v12  ;;  %v434_v17 = vcombine.high %v432_v14, %v432_v14  ;;  %v447_v18 = vsel %vm439_vm0, %v432_v14, 0  ;;  %v19024_v42 = vld [vmem:[#allocation2 + $0xc4] ss:$16 sps:$4 sm:$0xff]   ;;  %v19027_v43 = vld [vmem:[#allocation2 + $0xcc] ss:$16 sps:$4 sm:$0xff]   ;;  %s23611_s15 = sld [smem:[#allocation36_spill]] }
 0x14a   :  { %453 = vmatpush1.bf16.msra.mxu0 %v441_v13  ;;  %v19022_v44 = vld [vmem:[#allocation2 + $0xc0] ss:$16 sps:$4 sm:$0xff]   ;;  %v19030_v45 = vld [vmem:[#allocation2 + $0xe4] ss:$16 sps:$4 sm:$0xff]   ;;  %v19025_v46 = vld [vmem:[#allocation2 + $0xc8] ss:$16 sps:$4 sm:$0xff]  }
 0x14b   :  { %16661 = vmatprep.subr.msk.bf16.mxu1 %vm439_vm0, %v434_v17  ;;  %1372 = vmatprep.subr.bf16.mxu0 %v18988_v15  ;;  %v19033_v47 = vld [vmem:[#allocation2 + $0xec] ss:$16 sps:$4 sm:$0xff]   ;;  %v19028_v48 = vld [vmem:[#allocation2 + $0xe0] ss:$16 sps:$4 sm:$0xff]   ;;  %v19036_v49 = vld [vmem:[#allocation2 + $0x104] ss:$16 sps:$4 sm:$0xff]  }
 0x14c   :  { %496 = vmatpush1.bf16.msra.mxu1 %v447_v18  ;;  %v19031_v50 = vld [vmem:[#allocation2 + $0xe8] ss:$16 sps:$4 sm:$0xff]   ;;  %v19039_v51 = vld [vmem:[#allocation2 + $0x10c] ss:$16 sps:$4 sm:$0xff]   ;;  %v19034_v52 = vld [vmem:[#allocation2 + $0x100] ss:$16 sps:$4 sm:$0xff]  }
 0x14d   :  { %16660 = vmatmul.mubr.msk.bf16.vlgmr.msra.gmra.mrb[0].mxu0 %vm23581_vm1, %v22670_v16  ;;  %1458 = vmatprep.subr.bf16.mxu1 %v18991_v19  ;;  %v19042_v53 = vld [vmem:[#allocation2 + $0x124] ss:$16 sps:$4 sm:$0xff]   ;;  %v19037_v54 = vld [vmem:[#allocation2 + $0x108] ss:$16 sps:$4 sm:$0xff]   ;;  %v19045_v55 = vld [vmem:[#allocation2 + $0x12c] ss:$16 sps:$4 sm:$0xff]  }
 0x14e   :  { %1373 = vmatpush1.bf16.msra.mxu0 %v18986_v20  ;;  %v19040_v56 = vld [vmem:[#allocation2 + $0x120] ss:$16 sps:$4 sm:$0xff]   ;;  %v19043_v57 = vld [vmem:[#allocation2 + $0x128] ss:$16 sps:$4 sm:$0xff]   ;;  %v19048_v58 = vld [vmem:[#allocation2 + $0x144] ss:$16 sps:$4 sm:$0xff]  }
 0x14f   :  { %16662 = vmatmul.mubr.msk.bf16.vlgmr.msra.gmra.mrb[0].mxu1 %vm23581_vm1, %v22670_v16  ;;  %1374 = vmatprep.subr.bf16.mxu0 %v18994_v21  ;;  %v19051_v59 = vld [vmem:[#allocation2 + $0x14c] ss:$16 sps:$4 sm:$0xff]   ;;  %v19046_v60 = vld [vmem:[#allocation2 + $0x140] ss:$16 sps:$4 sm:$0xff]   ;;  %v19049_v61 = vld [vmem:[#allocation2 + $0x148] ss:$16 sps:$4 sm:$0xff]  }
 0x150   :  { %1459 = vmatpush1.bf16.msra.mxu1 %v18989_v22  ;;  %v19054_v62 = vld [vmem:[#allocation2 + $0x164] ss:$16 sps:$4 sm:$0xff]   ;;  %v19057_v63 = vld [vmem:[#allocation2 + $0x16c] ss:$16 sps:$4 sm:$0xff]   ;;  %v19052_v0 = vld [vmem:[#allocation2 + $0x160] ss:$16 sps:$4 sm:$0xff]  }
 0x151   :  { %1460 = vmatprep.subr.bf16.mxu1 %v18997_v23  ;;  %v19055_v1 = vld [vmem:[#allocation2 + $0x168] ss:$16 sps:$4 sm:$0xff]   ;;  %v19060_v2 = vld [vmem:[#allocation2 + $0x184] ss:$16 sps:$4 sm:$0xff]   ;;  %v19063_v5 = vld [vmem:[#allocation2 + $0x18c] ss:$16 sps:$4 sm:$0xff]  }
 0x152   :  { %1375 = vmatpush1.bf16.msra.mxu0 %v18992_v24  ;;  %v19058_v7 = vld [vmem:[#allocation2 + $0x180] ss:$16 sps:$4 sm:$0xff]   ;;  %v19061_v8 = vld [vmem:[#allocation2 + $0x188] ss:$16 sps:$4 sm:$0xff]   ;;  %v19066_v9 = vld [vmem:[#allocation2 + $0x1a4] ss:$16 sps:$4 sm:$0xff]  }
 0x153   :  { %1376 = vmatprep.subr.bf16.mxu0 %v19000_v25  ;;  %v19069_v10 = vld [vmem:[#allocation2 + $0x1ac] ss:$16 sps:$4 sm:$0xff]   ;;  %v19064_v11 = vld [vmem:[#allocation2 + $0x1a0] ss:$16 sps:$4 sm:$0xff]   ;;  %v19067_v12 = vld [vmem:[#allocation2 + $0x1a8] ss:$16 sps:$4 sm:$0xff]  }
 0x154   :  { %1461 = vmatpush1.bf16.msra.mxu1 %v18995_v26  ;;  %v19072_v13 = vld [vmem:[#allocation2 + $0x1c4] ss:$16 sps:$4 sm:$0xff]   ;;  %v19075_v14 = vld [vmem:[#allocation2 + $0x1cc] ss:$16 sps:$4 sm:$0xff]   ;;  %v19070_v15 = vld [vmem:[#allocation2 + $0x1c0] ss:$16 sps:$4 sm:$0xff]  }
 0x155   :  { %1462 = vmatprep.subr.bf16.mxu1 %v19003_v27  ;;  %v19073_v17 = vld [vmem:[#allocation2 + $0x1c8] ss:$16 sps:$4 sm:$0xff]   ;;  %v19078_v18 = vld [vmem:[#allocation2 + $0x1e4] ss:$16 sps:$4 sm:$0xff]   ;;  %v19081_v19 = vld [vmem:[#allocation2 + $0x1ec] ss:$16 sps:$4 sm:$0xff]  }
 0x156   :  { %1377 = vmatpush1.bf16.msra.mxu0 %v18998_v28  ;;  %v19076_v20 = vld [vmem:[#allocation2 + $0x1e0] ss:$16 sps:$4 sm:$0xff]   ;;  %v19079_v21 = vld [vmem:[#allocation2 + $0x1e8] ss:$16 sps:$4 sm:$0xff]   ;;  %v19084_v22 = vld [vmem:[#allocation2 + $0x204] ss:$16 sps:$4 sm:$0xff]  }
 0x157   :  { %1378 = vmatprep.subr.bf16.mxu0 %v19006_v29  ;;  %v19087_v23 = vld [vmem:[#allocation2 + $0x20c] ss:$16 sps:$4 sm:$0xff]   ;;  %v395_v24 = vld [vmem:[%s23609_s24] sm:$0xf]  ;;  %v22680_v25 = vsub.s32 0, %v22657_v4  ;;  %v22683_v26 = vsub.s32 1, %v22657_v4 }
 0x158   :  { %1463 = vmatpush1.bf16.msra.mxu1 %v19001_v30  ;;  %v22686_v27 = vsub.s32 2, %v22657_v4  ;;  %v22689_v28 = vsub.s32 3, %v22657_v4  ;;  %s23612_s30 = sld [smem:[#allocation37_spill]]  ;;  %s23613_s7 = sld [smem:[#allocation38_spill]] }
 0x159   :  { %1464 = vmatprep.subr.bf16.mxu1 %v19009_v31  ;;  %v400_v29 = vrot.slane %v395_v24, %v22680_v25  ;;  %v404_v30 = vrot.slane %v395_v24, %v22683_v26  ;;  %s23614_s0 = sld [smem:[#allocation39_spill]]  ;;  %s23615_s10 = sld [smem:[#allocation40_spill]] }
 0x15a   :  { %1379 = vmatpush1.bf16.msra.mxu0 %v19004_v32  ;;  %v408_v31 = vrot.slane %v395_v24, %v22686_v27  ;;  %s23616_s29 = sld [smem:[#allocation42_spill]]  ;;  %s23617_s16 = sld [smem:[#allocation45_spill]] }
 0x15b   :  { %1380 = vmatprep.subr.bf16.mxu0 %v19012_v33  ;;  %v412_v33 = vrot.slane %v395_v24, %v22689_v28  ;;  %s23618_s19 = sld [smem:[#allocation41_spill]]  ;;  %s23619_s18 = sld [smem:[#allocation44_spill]] }
 0x15c   :  { %1465 = vmatpush1.bf16.msra.mxu1 %v19007_v34  ;;  %s23624_s20 = sld [smem:[#allocation43_spill]]  ;;  %s23625_s25 = sld [smem:[#allocation46_spill]] }
 0x15d   :  { %1466 = vmatprep.subr.bf16.mxu1 %v19015_v35  ;;  %s23629_s6 = sld [smem:[#allocation48_spill]]  ;;  %s23635_s22 = sld [smem:[#allocation50_spill]] }
 0x15e   :  { %1381 = vmatpush1.bf16.msra.mxu0 %v19010_v36  ;;  %s23636_s12 = sld [smem:[#allocation47_spill]]  ;;  %s23637_s23 = sld [smem:[#allocation51_spill]] }
 0x15f   :  { %1382 = vmatprep.subr.bf16.mxu0 %v19018_v37  ;;  %s23646_s27 = sld [smem:[#allocation52_spill]]  ;;  %s23649_s26 = sld [smem:[#allocation53_spill]] }
 0x160   :  { %1467 = vmatpush1.bf16.msra.mxu1 %v19013_v38  ;;  %s23650_s28 = sld [smem:[#allocation54_spill]] }
 0x161   :  { %1468 = vmatprep.subr.bf16.mxu1 %v19021_v39 }
 0x162   :  { %1383 = vmatpush1.bf16.msra.mxu0 %v19016_v40 }
 0x163   :  { %1384 = vmatprep.subr.bf16.mxu0 %v19024_v42 }
 0x164   :  { %1469 = vmatpush1.bf16.msra.mxu1 %v19019_v41 }
 0x165   :  { %1470 = vmatprep.subr.bf16.mxu1 %v19027_v43 }
 0x166   :  { %1385 = vmatpush1.bf16.msra.mxu0 %v19022_v44 }
 0x167   :  { %1386 = vmatprep.subr.bf16.mxu0 %v19030_v45 }
 0x168   :  { %1471 = vmatpush1.bf16.msra.mxu1 %v19025_v46 }
 0x169   :  { %1472 = vmatprep.subr.bf16.mxu1 %v19033_v47 }
 0x16a   :  { %1387 = vmatpush1.bf16.msra.mxu0 %v19028_v48 }
 0x16b   :  { %1388 = vmatprep.subr.bf16.mxu0 %v19036_v49 }
 0x16c   :  { %1473 = vmatpush1.bf16.msra.mxu1 %v19031_v50 }
 0x16d   :  { %1474 = vmatprep.subr.bf16.mxu1 %v19039_v51 }
 0x16e   :  { %1389 = vmatpush1.bf16.msra.mxu0 %v19034_v52 }
 0x16f   :  { %1390 = vmatprep.subr.bf16.mxu0 %v19042_v53 }
 0x170   :  { %1475 = vmatpush1.bf16.msra.mxu1 %v19037_v54 }
 0x171   :  { %1476 = vmatprep.subr.bf16.mxu1 %v19045_v55 }
 0x172   :  { %1391 = vmatpush1.bf16.msra.mxu0 %v19040_v56 }
 0x173   :  { %1392 = vmatprep.subr.bf16.mxu0 %v19048_v58 }
 0x174   :  { %1477 = vmatpush1.bf16.msra.mxu1 %v19043_v57 }
 0x175   :  { %1478 = vmatprep.subr.bf16.mxu1 %v19051_v59 }
 0x176   :  { %1393 = vmatpush1.bf16.msra.mxu0 %v19046_v60 }
 0x177   :  { %1394 = vmatprep.subr.bf16.mxu0 %v19054_v62 }
 0x178   :  { %1479 = vmatpush1.bf16.msra.mxu1 %v19049_v61 }
 0x179   :  { %1480 = vmatprep.subr.bf16.mxu1 %v19057_v63 }
 0x17a   :  { %1395 = vmatpush1.bf16.msra.mxu0 %v19052_v0 }
 0x17b   :  { %1396 = vmatprep.subr.bf16.mxu0 %v19060_v2 }
 0x17c   :  { %1481 = vmatpush1.bf16.msra.mxu1 %v19055_v1 }
 0x17d   :  { %1482 = vmatprep.subr.bf16.mxu1 %v19063_v5 }
 0x17e   :  { %1397 = vmatpush1.bf16.msra.mxu0 %v19058_v7 }
 0x17f   :  { %1398 = vmatprep.subr.bf16.mxu0 %v19066_v9  ;;  %v19085_v9 = vld [vmem:[#allocation2 + $0x208] ss:$16 sps:$4 sm:$0xff]  }
 0x180   :  { %1483 = vmatpush1.bf16.msra.mxu1 %v19061_v8  ;;  %v19082_v8 = vld [vmem:[#allocation2 + $0x200] ss:$16 sps:$4 sm:$0xff]  }
 0x181   :  { %1484 = vmatprep.subr.bf16.mxu1 %v19069_v10 }
 0x182   :  { %1399 = vmatpush1.bf16.msra.mxu0 %v19064_v11 }
 0x183   :  { %1400 = vmatprep.subr.bf16.mxu0 %v19072_v13 }
 0x184   :  { %1485 = vmatpush1.bf16.msra.mxu1 %v19067_v12 }
 0x185   :  { %1486 = vmatprep.subr.bf16.mxu1 %v19075_v14 }
 0x186   :  { %1401 = vmatpush1.bf16.msra.mxu0 %v19070_v15  ;;  %v19090_v15 = vld [vmem:[#allocation2 + $0x224] ss:$16 sps:$4 sm:$0xff]  }
 0x187   :  { %1402 = vmatprep.subr.bf16.mxu0 %v19078_v18 }
 0x188   :  { %1487 = vmatpush1.bf16.msra.mxu1 %v19073_v17  ;;  %v19093_v17 = vld [vmem:[#allocation2 + $0x22c] ss:$16 sps:$4 sm:$0xff]  }
 0x189   :  { %1488 = vmatprep.subr.bf16.mxu1 %v19081_v19 }
 0x18a   :  { %1403 = vmatpush1.bf16.msra.mxu0 %v19076_v20 }
 0x18b   :  { %1415 = vmatprep.subr.bf16.mxu0 %v19084_v22 }
 0x18c   :  { %1489 = vmatpush1.bf16.msra.mxu1 %v19079_v21 }
 0x18d   :  { %1501 = vmatprep.subr.bf16.mxu1 %v19087_v23 }
 0x220   :  { %v486_v32 = vpop.f32.mrb[0].mxu0 }
 0x221   :  { %v487_v34 = vadd.f32 %v486_v32, %v400_v29  ;;  %v488_v35 = vpop.f32.mrb[1].mxu0  ;;  %v19096_v32 = vld [vmem:[#allocation2 + $0x244] ss:$16 sps:$4 sm:$0xff]  }
 0x222   :  { %v489_v36 = vadd.f32 %v488_v35, %v404_v30  ;;  %v490_v37 = vpop.f32.mrb[2].mxu0  ;;  %v529_v38 = vpop.f32.mrb[0].mxu1 }
 0x223   :  { %v546_v39 = vmul.f32 1.442695, %v487_v34  ;;  %v491_v40 = vadd.f32 %v490_v37, %v400_v29  ;;  %v492_v41 = vpop.f32.mrb[3].mxu0  ;;  %v530_v42 = vadd.f32 %v529_v38, %v408_v31  ;;  %v531_v43 = vpop.f32.mrb[1].mxu1  ;;  %vm538_vm2 = vcmp.gt.f32.partialorder %v487_v34, 0.0 }
 0x224   :  { %v548_v44 = vmul.f32 1.442695, %v489_v36  ;;  %v493_v45 = vadd.f32 %v492_v41, %v404_v30  ;;  %v532_v46 = vadd.f32 %v531_v43, %v412_v33  ;;  %v533_v47 = vpop.f32.mrb[2].mxu1  ;;  %vm539_vm3 = vcmp.gt.f32.partialorder %v489_v36, 0.0  ;;  %v19088_v29 = vld [vmem:[#allocation2 + $0x220] ss:$16 sps:$4 sm:$0xff]  }
 0x225   :  { %21743 = vpow2.f32 %v546_v39  ;;  %v554_v48 = vmul.f32 1.442695, %v491_v40  ;;  %v535_v49 = vpop.f32.mrb[3].mxu1  ;;  %v550_v51 = vmul.f32 1.442695, %v530_v42  ;;  %v534_v53 = vadd.f32 %v533_v47, %v408_v31 }
 0x226   :  { %21745 = vpow2.f32 %v548_v44  ;;  %v556_v50 = vmul.f32 1.442695, %v493_v45  ;;  %v552_v52 = vmul.f32 1.442695, %v532_v46  ;;  %v536_v54 = vadd.f32 %v535_v49, %v412_v33  ;;  %v19091_v30 = vld [vmem:[#allocation2 + $0x228] ss:$16 sps:$4 sm:$0xff]  }
 0x227   :  { %21747 = vpow2.f32 %v554_v48  ;;  %v558_v55 = vmul.f32 1.442695, %v534_v53  ;;  %vm542_vm4 = vcmp.gt.f32.partialorder %v491_v40, 0.0  ;;  %vm540_vm5 = vcmp.gt.f32.partialorder %v530_v42, 0.0  ;;  %v19099_v33 = vld [vmem:[#allocation2 + $0x24c] ss:$16 sps:$4 sm:$0xff]  }
 0x228   :  { %21749 = vpow2.f32 %v556_v50  ;;  %v560_v56 = vmul.f32 1.442695, %v536_v54  ;;  %vm543_vm6 = vcmp.gt.f32.partialorder %v493_v45, 0.0  ;;  %vm541_vm7 = vcmp.gt.f32.partialorder %v532_v46, 0.0  ;;  %v19094_v37 = vld [vmem:[#allocation2 + $0x240] ss:$16 sps:$4 sm:$0xff]  }
 0x229   :  { %21751 = vpow2.f32 %v550_v51  ;;  %vm544_vm8 = vcmp.gt.f32.partialorder %v534_v53, 0.0  ;;  %vm545_vm9 = vcmp.gt.f32.partialorder %v536_v54, 0.0  ;;  %v19097_v38 = vld [vmem:[#allocation2 + $0x248] ss:$16 sps:$4 sm:$0xff]   ;;  %v19102_v39 = vld [vmem:[#allocation2 + $0x264] ss:$16 sps:$4 sm:$0xff]  }
 0x22a   :  { %21753 = vpow2.f32 %v552_v52  ;;  %v19100_v41 = vld [vmem:[#allocation2 + $0x260] ss:$16 sps:$4 sm:$0xff]   ;;  %v19108_v43 = vld [vmem:[#allocation2 + $0x284] ss:$16 sps:$4 sm:$0xff]   ;;  %v19111_v44 = vld [vmem:[#allocation2 + $0x28c] ss:$16 sps:$4 sm:$0xff]  }
 0x22b   :  { %21755 = vpow2.f32 %v558_v55  ;;  %v19114_v47 = vld [vmem:[#allocation2 + $0x2a4] ss:$16 sps:$4 sm:$0xff]   ;;  %v19117_v48 = vld [vmem:[#allocation2 + $0x2ac] ss:$16 sps:$4 sm:$0xff]   ;;  %v19112_v49 = vld [vmem:[#allocation2 + $0x2a0] ss:$16 sps:$4 sm:$0xff]  }
 0x22c   :  { %21757 = vpow2.f32 %v560_v56  ;;  %v19115_v50 = vld [vmem:[#allocation2 + $0x2a8] ss:$16 sps:$4 sm:$0xff]   ;;  %v19120_v51 = vld [vmem:[#allocation2 + $0x2c4] ss:$16 sps:$4 sm:$0xff]   ;;  %v19123_v52 = vld [vmem:[#allocation2 + $0x2cc] ss:$16 sps:$4 sm:$0xff]  }
 0x22d   :  { %v19126_v55 = vld [vmem:[#allocation2 + $0x2e4] ss:$16 sps:$4 sm:$0xff]   ;;  %v19129_v56 = vld [vmem:[#allocation2 + $0x2ec] ss:$16 sps:$4 sm:$0xff]  }
 0x22f   :  { %v21744_v57 = vpop.eup %21743 }
 0x230   :  { %v21746_v58 = vpop.eup %21745  ;;  %v16663_v59 = vadd.f32 -1.0, %v21744_v57  ;;  %v19124_v57 = vld [vmem:[#allocation2 + $0x2e0] ss:$16 sps:$4 sm:$0xff]  }
 0x231   :  { %v21748_v60 = vpop.eup %21747  ;;  %v16664_v61 = vadd.f32 -1.0, %v21746_v58  ;;  %v19127_v58 = vld [vmem:[#allocation2 + $0x2e8] ss:$16 sps:$4 sm:$0xff]  }
 0x232   :  { %v21750_v62 = vpop.eup %21749  ;;  %v16667_v63 = vadd.f32 -1.0, %v21748_v60  ;;  %v570_v5 = vsel %vm538_vm2, %v487_v34, %v16663_v59  ;;  %v19132_v59 = vld [vmem:[#allocation2 + $0x304] ss:$16 sps:$4 sm:$0xff]   ;;  %v19135_v60 = vld [vmem:[#allocation2 + $0x30c] ss:$16 sps:$4 sm:$0xff]  }
 0x233   :  { %v21752_v0 = vpop.eup %21751  ;;  %v16668_v1 = vadd.f32 -1.0, %v21750_v62  ;;  %v571_v13 = vsel %vm539_vm3, %v489_v36, %v16664_v61  ;;  %v19130_v61 = vld [vmem:[#allocation2 + $0x300] ss:$16 sps:$4 sm:$0xff]   ;;  %v19133_v62 = vld [vmem:[#allocation2 + $0x308] ss:$16 sps:$4 sm:$0xff]  }
 0x234   :  { %v21754_v2 = vpop.eup %21753  ;;  %v574_v7 = vsel %vm542_vm4, %v491_v40, %v16667_v63  ;;  %v16665_v10 = vadd.f32 -1.0, %v21752_v0  ;;  %v19105_v40 = vld [vmem:[#allocation2 + $0x26c] ss:$16 sps:$4 sm:$0xff]   ;;  %v19138_v63 = vld [vmem:[#allocation2 + $0x324] ss:$16 sps:$4 sm:$0xff]  }
 0x235   :  { %v21756_v11 = vpop.eup %21755  ;;  %v578_v12 = vpack.c.bf16 %v574_v7, %v570_v5  ;;  %v575_v14 = vsel %vm543_vm6, %v493_v45, %v16668_v1  ;;  %v16666_v18 = vadd.f32 -1.0, %v21754_v2  ;;  %v19106_v45 = vld [vmem:[#allocation2 + $0x280] ss:$16 sps:$4 sm:$0xff]   ;;  %v19141_v0 = vld [vmem:[#allocation2 + $0x32c] ss:$16 sps:$4 sm:$0xff]  }
 0x236   :  { %v21758_v19 = vpop.eup %21757  ;;  %v579_v20 = vpack.c.bf16 %v575_v14, %v571_v13  ;;  %v572_v21 = vsel %vm540_vm5, %v530_v42, %v16665_v10  ;;  %v16669_v22 = vadd.f32 -1.0, %v21756_v11  ;;  %v19103_v42 = vld [vmem:[#allocation2 + $0x268] ss:$16 sps:$4 sm:$0xff]   ;;  %v19136_v1 = vld [vmem:[#allocation2 + $0x320] ss:$16 sps:$4 sm:$0xff]  }
 0x237   :  { %v16670_v23 = vadd.f32 -1.0, %v21758_v19  ;;  %v573_v24 = vsel %vm541_vm7, %v532_v46, %v16666_v18  ;;  %v19109_v46 = vld [vmem:[#allocation2 + $0x288] ss:$16 sps:$4 sm:$0xff]   ;;  %v19144_v5 = vld [vmem:[#allocation2 + $0x344] ss:$16 sps:$4 sm:$0xff]  }
 0x238   :  { %1404 = vmatprep.mubr.bf16.mxu0 %v579_v20  ;;  %1490 = vmatprep.mubr.bf16.mxu1 %v579_v20  ;;  %v576_v31 = vsel %vm544_vm8, %v534_v53, %v16669_v22  ;;  %v19118_v53 = vld [vmem:[#allocation2 + $0x2c0] ss:$16 sps:$4 sm:$0xff]   ;;  %v19139_v2 = vld [vmem:[#allocation2 + $0x328] ss:$16 sps:$4 sm:$0xff]   ;;  %v19147_v7 = vld [vmem:[#allocation2 + $0x34c] ss:$16 sps:$4 sm:$0xff]  }
 0x239   :  { %1405 = vmatmul.mubr.bf16.vlgmr.msra.gmra.mrb[4].mxu0 %v578_v12  ;;  %1491 = vmatmul.mubr.bf16.vlgmr.msra.gmra.mrb[4].mxu1 %v578_v12  ;;  %v22699_v34 = vpack.c.bf16 %v576_v31, %v572_v21  ;;  %v577_v35 = vsel %vm545_vm9, %v536_v54, %v16670_v23  ;;  %v19121_v54 = vld [vmem:[#allocation2 + $0x2c8] ss:$16 sps:$4 sm:$0xff]   ;;  %v19150_v10 = vld [vmem:[#allocation2 + $0x364] ss:$16 sps:$4 sm:$0xff]   ;;  %v19153_v11 = vld [vmem:[#allocation2 + $0x36c] ss:$16 sps:$4 sm:$0xff]  }
 0x23a   :  { %1416 = vmatpush1.bf16.msra.mxu0 %v19082_v8  ;;  %1502 = vmatpush1.bf16.msra.mxu1 %v19085_v9  ;;  %v581_v36 = vpack.c.bf16 %v577_v35, %v573_v24  ;;  %v19142_v8 = vld [vmem:[#allocation2 + $0x340] ss:$16 sps:$4 sm:$0xff]   ;;  %v19145_v9 = vld [vmem:[#allocation2 + $0x348] ss:$16 sps:$4 sm:$0xff]   ;;  %v19156_v14 = vld [vmem:[#allocation2 + $0x384] ss:$16 sps:$4 sm:$0xff]  }
 0x23b   :  { %1417 = vmatprep.subr.bf16.mxu0 %v19090_v15  ;;  %1503 = vmatprep.subr.bf16.mxu1 %v19093_v17  ;;  %v19148_v12 = vld [vmem:[#allocation2 + $0x360] ss:$16 sps:$4 sm:$0xff]   ;;  %v19151_v13 = vld [vmem:[#allocation2 + $0x368] ss:$16 sps:$4 sm:$0xff]   ;;  %v19159_v15 = vld [vmem:[#allocation2 + $0x38c] ss:$16 sps:$4 sm:$0xff]  }
 0x23c   :  { %1447 = vmatprep.mubr.bf16.mxu0 %v581_v36  ;;  %1533 = vmatprep.mubr.bf16.mxu1 %v581_v36  ;;  %v19154_v17 = vld [vmem:[#allocation2 + $0x380] ss:$16 sps:$4 sm:$0xff]   ;;  %v19157_v18 = vld [vmem:[#allocation2 + $0x388] ss:$16 sps:$4 sm:$0xff]   ;;  %v19162_v19 = vld [vmem:[#allocation2 + $0x3a4] ss:$16 sps:$4 sm:$0xff]  }
 0x23d   :  { %v19165_v20 = vld [vmem:[#allocation2 + $0x3ac] ss:$16 sps:$4 sm:$0xff]   ;;  %v19160_v21 = vld [vmem:[#allocation2 + $0x3a0] ss:$16 sps:$4 sm:$0xff]   ;;  %v19163_v22 = vld [vmem:[#allocation2 + $0x3a8] ss:$16 sps:$4 sm:$0xff]  }
 0x23e   :  { %1418 = vmatpush1.bf16.msra.mxu0 %v19088_v29  ;;  %1504 = vmatpush1.bf16.msra.mxu1 %v19091_v30  ;;  %v19168_v23 = vld [vmem:[#allocation2 + $0x3c4] ss:$16 sps:$4 sm:$0xff]   ;;  %v19171_v24 = vld [vmem:[#allocation2 + $0x3cc] ss:$16 sps:$4 sm:$0xff]   ;;  %v19166_v29 = vld [vmem:[#allocation2 + $0x3c0] ss:$16 sps:$4 sm:$0xff]  }
 0x23f   :  { %1419 = vmatprep.subr.bf16.mxu0 %v19096_v32  ;;  %1505 = vmatprep.subr.bf16.mxu1 %v19099_v33  ;;  %v19169_v30 = vld [vmem:[#allocation2 + $0x3c8] ss:$16 sps:$4 sm:$0xff]   ;;  %v19174_v31 = vld [vmem:[#allocation2 + $0x3e4] ss:$16 sps:$4 sm:$0xff]   ;;  %v19177_v32 = vld [vmem:[#allocation2 + $0x3ec] ss:$16 sps:$4 sm:$0xff]  }
 0x240   :  { %v19172_v33 = vld [vmem:[#allocation2 + $0x3e0] ss:$16 sps:$4 sm:$0xff]   ;;  %v19175_v35 = vld [vmem:[#allocation2 + $0x3e8] ss:$16 sps:$4 sm:$0xff]   ;;  %v19180_v36 = vld [vmem:[#allocation6 + $0x4] ss:$16 sps:$4 sm:$0xff]  }
 0x242   :  { %1420 = vmatpush1.bf16.msra.mxu0 %v19094_v37  ;;  %1506 = vmatpush1.bf16.msra.mxu1 %v19097_v38  ;;  %v19183_v37 = vld [vmem:[#allocation6 + $0xc] ss:$16 sps:$4 sm:$0xff]   ;;  %v19178_v38 = vld [vmem:[#allocation6] ss:$16 sps:$4 sm:$0xff]  }
 0x243   :  { %1421 = vmatprep.subr.bf16.mxu0 %v19102_v39  ;;  %1507 = vmatprep.subr.bf16.mxu1 %v19105_v40  ;;  %v19181_v39 = vld [vmem:[#allocation6 + $0x8] ss:$16 sps:$4 sm:$0xff]   ;;  %v19186_v40 = vld [vmem:[#allocation6 + $0x24] ss:$16 sps:$4 sm:$0xff]  }
 0x246   :  { %1422 = vmatpush1.bf16.msra.mxu0 %v19100_v41  ;;  %1508 = vmatpush1.bf16.msra.mxu1 %v19103_v42  ;;  %v19189_v41 = vld [vmem:[#allocation6 + $0x2c] ss:$16 sps:$4 sm:$0xff]   ;;  %v19184_v42 = vld [vmem:[#allocation6 + $0x20] ss:$16 sps:$4 sm:$0xff]  }
 0x247   :  { %1423 = vmatprep.subr.bf16.mxu0 %v19108_v43  ;;  %1509 = vmatprep.subr.bf16.mxu1 %v19111_v44  ;;  %v19187_v43 = vld [vmem:[#allocation6 + $0x28] ss:$16 sps:$4 sm:$0xff]   ;;  %v19192_v44 = vld [vmem:[#allocation6 + $0x44] ss:$16 sps:$4 sm:$0xff]  }
 0x24a   :  { %1424 = vmatpush1.bf16.msra.mxu0 %v19106_v45  ;;  %1510 = vmatpush1.bf16.msra.mxu1 %v19109_v46  ;;  %v19195_v45 = vld [vmem:[#allocation6 + $0x4c] ss:$16 sps:$4 sm:$0xff]   ;;  %v19190_v46 = vld [vmem:[#allocation6 + $0x40] ss:$16 sps:$4 sm:$0xff]  }
 0x24b   :  { %1425 = vmatprep.subr.bf16.mxu0 %v19114_v47  ;;  %1511 = vmatprep.subr.bf16.mxu1 %v19117_v48  ;;  %v19193_v47 = vld [vmem:[#allocation6 + $0x48] ss:$16 sps:$4 sm:$0xff]   ;;  %v19198_v48 = vld [vmem:[#allocation6 + $0x64] ss:$16 sps:$4 sm:$0xff]  }
 0x24e   :  { %1426 = vmatpush1.bf16.msra.mxu0 %v19112_v49  ;;  %1512 = vmatpush1.bf16.msra.mxu1 %v19115_v50  ;;  %v19196_v49 = vld [vmem:[#allocation6 + $0x60] ss:$16 sps:$4 sm:$0xff]   ;;  %v19199_v50 = vld [vmem:[#allocation6 + $0x68] ss:$16 sps:$4 sm:$0xff]  }
 0x24f   :  { %1427 = vmatprep.subr.bf16.mxu0 %v19120_v51  ;;  %1513 = vmatprep.subr.bf16.mxu1 %v19123_v52  ;;  %v19204_v51 = vld [vmem:[#allocation6 + $0x84] ss:$16 sps:$4 sm:$0xff]   ;;  %v19207_v52 = vld [vmem:[#allocation6 + $0x8c] ss:$16 sps:$4 sm:$0xff]  }
 0x252   :  { %1428 = vmatpush1.bf16.msra.mxu0 %v19118_v53  ;;  %1514 = vmatpush1.bf16.msra.mxu1 %v19121_v54  ;;  %v19202_v53 = vld [vmem:[#allocation6 + $0x80] ss:$16 sps:$4 sm:$0xff]   ;;  %v19205_v54 = vld [vmem:[#allocation6 + $0x88] ss:$16 sps:$4 sm:$0xff]  }
 0x253   :  { %1429 = vmatprep.subr.bf16.mxu0 %v19126_v55  ;;  %1515 = vmatprep.subr.bf16.mxu1 %v19129_v56  ;;  %v19210_v55 = vld [vmem:[#allocation6 + $0xa4] ss:$16 sps:$4 sm:$0xff]   ;;  %v19213_v56 = vld [vmem:[#allocation6 + $0xac] ss:$16 sps:$4 sm:$0xff]  }
 0x256   :  { %1430 = vmatpush1.bf16.msra.mxu0 %v19124_v57  ;;  %1516 = vmatpush1.bf16.msra.mxu1 %v19127_v58  ;;  %v19208_v57 = vld [vmem:[#allocation6 + $0xa0] ss:$16 sps:$4 sm:$0xff]   ;;  %v19211_v58 = vld [vmem:[#allocation6 + $0xa8] ss:$16 sps:$4 sm:$0xff]  }
 0x257   :  { %1431 = vmatprep.subr.bf16.mxu0 %v19132_v59  ;;  %1517 = vmatprep.subr.bf16.mxu1 %v19135_v60  ;;  %v19216_v59 = vld [vmem:[#allocation6 + $0xc4] ss:$16 sps:$4 sm:$0xff]   ;;  %v19219_v60 = vld [vmem:[#allocation6 + $0xcc] ss:$16 sps:$4 sm:$0xff]  }
 0x25a   :  { %1432 = vmatpush1.bf16.msra.mxu0 %v19130_v61  ;;  %1518 = vmatpush1.bf16.msra.mxu1 %v19133_v62  ;;  %v19214_v61 = vld [vmem:[#allocation6 + $0xc0] ss:$16 sps:$4 sm:$0xff]   ;;  %v19217_v62 = vld [vmem:[#allocation6 + $0xc8] ss:$16 sps:$4 sm:$0xff]  }
 0x25b   :  { %1433 = vmatprep.subr.bf16.mxu0 %v19138_v63  ;;  %1519 = vmatprep.subr.bf16.mxu1 %v19141_v0  ;;  %v19222_v63 = vld [vmem:[#allocation6 + $0xe4] ss:$16 sps:$4 sm:$0xff]   ;;  %v19225_v0 = vld [vmem:[#allocation6 + $0xec] ss:$16 sps:$4 sm:$0xff]  }
 0x25e   :  { %1434 = vmatpush1.bf16.msra.mxu0 %v19136_v1  ;;  %1520 = vmatpush1.bf16.msra.mxu1 %v19139_v2  ;;  %v19220_v1 = vld [vmem:[#allocation6 + $0xe0] ss:$16 sps:$4 sm:$0xff]   ;;  %v19223_v2 = vld [vmem:[#allocation6 + $0xe8] ss:$16 sps:$4 sm:$0xff]  }
 0x25f   :  { %1435 = vmatprep.subr.bf16.mxu0 %v19144_v5  ;;  %1521 = vmatprep.subr.bf16.mxu1 %v19147_v7  ;;  %v19228_v5 = vld [vmem:[#allocation6 + $0x104] ss:$16 sps:$4 sm:$0xff]   ;;  %v19231_v7 = vld [vmem:[#allocation6 + $0x10c] ss:$16 sps:$4 sm:$0xff]  }
 0x262   :  { %1436 = vmatpush1.bf16.msra.mxu0 %v19142_v8  ;;  %1522 = vmatpush1.bf16.msra.mxu1 %v19145_v9  ;;  %v19226_v8 = vld [vmem:[#allocation6 + $0x100] ss:$16 sps:$4 sm:$0xff]   ;;  %v19229_v9 = vld [vmem:[#allocation6 + $0x108] ss:$16 sps:$4 sm:$0xff]  }
 0x263   :  { %1437 = vmatprep.subr.bf16.mxu0 %v19150_v10  ;;  %1523 = vmatprep.subr.bf16.mxu1 %v19153_v11  ;;  %v19234_v10 = vld [vmem:[#allocation6 + $0x124] ss:$16 sps:$4 sm:$0xff]   ;;  %v19237_v11 = vld [vmem:[#allocation6 + $0x12c] ss:$16 sps:$4 sm:$0xff]  }
 0x266   :  { %1438 = vmatpush1.bf16.msra.mxu0 %v19148_v12  ;;  %1524 = vmatpush1.bf16.msra.mxu1 %v19151_v13  ;;  %v19232_v12 = vld [vmem:[#allocation6 + $0x120] ss:$16 sps:$4 sm:$0xff]   ;;  %v19235_v13 = vld [vmem:[#allocation6 + $0x128] ss:$16 sps:$4 sm:$0xff]  }
 0x267   :  { %1439 = vmatprep.subr.bf16.mxu0 %v19156_v14  ;;  %1525 = vmatprep.subr.bf16.mxu1 %v19159_v15  ;;  %v19240_v14 = vld [vmem:[#allocation6 + $0x144] ss:$16 sps:$4 sm:$0xff]   ;;  %v19243_v15 = vld [vmem:[#allocation6 + $0x14c] ss:$16 sps:$4 sm:$0xff]  }
 0x26a   :  { %1440 = vmatpush1.bf16.msra.mxu0 %v19154_v17  ;;  %1526 = vmatpush1.bf16.msra.mxu1 %v19157_v18  ;;  %v19238_v17 = vld [vmem:[#allocation6 + $0x140] ss:$16 sps:$4 sm:$0xff]   ;;  %v19241_v18 = vld [vmem:[#allocation6 + $0x148] ss:$16 sps:$4 sm:$0xff]  }
 0x26b   :  { %1441 = vmatprep.subr.bf16.mxu0 %v19162_v19  ;;  %1527 = vmatprep.subr.bf16.mxu1 %v19165_v20  ;;  %v19246_v19 = vld [vmem:[#allocation6 + $0x164] ss:$16 sps:$4 sm:$0xff]   ;;  %v19249_v20 = vld [vmem:[#allocation6 + $0x16c] ss:$16 sps:$4 sm:$0xff]  }
 0x26e   :  { %1442 = vmatpush1.bf16.msra.mxu0 %v19160_v21  ;;  %1528 = vmatpush1.bf16.msra.mxu1 %v19163_v22  ;;  %v19244_v21 = vld [vmem:[#allocation6 + $0x160] ss:$16 sps:$4 sm:$0xff]   ;;  %v19247_v22 = vld [vmem:[#allocation6 + $0x168] ss:$16 sps:$4 sm:$0xff]  }
 0x26f   :  { %1443 = vmatprep.subr.bf16.mxu0 %v19168_v23  ;;  %1529 = vmatprep.subr.bf16.mxu1 %v19171_v24  ;;  %v19252_v23 = vld [vmem:[#allocation6 + $0x184] ss:$16 sps:$4 sm:$0xff]   ;;  %v19255_v24 = vld [vmem:[#allocation6 + $0x18c] ss:$16 sps:$4 sm:$0xff]  }
 0x272   :  { %1444 = vmatpush1.bf16.msra.mxu0 %v19166_v29  ;;  %1530 = vmatpush1.bf16.msra.mxu1 %v19169_v30  ;;  %v19250_v29 = vld [vmem:[#allocation6 + $0x180] ss:$16 sps:$4 sm:$0xff]   ;;  %v19253_v30 = vld [vmem:[#allocation6 + $0x188] ss:$16 sps:$4 sm:$0xff]  }
 0x273   :  { %1445 = vmatprep.subr.bf16.mxu0 %v19174_v31  ;;  %1531 = vmatprep.subr.bf16.mxu1 %v19177_v32  ;;  %v19258_v31 = vld [vmem:[#allocation6 + $0x1a4] ss:$16 sps:$4 sm:$0xff]   ;;  %v19261_v32 = vld [vmem:[#allocation6 + $0x1ac] ss:$16 sps:$4 sm:$0xff]  }
 0x276   :  { %1446 = vmatpush1.bf16.msra.mxu0 %v19172_v33  ;;  %1532 = vmatpush1.bf16.msra.mxu1 %v19175_v35  ;;  %v19256_v33 = vld [vmem:[#allocation6 + $0x1a0] ss:$16 sps:$4 sm:$0xff]   ;;  %v19259_v35 = vld [vmem:[#allocation6 + $0x1a8] ss:$16 sps:$4 sm:$0xff]  }
 0x277   :  { %2688 = vmatprep.subr.bf16.mxu0 %v19180_v36  ;;  %2774 = vmatprep.subr.bf16.mxu1 %v19183_v37  ;;  %v19262_v36 = vld [vmem:[#allocation6 + $0x1c0] ss:$16 sps:$4 sm:$0xff]   ;;  %v19264_v37 = vld [vmem:[#allocation6 + $0x1c4] ss:$16 sps:$4 sm:$0xff]  }
 0x279   :  { %1448 = vmatmul.mubr.bf16.vlgmr.msra.gmra.mrb[4].mxu0 %v22699_v34  ;;  %1534 = vmatmul.mubr.bf16.vlgmr.msra.gmra.mrb[4].mxu1 %v22699_v34  ;;  %v19201_v34 = vld [vmem:[#allocation6 + $0x6c] ss:$16 sps:$4 sm:$0xff]  }
 0x27a   :  { %2689 = vmatpush1.bf16.msra.mxu0 %v19178_v38  ;;  %2775 = vmatpush1.bf16.msra.mxu1 %v19181_v39  ;;  %v19265_v38 = vld [vmem:[#allocation6 + $0x1c8] ss:$16 sps:$4 sm:$0xff]   ;;  %v19267_v39 = vld [vmem:[#allocation6 + $0x1cc] ss:$16 sps:$4 sm:$0xff]  }
 0x27b   :  { %2690 = vmatprep.subr.bf16.mxu0 %v19186_v40  ;;  %2776 = vmatprep.subr.bf16.mxu1 %v19189_v41  ;;  %v19270_v40 = vld [vmem:[#allocation6 + $0x1e4] ss:$16 sps:$4 sm:$0xff]   ;;  %v19268_v41 = vld [vmem:[#allocation6 + $0x1e0] ss:$16 sps:$4 sm:$0xff]  }
 0x27e   :  { %2691 = vmatpush1.bf16.msra.mxu0 %v19184_v42  ;;  %2777 = vmatpush1.bf16.msra.mxu1 %v19187_v43  ;;  %v19271_v42 = vld [vmem:[#allocation6 + $0x1e8] ss:$16 sps:$4 sm:$0xff]   ;;  %v19273_v43 = vld [vmem:[#allocation6 + $0x1ec] ss:$16 sps:$4 sm:$0xff]  }
 0x27f   :  { %2692 = vmatprep.subr.bf16.mxu0 %v19192_v44  ;;  %2778 = vmatprep.subr.bf16.mxu1 %v19195_v45  ;;  %v19276_v44 = vld [vmem:[#allocation6 + $0x204] ss:$16 sps:$4 sm:$0xff]   ;;  %v19279_v45 = vld [vmem:[#allocation6 + $0x20c] ss:$16 sps:$4 sm:$0xff]  }
 0x282   :  { %2693 = vmatpush1.bf16.msra.mxu0 %v19190_v46  ;;  %2779 = vmatpush1.bf16.msra.mxu1 %v19193_v47  ;;  %v710_v46 = vld [vmem:[%s23610_s11] sm:$0xf]  ;;  %v22705_v47 = vadd.s32 8, %v22657_v4 }
 0x283   :  { %2694 = vmatprep.subr.bf16.mxu0 %v19198_v48  ;;  %2780 = vmatprep.subr.bf16.mxu1 %v19201_v34 }
 0x284   :  { %v22708_v48 = vmul.u32.u64.low 2863311531, %v22705_v47  ;;  %v22709_v34 = vmul.u32.u64.high 2863311531, %v22705_v47, %v22708_v48 }
 0x286   :  { %2695 = vmatpush1.bf16.msra.mxu0 %v19196_v49  ;;  %2781 = vmatpush1.bf16.msra.mxu1 %v19199_v50  ;;  %v715_v49 = vrot.slane %v710_v46, %v22680_v25  ;;  %v723_v50 = vrot.slane %v710_v46, %v22686_v27 }
 0x287   :  { %2696 = vmatprep.subr.bf16.mxu0 %v19204_v51  ;;  %2782 = vmatprep.subr.bf16.mxu1 %v19207_v52  ;;  %v22714_v51 = vmul.u32.u64.low 2863311531, %v22657_v4  ;;  %v22715_v52 = vmul.u32.u64.high 2863311531, %v22657_v4, %v22714_v51 }
 0x28a   :  { %2697 = vmatpush1.bf16.msra.mxu0 %v19202_v53  ;;  %2783 = vmatpush1.bf16.msra.mxu1 %v19205_v54  ;;  %v719_v53 = vrot.slane %v710_v46, %v22683_v26  ;;  %v727_v54 = vrot.slane %v710_v46, %v22689_v28 }
 0x28b   :  { %2698 = vmatprep.subr.bf16.mxu0 %v19210_v55  ;;  %2784 = vmatprep.subr.bf16.mxu1 %v19213_v56 }
 0x28e   :  { %2699 = vmatpush1.bf16.msra.mxu0 %v19208_v57  ;;  %2785 = vmatpush1.bf16.msra.mxu1 %v19211_v58 }
 0x28f   :  { %2700 = vmatprep.subr.bf16.mxu0 %v19216_v59  ;;  %2786 = vmatprep.subr.bf16.mxu1 %v19219_v60 }
 0x292   :  { %2701 = vmatpush1.bf16.msra.mxu0 %v19214_v61  ;;  %2787 = vmatpush1.bf16.msra.mxu1 %v19217_v62 }
 0x293   :  { %2702 = vmatprep.subr.bf16.mxu0 %v19222_v63  ;;  %2788 = vmatprep.subr.bf16.mxu1 %v19225_v0 }
 0x296   :  { %2703 = vmatpush1.bf16.msra.mxu0 %v19220_v1  ;;  %2789 = vmatpush1.bf16.msra.mxu1 %v19223_v2 }
 0x297   :  { %2704 = vmatprep.subr.bf16.mxu0 %v19228_v5  ;;  %2790 = vmatprep.subr.bf16.mxu1 %v19231_v7 }
 0x29a   :  { %2705 = vmatpush1.bf16.msra.mxu0 %v19226_v8  ;;  %2791 = vmatpush1.bf16.msra.mxu1 %v19229_v9 }
 0x29b   :  { %2706 = vmatprep.subr.bf16.mxu0 %v19234_v10  ;;  %2792 = vmatprep.subr.bf16.mxu1 %v19237_v11 }
 0x29e   :  { %2707 = vmatpush1.bf16.msra.mxu0 %v19232_v12  ;;  %2793 = vmatpush1.bf16.msra.mxu1 %v19235_v13 }
 0x29f   :  { %2708 = vmatprep.subr.bf16.mxu0 %v19240_v14  ;;  %2794 = vmatprep.subr.bf16.mxu1 %v19243_v15 }
 0x2a2   :  { %2709 = vmatpush1.bf16.msra.mxu0 %v19238_v17  ;;  %2795 = vmatpush1.bf16.msra.mxu1 %v19241_v18 }
 0x2a3   :  { %2710 = vmatprep.subr.bf16.mxu0 %v19246_v19  ;;  %2796 = vmatprep.subr.bf16.mxu1 %v19249_v20  ;;  %v365_v19 = vshrl.u32 %v22715_v52, 2  ;;  %v376_v20 = vshrl.u32 %v22709_v34, 2 }
 0x2a6   :  { %2711 = vmatpush1.bf16.msra.mxu0 %v19244_v21  ;;  %2797 = vmatpush1.bf16.msra.mxu1 %v19247_v22  ;;  %v366_v21 = vmul.u32 6, %v365_v19  ;;  %v22724_v22 = vmul.u32 6, %v376_v20 }
 0x2a7   :  { %2712 = vmatprep.subr.bf16.mxu0 %v19252_v23  ;;  %2798 = vmatprep.subr.bf16.mxu1 %v19255_v24 }
 0x2aa   :  { %2713 = vmatpush1.bf16.msra.mxu0 %v19250_v29  ;;  %2799 = vmatpush1.bf16.msra.mxu1 %v19253_v30 }
 0x2ab   :  { %2714 = vmatprep.subr.bf16.mxu0 %v19258_v31  ;;  %2800 = vmatprep.subr.bf16.mxu1 %v19261_v32 }
 0x2ae   :  { %2715 = vmatpush1.bf16.msra.mxu0 %v19256_v33  ;;  %2801 = vmatpush1.bf16.msra.mxu1 %v19259_v35 }
 0x2af   :  { %2716 = vmatprep.subr.bf16.mxu0 %v19264_v37  ;;  %2802 = vmatprep.subr.bf16.mxu1 %v19267_v39  ;;  %v22731_v39 = vsub.s32 %v22657_v4, %v366_v21 }
 0x2b1   :  { %vm381_vm5 = vcmp.ne.s32.totalorder %v22731_v39, 0  ;;  %vm383_vm7 = vcmp.lt.s32.totalorder %v22731_v39, 0 }
 0x2b2   :  { %2717 = vmatpush1.bf16.msra.mxu0 %v19262_v36  ;;  %2803 = vmatpush1.bf16.msra.mxu1 %v19265_v38  ;;  %vm385_vm9 = vmand %vm383_vm7, %vm381_vm5 }
 0x2b3   :  { %2718 = vmatprep.subr.bf16.mxu0 %v19270_v40  ;;  %2804 = vmatprep.subr.bf16.mxu1 %v19273_v43 }
 0x2b6   :  { %2719 = vmatpush1.bf16.msra.mxu0 %v19268_v41  ;;  %2805 = vmatpush1.bf16.msra.mxu1 %v19271_v42 }
 0x2b7   :  { %2731 = vmatprep.subr.bf16.mxu0 %v19276_v44  ;;  %2817 = vmatprep.subr.bf16.mxu1 %v19279_v45 }
 0x34c   :  { %v1449_v55 = vpop.f32.mrb[4].mxu0  ;;  %v1535_v56 = vpop.f32.mrb[4].mxu1 }
 0x34d   :  { %v18693_v57 = vadd.f32 %v1449_v55, %v715_v49  ;;  %v18697_v58 = vadd.f32 %v1535_v56, %v723_v50  ;;  %v1451_v59 = vpop.f32.mrb[5].mxu0  ;;  %v1537_v60 = vpop.f32.mrb[5].mxu1 }
 0x34e   :  { %v18694_v61 = vadd.f32 %v1451_v59, %v719_v53  ;;  %v18698_v62 = vadd.f32 %v1537_v60, %v727_v54  ;;  %v1453_v63 = vpop.f32.mrb[6].mxu0  ;;  %v1539_v0 = vpop.f32.mrb[6].mxu1 }
 0x34f   :  { %v1552_v1 = vmul.f32 1.442695, %v18693_v57  ;;  %v1556_v2 = vmul.f32 1.442695, %v18697_v58  ;;  %v18695_v8 = vadd.f32 %v1453_v63, %v715_v49  ;;  %v18699_v9 = vadd.f32 %v1539_v0, %v723_v50  ;;  %v1455_v10 = vpop.f32.mrb[7].mxu0  ;;  %v1541_v11 = vpop.f32.mrb[7].mxu1 }
 0x350   :  { %v1554_v5 = vmul.f32 1.442695, %v18694_v61  ;;  %v1558_v7 = vmul.f32 1.442695, %v18698_v62  ;;  %v18696_v12 = vadd.f32 %v1455_v10, %v719_v53  ;;  %v22719_v13 = vadd.f32 %v1541_v11, %v727_v54 }
 0x351   :  { %21759 = vpow2.f32 %v1552_v1  ;;  %v1560_v14 = vmul.f32 1.442695, %v18695_v8  ;;  %v1564_v15 = vmul.f32 1.442695, %v18699_v9  ;;  %vm1544_vm11 = vcmp.gt.f32.partialorder %v18693_v57, 0.0 }
 0x352   :  { %21761 = vpow2.f32 %v1556_v2  ;;  %v1562_v17 = vmul.f32 1.442695, %v18696_v12  ;;  %v1566_v18 = vmul.f32 1.442695, %v22719_v13  ;;  %vm1546_vm12 = vcmp.gt.f32.partialorder %v18697_v58, 0.0 }
 0x353   :  { %21763 = vpow2.f32 %v1554_v5  ;;  %vm1545_vm13 = vcmp.gt.f32.partialorder %v18694_v61, 0.0  ;;  %vm1547_vm14 = vcmp.gt.f32.partialorder %v18698_v62, 0.0  ;;  %vm1548_vm15 = vcmp.gt.f32.partialorder %v18695_v8, 0.0 }
 0x354   :  { %21765 = vpow2.f32 %v1558_v7  ;;  %vm1550_vm2 = vcmp.gt.f32.partialorder %v18699_v9, 0.0  ;;  %vm1549_vm3 = vcmp.gt.f32.partialorder %v18696_v12, 0.0  ;;  %vm1551_vm4 = vcmp.gt.f32.partialorder %v22719_v13, 0.0 }
 0x355   :  { %21767 = vpow2.f32 %v1560_v14 }
 0x356   :  { %21769 = vpow2.f32 %v1564_v15 }
 0x357   :  { %21771 = vpow2.f32 %v1562_v17 }
 0x358   :  { %21773 = vpow2.f32 %v1566_v18 }
 0x35b   :  { %v21760_v23 = vpop.eup %21759 }
 0x35c   :  { %v21762_v24 = vpop.eup %21761  ;;  %v16799_v29 = vadd.f32 -1.0, %v21760_v23 }
 0x35d   :  { %v21764_v30 = vpop.eup %21763  ;;  %v16801_v31 = vadd.f32 -1.0, %v21762_v24 }
 0x35e   :  { %v21766_v32 = vpop.eup %21765  ;;  %v22726_v33 = vsel %vm1544_vm11, %v18693_v57, %v16799_v29  ;;  %v16800_v35 = vadd.f32 -1.0, %v21764_v30 }
 0x35f   :  { %v21768_v36 = vpop.eup %21767  ;;  %v22728_v37 = vsel %vm1546_vm12, %v18697_v58, %v16801_v31  ;;  %v16802_v38 = vadd.f32 -1.0, %v21766_v32  ;;  %v1622_v44 = vmul.f32 %v22726_v33, %v22726_v33  ;;  %vm1706_vm12 = vcmask 1046528  }
 0x360   :  { %v21770_v40 = vpop.eup %21769  ;;  %v22733_v41 = vsel %vm1545_vm13, %v18694_v61, %v16800_v35  ;;  %v16803_v42 = vadd.f32 -1.0, %v21768_v36  ;;  %v1624_v45 = vmul.f32 %v22728_v37, %v22728_v37  ;;  %vm1735_vm13 = vcmask 1042432  }
 0x361   :  { %v21772_v43 = vpop.eup %21771  ;;  %v22741_v46 = vsel %vm1547_vm14, %v18698_v62, %v16802_v38  ;;  %v16805_v48 = vadd.f32 -1.0, %v21770_v40  ;;  %v1623_v34 = vmul.f32 %v22733_v41, %v22733_v41  ;;  %vm1740_vm14 = vcmask 1040384  }
 0x362   :  { %v21774_v4 = vpop.eup %21773  ;;  %v1625_v49 = vmul.f32 %v22741_v46, %v22741_v46  ;;  %v22748_v50 = vsel %vm1548_vm15, %v18695_v8, %v16803_v42  ;;  %v16804_v51 = vadd.f32 -1.0, %v21772_v43  ;;  %vm1765_vm15 = vcmask 1044480  }
 0x363   :  { %v1585_v52 = vsel %vm1584_vm10, %v22748_v50, 0.0  ;;  %v1626_v53 = vmul.f32 %v22748_v50, %v22748_v50  ;;  %v22755_v54 = vsel %vm1550_vm2, %v18699_v9, %v16805_v48  ;;  %v16806_v55 = vadd.f32 -1.0, %v21774_v4 }
 0x364   :  { %v1586_v56 = vadd.f32 %v1585_v52, %v22726_v33  ;;  %v1601_v57 = vsel %vm1584_vm10, %v22755_v54, 0.0  ;;  %v1628_v58 = vmul.f32 %v22755_v54, %v22755_v54  ;;  %v22763_v59 = vsel %vm1549_vm3, %v18696_v12, %v16804_v51 }
 0x365   :  { %v1630_v60 = vsel %vm1584_vm10, %v1626_v53, 0.0  ;;  %v1602_v61 = vadd.f32 %v1601_v57, %v22728_v37  ;;  %v1593_v62 = vsel %vm1584_vm10, %v22763_v59, 0.0  ;;  %v1627_v63 = vmul.f32 %v22763_v59, %v22763_v59 }
 0x366   :  { %v1587_v0 = vrot.slane %v1586_v56, 4  ;;  %v1631_v1 = vadd.f32 %v1630_v60, %v1622_v44  ;;  %v1646_v2 = vsel %vm1584_vm10, %v1628_v58, 0.0  ;;  %v1594_v5 = vadd.f32 %v1593_v62, %v22733_v41 }
 0x367   :  { %v1603_v7 = vrot.slane %v1602_v61, 4  ;;  %v1647_v8 = vadd.f32 %v1646_v2, %v1624_v45  ;;  %v1638_v9 = vsel %vm1584_vm10, %v1627_v63, 0.0  ;;  %v22777_v10 = vsel %vm1551_vm4, %v22719_v13, %v16806_v55 }
 0x368   :  { %v1588_v11 = vadd.f32 %v1587_v0, %v1586_v56  ;;  %v1632_v12 = vrot.slane %v1631_v1, 4  ;;  %v1595_v14 = vrot.slane %v1594_v5, 4  ;;  %v1639_v15 = vadd.f32 %v1638_v9, %v1623_v34 }
 0x369   :  { %v1604_v17 = vadd.f32 %v1603_v7, %v1602_v61  ;;  %v1648_v18 = vrot.slane %v1647_v8, 4  ;;  %v1609_v19 = vsel %vm1584_vm10, %v22777_v10, 0.0  ;;  %v1629_v20 = vmul.f32 %v22777_v10, %v22777_v10 }
 0x36a   :  { %v1589_v21 = vrot.slane %v1588_v11, 2  ;;  %v1633_v23 = vadd.f32 %v1632_v12, %v1631_v1  ;;  %v1596_v24 = vadd.f32 %v1595_v14, %v1594_v5  ;;  %v1640_v29 = vrot.slane %v1639_v15, 4 }
 0x36b   :  { %v1605_v30 = vrot.slane %v1604_v17, 2  ;;  %v1649_v31 = vadd.f32 %v1648_v18, %v1647_v8  ;;  %v1610_v13 = vadd.f32 %v1609_v19, %v22741_v46  ;;  %v1654_v32 = vsel %vm1584_vm10, %v1629_v20, 0.0 }
 0x36c   :  { %v1590_v35 = vadd.f32 %v1589_v21, %v1588_v11  ;;  %v1634_v36 = vrot.slane %v1633_v23, 2  ;;  %v1597_v38 = vrot.slane %v1596_v24, 2  ;;  %v1641_v40 = vadd.f32 %v1640_v29, %v1639_v15 }
 0x36d   :  { %v1606_v42 = vadd.f32 %v1605_v30, %v1604_v17  ;;  %v1650_v43 = vrot.slane %v1649_v31, 2  ;;  %v1611_v44 = vrot.slane %v1610_v13, 4  ;;  %v1655_v45 = vadd.f32 %v1654_v32, %v1625_v49 }
 0x36e   :  { %v1591_v48 = vrot.slane %v1590_v35, 1  ;;  %v1635_v4 = vadd.f32 %v1634_v36, %v1633_v23  ;;  %v1598_v34 = vadd.f32 %v1597_v38, %v1596_v24  ;;  %v1642_v51 = vrot.slane %v1641_v40, 2 }
 0x36f   :  { %v1607_v52 = vrot.slane %v1606_v42, 1  ;;  %v1651_v53 = vadd.f32 %v1650_v43, %v1649_v31  ;;  %v1612_v55 = vadd.f32 %v1611_v44, %v1610_v13  ;;  %v1656_v56 = vrot.slane %v1655_v45, 4 }
 0x370   :  { %v1592_v57 = vadd.f32 %v1591_v48, %v1590_v35  ;;  %v1636_v58 = vrot.slane %v1635_v4, 1  ;;  %v1599_v60 = vrot.slane %v1598_v34, 1  ;;  %v1643_v61 = vadd.f32 %v1642_v51, %v1641_v40 }
 0x371   :  { %v1608_v62 = vadd.f32 %v1607_v52, %v1606_v42  ;;  %v1652_v63 = vrot.slane %v1651_v53, 1  ;;  %v1613_v0 = vrot.slane %v1612_v55, 2  ;;  %v1657_v1 = vadd.f32 %v1656_v56, %v1655_v45 }
 0x372   :  { %v1618_v2 = vmul.f32 0.083333336, %v1592_v57  ;;  %v1637_v5 = vadd.f32 %v1636_v58, %v1635_v4  ;;  %v1600_v7 = vadd.f32 %v1599_v60, %v1598_v34  ;;  %v1644_v49 = vrot.slane %v1643_v61, 1 }
 0x373   :  { %v1620_v8 = vmul.f32 0.083333336, %v1608_v62  ;;  %v1653_v9 = vadd.f32 %v1652_v63, %v1651_v53  ;;  %v1614_v11 = vadd.f32 %v1613_v0, %v1612_v55  ;;  %v1658_v12 = vrot.slane %v1657_v1, 2 }
 0x374   :  { %v1662_v14 = vmul.f32 0.083333336, %v1637_v5  ;;  %v1666_v15 = vmul.f32 %v1618_v2, %v1618_v2  ;;  %v1674_v17 = vsub.f32 %v22726_v33, %v1618_v2  ;;  %v1678_v18 = vsub.f32 %v22748_v50, %v1618_v2 }
 0x375   :  { %v1664_v19 = vmul.f32 0.083333336, %v1653_v9  ;;  %v1668_v20 = vmul.f32 %v1620_v8, %v1620_v8  ;;  %v1676_v21 = vsub.f32 %v22728_v37, %v1620_v8  ;;  %v1680_v23 = vsub.f32 %v22755_v54, %v1620_v8  ;;  %v19277_v8 = vld [vmem:[#allocation6 + $0x208] ss:$16 sps:$4 sm:$0xff]  }
 0x376   :  { %v1670_v24 = vsub.f32 %v1662_v14, %v1666_v15  ;;  %v1619_v29 = vmul.f32 0.083333336, %v1600_v7  ;;  %v1645_v30 = vadd.f32 %v1644_v49, %v1643_v61  ;;  %v1615_v31 = vrot.slane %v1614_v11, 1  ;;  %v19274_v49 = vld [vmem:[#allocation6 + $0x200] ss:$16 sps:$4 sm:$0xff]  }
 0x377   :  { %v1672_v13 = vsub.f32 %v1664_v19, %v1668_v20  ;;  %v1659_v32 = vadd.f32 %v1658_v12, %v1657_v1  ;;  %v378_v35 = vsub.s32 %v22705_v47, %v22724_v22  ;;  %v387_v34 = vadd.s32 6, %v22731_v39  ;;  %v19282_v14 = vld [vmem:[#allocation6 + $0x224] ss:$16 sps:$4 sm:$0xff]   ;;  %v19285_v15 = vld [vmem:[#allocation6 + $0x22c] ss:$16 sps:$4 sm:$0xff]  }
 0x378   :  { %v1682_v36 = vadd.f32 1e-05, %v1670_v24  ;;  %v1663_v38 = vmul.f32 0.083333336, %v1645_v30  ;;  %v1667_v33 = vmul.f32 %v1619_v29, %v1619_v29  ;;  %v1675_v50 = vsub.f32 %v22733_v41, %v1619_v29 }
 0x379   :  { %v1684_v40 = vadd.f32 1e-05, %v1672_v13  ;;  %v1679_v42 = vsub.f32 %v22763_v59, %v1619_v29  ;;  %v1616_v37 = vadd.f32 %v1615_v31, %v1614_v11  ;;  %v1660_v43 = vrot.slane %v1659_v32, 1 }
 0x37a   :  { %21775 = vrsqrt.f32 %v1682_v36  ;;  %v1671_v54 = vsub.f32 %v1663_v38, %v1667_v33  ;;  %vm382_vm6 = vcmp.ne.s32.totalorder %v378_v35, 0  ;;  %vm384_vm8 = vcmp.lt.s32.totalorder %v378_v35, 0 }
 0x37b   :  { %21777 = vrsqrt.f32 %v1684_v40  ;;  %v22794_v44 = vmul.f32 0.083333336, %v1616_v37  ;;  %v1661_v45 = vadd.f32 %v1660_v43, %v1659_v32  ;;  %vm386_vm11 = vmand %vm384_vm8, %vm382_vm6  ;;  %v388_v52 = vadd.s32 6, %v378_v35  ;;  %v19283_v37 = vld [vmem:[#allocation6 + $0x228] ss:$16 sps:$4 sm:$0xff]  }
 0x37c   :  { %v1683_v48 = vadd.f32 1e-05, %v1671_v54  ;;  %v22805_v55 = vsel %vm385_vm9, %v387_v34, %v22731_v39 }
 0x37d   :  { %v1665_v47 = vmul.f32 0.083333336, %v1661_v45  ;;  %v1669_v22 = vmul.f32 %v22794_v44, %v22794_v44  ;;  %v1677_v41 = vsub.f32 %v22741_v46, %v22794_v44  ;;  %v1681_v59 = vsub.f32 %v22777_v10, %v22794_v44  ;;  %v19288_v44 = vld [vmem:[#allocation6 + $0x244] ss:$16 sps:$4 sm:$0xff]   ;;  %v19291_v45 = vld [vmem:[#allocation6 + $0x24c] ss:$16 sps:$4 sm:$0xff]  }
 0x37e   :  { %21779 = vrsqrt.f32 %v1683_v48  ;;  %v22807_v58 = vsel %vm386_vm11, %v388_v52, %v378_v35  ;;  %vm1770_vm2 = vcmp.eq.s32.totalorder %v22805_v55, 5 }
 0x37f   :  { %v1673_v4 = vsub.f32 %v1665_v47, %v1669_v22  ;;  %vm1771_vm3 = vcmp.eq.s32.totalorder %v22807_v58, 5 }
 0x381   :  { %v1685_v51 = vadd.f32 1e-05, %v1673_v4 }
 0x383   :  { %21781 = vrsqrt.f32 %v1685_v51 }
 0x384   :  { %v21776_v53 = vpop.eup %21775 }
 0x385   :  { %v21778_v56 = vpop.eup %21777  ;;  %v1690_v57 = vmul.f32 %v21776_v53, %v1674_v17  ;;  %v1694_v46 = vmul.f32 %v21776_v53, %v1678_v18 }
 0x386   :  { %v22809_v10 = vmul.f32 %v21778_v56, %v1676_v21  ;;  %v22811_v60 = vmul.f32 %v21778_v56, %v1680_v23 }
 0x387   :  { %v1708_v61 = vrot.slane %v1694_v46, 1  ;;  %v1916_v62 = vpack.c.bf16 %v1694_v46, %v1690_v57  ;;  %v1707_v63 = vrot.slane %v1690_v57, 1  ;;  %v1742_v0 = vrot.slane %v1694_v46, 7  ;;  %v19286_v46 = vld [vmem:[#allocation6 + $0x240] ss:$16 sps:$4 sm:$0xff]  }
 0x388   :  { %v21780_v39 = vpop.eup %21779  ;;  %v1714_v1 = vrot.slane %v22811_v60, 1  ;;  %v22817_v2 = vpack.c.bf16 %v22811_v60, %v22809_v10  ;;  %v1727_v11 = vrot.slane %v1690_v57, 5  ;;  %v1748_v12 = vrot.slane %v22811_v60, 7 }
 0x389   :  { %v1691_v5 = vmul.f32 %v21780_v39, %v1675_v50  ;;  %v1695_v7 = vmul.f32 %v21780_v39, %v1679_v42  ;;  %v1709_v9 = vsel %vm1706_vm12, %v1707_v63, %v1708_v61  ;;  %v1741_v17 = vrot.slane %v1690_v57, 7  ;;  %v19280_v42 = vld [vmem:[#allocation6 + $0x220] ss:$16 sps:$4 sm:$0xff]   ;;  %v19289_v39 = vld [vmem:[#allocation6 + $0x248] ss:$16 sps:$4 sm:$0xff]  }
 0x38a   :  { %v1757_v18 = vrot.slane %v1690_v57, 3  ;;  %v1713_v19 = vrot.slane %v22809_v10, 1  ;;  %v1736_v13 = vsel %vm1735_vm13, %v1708_v61, %v1727_v11  ;;  %v1729_v33 = vrot.slane %v22809_v10, 5 }
 0x38b   :  { %v1745_v20 = vrot.slane %v1695_v7, 7  ;;  %v1917_v21 = vpack.c.bf16 %v1695_v7, %v1691_v5  ;;  %v1710_v23 = vrot.slane %v1691_v5, 1  ;;  %v1711_v24 = vrot.slane %v1695_v7, 1 }
 0x38c   :  { %v1728_v29 = vrot.slane %v1691_v5, 5  ;;  %v1744_v30 = vrot.slane %v1691_v5, 7  ;;  %v1758_v31 = vrot.slane %v1691_v5, 3  ;;  %v1743_v36 = vsel %vm1740_vm14, %v1741_v17, %v1742_v0  ;;  %v19295_v17 = vld [vmem:[#allocation6 + $0x268] ss:$16 sps:$4 sm:$0xff]  }
 0x38d   :  { %v21782_v32 = vpop.eup %21781  ;;  %2720 = vmatprep.mubr.bf16.mxu0 %v1917_v21  ;;  %2806 = vmatprep.mubr.bf16.mxu1 %v1917_v21  ;;  %v1712_v35 = vsel %vm1706_vm12, %v1710_v23, %v1711_v24  ;;  %v1780_v38 = vsel %vm1771_vm3, %v1757_v18, %v1736_v13  ;;  %v1747_v54 = vrot.slane %v22809_v10, 7  ;;  %v1766_v22 = vsel %vm1765_vm15, %v1743_v36, %v1757_v18  ;;  %v19306_v13 = vld [vmem:[#allocation6 + $0x2a4] ss:$16 sps:$4 sm:$0xff]   ;;  %v19307_v36 = vld [vmem:[#allocation6 + $0x2a8] ss:$16 sps:$4 sm:$0xff]  }
 0x38e   :  { %2721 = vmatmul.mubr.bf16.vlgmr.msra.gmra.mrb[8].mxu0 %v1916_v62  ;;  %2807 = vmatmul.mubr.bf16.vlgmr.msra.gmra.mrb[8].mxu1 %v1916_v62  ;;  %v1693_v50 = vmul.f32 %v21782_v32, %v1677_v41  ;;  %v1697_v40 = vmul.f32 %v21782_v32, %v1681_v59  ;;  %v1737_v43 = vsel %vm1735_vm13, %v1711_v24, %v1728_v29  ;;  %v1759_v41 = vrot.slane %v22809_v10, 3  ;;  %v19300_v24 = vld [vmem:[#allocation6 + $0x284] ss:$16 sps:$4 sm:$0xff]   ;;  %v19303_v29 = vld [vmem:[#allocation6 + $0x28c] ss:$16 sps:$4 sm:$0xff]  }
 0x38f   :  { %2732 = vmatpush1.bf16.msra.mxu0 %v19274_v49  ;;  %2818 = vmatpush1.bf16.msra.mxu1 %v19277_v8  ;;  %v1746_v48 = vsel %vm1740_vm14, %v1744_v30, %v1745_v20  ;;  %v1781_v47 = vsel %vm1771_vm3, %v1758_v31, %v1737_v43  ;;  %v1776_v51 = vsel %vm1770_vm2, %v1766_v22, %v1709_v9  ;;  %v19294_v49 = vld [vmem:[#allocation6 + $0x264] ss:$16 sps:$4 sm:$0xff]   ;;  %v19297_v8 = vld [vmem:[#allocation6 + $0x26c] ss:$16 sps:$4 sm:$0xff]   ;;  %v19298_v30 = vld [vmem:[#allocation6 + $0x280] ss:$16 sps:$4 sm:$0xff]  }
 0x390   :  { %v1751_v59 = vrot.slane %v1697_v40, 7  ;;  %v1919_v4 = vpack.c.bf16 %v1697_v40, %v1693_v50  ;;  %2733 = vmatprep.subr.bf16.mxu0 %v19282_v14  ;;  %2819 = vmatprep.subr.bf16.mxu1 %v19285_v15  ;;  %v1767_v34 = vsel %vm1765_vm15, %v1746_v48, %v1758_v31  ;;  %v22841_v53 = vpack.c.bf16 %v1780_v38, %v1776_v51  ;;  %v19292_v15 = vld [vmem:[#allocation6 + $0x260] ss:$16 sps:$4 sm:$0xff]   ;;  %v19301_v31 = vld [vmem:[#allocation6 + $0x288] ss:$16 sps:$4 sm:$0xff]  }
 0x391   :  { %v1777_v52 = vsel %vm1770_vm2, %v1767_v34, %v1712_v35  ;;  %v1716_v56 = vrot.slane %v1693_v50, 1  ;;  %v1717_v57 = vrot.slane %v1697_v40, 1  ;;  %v1730_v61 = vrot.slane %v1693_v50, 5  ;;  %v19309_v32 = vld [vmem:[#allocation6 + $0x2ac] ss:$16 sps:$4 sm:$0xff]  }
 0x392   :  { %2763 = vmatprep.mubr.bf16.mxu0 %v1919_v4  ;;  %2849 = vmatprep.mubr.bf16.mxu1 %v1919_v4  ;;  %v22843_v10 = vpack.c.bf16 %v1781_v47, %v1777_v52  ;;  %v1750_v62 = vrot.slane %v1693_v50, 7  ;;  %v1760_v63 = vrot.slane %v1693_v50, 3  ;;  %v1715_v5 = vsel %vm1706_vm12, %v1713_v19, %v1714_v1  ;;  %v19304_v35 = vld [vmem:[#allocation6 + $0x2a0] ss:$16 sps:$4 sm:$0xff]   ;;  %v19312_v38 = vld [vmem:[#allocation6 + $0x2c4] ss:$16 sps:$4 sm:$0xff]  }
 0x393   :  { %2734 = vmatpush1.bf16.msra.mxu0 %v19280_v42  ;;  %2820 = vmatpush1.bf16.msra.mxu1 %v19283_v37  ;;  %v1718_v0 = vsel %vm1706_vm12, %v1716_v56, %v1717_v57  ;;  %v1738_v7 = vsel %vm1735_vm13, %v1714_v1, %v1729_v33  ;;  %v1739_v9 = vsel %vm1735_vm13, %v1717_v57, %v1730_v61  ;;  %v19315_v33 = vld [vmem:[#allocation6 + $0x2cc] ss:$16 sps:$4 sm:$0xff]   ;;  %v19310_v50 = vld [vmem:[#allocation6 + $0x2c0] ss:$16 sps:$4 sm:$0xff]   ;;  %v19313_v40 = vld [vmem:[#allocation6 + $0x2c8] ss:$16 sps:$4 sm:$0xff]  }
 0x394   :  { %2735 = vmatprep.subr.bf16.mxu0 %v19288_v44  ;;  %2821 = vmatprep.subr.bf16.mxu1 %v19291_v45  ;;  %v1752_v11 = vsel %vm1740_vm14, %v1750_v62, %v1751_v59  ;;  %v1749_v14 = vsel %vm1740_vm14, %v1747_v54, %v1748_v12  ;;  %v1783_v19 = vsel %vm1771_vm3, %v1760_v63, %v1739_v9  ;;  %v19318_v42 = vld [vmem:[#allocation6 + $0x2e4] ss:$16 sps:$4 sm:$0xff]   ;;  %v19321_v37 = vld [vmem:[#allocation6 + $0x2ec] ss:$16 sps:$4 sm:$0xff]   ;;  %v19316_v43 = vld [vmem:[#allocation6 + $0x2e0] ss:$16 sps:$4 sm:$0xff]  }
 0x395   :  { %v1769_v18 = vsel %vm1765_vm15, %v1752_v11, %v1760_v63  ;;  %v1768_v1 = vsel %vm1765_vm15, %v1749_v14, %v1759_v41  ;;  %v1782_v20 = vsel %vm1771_vm3, %v1759_v41, %v1738_v7  ;;  %v19319_v54 = vld [vmem:[#allocation6 + $0x2e8] ss:$16 sps:$4 sm:$0xff]   ;;  %v19324_v44 = vld [vmem:[#allocation6 + $0x304] ss:$16 sps:$4 sm:$0xff]   ;;  %v19327_v45 = vld [vmem:[#allocation6 + $0x30c] ss:$16 sps:$4 sm:$0xff]  }
 0x396   :  { %v1779_v21 = vsel %vm1770_vm2, %v1769_v18, %v1718_v0  ;;  %v1778_v60 = vsel %vm1770_vm2, %v1768_v1, %v1715_v5  ;;  %v19322_v48 = vld [vmem:[#allocation6 + $0x300] ss:$16 sps:$4 sm:$0xff]   ;;  %v19325_v47 = vld [vmem:[#allocation6 + $0x308] ss:$16 sps:$4 sm:$0xff]   ;;  %v19330_v22 = vld [vmem:[#allocation6 + $0x324] ss:$16 sps:$4 sm:$0xff]  }
 0x397   :  { %2736 = vmatpush1.bf16.msra.mxu0 %v19286_v46  ;;  %2822 = vmatpush1.bf16.msra.mxu1 %v19289_v39  ;;  %v22867_v12 = vpack.c.bf16 %v1783_v19, %v1779_v21  ;;  %v22869_v23 = vpack.c.bf16 %v1782_v20, %v1778_v60  ;;  %v19333_v41 = vld [vmem:[#allocation6 + $0x32c] ss:$16 sps:$4 sm:$0xff]   ;;  %v19328_v59 = vld [vmem:[#allocation6 + $0x320] ss:$16 sps:$4 sm:$0xff]   ;;  %v19331_v4 = vld [vmem:[#allocation6 + $0x328] ss:$16 sps:$4 sm:$0xff]  }
 0x398   :  { %2737 = vmatprep.subr.bf16.mxu0 %v19294_v49  ;;  %2823 = vmatprep.subr.bf16.mxu1 %v19297_v8  ;;  %v19336_v34 = vld [vmem:[#allocation6 + $0x344] ss:$16 sps:$4 sm:$0xff]   ;;  %v19339_v51 = vld [vmem:[#allocation6 + $0x34c] ss:$16 sps:$4 sm:$0xff]   ;;  %v19334_v52 = vld [vmem:[#allocation6 + $0x340] ss:$16 sps:$4 sm:$0xff]  }
 0x399   :  { %v19337_v56 = vld [vmem:[#allocation6 + $0x348] ss:$16 sps:$4 sm:$0xff]   ;;  %v19342_v57 = vld [vmem:[#allocation6 + $0x364] ss:$16 sps:$4 sm:$0xff]   ;;  %v19345_v46 = vld [vmem:[#allocation6 + $0x36c] ss:$16 sps:$4 sm:$0xff]  }
 0x39a   :  { %v19340_v61 = vld [vmem:[#allocation6 + $0x360] ss:$16 sps:$4 sm:$0xff]   ;;  %v19343_v62 = vld [vmem:[#allocation6 + $0x368] ss:$16 sps:$4 sm:$0xff]   ;;  %v19348_v63 = vld [vmem:[#allocation6 + $0x384] ss:$16 sps:$4 sm:$0xff]  }
 0x39b   :  { %2738 = vmatpush1.bf16.msra.mxu0 %v19292_v15  ;;  %2824 = vmatpush1.bf16.msra.mxu1 %v19295_v17  ;;  %v19351_v39 = vld [vmem:[#allocation6 + $0x38c] ss:$16 sps:$4 sm:$0xff]   ;;  %v19346_v0 = vld [vmem:[#allocation6 + $0x380] ss:$16 sps:$4 sm:$0xff]   ;;  %v19349_v5 = vld [vmem:[#allocation6 + $0x388] ss:$16 sps:$4 sm:$0xff]  }
 0x39c   :  { %2739 = vmatprep.subr.bf16.mxu0 %v19300_v24  ;;  %2825 = vmatprep.subr.bf16.mxu1 %v19303_v29  ;;  %v19354_v7 = vld [vmem:[#allocation6 + $0x3a4] ss:$16 sps:$4 sm:$0xff]   ;;  %v19357_v49 = vld [vmem:[#allocation6 + $0x3ac] ss:$16 sps:$4 sm:$0xff]   ;;  %v19352_v8 = vld [vmem:[#allocation6 + $0x3a0] ss:$16 sps:$4 sm:$0xff]  }
 0x39d   :  { %v19355_v9 = vld [vmem:[#allocation6 + $0x3a8] ss:$16 sps:$4 sm:$0xff]   ;;  %v19360_v11 = vld [vmem:[#allocation6 + $0x3c4] ss:$16 sps:$4 sm:$0xff]   ;;  %v19363_v14 = vld [vmem:[#allocation6 + $0x3cc] ss:$16 sps:$4 sm:$0xff]  }
 0x39e   :  { %v19358_v15 = vld [vmem:[#allocation6 + $0x3c0] ss:$16 sps:$4 sm:$0xff]   ;;  %v19361_v17 = vld [vmem:[#allocation6 + $0x3c8] ss:$16 sps:$4 sm:$0xff]   ;;  %v19366_v18 = vld [vmem:[#allocation6 + $0x3e4] ss:$16 sps:$4 sm:$0xff]  }
 0x39f   :  { %2740 = vmatpush1.bf16.msra.mxu0 %v19298_v30  ;;  %2826 = vmatpush1.bf16.msra.mxu1 %v19301_v31  ;;  %v19369_v19 = vld [vmem:[#allocation6 + $0x3ec] ss:$16 sps:$4 sm:$0xff]   ;;  %v19364_v1 = vld [vmem:[#allocation6 + $0x3e0] ss:$16 sps:$4 sm:$0xff]   ;;  %v19367_v20 = vld [vmem:[#allocation6 + $0x3e8] ss:$16 sps:$4 sm:$0xff]  }
 0x3a0   :  { %2741 = vmatprep.subr.bf16.mxu0 %v19306_v13  ;;  %2827 = vmatprep.subr.bf16.mxu1 %v19309_v32  ;;  %v19372_v21 = vld [vmem:[#allocation4 + $0x4] ss:$16 sps:$4 sm:$0xff]   ;;  %v19375_v60 = vld [vmem:[#allocation4 + $0xc] ss:$16 sps:$4 sm:$0xff]   ;;  %v19370_v24 = vld [vmem:[#allocation4] ss:$16 sps:$4 sm:$0xff]  }
 0x3a1   :  { %v19373_v29 = vld [vmem:[#allocation4 + $0x8] ss:$16 sps:$4 sm:$0xff]   ;;  %v19378_v30 = vld [vmem:[#allocation4 + $0x24] ss:$16 sps:$4 sm:$0xff]   ;;  %v19381_v31 = vld [vmem:[#allocation4 + $0x2c] ss:$16 sps:$4 sm:$0xff]  }
 0x3a2   :  { %v19376_v13 = vld [vmem:[#allocation4 + $0x20] ss:$16 sps:$4 sm:$0xff]   ;;  %v19379_v32 = vld [vmem:[#allocation4 + $0x28] ss:$16 sps:$4 sm:$0xff]  }
 0x3a3   :  { %2742 = vmatpush1.bf16.msra.mxu0 %v19304_v35  ;;  %2828 = vmatpush1.bf16.msra.mxu1 %v19307_v36  ;;  %v19384_v35 = vld [vmem:[#allocation4 + $0x44] ss:$16 sps:$4 sm:$0xff]   ;;  %v19382_v36 = vld [vmem:[#allocation4 + $0x40] ss:$16 sps:$4 sm:$0xff]  }
 0x3a4   :  { %2743 = vmatprep.subr.bf16.mxu0 %v19312_v38  ;;  %2829 = vmatprep.subr.bf16.mxu1 %v19315_v33  ;;  %v19387_v38 = vld [vmem:[#allocation4 + $0x4c] ss:$16 sps:$4 sm:$0xff]   ;;  %v19385_v33 = vld [vmem:[#allocation4 + $0x48] ss:$16 sps:$4 sm:$0xff]  }
 0x3a7   :  { %2744 = vmatpush1.bf16.msra.mxu0 %v19310_v50  ;;  %2830 = vmatpush1.bf16.msra.mxu1 %v19313_v40  ;;  %v19390_v50 = vld [vmem:[#allocation4 + $0x64] ss:$16 sps:$4 sm:$0xff]   ;;  %v19393_v40 = vld [vmem:[#allocation4 + $0x6c] ss:$16 sps:$4 sm:$0xff]  }
 0x3a8   :  { %2745 = vmatprep.subr.bf16.mxu0 %v19318_v42  ;;  %2831 = vmatprep.subr.bf16.mxu1 %v19321_v37  ;;  %v19391_v42 = vld [vmem:[#allocation4 + $0x68] ss:$16 sps:$4 sm:$0xff]   ;;  %v19396_v37 = vld [vmem:[#allocation4 + $0x84] ss:$16 sps:$4 sm:$0xff]  }
 0x3ab   :  { %2746 = vmatpush1.bf16.msra.mxu0 %v19316_v43  ;;  %2832 = vmatpush1.bf16.msra.mxu1 %v19319_v54  ;;  %v19399_v43 = vld [vmem:[#allocation4 + $0x8c] ss:$16 sps:$4 sm:$0xff]   ;;  %v19397_v54 = vld [vmem:[#allocation4 + $0x88] ss:$16 sps:$4 sm:$0xff]  }
 0x3ac   :  { %2747 = vmatprep.subr.bf16.mxu0 %v19324_v44  ;;  %2833 = vmatprep.subr.bf16.mxu1 %v19327_v45  ;;  %v19402_v44 = vld [vmem:[#allocation4 + $0xa4] ss:$16 sps:$4 sm:$0xff]   ;;  %v19400_v45 = vld [vmem:[#allocation4 + $0xa0] ss:$16 sps:$4 sm:$0xff]  }
 0x3af   :  { %2748 = vmatpush1.bf16.msra.mxu0 %v19322_v48  ;;  %2834 = vmatpush1.bf16.msra.mxu1 %v19325_v47  ;;  %v19405_v48 = vld [vmem:[#allocation4 + $0xac] ss:$16 sps:$4 sm:$0xff]   ;;  %v19403_v47 = vld [vmem:[#allocation4 + $0xa8] ss:$16 sps:$4 sm:$0xff]  }
 0x3b0   :  { %2749 = vmatprep.subr.bf16.mxu0 %v19330_v22  ;;  %2835 = vmatprep.subr.bf16.mxu1 %v19333_v41  ;;  %v19408_v22 = vld [vmem:[#allocation4 + $0xc4] ss:$16 sps:$4 sm:$0xff]   ;;  %v19406_v41 = vld [vmem:[#allocation4 + $0xc0] ss:$16 sps:$4 sm:$0xff]  }
 0x3b3   :  { %2750 = vmatpush1.bf16.msra.mxu0 %v19328_v59  ;;  %2836 = vmatpush1.bf16.msra.mxu1 %v19331_v4  ;;  %v19411_v59 = vld [vmem:[#allocation4 + $0xcc] ss:$16 sps:$4 sm:$0xff]   ;;  %v19409_v4 = vld [vmem:[#allocation4 + $0xc8] ss:$16 sps:$4 sm:$0xff]  }
 0x3b4   :  { %2751 = vmatprep.subr.bf16.mxu0 %v19336_v34  ;;  %2837 = vmatprep.subr.bf16.mxu1 %v19339_v51  ;;  %v19414_v34 = vld [vmem:[#allocation4 + $0xe4] ss:$16 sps:$4 sm:$0xff]   ;;  %v19412_v51 = vld [vmem:[#allocation4 + $0xe0] ss:$16 sps:$4 sm:$0xff]  }
 0x3b7   :  { %2752 = vmatpush1.bf16.msra.mxu0 %v19334_v52  ;;  %2838 = vmatpush1.bf16.msra.mxu1 %v19337_v56  ;;  %v19417_v52 = vld [vmem:[#allocation4 + $0xec] ss:$16 sps:$4 sm:$0xff]   ;;  %v19415_v56 = vld [vmem:[#allocation4 + $0xe8] ss:$16 sps:$4 sm:$0xff]  }
 0x3b8   :  { %2753 = vmatprep.subr.bf16.mxu0 %v19342_v57  ;;  %2839 = vmatprep.subr.bf16.mxu1 %v19345_v46  ;;  %v19420_v57 = vld [vmem:[#allocation4 + $0x104] ss:$16 sps:$4 sm:$0xff]   ;;  %v19418_v46 = vld [vmem:[#allocation4 + $0x100] ss:$16 sps:$4 sm:$0xff]  }
 0x3bb   :  { %2754 = vmatpush1.bf16.msra.mxu0 %v19340_v61  ;;  %2840 = vmatpush1.bf16.msra.mxu1 %v19343_v62  ;;  %v19423_v61 = vld [vmem:[#allocation4 + $0x10c] ss:$16 sps:$4 sm:$0xff]   ;;  %v19421_v62 = vld [vmem:[#allocation4 + $0x108] ss:$16 sps:$4 sm:$0xff]  }
 0x3bc   :  { %2755 = vmatprep.subr.bf16.mxu0 %v19348_v63  ;;  %2841 = vmatprep.subr.bf16.mxu1 %v19351_v39  ;;  %v19426_v63 = vld [vmem:[#allocation4 + $0x124] ss:$16 sps:$4 sm:$0xff]   ;;  %v19424_v39 = vld [vmem:[#allocation4 + $0x120] ss:$16 sps:$4 sm:$0xff]  }
 0x3bf   :  { %2756 = vmatpush1.bf16.msra.mxu0 %v19346_v0  ;;  %2842 = vmatpush1.bf16.msra.mxu1 %v19349_v5  ;;  %v19429_v0 = vld [vmem:[#allocation4 + $0x12c] ss:$16 sps:$4 sm:$0xff]   ;;  %v19427_v5 = vld [vmem:[#allocation4 + $0x128] ss:$16 sps:$4 sm:$0xff]  }
 0x3c0   :  { %2757 = vmatprep.subr.bf16.mxu0 %v19354_v7  ;;  %2843 = vmatprep.subr.bf16.mxu1 %v19357_v49  ;;  %v19432_v7 = vld [vmem:[#allocation4 + $0x144] ss:$16 sps:$4 sm:$0xff]   ;;  %v19430_v49 = vld [vmem:[#allocation4 + $0x140] ss:$16 sps:$4 sm:$0xff]  }
 0x3c3   :  { %2758 = vmatpush1.bf16.msra.mxu0 %v19352_v8  ;;  %2844 = vmatpush1.bf16.msra.mxu1 %v19355_v9  ;;  %v19435_v8 = vld [vmem:[#allocation4 + $0x14c] ss:$16 sps:$4 sm:$0xff]   ;;  %v19433_v9 = vld [vmem:[#allocation4 + $0x148] ss:$16 sps:$4 sm:$0xff]  }
 0x3c4   :  { %2759 = vmatprep.subr.bf16.mxu0 %v19360_v11  ;;  %2845 = vmatprep.subr.bf16.mxu1 %v19363_v14  ;;  %v19438_v11 = vld [vmem:[#allocation4 + $0x164] ss:$16 sps:$4 sm:$0xff]   ;;  %v19441_v14 = vld [vmem:[#allocation4 + $0x16c] ss:$16 sps:$4 sm:$0xff]  }
 0x3c7   :  { %2760 = vmatpush1.bf16.msra.mxu0 %v19358_v15  ;;  %2846 = vmatpush1.bf16.msra.mxu1 %v19361_v17  ;;  %v19436_v15 = vld [vmem:[#allocation4 + $0x160] ss:$16 sps:$4 sm:$0xff]   ;;  %v19439_v17 = vld [vmem:[#allocation4 + $0x168] ss:$16 sps:$4 sm:$0xff]  }
 0x3c8   :  { %2761 = vmatprep.subr.bf16.mxu0 %v19366_v18  ;;  %2847 = vmatprep.subr.bf16.mxu1 %v19369_v19  ;;  %v19444_v18 = vld [vmem:[#allocation4 + $0x184] ss:$16 sps:$4 sm:$0xff]   ;;  %v19447_v19 = vld [vmem:[#allocation4 + $0x18c] ss:$16 sps:$4 sm:$0xff]  }
 0x3cb   :  { %2762 = vmatpush1.bf16.msra.mxu0 %v19364_v1  ;;  %2848 = vmatpush1.bf16.msra.mxu1 %v19367_v20  ;;  %v19442_v1 = vld [vmem:[#allocation4 + $0x180] ss:$16 sps:$4 sm:$0xff]   ;;  %v19445_v20 = vld [vmem:[#allocation4 + $0x188] ss:$16 sps:$4 sm:$0xff]  }
 0x3cc   :  { %3500 = vmatprep.subr.bf16.mxu0 %v19372_v21  ;;  %3586 = vmatprep.subr.bf16.mxu1 %v19375_v60  ;;  %v19450_v21 = vld [vmem:[#allocation4 + $0x1a4] ss:$16 sps:$4 sm:$0xff]   ;;  %v19453_v60 = vld [vmem:[#allocation4 + $0x1ac] ss:$16 sps:$4 sm:$0xff]  }
 0x3ce   :  { %2764 = vmatmul.mubr.bf16.vlgmr.msra.gmra.mrb[8].mxu0 %v22817_v2  ;;  %2850 = vmatmul.mubr.bf16.vlgmr.msra.gmra.mrb[8].mxu1 %v22817_v2  ;;  %v19388_v2 = vld [vmem:[#allocation4 + $0x60] ss:$16 sps:$4 sm:$0xff]  }
 0x3cf   :  { %3501 = vmatpush1.bf16.msra.mxu0 %v19370_v24  ;;  %3532 = vmatprep.mubr.bf16.mxu0 %v22843_v10  ;;  %v19448_v24 = vld [vmem:[#allocation4 + $0x1a0] ss:$16 sps:$4 sm:$0xff]  }
 0x3d0   :  { %3587 = vmatpush1.bf16.msra.mxu1 %v19373_v29  ;;  %3618 = vmatprep.mubr.bf16.mxu1 %v22843_v10  ;;  %v19394_v10 = vld [vmem:[#allocation4 + $0x80] ss:$16 sps:$4 sm:$0xff]   ;;  %v19451_v29 = vld [vmem:[#allocation4 + $0x1a8] ss:$16 sps:$4 sm:$0xff]  }
 0x3d1   :  { %3502 = vmatprep.subr.bf16.mxu0 %v19378_v30  ;;  %3588 = vmatprep.subr.bf16.mxu1 %v19381_v31  ;;  %v19456_v30 = vld [vmem:[#allocation4 + $0x1c4] ss:$16 sps:$4 sm:$0xff]   ;;  %v19459_v31 = vld [vmem:[#allocation4 + $0x1cc] ss:$16 sps:$4 sm:$0xff]  }
 0x3d3   :  { %3503 = vmatpush1.bf16.msra.mxu0 %v19376_v13  ;;  %v19454_v13 = vld [vmem:[#allocation4 + $0x1c0] ss:$16 sps:$4 sm:$0xff]  }
 0x3d4   :  { %3589 = vmatpush1.bf16.msra.mxu1 %v19379_v32  ;;  %3504 = vmatprep.subr.bf16.mxu0 %v19384_v35  ;;  %v19457_v32 = vld [vmem:[#allocation4 + $0x1c8] ss:$16 sps:$4 sm:$0xff]   ;;  %v19462_v35 = vld [vmem:[#allocation4 + $0x1e4] ss:$16 sps:$4 sm:$0xff]  }
 0x3d5   :  { %3590 = vmatprep.subr.bf16.mxu1 %v19387_v38  ;;  %v19460_v38 = vld [vmem:[#allocation4 + $0x1e0] ss:$16 sps:$4 sm:$0xff]  }
 0x3d7   :  { %3505 = vmatpush1.bf16.msra.mxu0 %v19382_v36  ;;  %v19465_v36 = vld [vmem:[#allocation4 + $0x1ec] ss:$16 sps:$4 sm:$0xff]  }
 0x3d8   :  { %3591 = vmatpush1.bf16.msra.mxu1 %v19385_v33  ;;  %3506 = vmatprep.subr.bf16.mxu0 %v19390_v50  ;;  %v19463_v33 = vld [vmem:[#allocation4 + $0x1e8] ss:$16 sps:$4 sm:$0xff]   ;;  %v19468_v50 = vld [vmem:[#allocation4 + $0x204] ss:$16 sps:$4 sm:$0xff]  }
 0x3d9   :  { %3592 = vmatprep.subr.bf16.mxu1 %v19393_v40  ;;  %v19466_v40 = vld [vmem:[#allocation4 + $0x200] ss:$16 sps:$4 sm:$0xff]  }
 0x3db   :  { %3507 = vmatpush1.bf16.msra.mxu0 %v19388_v2  ;;  %v19471_v2 = vld [vmem:[#allocation4 + $0x20c] ss:$16 sps:$4 sm:$0xff]  }
 0x3dc   :  { %3593 = vmatpush1.bf16.msra.mxu1 %v19391_v42  ;;  %3508 = vmatprep.subr.bf16.mxu0 %v19396_v37  ;;  %v19469_v42 = vld [vmem:[#allocation4 + $0x208] ss:$16 sps:$4 sm:$0xff]   ;;  %v19474_v37 = vld [vmem:[#allocation4 + $0x224] ss:$16 sps:$4 sm:$0xff]  }
 0x3dd   :  { %3594 = vmatprep.subr.bf16.mxu1 %v19399_v43  ;;  %v19472_v43 = vld [vmem:[#allocation4 + $0x220] ss:$16 sps:$4 sm:$0xff]  }
 0x3df   :  { %3509 = vmatpush1.bf16.msra.mxu0 %v19394_v10  ;;  %v19477_v10 = vld [vmem:[#allocation4 + $0x22c] ss:$16 sps:$4 sm:$0xff]  }
 0x3e0   :  { %3595 = vmatpush1.bf16.msra.mxu1 %v19397_v54  ;;  %3510 = vmatprep.subr.bf16.mxu0 %v19402_v44  ;;  %v19475_v54 = vld [vmem:[#allocation4 + $0x228] ss:$16 sps:$4 sm:$0xff]   ;;  %v19480_v44 = vld [vmem:[#allocation4 + $0x244] ss:$16 sps:$4 sm:$0xff]  }
 0x3e1   :  { %3596 = vmatprep.subr.bf16.mxu1 %v19405_v48  ;;  %v19478_v48 = vld [vmem:[#allocation4 + $0x240] ss:$16 sps:$4 sm:$0xff]  }
 0x3e3   :  { %3511 = vmatpush1.bf16.msra.mxu0 %v19400_v45  ;;  %v19483_v45 = vld [vmem:[#allocation4 + $0x24c] ss:$16 sps:$4 sm:$0xff]  }
 0x3e4   :  { %3597 = vmatpush1.bf16.msra.mxu1 %v19403_v47  ;;  %3512 = vmatprep.subr.bf16.mxu0 %v19408_v22  ;;  %v19481_v47 = vld [vmem:[#allocation4 + $0x248] ss:$16 sps:$4 sm:$0xff]   ;;  %v19486_v22 = vld [vmem:[#allocation4 + $0x264] ss:$16 sps:$4 sm:$0xff]  }
 0x3e5   :  { %3598 = vmatprep.subr.bf16.mxu1 %v19411_v59  ;;  %v19484_v59 = vld [vmem:[#allocation4 + $0x260] ss:$16 sps:$4 sm:$0xff]  }
 0x3e7   :  { %3513 = vmatpush1.bf16.msra.mxu0 %v19406_v41  ;;  %v19489_v41 = vld [vmem:[#allocation4 + $0x26c] ss:$16 sps:$4 sm:$0xff]  }
 0x3e8   :  { %3599 = vmatpush1.bf16.msra.mxu1 %v19409_v4  ;;  %3514 = vmatprep.subr.bf16.mxu0 %v19414_v34  ;;  %v19487_v4 = vld [vmem:[#allocation4 + $0x268] ss:$16 sps:$4 sm:$0xff]   ;;  %v19495_v34 = vld [vmem:[#allocation4 + $0x28c] ss:$16 sps:$4 sm:$0xff]  }
 0x3e9   :  { %3600 = vmatprep.subr.bf16.mxu1 %v19417_v52  ;;  %v19498_v52 = vld [vmem:[#allocation4 + $0x2a4] ss:$16 sps:$4 sm:$0xff]  }
 0x3eb   :  { %3515 = vmatpush1.bf16.msra.mxu0 %v19412_v51  ;;  %v19490_v51 = vld [vmem:[#allocation4 + $0x280] ss:$16 sps:$4 sm:$0xff]  }
 0x3ec   :  { %3601 = vmatpush1.bf16.msra.mxu1 %v19415_v56  ;;  %3516 = vmatprep.subr.bf16.mxu0 %v19420_v57  ;;  %v19501_v56 = vld [vmem:[#allocation4 + $0x2ac] ss:$16 sps:$4 sm:$0xff]   ;;  %v19496_v57 = vld [vmem:[#allocation4 + $0x2a0] ss:$16 sps:$4 sm:$0xff]  }
 0x3ed   :  { %3602 = vmatprep.subr.bf16.mxu1 %v19423_v61  ;;  %v19504_v61 = vld [vmem:[#allocation4 + $0x2c4] ss:$16 sps:$4 sm:$0xff]  }
 0x3ef   :  { %3517 = vmatpush1.bf16.msra.mxu0 %v19418_v46  ;;  %v19499_v46 = vld [vmem:[#allocation4 + $0x2a8] ss:$16 sps:$4 sm:$0xff]  }
 0x3f0   :  { %3603 = vmatpush1.bf16.msra.mxu1 %v19421_v62  ;;  %3518 = vmatprep.subr.bf16.mxu0 %v19426_v63  ;;  %v19507_v62 = vld [vmem:[#allocation4 + $0x2cc] ss:$16 sps:$4 sm:$0xff]   ;;  %v19502_v63 = vld [vmem:[#allocation4 + $0x2c0] ss:$16 sps:$4 sm:$0xff]  }
 0x3f1   :  { %3604 = vmatprep.subr.bf16.mxu1 %v19429_v0  ;;  %v19510_v0 = vld [vmem:[#allocation4 + $0x2e4] ss:$16 sps:$4 sm:$0xff]  }
 0x3f3   :  { %3519 = vmatpush1.bf16.msra.mxu0 %v19424_v39  ;;  %v19505_v39 = vld [vmem:[#allocation4 + $0x2c8] ss:$16 sps:$4 sm:$0xff]  }
 0x3f4   :  { %3605 = vmatpush1.bf16.msra.mxu1 %v19427_v5  ;;  %3520 = vmatprep.subr.bf16.mxu0 %v19432_v7  ;;  %v19513_v5 = vld [vmem:[#allocation4 + $0x2ec] ss:$16 sps:$4 sm:$0xff]   ;;  %v19508_v7 = vld [vmem:[#allocation4 + $0x2e0] ss:$16 sps:$4 sm:$0xff]  }
 0x3f5   :  { %3606 = vmatprep.subr.bf16.mxu1 %v19435_v8  ;;  %v19516_v8 = vld [vmem:[#allocation4 + $0x304] ss:$16 sps:$4 sm:$0xff]  }
 0x3f7   :  { %3521 = vmatpush1.bf16.msra.mxu0 %v19430_v49  ;;  %v19511_v49 = vld [vmem:[#allocation4 + $0x2e8] ss:$16 sps:$4 sm:$0xff]  }
 0x3f8   :  { %3607 = vmatpush1.bf16.msra.mxu1 %v19433_v9  ;;  %3522 = vmatprep.subr.bf16.mxu0 %v19438_v11  ;;  %v19519_v9 = vld [vmem:[#allocation4 + $0x30c] ss:$16 sps:$4 sm:$0xff]   ;;  %v19514_v11 = vld [vmem:[#allocation4 + $0x300] ss:$16 sps:$4 sm:$0xff]  }
 0x3f9   :  { %3608 = vmatprep.subr.bf16.mxu1 %v19441_v14  ;;  %v19517_v14 = vld [vmem:[#allocation4 + $0x308] ss:$16 sps:$4 sm:$0xff]  }
 0x3fb   :  { %3523 = vmatpush1.bf16.msra.mxu0 %v19436_v15  ;;  %v19522_v15 = vld [vmem:[#allocation4 + $0x324] ss:$16 sps:$4 sm:$0xff]  }
 0x3fc   :  { %3609 = vmatpush1.bf16.msra.mxu1 %v19439_v17  ;;  %3524 = vmatprep.subr.bf16.mxu0 %v19444_v18  ;;  %v19525_v17 = vld [vmem:[#allocation4 + $0x32c] ss:$16 sps:$4 sm:$0xff]   ;;  %v19520_v18 = vld [vmem:[#allocation4 + $0x320] ss:$16 sps:$4 sm:$0xff]  }
 0x3fd   :  { %3610 = vmatprep.subr.bf16.mxu1 %v19447_v19  ;;  %v19523_v19 = vld [vmem:[#allocation4 + $0x328] ss:$16 sps:$4 sm:$0xff]  }
 0x3ff   :  { %3525 = vmatpush1.bf16.msra.mxu0 %v19442_v1  ;;  %v19528_v1 = vld [vmem:[#allocation4 + $0x344] ss:$16 sps:$4 sm:$0xff]  }
 0x400   :  { %3611 = vmatpush1.bf16.msra.mxu1 %v19445_v20  ;;  %3526 = vmatprep.subr.bf16.mxu0 %v19450_v21  ;;  %v19531_v20 = vld [vmem:[#allocation4 + $0x34c] ss:$16 sps:$4 sm:$0xff]   ;;  %v19526_v21 = vld [vmem:[#allocation4 + $0x340] ss:$16 sps:$4 sm:$0xff]  }
 0x401   :  { %3612 = vmatprep.subr.bf16.mxu1 %v19453_v60  ;;  %v19529_v60 = vld [vmem:[#allocation4 + $0x348] ss:$16 sps:$4 sm:$0xff]  }
 0x403   :  { %3527 = vmatpush1.bf16.msra.mxu0 %v19448_v24  ;;  %v19534_v24 = vld [vmem:[#allocation4 + $0x364] ss:$16 sps:$4 sm:$0xff]  }
 0x404   :  { %3613 = vmatpush1.bf16.msra.mxu1 %v19451_v29  ;;  %3528 = vmatprep.subr.bf16.mxu0 %v19456_v30  ;;  %v19537_v29 = vld [vmem:[#allocation4 + $0x36c] ss:$16 sps:$4 sm:$0xff]   ;;  %v19532_v30 = vld [vmem:[#allocation4 + $0x360] ss:$16 sps:$4 sm:$0xff]  }
 0x405   :  { %3614 = vmatprep.subr.bf16.mxu1 %v19459_v31  ;;  %v19535_v31 = vld [vmem:[#allocation4 + $0x368] ss:$16 sps:$4 sm:$0xff]  }
 0x407   :  { %3529 = vmatpush1.bf16.msra.mxu0 %v19454_v13  ;;  %v19540_v13 = vld [vmem:[#allocation4 + $0x384] ss:$16 sps:$4 sm:$0xff]  }
 0x408   :  { %3615 = vmatpush1.bf16.msra.mxu1 %v19457_v32  ;;  %3530 = vmatprep.subr.bf16.mxu0 %v19462_v35  ;;  %v19543_v32 = vld [vmem:[#allocation4 + $0x38c] ss:$16 sps:$4 sm:$0xff]   ;;  %v19538_v35 = vld [vmem:[#allocation4 + $0x380] ss:$16 sps:$4 sm:$0xff]  }
 0x409   :  { %3616 = vmatprep.subr.bf16.mxu1 %v19465_v36  ;;  %v19541_v36 = vld [vmem:[#allocation4 + $0x388] ss:$16 sps:$4 sm:$0xff]  }
 0x40b   :  { %3531 = vmatpush1.bf16.msra.mxu0 %v19460_v38  ;;  %v19546_v38 = vld [vmem:[#allocation4 + $0x3a4] ss:$16 sps:$4 sm:$0xff]  }
 0x40c   :  { %3617 = vmatpush1.bf16.msra.mxu1 %v19463_v33  ;;  %3543 = vmatprep.subr.bf16.mxu0 %v19468_v50  ;;  %v19549_v33 = vld [vmem:[#allocation4 + $0x3ac] ss:$16 sps:$4 sm:$0xff]   ;;  %v19544_v50 = vld [vmem:[#allocation4 + $0x3a0] ss:$16 sps:$4 sm:$0xff]  }
 0x40d   :  { %3629 = vmatprep.subr.bf16.mxu1 %v19471_v2  ;;  %v19547_v2 = vld [vmem:[#allocation4 + $0x3a8] ss:$16 sps:$4 sm:$0xff]  }
 0x40e   :  { %3533 = vmatmul.mubr.bf16.vlgmr.msra.gmra.mrb[8].mxu0 %v22841_v53 }
 0x40f   :  { %3619 = vmatmul.mubr.bf16.vlgmr.msra.gmra.mrb[8].mxu1 %v22841_v53  ;;  %3544 = vmatpush1.bf16.msra.mxu0 %v19466_v40  ;;  %v19492_v53 = vld [vmem:[#allocation4 + $0x284] ss:$16 sps:$4 sm:$0xff]  }
 0x410   :  { %3575 = vmatprep.mubr.bf16.mxu0 %v22867_v12  ;;  %3630 = vmatpush1.bf16.msra.mxu1 %v19469_v42  ;;  %v19552_v40 = vld [vmem:[#allocation4 + $0x3c4] ss:$16 sps:$4 sm:$0xff]   ;;  %v19555_v42 = vld [vmem:[#allocation4 + $0x3cc] ss:$16 sps:$4 sm:$0xff]  }
 0x411   :  { %3661 = vmatprep.mubr.bf16.mxu1 %v22867_v12  ;;  %3545 = vmatprep.subr.bf16.mxu0 %v19474_v37  ;;  %v19493_v12 = vld [vmem:[#allocation4 + $0x288] ss:$16 sps:$4 sm:$0xff]   ;;  %v19550_v37 = vld [vmem:[#allocation4 + $0x3c0] ss:$16 sps:$4 sm:$0xff]  }
 0x412   :  { %3631 = vmatprep.subr.bf16.mxu1 %v19477_v10  ;;  %v19553_v10 = vld [vmem:[#allocation4 + $0x3c8] ss:$16 sps:$4 sm:$0xff]  }
 0x413   :  { %3546 = vmatpush1.bf16.msra.mxu0 %v19472_v43  ;;  %v19558_v43 = vld [vmem:[#allocation4 + $0x3e4] ss:$16 sps:$4 sm:$0xff]  }
 0x414   :  { %3632 = vmatpush1.bf16.msra.mxu1 %v19475_v54  ;;  %3547 = vmatprep.subr.bf16.mxu0 %v19480_v44  ;;  %v19561_v54 = vld [vmem:[#allocation4 + $0x3ec] ss:$16 sps:$4 sm:$0xff]   ;;  %v19556_v44 = vld [vmem:[#allocation4 + $0x3e0] ss:$16 sps:$4 sm:$0xff]  }
 0x415   :  { %3633 = vmatprep.subr.bf16.mxu1 %v19483_v45  ;;  %v19559_v45 = vld [vmem:[#allocation4 + $0x3e8] ss:$16 sps:$4 sm:$0xff]  }
 0x417   :  { %3548 = vmatpush1.bf16.msra.mxu0 %v19478_v48  ;;  %v19564_v48 = vld [vmem:[#allocation7 + $0x4] ss:$16 sps:$4 sm:$0xff]  }
 0x418   :  { %3634 = vmatpush1.bf16.msra.mxu1 %v19481_v47  ;;  %3549 = vmatprep.subr.bf16.mxu0 %v19486_v22  ;;  %v19567_v47 = vld [vmem:[#allocation7 + $0xc] ss:$16 sps:$4 sm:$0xff]   ;;  %v19562_v22 = vld [vmem:[#allocation7] ss:$16 sps:$4 sm:$0xff]  }
 0x419   :  { %3635 = vmatprep.subr.bf16.mxu1 %v19489_v41  ;;  %v19565_v41 = vld [vmem:[#allocation7 + $0x8] ss:$16 sps:$4 sm:$0xff]  }
 0x41b   :  { %3550 = vmatpush1.bf16.msra.mxu0 %v19484_v59  ;;  %v19570_v59 = vld [vmem:[#allocation7 + $0x24] ss:$16 sps:$4 sm:$0xff]  }
 0x41c   :  { %3636 = vmatpush1.bf16.msra.mxu1 %v19487_v4  ;;  %3551 = vmatprep.subr.bf16.mxu0 %v19492_v53  ;;  %v19573_v4 = vld [vmem:[#allocation7 + $0x2c] ss:$16 sps:$4 sm:$0xff]   ;;  %v19568_v53 = vld [vmem:[#allocation7 + $0x20] ss:$16 sps:$4 sm:$0xff]  }
 0x41d   :  { %3637 = vmatprep.subr.bf16.mxu1 %v19495_v34  ;;  %v19571_v34 = vld [vmem:[#allocation7 + $0x28] ss:$16 sps:$4 sm:$0xff]  }
 0x41f   :  { %3552 = vmatpush1.bf16.msra.mxu0 %v19490_v51  ;;  %v19576_v51 = vld [vmem:[#allocation7 + $0x44] ss:$16 sps:$4 sm:$0xff]  }
 0x420   :  { %3638 = vmatpush1.bf16.msra.mxu1 %v19493_v12  ;;  %3553 = vmatprep.subr.bf16.mxu0 %v19498_v52  ;;  %v19579_v12 = vld [vmem:[#allocation7 + $0x4c] ss:$16 sps:$4 sm:$0xff]   ;;  %v19574_v52 = vld [vmem:[#allocation7 + $0x40] ss:$16 sps:$4 sm:$0xff]  }
 0x421   :  { %3639 = vmatprep.subr.bf16.mxu1 %v19501_v56  ;;  %v19577_v56 = vld [vmem:[#allocation7 + $0x48] ss:$16 sps:$4 sm:$0xff]  }
 0x423   :  { %3554 = vmatpush1.bf16.msra.mxu0 %v19496_v57  ;;  %v19582_v57 = vld [vmem:[#allocation7 + $0x64] ss:$16 sps:$4 sm:$0xff]  }
 0x424   :  { %3640 = vmatpush1.bf16.msra.mxu1 %v19499_v46  ;;  %3555 = vmatprep.subr.bf16.mxu0 %v19504_v61  ;;  %v19585_v46 = vld [vmem:[#allocation7 + $0x6c] ss:$16 sps:$4 sm:$0xff]   ;;  %v19580_v61 = vld [vmem:[#allocation7 + $0x60] ss:$16 sps:$4 sm:$0xff]  }
 0x425   :  { %3641 = vmatprep.subr.bf16.mxu1 %v19507_v62  ;;  %v19583_v62 = vld [vmem:[#allocation7 + $0x68] ss:$16 sps:$4 sm:$0xff]  }
 0x427   :  { %3556 = vmatpush1.bf16.msra.mxu0 %v19502_v63  ;;  %v19588_v63 = vld [vmem:[#allocation7 + $0x84] ss:$16 sps:$4 sm:$0xff]  }
 0x428   :  { %3642 = vmatpush1.bf16.msra.mxu1 %v19505_v39  ;;  %3557 = vmatprep.subr.bf16.mxu0 %v19510_v0  ;;  %v19591_v39 = vld [vmem:[#allocation7 + $0x8c] ss:$16 sps:$4 sm:$0xff]   ;;  %v19589_v0 = vld [vmem:[#allocation7 + $0x88] ss:$16 sps:$4 sm:$0xff]  }
 0x429   :  { %3643 = vmatprep.subr.bf16.mxu1 %v19513_v5  ;;  %v19594_v5 = vld [vmem:[#allocation7 + $0xa4] ss:$16 sps:$4 sm:$0xff]  }
 0x42b   :  { %3558 = vmatpush1.bf16.msra.mxu0 %v19508_v7  ;;  %v19597_v7 = vld [vmem:[#allocation7 + $0xac] ss:$16 sps:$4 sm:$0xff]  }
 0x42c   :  { %3644 = vmatpush1.bf16.msra.mxu1 %v19511_v49  ;;  %3559 = vmatprep.subr.bf16.mxu0 %v19516_v8  ;;  %v19592_v49 = vld [vmem:[#allocation7 + $0xa0] ss:$16 sps:$4 sm:$0xff]   ;;  %v19595_v8 = vld [vmem:[#allocation7 + $0xa8] ss:$16 sps:$4 sm:$0xff]  }
 0x42d   :  { %3645 = vmatprep.subr.bf16.mxu1 %v19519_v9  ;;  %v19600_v9 = vld [vmem:[#allocation7 + $0xc4] ss:$16 sps:$4 sm:$0xff]  }
 0x42f   :  { %3560 = vmatpush1.bf16.msra.mxu0 %v19514_v11  ;;  %v19603_v11 = vld [vmem:[#allocation7 + $0xcc] ss:$16 sps:$4 sm:$0xff]  }
 0x430   :  { %3646 = vmatpush1.bf16.msra.mxu1 %v19517_v14  ;;  %3561 = vmatprep.subr.bf16.mxu0 %v19522_v15  ;;  %v19598_v14 = vld [vmem:[#allocation7 + $0xc0] ss:$16 sps:$4 sm:$0xff]   ;;  %v19601_v15 = vld [vmem:[#allocation7 + $0xc8] ss:$16 sps:$4 sm:$0xff]  }
 0x431   :  { %3647 = vmatprep.subr.bf16.mxu1 %v19525_v17  ;;  %v19606_v17 = vld [vmem:[#allocation7 + $0xe4] ss:$16 sps:$4 sm:$0xff]  }
 0x433   :  { %3562 = vmatpush1.bf16.msra.mxu0 %v19520_v18  ;;  %v19609_v18 = vld [vmem:[#allocation7 + $0xec] ss:$16 sps:$4 sm:$0xff]  }
 0x434   :  { %3648 = vmatpush1.bf16.msra.mxu1 %v19523_v19  ;;  %3563 = vmatprep.subr.bf16.mxu0 %v19528_v1  ;;  %v19604_v19 = vld [vmem:[#allocation7 + $0xe0] ss:$16 sps:$4 sm:$0xff]   ;;  %v19607_v1 = vld [vmem:[#allocation7 + $0xe8] ss:$16 sps:$4 sm:$0xff]  }
 0x435   :  { %3649 = vmatprep.subr.bf16.mxu1 %v19531_v20  ;;  %v19612_v20 = vld [vmem:[#allocation7 + $0x104] ss:$16 sps:$4 sm:$0xff]  }
 0x437   :  { %3564 = vmatpush1.bf16.msra.mxu0 %v19526_v21  ;;  %v19615_v21 = vld [vmem:[#allocation7 + $0x10c] ss:$16 sps:$4 sm:$0xff]  }
 0x438   :  { %3650 = vmatpush1.bf16.msra.mxu1 %v19529_v60  ;;  %3565 = vmatprep.subr.bf16.mxu0 %v19534_v24  ;;  %v19610_v60 = vld [vmem:[#allocation7 + $0x100] ss:$16 sps:$4 sm:$0xff]   ;;  %v19613_v24 = vld [vmem:[#allocation7 + $0x108] ss:$16 sps:$4 sm:$0xff]  }
 0x439   :  { %3651 = vmatprep.subr.bf16.mxu1 %v19537_v29  ;;  %v19618_v29 = vld [vmem:[#allocation7 + $0x124] ss:$16 sps:$4 sm:$0xff]  }
 0x43b   :  { %3566 = vmatpush1.bf16.msra.mxu0 %v19532_v30  ;;  %v19621_v30 = vld [vmem:[#allocation7 + $0x12c] ss:$16 sps:$4 sm:$0xff]  }
 0x43c   :  { %3652 = vmatpush1.bf16.msra.mxu1 %v19535_v31  ;;  %3567 = vmatprep.subr.bf16.mxu0 %v19540_v13  ;;  %v19616_v31 = vld [vmem:[#allocation7 + $0x120] ss:$16 sps:$4 sm:$0xff]   ;;  %v19619_v13 = vld [vmem:[#allocation7 + $0x128] ss:$16 sps:$4 sm:$0xff]  }
 0x43d   :  { %3653 = vmatprep.subr.bf16.mxu1 %v19543_v32  ;;  %v19624_v32 = vld [vmem:[#allocation7 + $0x144] ss:$16 sps:$4 sm:$0xff]  }
 0x43f   :  { %3568 = vmatpush1.bf16.msra.mxu0 %v19538_v35  ;;  %v19627_v35 = vld [vmem:[#allocation7 + $0x14c] ss:$16 sps:$4 sm:$0xff]  }
 0x440   :  { %3654 = vmatpush1.bf16.msra.mxu1 %v19541_v36  ;;  %3569 = vmatprep.subr.bf16.mxu0 %v19546_v38  ;;  %v19622_v36 = vld [vmem:[#allocation7 + $0x140] ss:$16 sps:$4 sm:$0xff]   ;;  %v19625_v38 = vld [vmem:[#allocation7 + $0x148] ss:$16 sps:$4 sm:$0xff]  }
 0x441   :  { %3655 = vmatprep.subr.bf16.mxu1 %v19549_v33  ;;  %v19630_v33 = vld [vmem:[#allocation7 + $0x164] ss:$16 sps:$4 sm:$0xff]  }
 0x443   :  { %3570 = vmatpush1.bf16.msra.mxu0 %v19544_v50  ;;  %v19633_v50 = vld [vmem:[#allocation7 + $0x16c] ss:$16 sps:$4 sm:$0xff]  }
 0x444   :  { %3656 = vmatpush1.bf16.msra.mxu1 %v19547_v2  ;;  %3571 = vmatprep.subr.bf16.mxu0 %v19552_v40  ;;  %v19628_v2 = vld [vmem:[#allocation7 + $0x160] ss:$16 sps:$4 sm:$0xff]   ;;  %v19631_v40 = vld [vmem:[#allocation7 + $0x168] ss:$16 sps:$4 sm:$0xff]  }
 0x445   :  { %3657 = vmatprep.subr.bf16.mxu1 %v19555_v42  ;;  %v19636_v42 = vld [vmem:[#allocation7 + $0x184] ss:$16 sps:$4 sm:$0xff]  }
 0x447   :  { %3572 = vmatpush1.bf16.msra.mxu0 %v19550_v37  ;;  %v19639_v37 = vld [vmem:[#allocation7 + $0x18c] ss:$16 sps:$4 sm:$0xff]  }
 0x448   :  { %3658 = vmatpush1.bf16.msra.mxu1 %v19553_v10  ;;  %3573 = vmatprep.subr.bf16.mxu0 %v19558_v43  ;;  %v19634_v10 = vld [vmem:[#allocation7 + $0x180] ss:$16 sps:$4 sm:$0xff]   ;;  %v19637_v43 = vld [vmem:[#allocation7 + $0x188] ss:$16 sps:$4 sm:$0xff]  }
 0x449   :  { %3659 = vmatprep.subr.bf16.mxu1 %v19561_v54  ;;  %v19642_v54 = vld [vmem:[#allocation7 + $0x1a4] ss:$16 sps:$4 sm:$0xff]  }
 0x44b   :  { %3574 = vmatpush1.bf16.msra.mxu0 %v19556_v44  ;;  %v19645_v44 = vld [vmem:[#allocation7 + $0x1ac] ss:$16 sps:$4 sm:$0xff]  }
 0x44c   :  { %3660 = vmatpush1.bf16.msra.mxu1 %v19559_v45  ;;  %4536 = vmatprep.subr.bf16.mxu0 %v19564_v48  ;;  %v19640_v45 = vld [vmem:[#allocation7 + $0x1a0] ss:$16 sps:$4 sm:$0xff]   ;;  %v19643_v48 = vld [vmem:[#allocation7 + $0x1a8] ss:$16 sps:$4 sm:$0xff]  }
 0x44d   :  { %4622 = vmatprep.subr.bf16.mxu1 %v19567_v47  ;;  %v19648_v47 = vld [vmem:[#allocation7 + $0x1c4] ss:$16 sps:$4 sm:$0xff]  }
 0x44e   :  { %3576 = vmatmul.mubr.bf16.vlgmr.msra.gmra.mrb[8].mxu0 %v22869_v23 }
 0x44f   :  { %3662 = vmatmul.mubr.bf16.vlgmr.msra.gmra.mrb[8].mxu1 %v22869_v23  ;;  %4537 = vmatpush1.bf16.msra.mxu0 %v19562_v22  ;;  %v19586_v23 = vld [vmem:[#allocation7 + $0x80] ss:$16 sps:$4 sm:$0xff]   ;;  %v19651_v22 = vld [vmem:[#allocation7 + $0x1cc] ss:$16 sps:$4 sm:$0xff]  }
 0x450   :  { %4623 = vmatpush1.bf16.msra.mxu1 %v19565_v41  ;;  %4538 = vmatprep.subr.bf16.mxu0 %v19570_v59  ;;  %v19646_v41 = vld [vmem:[#allocation7 + $0x1c0] ss:$16 sps:$4 sm:$0xff]   ;;  %v19649_v59 = vld [vmem:[#allocation7 + $0x1c8] ss:$16 sps:$4 sm:$0xff]  }
 0x451   :  { %4624 = vmatprep.subr.bf16.mxu1 %v19573_v4  ;;  %v19652_v4 = vld [vmem:[#allocation7 + $0x1e0] ss:$16 sps:$4 sm:$0xff]  }
 0x453   :  { %4539 = vmatpush1.bf16.msra.mxu0 %v19568_v53  ;;  %v19654_v53 = vld [vmem:[#allocation7 + $0x1e4] ss:$16 sps:$4 sm:$0xff]  }
 0x454   :  { %4625 = vmatpush1.bf16.msra.mxu1 %v19571_v34  ;;  %4540 = vmatprep.subr.bf16.mxu0 %v19576_v51  ;;  %v19655_v34 = vld [vmem:[#allocation7 + $0x1e8] ss:$16 sps:$4 sm:$0xff]   ;;  %v19657_v51 = vld [vmem:[#allocation7 + $0x1ec] ss:$16 sps:$4 sm:$0xff]  }
 0x455   :  { %4626 = vmatprep.subr.bf16.mxu1 %v19579_v12  ;;  %v19660_v12 = vld [vmem:[#allocation7 + $0x204] ss:$16 sps:$4 sm:$0xff]  }
 0x457   :  { %4541 = vmatpush1.bf16.msra.mxu0 %v19574_v52  ;;  %v19663_v52 = vld [vmem:[#allocation7 + $0x20c] ss:$16 sps:$4 sm:$0xff]  }
 0x458   :  { %4627 = vmatpush1.bf16.msra.mxu1 %v19577_v56  ;;  %4542 = vmatprep.subr.bf16.mxu0 %v19582_v57  ;;  %v3672_v56 = vld [vmem:[%s23611_s15] sm:$0xf] }
 0x459   :  { %4628 = vmatprep.subr.bf16.mxu1 %v19585_v46  ;;  %v3677_v57 = vrot.slane %v3672_v56, %v22680_v25  ;;  %v3685_v46 = vrot.slane %v3672_v56, %v22686_v27 }
 0x45b   :  { %4543 = vmatpush1.bf16.msra.mxu0 %v19580_v61  ;;  %v3681_v61 = vrot.slane %v3672_v56, %v22683_v26 }
 0x45c   :  { %4629 = vmatpush1.bf16.msra.mxu1 %v19583_v62  ;;  %4544 = vmatprep.subr.bf16.mxu0 %v19588_v63  ;;  %v3689_v62 = vrot.slane %v3672_v56, %v22689_v28  ;;  %v19661_v56 = vld [vmem:[#allocation7 + $0x208] ss:$16 sps:$4 sm:$0xff]  }
 0x45d   :  { %4630 = vmatprep.subr.bf16.mxu1 %v19591_v39 }
 0x45f   :  { %4545 = vmatpush1.bf16.msra.mxu0 %v19586_v23 }
 0x460   :  { %4631 = vmatpush1.bf16.msra.mxu1 %v19589_v0  ;;  %4546 = vmatprep.subr.bf16.mxu0 %v19594_v5 }
 0x461   :  { %4632 = vmatprep.subr.bf16.mxu1 %v19597_v7 }
 0x463   :  { %4547 = vmatpush1.bf16.msra.mxu0 %v19592_v49 }
 0x464   :  { %4633 = vmatpush1.bf16.msra.mxu1 %v19595_v8  ;;  %4548 = vmatprep.subr.bf16.mxu0 %v19600_v9 }
 0x465   :  { %4634 = vmatprep.subr.bf16.mxu1 %v19603_v11 }
 0x467   :  { %4549 = vmatpush1.bf16.msra.mxu0 %v19598_v14 }
 0x468   :  { %4635 = vmatpush1.bf16.msra.mxu1 %v19601_v15  ;;  %4550 = vmatprep.subr.bf16.mxu0 %v19606_v17 }
 0x469   :  { %4636 = vmatprep.subr.bf16.mxu1 %v19609_v18 }
 0x46b   :  { %4551 = vmatpush1.bf16.msra.mxu0 %v19604_v19 }
 0x46c   :  { %4637 = vmatpush1.bf16.msra.mxu1 %v19607_v1  ;;  %4552 = vmatprep.subr.bf16.mxu0 %v19612_v20 }
 0x46d   :  { %4638 = vmatprep.subr.bf16.mxu1 %v19615_v21 }
 0x46f   :  { %4553 = vmatpush1.bf16.msra.mxu0 %v19610_v60 }
 0x470   :  { %4639 = vmatpush1.bf16.msra.mxu1 %v19613_v24  ;;  %4554 = vmatprep.subr.bf16.mxu0 %v19618_v29 }
 0x471   :  { %4640 = vmatprep.subr.bf16.mxu1 %v19621_v30 }
 0x473   :  { %4555 = vmatpush1.bf16.msra.mxu0 %v19616_v31 }
 0x474   :  { %4641 = vmatpush1.bf16.msra.mxu1 %v19619_v13  ;;  %4556 = vmatprep.subr.bf16.mxu0 %v19624_v32 }
 0x475   :  { %4642 = vmatprep.subr.bf16.mxu1 %v19627_v35 }
 0x477   :  { %4557 = vmatpush1.bf16.msra.mxu0 %v19622_v36 }
 0x478   :  { %4643 = vmatpush1.bf16.msra.mxu1 %v19625_v38  ;;  %4558 = vmatprep.subr.bf16.mxu0 %v19630_v33 }
 0x479   :  { %4644 = vmatprep.subr.bf16.mxu1 %v19633_v50 }
 0x47b   :  { %4559 = vmatpush1.bf16.msra.mxu0 %v19628_v2 }
 0x47c   :  { %4645 = vmatpush1.bf16.msra.mxu1 %v19631_v40  ;;  %4560 = vmatprep.subr.bf16.mxu0 %v19636_v42 }
 0x47d   :  { %4646 = vmatprep.subr.bf16.mxu1 %v19639_v37 }
 0x47f   :  { %4561 = vmatpush1.bf16.msra.mxu0 %v19634_v10 }
 0x480   :  { %4647 = vmatpush1.bf16.msra.mxu1 %v19637_v43  ;;  %4562 = vmatprep.subr.bf16.mxu0 %v19642_v54 }
 0x481   :  { %4648 = vmatprep.subr.bf16.mxu1 %v19645_v44 }
 0x483   :  { %4563 = vmatpush1.bf16.msra.mxu0 %v19640_v45 }
 0x484   :  { %4649 = vmatpush1.bf16.msra.mxu1 %v19643_v48  ;;  %4564 = vmatprep.subr.bf16.mxu0 %v19648_v47 }
 0x485   :  { %4650 = vmatprep.subr.bf16.mxu1 %v19651_v22 }
 0x487   :  { %4565 = vmatpush1.bf16.msra.mxu0 %v19646_v41 }
 0x488   :  { %4651 = vmatpush1.bf16.msra.mxu1 %v19649_v59  ;;  %4566 = vmatprep.subr.bf16.mxu0 %v19654_v53 }
 0x489   :  { %4652 = vmatprep.subr.bf16.mxu1 %v19657_v51 }
 0x48b   :  { %4567 = vmatpush1.bf16.msra.mxu0 %v19652_v4 }
 0x48c   :  { %4653 = vmatpush1.bf16.msra.mxu1 %v19655_v34  ;;  %4579 = vmatprep.subr.bf16.mxu0 %v19660_v12 }
 0x48d   :  { %4665 = vmatprep.subr.bf16.mxu1 %v19663_v52  ;;  %v19658_v52 = vld [vmem:[#allocation7 + $0x200] ss:$16 sps:$4 sm:$0xff]  }
 0x521   :  { %v3577_v63 = vpop.f32.mrb[8].mxu0 }
 0x522   :  { %v3694_v39 = vadd.f32 %v3677_v57, %v3577_v63  ;;  %v3663_v23 = vpop.f32.mrb[8].mxu1  ;;  %v3579_v0 = vpop.f32.mrb[9].mxu0  ;;  %v19669_v63 = vld [vmem:[#allocation7 + $0x22c] ss:$16 sps:$4 sm:$0xff]  }
 0x523   :  { %v3696_v5 = vadd.f32 %v3685_v46, %v3663_v23  ;;  %v3695_v7 = vadd.f32 %v3681_v61, %v3579_v0  ;;  %v3665_v49 = vpop.f32.mrb[9].mxu1  ;;  %v3581_v8 = vpop.f32.mrb[10].mxu0  ;;  %v19667_v23 = vld [vmem:[#allocation7 + $0x228] ss:$16 sps:$4 sm:$0xff]   ;;  %v19672_v0 = vld [vmem:[#allocation7 + $0x244] ss:$16 sps:$4 sm:$0xff]  }
 0x524   :  { %v3710_v9 = vmul.f32 1.442695, %v3694_v39  ;;  %v3697_v11 = vadd.f32 %v3689_v62, %v3665_v49  ;;  %v3698_v14 = vadd.f32 %v3677_v57, %v3581_v8  ;;  %v3667_v15 = vpop.f32.mrb[10].mxu1  ;;  %v3583_v17 = vpop.f32.mrb[11].mxu0  ;;  %vm3702_vm4 = vcmp.gt.f32.partialorder %v3694_v39, 0.0 }
 0x525   :  { %v3714_v18 = vmul.f32 1.442695, %v3696_v5  ;;  %v3712_v19 = vmul.f32 1.442695, %v3695_v7  ;;  %v3669_v20 = vpop.f32.mrb[11].mxu1  ;;  %v3700_v60 = vadd.f32 %v3685_v46, %v3667_v15  ;;  %v3699_v24 = vadd.f32 %v3681_v61, %v3583_v17 }
 0x526   :  { %21783 = vpow2.f32 %v3710_v9  ;;  %v3716_v1 = vmul.f32 1.442695, %v3697_v11  ;;  %v3718_v21 = vmul.f32 1.442695, %v3698_v14  ;;  %v3701_v29 = vadd.f32 %v3689_v62, %v3669_v20  ;;  %v19666_v62 = vld [vmem:[#allocation7 + $0x224] ss:$16 sps:$4 sm:$0xff]  }
 0x527   :  { %21785 = vpow2.f32 %v3714_v18  ;;  %v3722_v30 = vmul.f32 1.442695, %v3700_v60  ;;  %v3720_v31 = vmul.f32 1.442695, %v3699_v24  ;;  %vm3704_vm5 = vcmp.gt.f32.partialorder %v3696_v5, 0.0 }
 0x528   :  { %21787 = vpow2.f32 %v3712_v19  ;;  %v3724_v13 = vmul.f32 1.442695, %v3701_v29  ;;  %vm3703_vm6 = vcmp.gt.f32.partialorder %v3695_v7, 0.0  ;;  %vm3705_vm7 = vcmp.gt.f32.partialorder %v3697_v11, 0.0  ;;  %v19673_v49 = vld [vmem:[#allocation7 + $0x248] ss:$16 sps:$4 sm:$0xff]  }
 0x529   :  { %21789 = vpow2.f32 %v3716_v1  ;;  %vm3706_vm8 = vcmp.gt.f32.partialorder %v3698_v14, 0.0  ;;  %vm3708_vm9 = vcmp.gt.f32.partialorder %v3700_v60, 0.0  ;;  %vm3707_vm11 = vcmp.gt.f32.partialorder %v3699_v24, 0.0  ;;  %v19678_v8 = vld [vmem:[#allocation7 + $0x264] ss:$16 sps:$4 sm:$0xff]  }
 0x52a   :  { %21791 = vpow2.f32 %v3718_v21  ;;  %vm3709_vm1 = vcmp.gt.f32.partialorder %v3701_v29, 0.0  ;;  %v19681_v9 = vld [vmem:[#allocation7 + $0x26c] ss:$16 sps:$4 sm:$0xff]   ;;  %v19684_v15 = vld [vmem:[#allocation7 + $0x284] ss:$16 sps:$4 sm:$0xff]  }
 0x52b   :  { %21793 = vpow2.f32 %v3722_v30  ;;  %v19687_v17 = vld [vmem:[#allocation7 + $0x28c] ss:$16 sps:$4 sm:$0xff]   ;;  %v19682_v18 = vld [vmem:[#allocation7 + $0x280] ss:$16 sps:$4 sm:$0xff]   ;;  %v19685_v19 = vld [vmem:[#allocation7 + $0x288] ss:$16 sps:$4 sm:$0xff]  }
 0x52c   :  { %21795 = vpow2.f32 %v3720_v31  ;;  %v19690_v1 = vld [vmem:[#allocation7 + $0x2a4] ss:$16 sps:$4 sm:$0xff]   ;;  %v19693_v20 = vld [vmem:[#allocation7 + $0x2ac] ss:$16 sps:$4 sm:$0xff]   ;;  %v19688_v21 = vld [vmem:[#allocation7 + $0x2a0] ss:$16 sps:$4 sm:$0xff]  }
 0x52d   :  { %21797 = vpow2.f32 %v3724_v13  ;;  %v19694_v30 = vld [vmem:[#allocation7 + $0x2c0] ss:$16 sps:$4 sm:$0xff]   ;;  %v19697_v31 = vld [vmem:[#allocation7 + $0x2c8] ss:$16 sps:$4 sm:$0xff]   ;;  %v19702_v13 = vld [vmem:[#allocation7 + $0x2e4] ss:$16 sps:$4 sm:$0xff]  }
 0x530   :  { %v21784_v32 = vpop.eup %21783 }
 0x531   :  { %v21786_v35 = vpop.eup %21785  ;;  %v17063_v33 = vadd.f32 -1.0, %v21784_v32  ;;  %v19705_v32 = vld [vmem:[#allocation7 + $0x2ec] ss:$16 sps:$4 sm:$0xff]  }
 0x532   :  { %v21788_v36 = vpop.eup %21787  ;;  %v17065_v2 = vadd.f32 -1.0, %v21786_v35  ;;  %v19700_v35 = vld [vmem:[#allocation7 + $0x2e0] ss:$16 sps:$4 sm:$0xff]  }
 0x533   :  { %v21790_v38 = vpop.eup %21789  ;;  %v17064_v42 = vadd.f32 -1.0, %v21788_v36  ;;  %v3734_v45 = vsel %vm3702_vm4, %v3694_v39, %v17063_v33  ;;  %v19664_v39 = vld [vmem:[#allocation7 + $0x220] ss:$16 sps:$4 sm:$0xff]   ;;  %v19703_v36 = vld [vmem:[#allocation7 + $0x2e8] ss:$16 sps:$4 sm:$0xff]  }
 0x534   :  { %v21792_v50 = vpop.eup %21791  ;;  %v17066_v43 = vadd.f32 -1.0, %v21790_v38  ;;  %v3736_v22 = vsel %vm3704_vm5, %v3696_v5, %v17065_v2  ;;  %v19675_v5 = vld [vmem:[#allocation7 + $0x24c] ss:$16 sps:$4 sm:$0xff]   ;;  %v19708_v38 = vld [vmem:[#allocation7 + $0x304] ss:$16 sps:$4 sm:$0xff]  }
 0x535   :  { %v21794_v40 = vpop.eup %21793  ;;  %v17067_v37 = vadd.f32 -1.0, %v21792_v50  ;;  %v3735_v34 = vsel %vm3703_vm6, %v3695_v7, %v17064_v42  ;;  %v19670_v7 = vld [vmem:[#allocation7 + $0x240] ss:$16 sps:$4 sm:$0xff]   ;;  %v19711_v33 = vld [vmem:[#allocation7 + $0x30c] ss:$16 sps:$4 sm:$0xff]  }
 0x536   :  { %v21796_v10 = vpop.eup %21795  ;;  %v17069_v54 = vadd.f32 -1.0, %v21794_v40  ;;  %v3737_v57 = vsel %vm3705_vm7, %v3697_v11, %v17066_v43  ;;  %v19676_v11 = vld [vmem:[#allocation7 + $0x260] ss:$16 sps:$4 sm:$0xff]   ;;  %v19709_v2 = vld [vmem:[#allocation7 + $0x308] ss:$16 sps:$4 sm:$0xff]  }
 0x537   :  { %v21798_v44 = vpop.eup %21797  ;;  %v3738_v48 = vsel %vm3706_vm8, %v3698_v14, %v17067_v37  ;;  %v17068_v47 = vadd.f32 -1.0, %v21796_v10  ;;  %v19679_v14 = vld [vmem:[#allocation7 + $0x268] ss:$16 sps:$4 sm:$0xff]   ;;  %v19706_v50 = vld [vmem:[#allocation7 + $0x300] ss:$16 sps:$4 sm:$0xff]  }
 0x538   :  { %v3742_v41 = vpack.c.bf16 %v3738_v48, %v3734_v45  ;;  %v3740_v59 = vsel %vm3708_vm9, %v3700_v60, %v17069_v54  ;;  %v17070_v4 = vadd.f32 -1.0, %v21798_v44  ;;  %v19691_v60 = vld [vmem:[#allocation7 + $0x2a8] ss:$16 sps:$4 sm:$0xff]   ;;  %v19714_v40 = vld [vmem:[#allocation7 + $0x324] ss:$16 sps:$4 sm:$0xff]  }
 0x539   :  { %v22887_v53 = vpack.c.bf16 %v3740_v59, %v3736_v22  ;;  %v3739_v51 = vsel %vm3707_vm11, %v3699_v24, %v17068_v47  ;;  %v19696_v24 = vld [vmem:[#allocation7 + $0x2c4] ss:$16 sps:$4 sm:$0xff]   ;;  %v19717_v42 = vld [vmem:[#allocation7 + $0x32c] ss:$16 sps:$4 sm:$0xff]   ;;  %v19712_v37 = vld [vmem:[#allocation7 + $0x320] ss:$16 sps:$4 sm:$0xff]  }
 0x53a   :  { %v3743_v12 = vpack.c.bf16 %v3739_v51, %v3735_v34  ;;  %v3741_v46 = vsel %vm3709_vm1, %v3701_v29, %v17070_v4  ;;  %v19699_v29 = vld [vmem:[#allocation7 + $0x2cc] ss:$16 sps:$4 sm:$0xff]   ;;  %v19715_v10 = vld [vmem:[#allocation7 + $0x328] ss:$16 sps:$4 sm:$0xff]   ;;  %v19720_v43 = vld [vmem:[#allocation7 + $0x344] ss:$16 sps:$4 sm:$0xff]  }
 0x53b   :  { %v3745_v61 = vpack.c.bf16 %v3741_v46, %v3737_v57  ;;  %v19723_v54 = vld [vmem:[#allocation7 + $0x34c] ss:$16 sps:$4 sm:$0xff]   ;;  %v19718_v44 = vld [vmem:[#allocation7 + $0x340] ss:$16 sps:$4 sm:$0xff]   ;;  %v19721_v45 = vld [vmem:[#allocation7 + $0x348] ss:$16 sps:$4 sm:$0xff]  }
 0x53c   :  { %4568 = vmatprep.mubr.bf16.mxu0 %v3743_v12  ;;  %4654 = vmatprep.mubr.bf16.mxu1 %v3743_v12  ;;  %v19726_v48 = vld [vmem:[#allocation7 + $0x364] ss:$16 sps:$4 sm:$0xff]   ;;  %v19729_v47 = vld [vmem:[#allocation7 + $0x36c] ss:$16 sps:$4 sm:$0xff]   ;;  %v19724_v22 = vld [vmem:[#allocation7 + $0x360] ss:$16 sps:$4 sm:$0xff]  }
 0x53d   :  { %4569 = vmatmul.mubr.bf16.vlgmr.msra.gmra.mrb[12].mxu0 %v3742_v41  ;;  %4655 = vmatmul.mubr.bf16.vlgmr.msra.gmra.mrb[12].mxu1 %v3742_v41  ;;  %v19727_v41 = vld [vmem:[#allocation7 + $0x368] ss:$16 sps:$4 sm:$0xff]   ;;  %v19732_v59 = vld [vmem:[#allocation7 + $0x384] ss:$16 sps:$4 sm:$0xff]   ;;  %v19735_v4 = vld [vmem:[#allocation7 + $0x38c] ss:$16 sps:$4 sm:$0xff]  }
 0x53e   :  { %4580 = vmatpush1.bf16.msra.mxu0 %v19658_v52  ;;  %4666 = vmatpush1.bf16.msra.mxu1 %v19661_v56  ;;  %v19730_v34 = vld [vmem:[#allocation7 + $0x380] ss:$16 sps:$4 sm:$0xff]   ;;  %v19733_v51 = vld [vmem:[#allocation7 + $0x388] ss:$16 sps:$4 sm:$0xff]   ;;  %v19738_v12 = vld [vmem:[#allocation7 + $0x3a4] ss:$16 sps:$4 sm:$0xff]  }
 0x53f   :  { %4611 = vmatprep.mubr.bf16.mxu0 %v3745_v61  ;;  %4697 = vmatprep.mubr.bf16.mxu1 %v3745_v61  ;;  %v19741_v52 = vld [vmem:[#allocation7 + $0x3ac] ss:$16 sps:$4 sm:$0xff]   ;;  %v19736_v56 = vld [vmem:[#allocation7 + $0x3a0] ss:$16 sps:$4 sm:$0xff]   ;;  %v19739_v57 = vld [vmem:[#allocation7 + $0x3a8] ss:$16 sps:$4 sm:$0xff]  }
 0x540   :  { %4581 = vmatprep.subr.bf16.mxu0 %v19666_v62  ;;  %4667 = vmatprep.subr.bf16.mxu1 %v19669_v63  ;;  %v19744_v46 = vld [vmem:[#allocation7 + $0x3c4] ss:$16 sps:$4 sm:$0xff]   ;;  %v19747_v61 = vld [vmem:[#allocation7 + $0x3cc] ss:$16 sps:$4 sm:$0xff]   ;;  %v19742_v62 = vld [vmem:[#allocation7 + $0x3c0] ss:$16 sps:$4 sm:$0xff]  }
 0x541   :  { %v19745_v63 = vld [vmem:[#allocation7 + $0x3c8] ss:$16 sps:$4 sm:$0xff]  }
 0x542   :  { %4582 = vmatpush1.bf16.msra.mxu0 %v19664_v39  ;;  %4668 = vmatpush1.bf16.msra.mxu1 %v19667_v23  ;;  %v19750_v39 = vld [vmem:[#allocation7 + $0x3e4] ss:$16 sps:$4 sm:$0xff]   ;;  %v19753_v23 = vld [vmem:[#allocation7 + $0x3ec] ss:$16 sps:$4 sm:$0xff]  }
 0x543   :  { %4583 = vmatprep.subr.bf16.mxu0 %v19672_v0  ;;  %4669 = vmatprep.subr.bf16.mxu1 %v19675_v5  ;;  %v19748_v0 = vld [vmem:[#allocation7 + $0x3e0] ss:$16 sps:$4 sm:$0xff]   ;;  %v19751_v5 = vld [vmem:[#allocation7 + $0x3e8] ss:$16 sps:$4 sm:$0xff]  }
 0x546   :  { %4584 = vmatpush1.bf16.msra.mxu0 %v19670_v7  ;;  %4670 = vmatpush1.bf16.msra.mxu1 %v19673_v49  ;;  %v19756_v7 = vld [vmem:[#allocation9 + $0x4] ss:$16 sps:$4 sm:$0xff]   ;;  %v19759_v49 = vld [vmem:[#allocation9 + $0xc] ss:$16 sps:$4 sm:$0xff]  }
 0x547   :  { %4585 = vmatprep.subr.bf16.mxu0 %v19678_v8  ;;  %4671 = vmatprep.subr.bf16.mxu1 %v19681_v9  ;;  %v19754_v8 = vld [vmem:[#allocation9] ss:$16 sps:$4 sm:$0xff]   ;;  %v19757_v9 = vld [vmem:[#allocation9 + $0x8] ss:$16 sps:$4 sm:$0xff]  }
 0x54a   :  { %4586 = vmatpush1.bf16.msra.mxu0 %v19676_v11  ;;  %4672 = vmatpush1.bf16.msra.mxu1 %v19679_v14  ;;  %v19762_v11 = vld [vmem:[#allocation9 + $0x24] ss:$16 sps:$4 sm:$0xff]   ;;  %v19765_v14 = vld [vmem:[#allocation9 + $0x2c] ss:$16 sps:$4 sm:$0xff]  }
 0x54b   :  { %4587 = vmatprep.subr.bf16.mxu0 %v19684_v15  ;;  %4673 = vmatprep.subr.bf16.mxu1 %v19687_v17  ;;  %v19760_v15 = vld [vmem:[#allocation9 + $0x20] ss:$16 sps:$4 sm:$0xff]   ;;  %v19763_v17 = vld [vmem:[#allocation9 + $0x28] ss:$16 sps:$4 sm:$0xff]  }
 0x54e   :  { %4588 = vmatpush1.bf16.msra.mxu0 %v19682_v18  ;;  %4674 = vmatpush1.bf16.msra.mxu1 %v19685_v19  ;;  %v19768_v18 = vld [vmem:[#allocation9 + $0x44] ss:$16 sps:$4 sm:$0xff]   ;;  %v19771_v19 = vld [vmem:[#allocation9 + $0x4c] ss:$16 sps:$4 sm:$0xff]  }
 0x54f   :  { %4589 = vmatprep.subr.bf16.mxu0 %v19690_v1  ;;  %4675 = vmatprep.subr.bf16.mxu1 %v19693_v20  ;;  %v19766_v1 = vld [vmem:[#allocation9 + $0x40] ss:$16 sps:$4 sm:$0xff]   ;;  %v19774_v20 = vld [vmem:[#allocation9 + $0x64] ss:$16 sps:$4 sm:$0xff]  }
 0x552   :  { %4590 = vmatpush1.bf16.msra.mxu0 %v19688_v21  ;;  %4676 = vmatpush1.bf16.msra.mxu1 %v19691_v60  ;;  %v19777_v21 = vld [vmem:[#allocation9 + $0x6c] ss:$16 sps:$4 sm:$0xff]   ;;  %v19772_v60 = vld [vmem:[#allocation9 + $0x60] ss:$16 sps:$4 sm:$0xff]  }
 0x553   :  { %4591 = vmatprep.subr.bf16.mxu0 %v19696_v24  ;;  %4677 = vmatprep.subr.bf16.mxu1 %v19699_v29  ;;  %v19775_v24 = vld [vmem:[#allocation9 + $0x68] ss:$16 sps:$4 sm:$0xff]   ;;  %v19780_v29 = vld [vmem:[#allocation9 + $0x84] ss:$16 sps:$4 sm:$0xff]  }
 0x556   :  { %4592 = vmatpush1.bf16.msra.mxu0 %v19694_v30  ;;  %4678 = vmatpush1.bf16.msra.mxu1 %v19697_v31  ;;  %v19783_v30 = vld [vmem:[#allocation9 + $0x8c] ss:$16 sps:$4 sm:$0xff]   ;;  %v19778_v31 = vld [vmem:[#allocation9 + $0x80] ss:$16 sps:$4 sm:$0xff]  }
 0x557   :  { %4593 = vmatprep.subr.bf16.mxu0 %v19702_v13  ;;  %4679 = vmatprep.subr.bf16.mxu1 %v19705_v32  ;;  %v19781_v13 = vld [vmem:[#allocation9 + $0x88] ss:$16 sps:$4 sm:$0xff]   ;;  %v19786_v32 = vld [vmem:[#allocation9 + $0xa4] ss:$16 sps:$4 sm:$0xff]  }
 0x55a   :  { %4594 = vmatpush1.bf16.msra.mxu0 %v19700_v35  ;;  %4680 = vmatpush1.bf16.msra.mxu1 %v19703_v36  ;;  %v19789_v35 = vld [vmem:[#allocation9 + $0xac] ss:$16 sps:$4 sm:$0xff]   ;;  %v19784_v36 = vld [vmem:[#allocation9 + $0xa0] ss:$16 sps:$4 sm:$0xff]  }
 0x55b   :  { %4595 = vmatprep.subr.bf16.mxu0 %v19708_v38  ;;  %4681 = vmatprep.subr.bf16.mxu1 %v19711_v33  ;;  %v19787_v38 = vld [vmem:[#allocation9 + $0xa8] ss:$16 sps:$4 sm:$0xff]   ;;  %v19792_v33 = vld [vmem:[#allocation9 + $0xc4] ss:$16 sps:$4 sm:$0xff]  }
 0x55e   :  { %4596 = vmatpush1.bf16.msra.mxu0 %v19706_v50  ;;  %4682 = vmatpush1.bf16.msra.mxu1 %v19709_v2  ;;  %v19795_v50 = vld [vmem:[#allocation9 + $0xcc] ss:$16 sps:$4 sm:$0xff]   ;;  %v19790_v2 = vld [vmem:[#allocation9 + $0xc0] ss:$16 sps:$4 sm:$0xff]  }
 0x55f   :  { %4597 = vmatprep.subr.bf16.mxu0 %v19714_v40  ;;  %4683 = vmatprep.subr.bf16.mxu1 %v19717_v42  ;;  %v19793_v40 = vld [vmem:[#allocation9 + $0xc8] ss:$16 sps:$4 sm:$0xff]   ;;  %v19798_v42 = vld [vmem:[#allocation9 + $0xe4] ss:$16 sps:$4 sm:$0xff]  }
 0x562   :  { %4598 = vmatpush1.bf16.msra.mxu0 %v19712_v37  ;;  %4684 = vmatpush1.bf16.msra.mxu1 %v19715_v10  ;;  %v19801_v37 = vld [vmem:[#allocation9 + $0xec] ss:$16 sps:$4 sm:$0xff]   ;;  %v19796_v10 = vld [vmem:[#allocation9 + $0xe0] ss:$16 sps:$4 sm:$0xff]  }
 0x563   :  { %4599 = vmatprep.subr.bf16.mxu0 %v19720_v43  ;;  %4685 = vmatprep.subr.bf16.mxu1 %v19723_v54  ;;  %v19799_v43 = vld [vmem:[#allocation9 + $0xe8] ss:$16 sps:$4 sm:$0xff]   ;;  %v19804_v54 = vld [vmem:[#allocation9 + $0x104] ss:$16 sps:$4 sm:$0xff]  }
 0x566   :  { %4600 = vmatpush1.bf16.msra.mxu0 %v19718_v44  ;;  %4686 = vmatpush1.bf16.msra.mxu1 %v19721_v45  ;;  %v19807_v44 = vld [vmem:[#allocation9 + $0x10c] ss:$16 sps:$4 sm:$0xff]   ;;  %v19802_v45 = vld [vmem:[#allocation9 + $0x100] ss:$16 sps:$4 sm:$0xff]  }
 0x567   :  { %4601 = vmatprep.subr.bf16.mxu0 %v19726_v48  ;;  %4687 = vmatprep.subr.bf16.mxu1 %v19729_v47  ;;  %v19805_v48 = vld [vmem:[#allocation9 + $0x108] ss:$16 sps:$4 sm:$0xff]   ;;  %v19810_v47 = vld [vmem:[#allocation9 + $0x124] ss:$16 sps:$4 sm:$0xff]  }
 0x56a   :  { %4602 = vmatpush1.bf16.msra.mxu0 %v19724_v22  ;;  %4688 = vmatpush1.bf16.msra.mxu1 %v19727_v41  ;;  %v19813_v22 = vld [vmem:[#allocation9 + $0x12c] ss:$16 sps:$4 sm:$0xff]   ;;  %v19808_v41 = vld [vmem:[#allocation9 + $0x120] ss:$16 sps:$4 sm:$0xff]  }
 0x56b   :  { %4603 = vmatprep.subr.bf16.mxu0 %v19732_v59  ;;  %4689 = vmatprep.subr.bf16.mxu1 %v19735_v4  ;;  %v19811_v59 = vld [vmem:[#allocation9 + $0x128] ss:$16 sps:$4 sm:$0xff]   ;;  %v19816_v4 = vld [vmem:[#allocation9 + $0x144] ss:$16 sps:$4 sm:$0xff]  }
 0x56e   :  { %4604 = vmatpush1.bf16.msra.mxu0 %v19730_v34  ;;  %4690 = vmatpush1.bf16.msra.mxu1 %v19733_v51  ;;  %v19819_v34 = vld [vmem:[#allocation9 + $0x14c] ss:$16 sps:$4 sm:$0xff]   ;;  %v19814_v51 = vld [vmem:[#allocation9 + $0x140] ss:$16 sps:$4 sm:$0xff]  }
 0x56f   :  { %4605 = vmatprep.subr.bf16.mxu0 %v19738_v12  ;;  %4691 = vmatprep.subr.bf16.mxu1 %v19741_v52  ;;  %v19817_v12 = vld [vmem:[#allocation9 + $0x148] ss:$16 sps:$4 sm:$0xff]   ;;  %v19822_v52 = vld [vmem:[#allocation9 + $0x164] ss:$16 sps:$4 sm:$0xff]  }
 0x572   :  { %4606 = vmatpush1.bf16.msra.mxu0 %v19736_v56  ;;  %4692 = vmatpush1.bf16.msra.mxu1 %v19739_v57  ;;  %v19825_v56 = vld [vmem:[#allocation9 + $0x16c] ss:$16 sps:$4 sm:$0xff]   ;;  %v19820_v57 = vld [vmem:[#allocation9 + $0x160] ss:$16 sps:$4 sm:$0xff]  }
 0x573   :  { %4607 = vmatprep.subr.bf16.mxu0 %v19744_v46  ;;  %4693 = vmatprep.subr.bf16.mxu1 %v19747_v61  ;;  %v19823_v46 = vld [vmem:[#allocation9 + $0x168] ss:$16 sps:$4 sm:$0xff]   ;;  %v19828_v61 = vld [vmem:[#allocation9 + $0x184] ss:$16 sps:$4 sm:$0xff]  }
 0x576   :  { %4608 = vmatpush1.bf16.msra.mxu0 %v19742_v62  ;;  %4694 = vmatpush1.bf16.msra.mxu1 %v19745_v63  ;;  %v19831_v62 = vld [vmem:[#allocation9 + $0x18c] ss:$16 sps:$4 sm:$0xff]   ;;  %v19826_v63 = vld [vmem:[#allocation9 + $0x180] ss:$16 sps:$4 sm:$0xff]  }
 0x577   :  { %4609 = vmatprep.subr.bf16.mxu0 %v19750_v39  ;;  %4695 = vmatprep.subr.bf16.mxu1 %v19753_v23  ;;  %v19829_v39 = vld [vmem:[#allocation9 + $0x188] ss:$16 sps:$4 sm:$0xff]   ;;  %v19834_v23 = vld [vmem:[#allocation9 + $0x1a4] ss:$16 sps:$4 sm:$0xff]  }
 0x57a   :  { %4610 = vmatpush1.bf16.msra.mxu0 %v19748_v0  ;;  %4696 = vmatpush1.bf16.msra.mxu1 %v19751_v5  ;;  %v19837_v0 = vld [vmem:[#allocation9 + $0x1ac] ss:$16 sps:$4 sm:$0xff]   ;;  %v19832_v5 = vld [vmem:[#allocation9 + $0x1a0] ss:$16 sps:$4 sm:$0xff]  }
 0x57b   :  { %5736 = vmatprep.subr.bf16.mxu0 %v19756_v7  ;;  %5822 = vmatprep.subr.bf16.mxu1 %v19759_v49  ;;  %v19835_v7 = vld [vmem:[#allocation9 + $0x1a8] ss:$16 sps:$4 sm:$0xff]   ;;  %v19840_v49 = vld [vmem:[#allocation9 + $0x1c4] ss:$16 sps:$4 sm:$0xff]  }
 0x57d   :  { %4612 = vmatmul.mubr.bf16.vlgmr.msra.gmra.mrb[12].mxu0 %v22887_v53  ;;  %4698 = vmatmul.mubr.bf16.vlgmr.msra.gmra.mrb[12].mxu1 %v22887_v53  ;;  %v19769_v53 = vld [vmem:[#allocation9 + $0x48] ss:$16 sps:$4 sm:$0xff]  }
 0x57e   :  { %5737 = vmatpush1.bf16.msra.mxu0 %v19754_v8  ;;  %5823 = vmatpush1.bf16.msra.mxu1 %v19757_v9  ;;  %v19843_v8 = vld [vmem:[#allocation9 + $0x1cc] ss:$16 sps:$4 sm:$0xff]   ;;  %v19838_v9 = vld [vmem:[#allocation9 + $0x1c0] ss:$16 sps:$4 sm:$0xff]  }
 0x57f   :  { %5738 = vmatprep.subr.bf16.mxu0 %v19762_v11  ;;  %5824 = vmatprep.subr.bf16.mxu1 %v19765_v14  ;;  %v19841_v11 = vld [vmem:[#allocation9 + $0x1c8] ss:$16 sps:$4 sm:$0xff]   ;;  %v19846_v14 = vld [vmem:[#allocation9 + $0x1e4] ss:$16 sps:$4 sm:$0xff]  }
 0x582   :  { %5739 = vmatpush1.bf16.msra.mxu0 %v19760_v15  ;;  %5825 = vmatpush1.bf16.msra.mxu1 %v19763_v17  ;;  %v19849_v15 = vld [vmem:[#allocation9 + $0x1ec] ss:$16 sps:$4 sm:$0xff]   ;;  %v19844_v17 = vld [vmem:[#allocation9 + $0x1e0] ss:$16 sps:$4 sm:$0xff]  }
 0x583   :  { %5740 = vmatprep.subr.bf16.mxu0 %v19768_v18  ;;  %5826 = vmatprep.subr.bf16.mxu1 %v19771_v19  ;;  %v19847_v18 = vld [vmem:[#allocation9 + $0x1e8] ss:$16 sps:$4 sm:$0xff]   ;;  %v19852_v19 = vld [vmem:[#allocation9 + $0x204] ss:$16 sps:$4 sm:$0xff]  }
 0x586   :  { %5741 = vmatpush1.bf16.msra.mxu0 %v19766_v1  ;;  %5827 = vmatpush1.bf16.msra.mxu1 %v19769_v53  ;;  %v19855_v1 = vld [vmem:[#allocation9 + $0x20c] ss:$16 sps:$4 sm:$0xff]   ;;  %v3874_v53 = vld [vmem:[%s23612_s30] sm:$0xf] }
 0x587   :  { %5742 = vmatprep.subr.bf16.mxu0 %v19774_v20  ;;  %5828 = vmatprep.subr.bf16.mxu1 %v19777_v21  ;;  %v3879_v20 = vrot.slane %v3874_v53, %v22680_v25  ;;  %v3887_v21 = vrot.slane %v3874_v53, %v22686_v27 }
 0x58a   :  { %5743 = vmatpush1.bf16.msra.mxu0 %v19772_v60  ;;  %5829 = vmatpush1.bf16.msra.mxu1 %v19775_v24  ;;  %v3883_v60 = vrot.slane %v3874_v53, %v22683_v26  ;;  %v3891_v24 = vrot.slane %v3874_v53, %v22689_v28 }
 0x58b   :  { %5744 = vmatprep.subr.bf16.mxu0 %v19780_v29  ;;  %5830 = vmatprep.subr.bf16.mxu1 %v19783_v30 }
 0x58e   :  { %5745 = vmatpush1.bf16.msra.mxu0 %v19778_v31  ;;  %5831 = vmatpush1.bf16.msra.mxu1 %v19781_v13 }
 0x58f   :  { %5746 = vmatprep.subr.bf16.mxu0 %v19786_v32  ;;  %5832 = vmatprep.subr.bf16.mxu1 %v19789_v35 }
 0x592   :  { %5747 = vmatpush1.bf16.msra.mxu0 %v19784_v36  ;;  %5833 = vmatpush1.bf16.msra.mxu1 %v19787_v38 }
 0x593   :  { %5748 = vmatprep.subr.bf16.mxu0 %v19792_v33  ;;  %5834 = vmatprep.subr.bf16.mxu1 %v19795_v50 }
 0x596   :  { %5749 = vmatpush1.bf16.msra.mxu0 %v19790_v2  ;;  %5835 = vmatpush1.bf16.msra.mxu1 %v19793_v40 }
 0x597   :  { %5750 = vmatprep.subr.bf16.mxu0 %v19798_v42  ;;  %5836 = vmatprep.subr.bf16.mxu1 %v19801_v37 }
 0x59a   :  { %5751 = vmatpush1.bf16.msra.mxu0 %v19796_v10  ;;  %5837 = vmatpush1.bf16.msra.mxu1 %v19799_v43 }
 0x59b   :  { %5752 = vmatprep.subr.bf16.mxu0 %v19804_v54  ;;  %5838 = vmatprep.subr.bf16.mxu1 %v19807_v44 }
 0x59e   :  { %5753 = vmatpush1.bf16.msra.mxu0 %v19802_v45  ;;  %5839 = vmatpush1.bf16.msra.mxu1 %v19805_v48 }
 0x59f   :  { %5754 = vmatprep.subr.bf16.mxu0 %v19810_v47  ;;  %5840 = vmatprep.subr.bf16.mxu1 %v19813_v22 }
 0x5a2   :  { %5755 = vmatpush1.bf16.msra.mxu0 %v19808_v41  ;;  %5841 = vmatpush1.bf16.msra.mxu1 %v19811_v59 }
 0x5a3   :  { %5756 = vmatprep.subr.bf16.mxu0 %v19816_v4  ;;  %5842 = vmatprep.subr.bf16.mxu1 %v19819_v34 }
 0x5a6   :  { %5757 = vmatpush1.bf16.msra.mxu0 %v19814_v51  ;;  %5843 = vmatpush1.bf16.msra.mxu1 %v19817_v12 }
 0x5a7   :  { %5758 = vmatprep.subr.bf16.mxu0 %v19822_v52  ;;  %5844 = vmatprep.subr.bf16.mxu1 %v19825_v56 }
 0x5aa   :  { %5759 = vmatpush1.bf16.msra.mxu0 %v19820_v57  ;;  %5845 = vmatpush1.bf16.msra.mxu1 %v19823_v46 }
 0x5ab   :  { %5760 = vmatprep.subr.bf16.mxu0 %v19828_v61  ;;  %5846 = vmatprep.subr.bf16.mxu1 %v19831_v62 }
 0x5ae   :  { %5761 = vmatpush1.bf16.msra.mxu0 %v19826_v63  ;;  %5847 = vmatpush1.bf16.msra.mxu1 %v19829_v39 }
 0x5af   :  { %5762 = vmatprep.subr.bf16.mxu0 %v19834_v23  ;;  %5848 = vmatprep.subr.bf16.mxu1 %v19837_v0 }
 0x5b2   :  { %5763 = vmatpush1.bf16.msra.mxu0 %v19832_v5  ;;  %5849 = vmatpush1.bf16.msra.mxu1 %v19835_v7 }
 0x5b3   :  { %5764 = vmatprep.subr.bf16.mxu0 %v19840_v49  ;;  %5850 = vmatprep.subr.bf16.mxu1 %v19843_v8 }
 0x5b6   :  { %5765 = vmatpush1.bf16.msra.mxu0 %v19838_v9  ;;  %5851 = vmatpush1.bf16.msra.mxu1 %v19841_v11 }
 0x5b7   :  { %5766 = vmatprep.subr.bf16.mxu0 %v19846_v14  ;;  %5852 = vmatprep.subr.bf16.mxu1 %v19849_v15 }
 0x5ba   :  { %5767 = vmatpush1.bf16.msra.mxu0 %v19844_v17  ;;  %5853 = vmatpush1.bf16.msra.mxu1 %v19847_v18 }
 0x5bb   :  { %5779 = vmatprep.subr.bf16.mxu0 %v19852_v19  ;;  %5865 = vmatprep.subr.bf16.mxu1 %v19855_v1 }
 0x650   :  { %v4613_v29 = vpop.f32.mrb[12].mxu0  ;;  %v4699_v30 = vpop.f32.mrb[12].mxu1 }
 0x651   :  { %v18701_v31 = vadd.f32 %v4613_v29, %v3879_v20  ;;  %v18705_v13 = vadd.f32 %v4699_v30, %v3887_v21  ;;  %v4615_v32 = vpop.f32.mrb[13].mxu0  ;;  %v4701_v35 = vpop.f32.mrb[13].mxu1 }
 0x652   :  { %v18702_v36 = vadd.f32 %v4615_v32, %v3883_v60  ;;  %v18706_v38 = vadd.f32 %v4701_v35, %v3891_v24  ;;  %v4617_v33 = vpop.f32.mrb[14].mxu0  ;;  %v4703_v50 = vpop.f32.mrb[14].mxu1 }
 0x653   :  { %v4716_v2 = vmul.f32 1.442695, %v18701_v31  ;;  %v4720_v40 = vmul.f32 1.442695, %v18705_v13  ;;  %v18703_v10 = vadd.f32 %v4617_v33, %v3879_v20  ;;  %v18707_v43 = vadd.f32 %v4703_v50, %v3887_v21  ;;  %v4619_v54 = vpop.f32.mrb[15].mxu0  ;;  %v4705_v44 = vpop.f32.mrb[15].mxu1 }
 0x654   :  { %v4718_v42 = vmul.f32 1.442695, %v18702_v36  ;;  %v4722_v37 = vmul.f32 1.442695, %v18706_v38  ;;  %v18704_v45 = vadd.f32 %v4619_v54, %v3883_v60  ;;  %v22898_v48 = vadd.f32 %v4705_v44, %v3891_v24 }
 0x655   :  { %21799 = vpow2.f32 %v4716_v2  ;;  %v4724_v47 = vmul.f32 1.442695, %v18703_v10  ;;  %v4728_v22 = vmul.f32 1.442695, %v18707_v43  ;;  %vm4708_vm1 = vcmp.gt.f32.partialorder %v18701_v31, 0.0 }
 0x656   :  { %21801 = vpow2.f32 %v4720_v40  ;;  %v4726_v41 = vmul.f32 1.442695, %v18704_v45  ;;  %v4730_v59 = vmul.f32 1.442695, %v22898_v48  ;;  %vm4710_vm4 = vcmp.gt.f32.partialorder %v18705_v13, 0.0 }
 0x657   :  { %21803 = vpow2.f32 %v4718_v42  ;;  %vm4709_vm5 = vcmp.gt.f32.partialorder %v18702_v36, 0.0  ;;  %vm4711_vm6 = vcmp.gt.f32.partialorder %v18706_v38, 0.0  ;;  %vm4712_vm7 = vcmp.gt.f32.partialorder %v18703_v10, 0.0 }
 0x658   :  { %21805 = vpow2.f32 %v4722_v37  ;;  %vm4714_vm8 = vcmp.gt.f32.partialorder %v18707_v43, 0.0  ;;  %vm4713_vm9 = vcmp.gt.f32.partialorder %v18704_v45, 0.0  ;;  %vm4715_vm11 = vcmp.gt.f32.partialorder %v22898_v48, 0.0 }
 0x659   :  { %21807 = vpow2.f32 %v4724_v47 }
 0x65a   :  { %21809 = vpow2.f32 %v4728_v22 }
 0x65b   :  { %21811 = vpow2.f32 %v4726_v41 }
 0x65c   :  { %21813 = vpow2.f32 %v4730_v59 }
 0x65f   :  { %v21800_v4 = vpop.eup %21799 }
 0x660   :  { %v21802_v34 = vpop.eup %21801  ;;  %v17199_v51 = vadd.f32 -1.0, %v21800_v4 }
 0x661   :  { %v21804_v12 = vpop.eup %21803  ;;  %v17201_v52 = vadd.f32 -1.0, %v21802_v34 }
 0x662   :  { %v21806_v56 = vpop.eup %21805  ;;  %v22901_v57 = vsel %vm4708_vm1, %v18701_v31, %v17199_v51  ;;  %v17200_v46 = vadd.f32 -1.0, %v21804_v12  ;;  %vm23582_vm1 = vcmp.eq.s32.totalorder %v22805_v55, 0 }
 0x663   :  { %v21808_v61 = vpop.eup %21807  ;;  %v22903_v62 = vsel %vm4710_vm4, %v18705_v13, %v17201_v52  ;;  %v17202_v63 = vadd.f32 -1.0, %v21806_v56  ;;  %v4784_v7 = vmul.f32 %v22901_v57, %v22901_v57  ;;  %vm23583_vm4 = vcmp.eq.s32.totalorder %v22807_v58, 0 }
 0x664   :  { %v21810_v39 = vpop.eup %21809  ;;  %v22905_v23 = vsel %vm4709_vm5, %v18702_v36, %v17200_v46  ;;  %v17203_v0 = vadd.f32 -1.0, %v21808_v61  ;;  %v4786_v49 = vmul.f32 %v22903_v62, %v22903_v62 }
 0x665   :  { %v21812_v5 = vpop.eup %21811  ;;  %v22912_v8 = vsel %vm4711_vm6, %v18706_v38, %v17202_v63  ;;  %v17205_v9 = vadd.f32 -1.0, %v21810_v39  ;;  %v4785_v14 = vmul.f32 %v22905_v23, %v22905_v23 }
 0x666   :  { %v21814_v11 = vpop.eup %21813  ;;  %v4787_v15 = vmul.f32 %v22912_v8, %v22912_v8  ;;  %v22918_v17 = vsel %vm4712_vm7, %v18703_v10, %v17203_v0  ;;  %v17204_v18 = vadd.f32 -1.0, %v21812_v5 }
 0x667   :  { %v4748_v19 = vsel %vm1584_vm10, %v22918_v17, 0.0  ;;  %v4788_v1 = vmul.f32 %v22918_v17, %v22918_v17  ;;  %v22925_v53 = vsel %vm4714_vm8, %v18707_v43, %v17205_v9  ;;  %v17206_v20 = vadd.f32 -1.0, %v21814_v11 }
 0x668   :  { %v4749_v21 = vadd.f32 %v4748_v19, %v22901_v57  ;;  %v4764_v60 = vsel %vm1584_vm10, %v22925_v53, 0.0  ;;  %v4790_v24 = vmul.f32 %v22925_v53, %v22925_v53  ;;  %v22933_v29 = vsel %vm4713_vm9, %v18704_v45, %v17204_v18 }
 0x669   :  { %v4792_v30 = vsel %vm1584_vm10, %v4788_v1, 0.0  ;;  %v4765_v31 = vadd.f32 %v4764_v60, %v22903_v62  ;;  %v4756_v13 = vsel %vm1584_vm10, %v22933_v29, 0.0  ;;  %v4789_v32 = vmul.f32 %v22933_v29, %v22933_v29 }
 0x66a   :  { %v4750_v35 = vrot.slane %v4749_v21, 4  ;;  %v4793_v36 = vadd.f32 %v4792_v30, %v4784_v7  ;;  %v4808_v38 = vsel %vm1584_vm10, %v4790_v24, 0.0  ;;  %v4757_v33 = vadd.f32 %v4756_v13, %v22905_v23 }
 0x66b   :  { %v4766_v50 = vrot.slane %v4765_v31, 4  ;;  %v4809_v2 = vadd.f32 %v4808_v38, %v4786_v49  ;;  %v4800_v40 = vsel %vm1584_vm10, %v4789_v32, 0.0  ;;  %v22947_v42 = vsel %vm4715_vm11, %v22898_v48, %v17206_v20 }
 0x66c   :  { %v4751_v37 = vadd.f32 %v4750_v35, %v4749_v21  ;;  %v4794_v10 = vrot.slane %v4793_v36, 4  ;;  %v4758_v43 = vrot.slane %v4757_v33, 4  ;;  %v4801_v54 = vadd.f32 %v4800_v40, %v4785_v14 }
 0x66d   :  { %v4767_v44 = vadd.f32 %v4766_v50, %v4765_v31  ;;  %v4810_v45 = vrot.slane %v4809_v2, 4  ;;  %v4772_v47 = vsel %vm1584_vm10, %v22947_v42, 0.0  ;;  %v4791_v22 = vmul.f32 %v22947_v42, %v22947_v42 }
 0x66e   :  { %v4752_v41 = vrot.slane %v4751_v37, 2  ;;  %v4795_v59 = vadd.f32 %v4794_v10, %v4793_v36  ;;  %v4759_v4 = vadd.f32 %v4758_v43, %v4757_v33  ;;  %v4802_v34 = vrot.slane %v4801_v54, 4 }
 0x66f   :  { %v4768_v51 = vrot.slane %v4767_v44, 2  ;;  %v4811_v12 = vadd.f32 %v4810_v45, %v4809_v2  ;;  %v4773_v48 = vadd.f32 %v4772_v47, %v22912_v8  ;;  %v4816_v52 = vsel %vm1584_vm10, %v4791_v22, 0.0 }
 0x670   :  { %v4753_v56 = vadd.f32 %v4752_v41, %v4751_v37  ;;  %v4796_v46 = vrot.slane %v4795_v59, 2  ;;  %v4760_v61 = vrot.slane %v4759_v4, 2  ;;  %v4803_v63 = vadd.f32 %v4802_v34, %v4801_v54 }
 0x671   :  { %v4769_v39 = vadd.f32 %v4768_v51, %v4767_v44  ;;  %v4812_v0 = vrot.slane %v4811_v12, 2  ;;  %v4774_v5 = vrot.slane %v4773_v48, 4  ;;  %v4817_v7 = vadd.f32 %v4816_v52, %v4787_v15 }
 0x672   :  { %v4754_v49 = vrot.slane %v4753_v56, 1  ;;  %v4797_v9 = vadd.f32 %v4796_v46, %v4795_v59  ;;  %v4761_v11 = vadd.f32 %v4760_v61, %v4759_v4  ;;  %v4804_v14 = vrot.slane %v4803_v63, 2 }
 0x673   :  { %v4770_v18 = vrot.slane %v4769_v39, 1  ;;  %v4813_v19 = vadd.f32 %v4812_v0, %v4811_v12  ;;  %v4775_v1 = vadd.f32 %v4774_v5, %v4773_v48  ;;  %v4818_v20 = vrot.slane %v4817_v7, 4 }
 0x674   :  { %v4755_v21 = vadd.f32 %v4754_v49, %v4753_v56  ;;  %v4798_v60 = vrot.slane %v4797_v9, 1  ;;  %v4762_v24 = vrot.slane %v4761_v11, 1  ;;  %v4805_v30 = vadd.f32 %v4804_v14, %v4803_v63 }
 0x675   :  { %v4771_v31 = vadd.f32 %v4770_v18, %v4769_v39  ;;  %v4814_v13 = vrot.slane %v4813_v19, 1  ;;  %v4776_v32 = vrot.slane %v4775_v1, 2  ;;  %v4819_v35 = vadd.f32 %v4818_v20, %v4817_v7 }
 0x676   :  { %v4780_v36 = vmul.f32 0.083333336, %v4755_v21  ;;  %v4799_v38 = vadd.f32 %v4798_v60, %v4797_v9  ;;  %v4763_v33 = vadd.f32 %v4762_v24, %v4761_v11  ;;  %v4806_v15 = vrot.slane %v4805_v30, 1 }
 0x677   :  { %v4782_v50 = vmul.f32 0.083333336, %v4771_v31  ;;  %v4815_v2 = vadd.f32 %v4814_v13, %v4813_v19  ;;  %v4777_v40 = vadd.f32 %v4776_v32, %v4775_v1  ;;  %v4820_v37 = vrot.slane %v4819_v35, 2 }
 0x678   :  { %v4824_v10 = vmul.f32 0.083333336, %v4799_v38  ;;  %v4828_v43 = vmul.f32 %v4780_v36, %v4780_v36  ;;  %v4836_v54 = vsub.f32 %v22901_v57, %v4780_v36  ;;  %v4840_v44 = vsub.f32 %v22918_v17, %v4780_v36 }
 0x679   :  { %v4826_v45 = vmul.f32 0.083333336, %v4815_v2  ;;  %v4830_v47 = vmul.f32 %v4782_v50, %v4782_v50  ;;  %v4838_v22 = vsub.f32 %v22903_v62, %v4782_v50  ;;  %v4842_v41 = vsub.f32 %v22925_v53, %v4782_v50 }
 0x67a   :  { %v4832_v59 = vsub.f32 %v4824_v10, %v4828_v43  ;;  %v4781_v4 = vmul.f32 0.083333336, %v4763_v33  ;;  %v4807_v34 = vadd.f32 %v4806_v15, %v4805_v30  ;;  %v4778_v51 = vrot.slane %v4777_v40, 1 }
 0x67b   :  { %v4834_v12 = vsub.f32 %v4826_v45, %v4830_v47  ;;  %v4821_v48 = vadd.f32 %v4820_v37, %v4819_v35 }
 0x67c   :  { %v4844_v52 = vadd.f32 1e-05, %v4832_v59  ;;  %v4825_v56 = vmul.f32 0.083333336, %v4807_v34  ;;  %v4829_v46 = vmul.f32 %v4781_v4, %v4781_v4  ;;  %v4837_v61 = vsub.f32 %v22905_v23, %v4781_v4 }
 0x67d   :  { %v4846_v57 = vadd.f32 1e-05, %v4834_v12  ;;  %v4841_v17 = vsub.f32 %v22933_v29, %v4781_v4  ;;  %v4779_v63 = vadd.f32 %v4778_v51, %v4777_v40  ;;  %v4822_v39 = vrot.slane %v4821_v48, 1 }
 0x67e   :  { %21815 = vrsqrt.f32 %v4844_v52  ;;  %v4833_v62 = vsub.f32 %v4825_v56, %v4829_v46 }
 0x67f   :  { %21817 = vrsqrt.f32 %v4846_v57  ;;  %v4783_v53 = vmul.f32 0.083333336, %v4779_v63  ;;  %v4823_v0 = vadd.f32 %v4822_v39, %v4821_v48 }
 0x680   :  { %v4845_v5 = vadd.f32 1e-05, %v4833_v62  ;;  %v19850_v62 = vld [vmem:[#allocation9 + $0x200] ss:$16 sps:$4 sm:$0xff]  }
 0x681   :  { %v4827_v7 = vmul.f32 0.083333336, %v4823_v0  ;;  %v4831_v49 = vmul.f32 %v4783_v53, %v4783_v53  ;;  %v4839_v9 = vsub.f32 %v22912_v8, %v4783_v53  ;;  %v4843_v11 = vsub.f32 %v22947_v42, %v4783_v53 }
 0x682   :  { %21819 = vrsqrt.f32 %v4845_v5 }
 0x683   :  { %v4835_v14 = vsub.f32 %v4827_v7, %v4831_v49  ;;  %v19853_v49 = vld [vmem:[#allocation9 + $0x208] ss:$16 sps:$4 sm:$0xff]  }
 0x685   :  { %v4847_v23 = vadd.f32 1e-05, %v4835_v14 }
 0x687   :  { %21821 = vrsqrt.f32 %v4847_v23 }
 0x688   :  { %v21816_v18 = vpop.eup %21815 }
 0x689   :  { %v21818_v29 = vpop.eup %21817  ;;  %v4852_v19 = vmul.f32 %v21816_v18, %v4836_v54  ;;  %v4856_v1 = vmul.f32 %v21816_v18, %v4840_v44  ;;  %v19858_v18 = vld [vmem:[#allocation9 + $0x224] ss:$16 sps:$4 sm:$0xff]  }
 0x68a   :  { %v22963_v20 = vmul.f32 %v21818_v29, %v4838_v22  ;;  %v22965_v21 = vmul.f32 %v21818_v29, %v4842_v41  ;;  %v19861_v29 = vld [vmem:[#allocation9 + $0x22c] ss:$16 sps:$4 sm:$0xff]  }
 0x68b   :  { %v4901_v60 = vrot.slane %v4856_v1, 5  ;;  %v4864_v8 = vrot.slane %v4856_v1, 3  ;;  %v4876_v24 = vrot.slane %v4852_v19, 7  ;;  %v4880_v42 = vrot.slane %v4856_v1, 7 }
 0x68c   :  { %v21820_v30 = vpop.eup %21819  ;;  %v4907_v31 = vrot.slane %v22965_v21, 5  ;;  %v4900_v13 = vrot.slane %v4852_v19, 5  ;;  %v4916_v32 = vrot.slane %v4852_v19, 1  ;;  %v4866_v35 = vrot.slane %v22965_v21, 3 }
 0x68d   :  { %v4857_v36 = vmul.f32 %v21820_v30, %v4841_v17  ;;  %v4853_v38 = vmul.f32 %v21820_v30, %v4837_v61  ;;  %v4881_v33 = vsel %vm1740_vm14, %v4876_v24, %v4880_v42  ;;  %v4896_v15 = vsel %vm1740_vm14, %v4864_v8, %v4876_v24 }
 0x68e   :  { %v4902_v50 = vsel %vm1735_vm13, %v4900_v13, %v4901_v60  ;;  %v4938_v2 = vsel %vm23583_vm4, %v4916_v32, %v4881_v33  ;;  %v4878_v40 = vrot.slane %v22963_v20, 7  ;;  %v4884_v37 = vrot.slane %v22965_v21, 7 }
 0x68f   :  { %v4865_v10 = vrot.slane %v4857_v36, 3  ;;  %v4877_v43 = vrot.slane %v4853_v38, 7  ;;  %v4882_v54 = vrot.slane %v4857_v36, 7  ;;  %v4903_v44 = vrot.slane %v4853_v38, 5 }
 0x690   :  { %v4904_v45 = vrot.slane %v4857_v36, 5  ;;  %v4917_v47 = vrot.slane %v4853_v38, 1  ;;  %v4924_v22 = vsel %vm1706_vm12, %v4902_v50, %v4916_v32  ;;  %v4885_v41 = vsel %vm1740_vm14, %v4878_v40, %v4884_v37  ;;  %v19864_v50 = vld [vmem:[#allocation9 + $0x244] ss:$16 sps:$4 sm:$0xff]  }
 0x691   :  { %v21822_v59 = vpop.eup %21821  ;;  %v4883_v4 = vsel %vm1740_vm14, %v4877_v43, %v4882_v54  ;;  %v4897_v34 = vsel %vm1740_vm14, %v4865_v10, %v4877_v43  ;;  %v4934_v51 = vsel %vm23582_vm1, %v4924_v22, %v4896_v15  ;;  %v4898_v12 = vsel %vm1740_vm14, %v4866_v35, %v4878_v40  ;;  %v19862_v10 = vld [vmem:[#allocation9 + $0x240] ss:$16 sps:$4 sm:$0xff]   ;;  %v19865_v43 = vld [vmem:[#allocation9 + $0x248] ss:$16 sps:$4 sm:$0xff]   ;;  %v19870_v54 = vld [vmem:[#allocation9 + $0x264] ss:$16 sps:$4 sm:$0xff]  }
 0x692   :  { %v4859_v48 = vmul.f32 %v21822_v59, %v4843_v11  ;;  %v4905_v52 = vsel %vm1735_vm13, %v4903_v44, %v4904_v45  ;;  %v4939_v56 = vsel %vm23583_vm4, %v4917_v47, %v4883_v4  ;;  %v4942_v46 = vpack.c.bf16 %v4938_v2, %v4934_v51  ;;  %v19867_v2 = vld [vmem:[#allocation9 + $0x24c] ss:$16 sps:$4 sm:$0xff]   ;;  %v19868_v45 = vld [vmem:[#allocation9 + $0x260] ss:$16 sps:$4 sm:$0xff]   ;;  %v19876_v22 = vld [vmem:[#allocation9 + $0x284] ss:$16 sps:$4 sm:$0xff]  }
 0x693   :  { %v4925_v61 = vsel %vm1706_vm12, %v4905_v52, %v4917_v47  ;;  %v4855_v57 = vmul.f32 %v21822_v59, %v4839_v9  ;;  %v4906_v17 = vrot.slane %v22963_v20, 5  ;;  %v4918_v63 = vrot.slane %v22963_v20, 1  ;;  %v19873_v44 = vld [vmem:[#allocation9 + $0x26c] ss:$16 sps:$4 sm:$0xff]   ;;  %v19871_v47 = vld [vmem:[#allocation9 + $0x268] ss:$16 sps:$4 sm:$0xff]  }
 0x694   :  { %v4935_v39 = vsel %vm23582_vm1, %v4925_v61, %v4897_v34  ;;  %v4867_v53 = vrot.slane %v4859_v48, 3  ;;  %v4886_v0 = vrot.slane %v4859_v48, 7  ;;  %v4910_v5 = vrot.slane %v4859_v48, 5  ;;  %v19882_v59 = vld [vmem:[#allocation9 + $0x2a4] ss:$16 sps:$4 sm:$0xff]  }
 0x695   :  { %v4943_v7 = vpack.c.bf16 %v4939_v56, %v4935_v39  ;;  %v4879_v11 = vrot.slane %v4855_v57, 7  ;;  %v4909_v14 = vrot.slane %v4855_v57, 5  ;;  %v4919_v23 = vrot.slane %v4855_v57, 1  ;;  %v19885_v4 = vld [vmem:[#allocation9 + $0x2ac] ss:$16 sps:$4 sm:$0xff]  }
 0x696   :  { %v4908_v9 = vsel %vm1735_vm13, %v4906_v17, %v4907_v31  ;;  %v4940_v60 = vsel %vm23583_vm4, %v4918_v63, %v4885_v41  ;;  %v22996_v8 = vpack.c.bf16 %v4857_v36, %v4853_v38  ;;  %v22998_v24 = vpack.c.bf16 %v4856_v1, %v4852_v19  ;;  %v19856_v1 = vld [vmem:[#allocation9 + $0x220] ss:$16 sps:$4 sm:$0xff]   ;;  %v19859_v36 = vld [vmem:[#allocation9 + $0x228] ss:$16 sps:$4 sm:$0xff]   ;;  %v19879_v41 = vld [vmem:[#allocation9 + $0x28c] ss:$16 sps:$4 sm:$0xff]  }
 0x697   :  { %5768 = vmatprep.mubr.bf16.mxu0 %v4943_v7  ;;  %5854 = vmatprep.mubr.bf16.mxu1 %v4943_v7  ;;  %v4887_v42 = vsel %vm1740_vm14, %v4879_v11, %v4886_v0  ;;  %v4899_v30 = vsel %vm1740_vm14, %v4867_v53, %v4879_v11  ;;  %v4911_v13 = vsel %vm1735_vm13, %v4909_v14, %v4910_v5  ;;  %v19880_v34 = vld [vmem:[#allocation9 + $0x2a0] ss:$16 sps:$4 sm:$0xff]   ;;  %v19883_v51 = vld [vmem:[#allocation9 + $0x2a8] ss:$16 sps:$4 sm:$0xff]   ;;  %v19897_v61 = vld [vmem:[#allocation9 + $0x2ec] ss:$16 sps:$4 sm:$0xff]  }
 0x698   :  { %5769 = vmatmul.mubr.bf16.vlgmr.msra.gmra.mrb[16].mxu0 %v4942_v46  ;;  %5855 = vmatmul.mubr.bf16.vlgmr.msra.gmra.mrb[16].mxu1 %v4942_v46  ;;  %v4927_v32 = vsel %vm1706_vm12, %v4911_v13, %v4919_v23  ;;  %v4941_v31 = vsel %vm23583_vm4, %v4919_v23, %v4887_v42  ;;  %v4926_v35 = vsel %vm1706_vm12, %v4908_v9, %v4918_v63  ;;  %v19886_v52 = vld [vmem:[#allocation9 + $0x2c0] ss:$16 sps:$4 sm:$0xff]   ;;  %v19889_v56 = vld [vmem:[#allocation9 + $0x2c8] ss:$16 sps:$4 sm:$0xff]   ;;  %v19894_v46 = vld [vmem:[#allocation9 + $0x2e4] ss:$16 sps:$4 sm:$0xff]  }
 0x699   :  { %5780 = vmatpush1.bf16.msra.mxu0 %v19850_v62  ;;  %5866 = vmatpush1.bf16.msra.mxu1 %v19853_v49  ;;  %v4937_v19 = vsel %vm23582_vm1, %v4927_v32, %v4899_v30  ;;  %v4936_v38 = vsel %vm23582_vm1, %v4926_v35, %v4898_v12  ;;  %v23011_v33 = vpack.c.bf16 %v4859_v48, %v4855_v57  ;;  %v19888_v12 = vld [vmem:[#allocation9 + $0x2c4] ss:$16 sps:$4 sm:$0xff]   ;;  %v19891_v48 = vld [vmem:[#allocation9 + $0x2cc] ss:$16 sps:$4 sm:$0xff]   ;;  %v19892_v57 = vld [vmem:[#allocation9 + $0x2e0] ss:$16 sps:$4 sm:$0xff]  }
 0x69a   :  { %v4945_v15 = vpack.c.bf16 %v4941_v31, %v4937_v19  ;;  %5781 = vmatprep.subr.bf16.mxu0 %v19858_v18  ;;  %5867 = vmatprep.subr.bf16.mxu1 %v19861_v29  ;;  %v23013_v40 = vpack.c.bf16 %v4940_v60, %v4936_v38  ;;  %v23017_v37 = vpack.c.bf16 %v22965_v21, %v22963_v20  ;;  %v19874_v20 = vld [vmem:[#allocation9 + $0x280] ss:$16 sps:$4 sm:$0xff]   ;;  %v19877_v21 = vld [vmem:[#allocation9 + $0x288] ss:$16 sps:$4 sm:$0xff]   ;;  %v19900_v63 = vld [vmem:[#allocation9 + $0x304] ss:$16 sps:$4 sm:$0xff]  }
 0x69b   :  { %v19895_v17 = vld [vmem:[#allocation9 + $0x2e8] ss:$16 sps:$4 sm:$0xff]   ;;  %v19903_v39 = vld [vmem:[#allocation9 + $0x30c] ss:$16 sps:$4 sm:$0xff]   ;;  %v19898_v62 = vld [vmem:[#allocation9 + $0x300] ss:$16 sps:$4 sm:$0xff]  }
 0x69c   :  { %5811 = vmatprep.mubr.bf16.mxu0 %v4945_v15  ;;  %5897 = vmatprep.mubr.bf16.mxu1 %v4945_v15  ;;  %v19901_v53 = vld [vmem:[#allocation9 + $0x308] ss:$16 sps:$4 sm:$0xff]   ;;  %v19906_v0 = vld [vmem:[#allocation9 + $0x324] ss:$16 sps:$4 sm:$0xff]   ;;  %v19909_v5 = vld [vmem:[#allocation9 + $0x32c] ss:$16 sps:$4 sm:$0xff]  }
 0x69d   :  { %5782 = vmatpush1.bf16.msra.mxu0 %v19856_v1  ;;  %5868 = vmatpush1.bf16.msra.mxu1 %v19859_v36  ;;  %v19904_v7 = vld [vmem:[#allocation9 + $0x320] ss:$16 sps:$4 sm:$0xff]   ;;  %v19907_v49 = vld [vmem:[#allocation9 + $0x328] ss:$16 sps:$4 sm:$0xff]   ;;  %v19912_v11 = vld [vmem:[#allocation9 + $0x344] ss:$16 sps:$4 sm:$0xff]  }
 0x69e   :  { %5783 = vmatprep.subr.bf16.mxu0 %v19864_v50  ;;  %5869 = vmatprep.subr.bf16.mxu1 %v19867_v2  ;;  %v19915_v14 = vld [vmem:[#allocation9 + $0x34c] ss:$16 sps:$4 sm:$0xff]   ;;  %v19910_v23 = vld [vmem:[#allocation9 + $0x340] ss:$16 sps:$4 sm:$0xff]   ;;  %v19913_v18 = vld [vmem:[#allocation9 + $0x348] ss:$16 sps:$4 sm:$0xff]  }
 0x69f   :  { %v19918_v29 = vld [vmem:[#allocation9 + $0x364] ss:$16 sps:$4 sm:$0xff]   ;;  %v19921_v9 = vld [vmem:[#allocation9 + $0x36c] ss:$16 sps:$4 sm:$0xff]   ;;  %v19916_v60 = vld [vmem:[#allocation9 + $0x360] ss:$16 sps:$4 sm:$0xff]  }
 0x6a0   :  { %v19919_v42 = vld [vmem:[#allocation9 + $0x368] ss:$16 sps:$4 sm:$0xff]   ;;  %v19924_v30 = vld [vmem:[#allocation9 + $0x384] ss:$16 sps:$4 sm:$0xff]   ;;  %v19927_v13 = vld [vmem:[#allocation9 + $0x38c] ss:$16 sps:$4 sm:$0xff]  }
 0x6a1   :  { %5784 = vmatpush1.bf16.msra.mxu0 %v19862_v10  ;;  %5870 = vmatpush1.bf16.msra.mxu1 %v19865_v43  ;;  %v19922_v32 = vld [vmem:[#allocation9 + $0x380] ss:$16 sps:$4 sm:$0xff]   ;;  %v19925_v31 = vld [vmem:[#allocation9 + $0x388] ss:$16 sps:$4 sm:$0xff]   ;;  %v19930_v35 = vld [vmem:[#allocation9 + $0x3a4] ss:$16 sps:$4 sm:$0xff]  }
 0x6a2   :  { %5785 = vmatprep.subr.bf16.mxu0 %v19870_v54  ;;  %5871 = vmatprep.subr.bf16.mxu1 %v19873_v44  ;;  %v19933_v19 = vld [vmem:[#allocation9 + $0x3ac] ss:$16 sps:$4 sm:$0xff]   ;;  %v19928_v1 = vld [vmem:[#allocation9 + $0x3a0] ss:$16 sps:$4 sm:$0xff]   ;;  %v19931_v36 = vld [vmem:[#allocation9 + $0x3a8] ss:$16 sps:$4 sm:$0xff]  }
 0x6a3   :  { %v19936_v38 = vld [vmem:[#allocation9 + $0x3c4] ss:$16 sps:$4 sm:$0xff]   ;;  %v19939_v15 = vld [vmem:[#allocation9 + $0x3cc] ss:$16 sps:$4 sm:$0xff]   ;;  %v19934_v50 = vld [vmem:[#allocation9 + $0x3c0] ss:$16 sps:$4 sm:$0xff]  }
 0x6a4   :  { %v19937_v2 = vld [vmem:[#allocation9 + $0x3c8] ss:$16 sps:$4 sm:$0xff]   ;;  %v19942_v10 = vld [vmem:[#allocation9 + $0x3e4] ss:$16 sps:$4 sm:$0xff]   ;;  %v19945_v43 = vld [vmem:[#allocation9 + $0x3ec] ss:$16 sps:$4 sm:$0xff]  }
 0x6a5   :  { %5786 = vmatpush1.bf16.msra.mxu0 %v19868_v45  ;;  %5872 = vmatpush1.bf16.msra.mxu1 %v19871_v47  ;;  %v19940_v54 = vld [vmem:[#allocation9 + $0x3e0] ss:$16 sps:$4 sm:$0xff]   ;;  %v19943_v44 = vld [vmem:[#allocation9 + $0x3e8] ss:$16 sps:$4 sm:$0xff]   ;;  %v19948_v45 = vld [vmem:[#allocation10 + $0x4] ss:$16 sps:$4 sm:$0xff]  }
 0x6a6   :  { %5787 = vmatprep.subr.bf16.mxu0 %v19876_v22  ;;  %5873 = vmatprep.subr.bf16.mxu1 %v19879_v41  ;;  %v19951_v47 = vld [vmem:[#allocation10 + $0xc] ss:$16 sps:$4 sm:$0xff]   ;;  %v19946_v22 = vld [vmem:[#allocation10] ss:$16 sps:$4 sm:$0xff]   ;;  %v19949_v41 = vld [vmem:[#allocation10 + $0x8] ss:$16 sps:$4 sm:$0xff]  }
 0x6a9   :  { %5788 = vmatpush1.bf16.msra.mxu0 %v19874_v20  ;;  %5874 = vmatpush1.bf16.msra.mxu1 %v19877_v21  ;;  %v19954_v20 = vld [vmem:[#allocation10 + $0x24] ss:$16 sps:$4 sm:$0xff]   ;;  %v19957_v21 = vld [vmem:[#allocation10 + $0x2c] ss:$16 sps:$4 sm:$0xff]  }
 0x6aa   :  { %5789 = vmatprep.subr.bf16.mxu0 %v19882_v59  ;;  %5875 = vmatprep.subr.bf16.mxu1 %v19885_v4  ;;  %v19952_v59 = vld [vmem:[#allocation10 + $0x20] ss:$16 sps:$4 sm:$0xff]   ;;  %v19955_v4 = vld [vmem:[#allocation10 + $0x28] ss:$16 sps:$4 sm:$0xff]  }
 0x6ad   :  { %5790 = vmatpush1.bf16.msra.mxu0 %v19880_v34  ;;  %5876 = vmatpush1.bf16.msra.mxu1 %v19883_v51  ;;  %v19960_v34 = vld [vmem:[#allocation10 + $0x44] ss:$16 sps:$4 sm:$0xff]   ;;  %v19963_v51 = vld [vmem:[#allocation10 + $0x4c] ss:$16 sps:$4 sm:$0xff]  }
 0x6ae   :  { %5791 = vmatprep.subr.bf16.mxu0 %v19888_v12  ;;  %5877 = vmatprep.subr.bf16.mxu1 %v19891_v48  ;;  %v19958_v12 = vld [vmem:[#allocation10 + $0x40] ss:$16 sps:$4 sm:$0xff]   ;;  %v19961_v48 = vld [vmem:[#allocation10 + $0x48] ss:$16 sps:$4 sm:$0xff]  }
 0x6b1   :  { %5792 = vmatpush1.bf16.msra.mxu0 %v19886_v52  ;;  %5878 = vmatpush1.bf16.msra.mxu1 %v19889_v56  ;;  %v19966_v52 = vld [vmem:[#allocation10 + $0x64] ss:$16 sps:$4 sm:$0xff]   ;;  %v19969_v56 = vld [vmem:[#allocation10 + $0x6c] ss:$16 sps:$4 sm:$0xff]  }
 0x6b2   :  { %5793 = vmatprep.subr.bf16.mxu0 %v19894_v46  ;;  %5879 = vmatprep.subr.bf16.mxu1 %v19897_v61  ;;  %v19964_v46 = vld [vmem:[#allocation10 + $0x60] ss:$16 sps:$4 sm:$0xff]   ;;  %v19972_v61 = vld [vmem:[#allocation10 + $0x84] ss:$16 sps:$4 sm:$0xff]  }
 0x6b5   :  { %5794 = vmatpush1.bf16.msra.mxu0 %v19892_v57  ;;  %5880 = vmatpush1.bf16.msra.mxu1 %v19895_v17  ;;  %v19975_v57 = vld [vmem:[#allocation10 + $0x8c] ss:$16 sps:$4 sm:$0xff]   ;;  %v19970_v17 = vld [vmem:[#allocation10 + $0x80] ss:$16 sps:$4 sm:$0xff]  }
 0x6b6   :  { %5795 = vmatprep.subr.bf16.mxu0 %v19900_v63  ;;  %5881 = vmatprep.subr.bf16.mxu1 %v19903_v39  ;;  %v19973_v63 = vld [vmem:[#allocation10 + $0x88] ss:$16 sps:$4 sm:$0xff]   ;;  %v19978_v39 = vld [vmem:[#allocation10 + $0xa4] ss:$16 sps:$4 sm:$0xff]  }
 0x6b9   :  { %5796 = vmatpush1.bf16.msra.mxu0 %v19898_v62  ;;  %5882 = vmatpush1.bf16.msra.mxu1 %v19901_v53  ;;  %v19981_v62 = vld [vmem:[#allocation10 + $0xac] ss:$16 sps:$4 sm:$0xff]   ;;  %v19976_v53 = vld [vmem:[#allocation10 + $0xa0] ss:$16 sps:$4 sm:$0xff]  }
 0x6ba   :  { %5797 = vmatprep.subr.bf16.mxu0 %v19906_v0  ;;  %5883 = vmatprep.subr.bf16.mxu1 %v19909_v5  ;;  %v19979_v0 = vld [vmem:[#allocation10 + $0xa8] ss:$16 sps:$4 sm:$0xff]   ;;  %v19984_v5 = vld [vmem:[#allocation10 + $0xc4] ss:$16 sps:$4 sm:$0xff]  }
 0x6bd   :  { %5798 = vmatpush1.bf16.msra.mxu0 %v19904_v7  ;;  %5884 = vmatpush1.bf16.msra.mxu1 %v19907_v49  ;;  %v19987_v7 = vld [vmem:[#allocation10 + $0xcc] ss:$16 sps:$4 sm:$0xff]   ;;  %v19982_v49 = vld [vmem:[#allocation10 + $0xc0] ss:$16 sps:$4 sm:$0xff]  }
 0x6be   :  { %5799 = vmatprep.subr.bf16.mxu0 %v19912_v11  ;;  %5885 = vmatprep.subr.bf16.mxu1 %v19915_v14  ;;  %v19985_v11 = vld [vmem:[#allocation10 + $0xc8] ss:$16 sps:$4 sm:$0xff]   ;;  %v19990_v14 = vld [vmem:[#allocation10 + $0xe4] ss:$16 sps:$4 sm:$0xff]  }
 0x6c1   :  { %5800 = vmatpush1.bf16.msra.mxu0 %v19910_v23  ;;  %5886 = vmatpush1.bf16.msra.mxu1 %v19913_v18  ;;  %v19993_v23 = vld [vmem:[#allocation10 + $0xec] ss:$16 sps:$4 sm:$0xff]   ;;  %v19988_v18 = vld [vmem:[#allocation10 + $0xe0] ss:$16 sps:$4 sm:$0xff]  }
 0x6c2   :  { %5801 = vmatprep.subr.bf16.mxu0 %v19918_v29  ;;  %5887 = vmatprep.subr.bf16.mxu1 %v19921_v9  ;;  %v19991_v29 = vld [vmem:[#allocation10 + $0xe8] ss:$16 sps:$4 sm:$0xff]   ;;  %v19996_v9 = vld [vmem:[#allocation10 + $0x104] ss:$16 sps:$4 sm:$0xff]  }
 0x6c5   :  { %5802 = vmatpush1.bf16.msra.mxu0 %v19916_v60  ;;  %5888 = vmatpush1.bf16.msra.mxu1 %v19919_v42  ;;  %v19999_v60 = vld [vmem:[#allocation10 + $0x10c] ss:$16 sps:$4 sm:$0xff]   ;;  %v19994_v42 = vld [vmem:[#allocation10 + $0x100] ss:$16 sps:$4 sm:$0xff]  }
 0x6c6   :  { %5803 = vmatprep.subr.bf16.mxu0 %v19924_v30  ;;  %5889 = vmatprep.subr.bf16.mxu1 %v19927_v13  ;;  %v19997_v30 = vld [vmem:[#allocation10 + $0x108] ss:$16 sps:$4 sm:$0xff]   ;;  %v20002_v13 = vld [vmem:[#allocation10 + $0x124] ss:$16 sps:$4 sm:$0xff]  }
 0x6c9   :  { %5804 = vmatpush1.bf16.msra.mxu0 %v19922_v32  ;;  %5890 = vmatpush1.bf16.msra.mxu1 %v19925_v31  ;;  %v20005_v32 = vld [vmem:[#allocation10 + $0x12c] ss:$16 sps:$4 sm:$0xff]   ;;  %v20000_v31 = vld [vmem:[#allocation10 + $0x120] ss:$16 sps:$4 sm:$0xff]  }
 0x6ca   :  { %5805 = vmatprep.subr.bf16.mxu0 %v19930_v35  ;;  %5891 = vmatprep.subr.bf16.mxu1 %v19933_v19  ;;  %v20003_v35 = vld [vmem:[#allocation10 + $0x128] ss:$16 sps:$4 sm:$0xff]   ;;  %v20008_v19 = vld [vmem:[#allocation10 + $0x144] ss:$16 sps:$4 sm:$0xff]  }
 0x6cd   :  { %5806 = vmatpush1.bf16.msra.mxu0 %v19928_v1  ;;  %5892 = vmatpush1.bf16.msra.mxu1 %v19931_v36  ;;  %v20011_v1 = vld [vmem:[#allocation10 + $0x14c] ss:$16 sps:$4 sm:$0xff]   ;;  %v20006_v36 = vld [vmem:[#allocation10 + $0x140] ss:$16 sps:$4 sm:$0xff]  }
 0x6ce   :  { %5807 = vmatprep.subr.bf16.mxu0 %v19936_v38  ;;  %5893 = vmatprep.subr.bf16.mxu1 %v19939_v15  ;;  %v20009_v38 = vld [vmem:[#allocation10 + $0x148] ss:$16 sps:$4 sm:$0xff]   ;;  %v20014_v15 = vld [vmem:[#allocation10 + $0x164] ss:$16 sps:$4 sm:$0xff]  }
 0x6d1   :  { %5808 = vmatpush1.bf16.msra.mxu0 %v19934_v50  ;;  %5894 = vmatpush1.bf16.msra.mxu1 %v19937_v2  ;;  %v20017_v50 = vld [vmem:[#allocation10 + $0x16c] ss:$16 sps:$4 sm:$0xff]   ;;  %v20012_v2 = vld [vmem:[#allocation10 + $0x160] ss:$16 sps:$4 sm:$0xff]  }
 0x6d2   :  { %5809 = vmatprep.subr.bf16.mxu0 %v19942_v10  ;;  %5895 = vmatprep.subr.bf16.mxu1 %v19945_v43  ;;  %v20015_v10 = vld [vmem:[#allocation10 + $0x168] ss:$16 sps:$4 sm:$0xff]   ;;  %v20020_v43 = vld [vmem:[#allocation10 + $0x184] ss:$16 sps:$4 sm:$0xff]  }
 0x6d5   :  { %5810 = vmatpush1.bf16.msra.mxu0 %v19940_v54  ;;  %5896 = vmatpush1.bf16.msra.mxu1 %v19943_v44  ;;  %v20023_v54 = vld [vmem:[#allocation10 + $0x18c] ss:$16 sps:$4 sm:$0xff]   ;;  %v20018_v44 = vld [vmem:[#allocation10 + $0x180] ss:$16 sps:$4 sm:$0xff]  }
 0x6d6   :  { %6742 = vmatprep.subr.bf16.mxu0 %v19948_v45  ;;  %6828 = vmatprep.subr.bf16.mxu1 %v19951_v47  ;;  %v20021_v45 = vld [vmem:[#allocation10 + $0x188] ss:$16 sps:$4 sm:$0xff]   ;;  %v20026_v47 = vld [vmem:[#allocation10 + $0x1a4] ss:$16 sps:$4 sm:$0xff]  }
 0x6d8   :  { %5812 = vmatmul.mubr.bf16.vlgmr.msra.gmra.mrb[16].mxu0 %v23013_v40  ;;  %5898 = vmatmul.mubr.bf16.vlgmr.msra.gmra.mrb[16].mxu1 %v23013_v40  ;;  %v19967_v40 = vld [vmem:[#allocation10 + $0x68] ss:$16 sps:$4 sm:$0xff]  }
 0x6d9   :  { %6743 = vmatpush1.bf16.msra.mxu0 %v19946_v22  ;;  %6829 = vmatpush1.bf16.msra.mxu1 %v19949_v41  ;;  %v20029_v22 = vld [vmem:[#allocation10 + $0x1ac] ss:$16 sps:$4 sm:$0xff]   ;;  %v20024_v41 = vld [vmem:[#allocation10 + $0x1a0] ss:$16 sps:$4 sm:$0xff]  }
 0x6da   :  { %6744 = vmatprep.subr.bf16.mxu0 %v19954_v20  ;;  %6830 = vmatprep.subr.bf16.mxu1 %v19957_v21  ;;  %v20027_v20 = vld [vmem:[#allocation10 + $0x1a8] ss:$16 sps:$4 sm:$0xff]   ;;  %v20032_v21 = vld [vmem:[#allocation10 + $0x1c4] ss:$16 sps:$4 sm:$0xff]  }
 0x6dd   :  { %6745 = vmatpush1.bf16.msra.mxu0 %v19952_v59  ;;  %6831 = vmatpush1.bf16.msra.mxu1 %v19955_v4  ;;  %v20035_v59 = vld [vmem:[#allocation10 + $0x1cc] ss:$16 sps:$4 sm:$0xff]   ;;  %v20030_v4 = vld [vmem:[#allocation10 + $0x1c0] ss:$16 sps:$4 sm:$0xff]  }
 0x6de   :  { %6746 = vmatprep.subr.bf16.mxu0 %v19960_v34  ;;  %6832 = vmatprep.subr.bf16.mxu1 %v19963_v51  ;;  %v20033_v34 = vld [vmem:[#allocation10 + $0x1c8] ss:$16 sps:$4 sm:$0xff]   ;;  %v20038_v51 = vld [vmem:[#allocation10 + $0x1e4] ss:$16 sps:$4 sm:$0xff]  }
 0x6e1   :  { %6747 = vmatpush1.bf16.msra.mxu0 %v19958_v12  ;;  %6833 = vmatpush1.bf16.msra.mxu1 %v19961_v48  ;;  %v20041_v12 = vld [vmem:[#allocation10 + $0x1ec] ss:$16 sps:$4 sm:$0xff]   ;;  %v20036_v48 = vld [vmem:[#allocation10 + $0x1e0] ss:$16 sps:$4 sm:$0xff]  }
 0x6e2   :  { %6748 = vmatprep.subr.bf16.mxu0 %v19966_v52  ;;  %6834 = vmatprep.subr.bf16.mxu1 %v19969_v56  ;;  %v20039_v52 = vld [vmem:[#allocation10 + $0x1e8] ss:$16 sps:$4 sm:$0xff]   ;;  %v20044_v56 = vld [vmem:[#allocation10 + $0x204] ss:$16 sps:$4 sm:$0xff]  }
 0x6e5   :  { %6749 = vmatpush1.bf16.msra.mxu0 %v19964_v46  ;;  %6835 = vmatpush1.bf16.msra.mxu1 %v19967_v40  ;;  %v20047_v46 = vld [vmem:[#allocation10 + $0x20c] ss:$16 sps:$4 sm:$0xff]   ;;  %v5074_v40 = vld [vmem:[%s23613_s7] sm:$0xf] }
 0x6e6   :  { %6750 = vmatprep.subr.bf16.mxu0 %v19972_v61  ;;  %6836 = vmatprep.subr.bf16.mxu1 %v19975_v57  ;;  %v5079_v61 = vrot.slane %v5074_v40, %v22680_v25  ;;  %v5087_v57 = vrot.slane %v5074_v40, %v22686_v27 }
 0x6e9   :  { %6751 = vmatpush1.bf16.msra.mxu0 %v19970_v17  ;;  %6837 = vmatpush1.bf16.msra.mxu1 %v19973_v63  ;;  %v5083_v17 = vrot.slane %v5074_v40, %v22683_v26  ;;  %v5091_v63 = vrot.slane %v5074_v40, %v22689_v28 }
 0x6ea   :  { %6752 = vmatprep.subr.bf16.mxu0 %v19978_v39  ;;  %6838 = vmatprep.subr.bf16.mxu1 %v19981_v62 }
 0x6ed   :  { %6753 = vmatpush1.bf16.msra.mxu0 %v19976_v53  ;;  %6839 = vmatpush1.bf16.msra.mxu1 %v19979_v0 }
 0x6ee   :  { %6754 = vmatprep.subr.bf16.mxu0 %v19984_v5  ;;  %6840 = vmatprep.subr.bf16.mxu1 %v19987_v7 }
 0x6f1   :  { %6755 = vmatpush1.bf16.msra.mxu0 %v19982_v49  ;;  %6841 = vmatpush1.bf16.msra.mxu1 %v19985_v11 }
 0x6f2   :  { %6756 = vmatprep.subr.bf16.mxu0 %v19990_v14  ;;  %6842 = vmatprep.subr.bf16.mxu1 %v19993_v23 }
 0x6f5   :  { %6757 = vmatpush1.bf16.msra.mxu0 %v19988_v18  ;;  %6843 = vmatpush1.bf16.msra.mxu1 %v19991_v29 }
 0x6f6   :  { %6758 = vmatprep.subr.bf16.mxu0 %v19996_v9  ;;  %6844 = vmatprep.subr.bf16.mxu1 %v19999_v60 }
 0x6f9   :  { %6759 = vmatpush1.bf16.msra.mxu0 %v19994_v42  ;;  %6845 = vmatpush1.bf16.msra.mxu1 %v19997_v30 }
 0x6fa   :  { %6760 = vmatprep.subr.bf16.mxu0 %v20002_v13  ;;  %6846 = vmatprep.subr.bf16.mxu1 %v20005_v32 }
 0x6fd   :  { %6761 = vmatpush1.bf16.msra.mxu0 %v20000_v31  ;;  %6847 = vmatpush1.bf16.msra.mxu1 %v20003_v35 }
 0x6fe   :  { %6762 = vmatprep.subr.bf16.mxu0 %v20008_v19  ;;  %6848 = vmatprep.subr.bf16.mxu1 %v20011_v1 }
 0x701   :  { %6763 = vmatpush1.bf16.msra.mxu0 %v20006_v36  ;;  %6849 = vmatpush1.bf16.msra.mxu1 %v20009_v38 }
 0x702   :  { %6764 = vmatprep.subr.bf16.mxu0 %v20014_v15  ;;  %6850 = vmatprep.subr.bf16.mxu1 %v20017_v50 }
 0x705   :  { %6765 = vmatpush1.bf16.msra.mxu0 %v20012_v2  ;;  %6851 = vmatpush1.bf16.msra.mxu1 %v20015_v10 }
 0x706   :  { %6766 = vmatprep.subr.bf16.mxu0 %v20020_v43  ;;  %6852 = vmatprep.subr.bf16.mxu1 %v20023_v54 }
 0x709   :  { %6767 = vmatpush1.bf16.msra.mxu0 %v20018_v44  ;;  %6853 = vmatpush1.bf16.msra.mxu1 %v20021_v45 }
 0x70a   :  { %6768 = vmatprep.subr.bf16.mxu0 %v20026_v47  ;;  %6854 = vmatprep.subr.bf16.mxu1 %v20029_v22 }
 0x70d   :  { %6769 = vmatpush1.bf16.msra.mxu0 %v20024_v41  ;;  %6855 = vmatpush1.bf16.msra.mxu1 %v20027_v20 }
 0x70e   :  { %6770 = vmatprep.subr.bf16.mxu0 %v20032_v21  ;;  %6856 = vmatprep.subr.bf16.mxu1 %v20035_v59 }
 0x711   :  { %6771 = vmatpush1.bf16.msra.mxu0 %v20030_v4  ;;  %6857 = vmatpush1.bf16.msra.mxu1 %v20033_v34 }
 0x712   :  { %6772 = vmatprep.subr.bf16.mxu0 %v20038_v51  ;;  %6858 = vmatprep.subr.bf16.mxu1 %v20041_v12 }
 0x715   :  { %6773 = vmatpush1.bf16.msra.mxu0 %v20036_v48  ;;  %6859 = vmatpush1.bf16.msra.mxu1 %v20039_v52 }
 0x716   :  { %6785 = vmatprep.subr.bf16.mxu0 %v20044_v56  ;;  %6871 = vmatprep.subr.bf16.mxu1 %v20047_v46 }
 0x7ab   :  { %v5813_v39 = vpop.f32.mrb[16].mxu0  ;;  %v5899_v62 = vpop.f32.mrb[16].mxu1 }
 0x7ac   :  { %v18709_v53 = vadd.f32 %v5813_v39, %v5079_v61  ;;  %v18713_v0 = vadd.f32 %v5899_v62, %v5087_v57  ;;  %v5815_v5 = vpop.f32.mrb[17].mxu0  ;;  %v5901_v7 = vpop.f32.mrb[17].mxu1 }
 0x7ad   :  { %v18710_v49 = vadd.f32 %v5815_v5, %v5083_v17  ;;  %v18714_v11 = vadd.f32 %v5901_v7, %v5091_v63  ;;  %v5817_v14 = vpop.f32.mrb[18].mxu0  ;;  %v5903_v23 = vpop.f32.mrb[18].mxu1  ;;  %v20050_v5 = vld [vmem:[#allocation10 + $0x224] ss:$16 sps:$4 sm:$0xff]   ;;  %v20048_v7 = vld [vmem:[#allocation10 + $0x220] ss:$16 sps:$4 sm:$0xff]  }
 0x7ae   :  { %v5916_v18 = vmul.f32 1.442695, %v18709_v53  ;;  %v5920_v29 = vmul.f32 1.442695, %v18713_v0  ;;  %v18711_v42 = vadd.f32 %v5817_v14, %v5079_v61  ;;  %v18715_v30 = vadd.f32 %v5903_v23, %v5087_v57  ;;  %v5819_v13 = vpop.f32.mrb[19].mxu0  ;;  %v5905_v32 = vpop.f32.mrb[19].mxu1 }
 0x7af   :  { %v5918_v9 = vmul.f32 1.442695, %v18710_v49  ;;  %v5922_v60 = vmul.f32 1.442695, %v18714_v11  ;;  %v18712_v31 = vadd.f32 %v5819_v13, %v5083_v17  ;;  %v18716_v35 = vadd.f32 %v5905_v32, %v5091_v63  ;;  %v20042_v17 = vld [vmem:[#allocation10 + $0x200] ss:$16 sps:$4 sm:$0xff]  }
 0x7b0   :  { %21823 = vpow2.f32 %v5916_v18  ;;  %v5924_v19 = vmul.f32 1.442695, %v18711_v42  ;;  %v5928_v1 = vmul.f32 1.442695, %v18715_v30  ;;  %vm5908_vm5 = vcmp.gt.f32.partialorder %v18709_v53, 0.0 }
 0x7b1   :  { %21825 = vpow2.f32 %v5920_v29  ;;  %v5926_v36 = vmul.f32 1.442695, %v18712_v31  ;;  %v5930_v38 = vmul.f32 1.442695, %v18716_v35  ;;  %vm5910_vm6 = vcmp.gt.f32.partialorder %v18713_v0, 0.0 }
 0x7b2   :  { %21827 = vpow2.f32 %v5918_v9  ;;  %vm5909_vm7 = vcmp.gt.f32.partialorder %v18710_v49, 0.0  ;;  %vm5911_vm8 = vcmp.gt.f32.partialorder %v18714_v11, 0.0  ;;  %vm5912_vm9 = vcmp.gt.f32.partialorder %v18711_v42, 0.0  ;;  %v20045_v63 = vld [vmem:[#allocation10 + $0x208] ss:$16 sps:$4 sm:$0xff]  }
 0x7b3   :  { %21829 = vpow2.f32 %v5922_v60  ;;  %vm5914_vm11 = vcmp.gt.f32.partialorder %v18715_v30, 0.0  ;;  %vm5913_vm1 = vcmp.gt.f32.partialorder %v18712_v31, 0.0  ;;  %vm5915_vm4 = vcmp.gt.f32.partialorder %v18716_v35, 0.0  ;;  %v20051_v14 = vld [vmem:[#allocation10 + $0x228] ss:$16 sps:$4 sm:$0xff]  }
 0x7b4   :  { %21831 = vpow2.f32 %v5924_v19  ;;  %v20059_v23 = vld [vmem:[#allocation10 + $0x24c] ss:$16 sps:$4 sm:$0xff]   ;;  %v20057_v18 = vld [vmem:[#allocation10 + $0x248] ss:$16 sps:$4 sm:$0xff]   ;;  %v20062_v29 = vld [vmem:[#allocation10 + $0x264] ss:$16 sps:$4 sm:$0xff]  }
 0x7b5   :  { %21833 = vpow2.f32 %v5928_v1  ;;  %v20065_v9 = vld [vmem:[#allocation10 + $0x26c] ss:$16 sps:$4 sm:$0xff]   ;;  %v20060_v60 = vld [vmem:[#allocation10 + $0x260] ss:$16 sps:$4 sm:$0xff]  }
 0x7b6   :  { %21835 = vpow2.f32 %v5926_v36  ;;  %v20071_v13 = vld [vmem:[#allocation10 + $0x28c] ss:$16 sps:$4 sm:$0xff]   ;;  %v20066_v32 = vld [vmem:[#allocation10 + $0x280] ss:$16 sps:$4 sm:$0xff]   ;;  %v20075_v36 = vld [vmem:[#allocation10 + $0x2a8] ss:$16 sps:$4 sm:$0xff]  }
 0x7b7   :  { %21837 = vpow2.f32 %v5930_v38  ;;  %v20077_v19 = vld [vmem:[#allocation10 + $0x2ac] ss:$16 sps:$4 sm:$0xff]   ;;  %v20072_v1 = vld [vmem:[#allocation10 + $0x2a0] ss:$16 sps:$4 sm:$0xff]   ;;  %v20080_v38 = vld [vmem:[#allocation10 + $0x2c4] ss:$16 sps:$4 sm:$0xff]  }
 0x7ba   :  { %v21824_v15 = vpop.eup %21823 }
 0x7bb   :  { %v21826_v50 = vpop.eup %21825  ;;  %v17335_v43 = vadd.f32 -1.0, %v21824_v15  ;;  %v20083_v15 = vld [vmem:[#allocation10 + $0x2cc] ss:$16 sps:$4 sm:$0xff]  }
 0x7bc   :  { %v21828_v2 = vpop.eup %21827  ;;  %v17337_v44 = vadd.f32 -1.0, %v21826_v50  ;;  %v20078_v50 = vld [vmem:[#allocation10 + $0x2c0] ss:$16 sps:$4 sm:$0xff]  }
 0x7bd   :  { %v21830_v10 = vpop.eup %21829  ;;  %v17336_v47 = vadd.f32 -1.0, %v21828_v2  ;;  %v5940_v4 = vsel %vm5908_vm5, %v18709_v53, %v17335_v43  ;;  %v20081_v2 = vld [vmem:[#allocation10 + $0x2c8] ss:$16 sps:$4 sm:$0xff]   ;;  %v20089_v43 = vld [vmem:[#allocation10 + $0x2ec] ss:$16 sps:$4 sm:$0xff]  }
 0x7be   :  { %v21832_v54 = vpop.eup %21831  ;;  %v17338_v20 = vadd.f32 -1.0, %v21830_v10  ;;  %v5942_v12 = vsel %vm5910_vm6, %v18713_v0, %v17337_v44  ;;  %v20053_v0 = vld [vmem:[#allocation10 + $0x22c] ss:$16 sps:$4 sm:$0xff]   ;;  %v20086_v10 = vld [vmem:[#allocation10 + $0x2e4] ss:$16 sps:$4 sm:$0xff]  }
 0x7bf   :  { %v21834_v45 = vpop.eup %21833  ;;  %v17339_v22 = vadd.f32 -1.0, %v21832_v54  ;;  %v5941_v40 = vsel %vm5909_vm7, %v18710_v49, %v17336_v47  ;;  %v20056_v49 = vld [vmem:[#allocation10 + $0x244] ss:$16 sps:$4 sm:$0xff]   ;;  %v20084_v54 = vld [vmem:[#allocation10 + $0x2e0] ss:$16 sps:$4 sm:$0xff]  }
 0x7c0   :  { %v21836_v41 = vpop.eup %21835  ;;  %v17341_v21 = vadd.f32 -1.0, %v21834_v45  ;;  %v5943_v39 = vsel %vm5911_vm8, %v18714_v11, %v17338_v20  ;;  %v20054_v11 = vld [vmem:[#allocation10 + $0x240] ss:$16 sps:$4 sm:$0xff]   ;;  %v20087_v44 = vld [vmem:[#allocation10 + $0x2e8] ss:$16 sps:$4 sm:$0xff]  }
 0x7c1   :  { %v21838_v59 = vpop.eup %21837  ;;  %v5944_v34 = vsel %vm5912_vm9, %v18711_v42, %v17339_v22  ;;  %v17340_v51 = vadd.f32 -1.0, %v21836_v41  ;;  %v20063_v42 = vld [vmem:[#allocation10 + $0x268] ss:$16 sps:$4 sm:$0xff]   ;;  %v20092_v45 = vld [vmem:[#allocation10 + $0x304] ss:$16 sps:$4 sm:$0xff]  }
 0x7c2   :  { %v5948_v48 = vpack.c.bf16 %v5944_v34, %v5940_v4  ;;  %v5946_v52 = vsel %vm5914_vm11, %v18715_v30, %v17341_v21  ;;  %v17342_v56 = vadd.f32 -1.0, %v21838_v59  ;;  %v20068_v30 = vld [vmem:[#allocation10 + $0x284] ss:$16 sps:$4 sm:$0xff]   ;;  %v20095_v47 = vld [vmem:[#allocation10 + $0x30c] ss:$16 sps:$4 sm:$0xff]  }
 0x7c3   :  { %v23027_v46 = vpack.c.bf16 %v5946_v52, %v5942_v12  ;;  %v5945_v61 = vsel %vm5913_vm1, %v18712_v31, %v17340_v51  ;;  %v20069_v31 = vld [vmem:[#allocation10 + $0x288] ss:$16 sps:$4 sm:$0xff]   ;;  %v20090_v22 = vld [vmem:[#allocation10 + $0x300] ss:$16 sps:$4 sm:$0xff]   ;;  %v20098_v20 = vld [vmem:[#allocation10 + $0x324] ss:$16 sps:$4 sm:$0xff]  }
 0x7c4   :  { %v5949_v57 = vpack.c.bf16 %v5945_v61, %v5941_v40  ;;  %v5947_v62 = vsel %vm5915_vm4, %v18716_v35, %v17342_v56  ;;  %v20074_v35 = vld [vmem:[#allocation10 + $0x2a4] ss:$16 sps:$4 sm:$0xff]   ;;  %v20093_v41 = vld [vmem:[#allocation10 + $0x308] ss:$16 sps:$4 sm:$0xff]   ;;  %v20101_v21 = vld [vmem:[#allocation10 + $0x32c] ss:$16 sps:$4 sm:$0xff]  }
 0x7c5   :  { %v5951_v53 = vpack.c.bf16 %v5947_v62, %v5943_v39  ;;  %v20096_v59 = vld [vmem:[#allocation10 + $0x320] ss:$16 sps:$4 sm:$0xff]   ;;  %v20099_v4 = vld [vmem:[#allocation10 + $0x328] ss:$16 sps:$4 sm:$0xff]   ;;  %v20104_v34 = vld [vmem:[#allocation10 + $0x344] ss:$16 sps:$4 sm:$0xff]  }
 0x7c6   :  { %6774 = vmatprep.mubr.bf16.mxu0 %v5949_v57  ;;  %6860 = vmatprep.mubr.bf16.mxu1 %v5949_v57  ;;  %v20107_v51 = vld [vmem:[#allocation10 + $0x34c] ss:$16 sps:$4 sm:$0xff]   ;;  %v20102_v12 = vld [vmem:[#allocation10 + $0x340] ss:$16 sps:$4 sm:$0xff]   ;;  %v20110_v52 = vld [vmem:[#allocation10 + $0x364] ss:$16 sps:$4 sm:$0xff]  }
 0x7c7   :  { %6775 = vmatmul.mubr.bf16.vlgmr.msra.gmra.mrb[20].mxu0 %v5948_v48  ;;  %6861 = vmatmul.mubr.bf16.vlgmr.msra.gmra.mrb[20].mxu1 %v5948_v48  ;;  %v20105_v48 = vld [vmem:[#allocation10 + $0x348] ss:$16 sps:$4 sm:$0xff]   ;;  %v20113_v56 = vld [vmem:[#allocation10 + $0x36c] ss:$16 sps:$4 sm:$0xff]   ;;  %v20108_v40 = vld [vmem:[#allocation10 + $0x360] ss:$16 sps:$4 sm:$0xff]  }
 0x7c8   :  { %6786 = vmatpush1.bf16.msra.mxu0 %v20042_v17  ;;  %6872 = vmatpush1.bf16.msra.mxu1 %v20045_v63  ;;  %v20111_v61 = vld [vmem:[#allocation10 + $0x368] ss:$16 sps:$4 sm:$0xff]   ;;  %v20116_v57 = vld [vmem:[#allocation10 + $0x384] ss:$16 sps:$4 sm:$0xff]   ;;  %v20119_v17 = vld [vmem:[#allocation10 + $0x38c] ss:$16 sps:$4 sm:$0xff]  }
 0x7c9   :  { %6817 = vmatprep.mubr.bf16.mxu0 %v5951_v53  ;;  %6903 = vmatprep.mubr.bf16.mxu1 %v5951_v53  ;;  %v20114_v63 = vld [vmem:[#allocation10 + $0x380] ss:$16 sps:$4 sm:$0xff]   ;;  %v20117_v39 = vld [vmem:[#allocation10 + $0x388] ss:$16 sps:$4 sm:$0xff]   ;;  %v20122_v62 = vld [vmem:[#allocation10 + $0x3a4] ss:$16 sps:$4 sm:$0xff]  }
 0x7ca   :  { %6787 = vmatprep.subr.bf16.mxu0 %v20050_v5  ;;  %6873 = vmatprep.subr.bf16.mxu1 %v20053_v0  ;;  %v20125_v53 = vld [vmem:[#allocation10 + $0x3ac] ss:$16 sps:$4 sm:$0xff]   ;;  %v20120_v5 = vld [vmem:[#allocation10 + $0x3a0] ss:$16 sps:$4 sm:$0xff]   ;;  %v20123_v0 = vld [vmem:[#allocation10 + $0x3a8] ss:$16 sps:$4 sm:$0xff]  }
 0x7cc   :  { %6788 = vmatpush1.bf16.msra.mxu0 %v20048_v7  ;;  %6874 = vmatpush1.bf16.msra.mxu1 %v20051_v14  ;;  %v20128_v7 = vld [vmem:[#allocation10 + $0x3c4] ss:$16 sps:$4 sm:$0xff]   ;;  %v20131_v14 = vld [vmem:[#allocation10 + $0x3cc] ss:$16 sps:$4 sm:$0xff]  }
 0x7cd   :  { %6789 = vmatprep.subr.bf16.mxu0 %v20056_v49  ;;  %6875 = vmatprep.subr.bf16.mxu1 %v20059_v23  ;;  %v20126_v49 = vld [vmem:[#allocation10 + $0x3c0] ss:$16 sps:$4 sm:$0xff]   ;;  %v20129_v23 = vld [vmem:[#allocation10 + $0x3c8] ss:$16 sps:$4 sm:$0xff]  }
 0x7d0   :  { %6790 = vmatpush1.bf16.msra.mxu0 %v20054_v11  ;;  %6876 = vmatpush1.bf16.msra.mxu1 %v20057_v18  ;;  %v20134_v11 = vld [vmem:[#allocation10 + $0x3e4] ss:$16 sps:$4 sm:$0xff]   ;;  %v20137_v18 = vld [vmem:[#allocation10 + $0x3ec] ss:$16 sps:$4 sm:$0xff]  }
 0x7d1   :  { %6791 = vmatprep.subr.bf16.mxu0 %v20062_v29  ;;  %6877 = vmatprep.subr.bf16.mxu1 %v20065_v9  ;;  %v20132_v29 = vld [vmem:[#allocation10 + $0x3e0] ss:$16 sps:$4 sm:$0xff]   ;;  %v20135_v9 = vld [vmem:[#allocation10 + $0x3e8] ss:$16 sps:$4 sm:$0xff]  }
 0x7d4   :  { %6792 = vmatpush1.bf16.msra.mxu0 %v20060_v60  ;;  %6878 = vmatpush1.bf16.msra.mxu1 %v20063_v42  ;;  %v20140_v60 = vld [vmem:[#allocation13 + $0x4] ss:$16 sps:$4 sm:$0xff]   ;;  %v20143_v42 = vld [vmem:[#allocation13 + $0xc] ss:$16 sps:$4 sm:$0xff]  }
 0x7d5   :  { %6793 = vmatprep.subr.bf16.mxu0 %v20068_v30  ;;  %6879 = vmatprep.subr.bf16.mxu1 %v20071_v13  ;;  %v20138_v30 = vld [vmem:[#allocation13] ss:$16 sps:$4 sm:$0xff]   ;;  %v20141_v13 = vld [vmem:[#allocation13 + $0x8] ss:$16 sps:$4 sm:$0xff]  }
 0x7d8   :  { %6794 = vmatpush1.bf16.msra.mxu0 %v20066_v32  ;;  %6880 = vmatpush1.bf16.msra.mxu1 %v20069_v31  ;;  %v20146_v32 = vld [vmem:[#allocation13 + $0x24] ss:$16 sps:$4 sm:$0xff]   ;;  %v20149_v31 = vld [vmem:[#allocation13 + $0x2c] ss:$16 sps:$4 sm:$0xff]  }
 0x7d9   :  { %6795 = vmatprep.subr.bf16.mxu0 %v20074_v35  ;;  %6881 = vmatprep.subr.bf16.mxu1 %v20077_v19  ;;  %v20144_v35 = vld [vmem:[#allocation13 + $0x20] ss:$16 sps:$4 sm:$0xff]   ;;  %v20147_v19 = vld [vmem:[#allocation13 + $0x28] ss:$16 sps:$4 sm:$0xff]  }
 0x7dc   :  { %6796 = vmatpush1.bf16.msra.mxu0 %v20072_v1  ;;  %6882 = vmatpush1.bf16.msra.mxu1 %v20075_v36  ;;  %v20152_v1 = vld [vmem:[#allocation13 + $0x44] ss:$16 sps:$4 sm:$0xff]   ;;  %v20155_v36 = vld [vmem:[#allocation13 + $0x4c] ss:$16 sps:$4 sm:$0xff]  }
 0x7dd   :  { %6797 = vmatprep.subr.bf16.mxu0 %v20080_v38  ;;  %6883 = vmatprep.subr.bf16.mxu1 %v20083_v15  ;;  %v20150_v38 = vld [vmem:[#allocation13 + $0x40] ss:$16 sps:$4 sm:$0xff]   ;;  %v20153_v15 = vld [vmem:[#allocation13 + $0x48] ss:$16 sps:$4 sm:$0xff]  }
 0x7e0   :  { %6798 = vmatpush1.bf16.msra.mxu0 %v20078_v50  ;;  %6884 = vmatpush1.bf16.msra.mxu1 %v20081_v2  ;;  %v20158_v50 = vld [vmem:[#allocation13 + $0x64] ss:$16 sps:$4 sm:$0xff]   ;;  %v20156_v2 = vld [vmem:[#allocation13 + $0x60] ss:$16 sps:$4 sm:$0xff]  }
 0x7e1   :  { %6799 = vmatprep.subr.bf16.mxu0 %v20086_v10  ;;  %6885 = vmatprep.subr.bf16.mxu1 %v20089_v43  ;;  %v20159_v10 = vld [vmem:[#allocation13 + $0x68] ss:$16 sps:$4 sm:$0xff]   ;;  %v20164_v43 = vld [vmem:[#allocation13 + $0x84] ss:$16 sps:$4 sm:$0xff]  }
 0x7e4   :  { %6800 = vmatpush1.bf16.msra.mxu0 %v20084_v54  ;;  %6886 = vmatpush1.bf16.msra.mxu1 %v20087_v44  ;;  %v20167_v54 = vld [vmem:[#allocation13 + $0x8c] ss:$16 sps:$4 sm:$0xff]   ;;  %v20162_v44 = vld [vmem:[#allocation13 + $0x80] ss:$16 sps:$4 sm:$0xff]  }
 0x7e5   :  { %6801 = vmatprep.subr.bf16.mxu0 %v20092_v45  ;;  %6887 = vmatprep.subr.bf16.mxu1 %v20095_v47  ;;  %v20165_v45 = vld [vmem:[#allocation13 + $0x88] ss:$16 sps:$4 sm:$0xff]   ;;  %v20170_v47 = vld [vmem:[#allocation13 + $0xa4] ss:$16 sps:$4 sm:$0xff]  }
 0x7e8   :  { %6802 = vmatpush1.bf16.msra.mxu0 %v20090_v22  ;;  %6888 = vmatpush1.bf16.msra.mxu1 %v20093_v41  ;;  %v20173_v22 = vld [vmem:[#allocation13 + $0xac] ss:$16 sps:$4 sm:$0xff]   ;;  %v20168_v41 = vld [vmem:[#allocation13 + $0xa0] ss:$16 sps:$4 sm:$0xff]  }
 0x7e9   :  { %6803 = vmatprep.subr.bf16.mxu0 %v20098_v20  ;;  %6889 = vmatprep.subr.bf16.mxu1 %v20101_v21  ;;  %v20171_v20 = vld [vmem:[#allocation13 + $0xa8] ss:$16 sps:$4 sm:$0xff]   ;;  %v20176_v21 = vld [vmem:[#allocation13 + $0xc4] ss:$16 sps:$4 sm:$0xff]  }
 0x7ec   :  { %6804 = vmatpush1.bf16.msra.mxu0 %v20096_v59  ;;  %6890 = vmatpush1.bf16.msra.mxu1 %v20099_v4  ;;  %v20179_v59 = vld [vmem:[#allocation13 + $0xcc] ss:$16 sps:$4 sm:$0xff]   ;;  %v20174_v4 = vld [vmem:[#allocation13 + $0xc0] ss:$16 sps:$4 sm:$0xff]  }
 0x7ed   :  { %6805 = vmatprep.subr.bf16.mxu0 %v20104_v34  ;;  %6891 = vmatprep.subr.bf16.mxu1 %v20107_v51  ;;  %v20177_v34 = vld [vmem:[#allocation13 + $0xc8] ss:$16 sps:$4 sm:$0xff]   ;;  %v20182_v51 = vld [vmem:[#allocation13 + $0xe4] ss:$16 sps:$4 sm:$0xff]  }
 0x7f0   :  { %6806 = vmatpush1.bf16.msra.mxu0 %v20102_v12  ;;  %6892 = vmatpush1.bf16.msra.mxu1 %v20105_v48  ;;  %v20185_v12 = vld [vmem:[#allocation13 + $0xec] ss:$16 sps:$4 sm:$0xff]   ;;  %v20180_v48 = vld [vmem:[#allocation13 + $0xe0] ss:$16 sps:$4 sm:$0xff]  }
 0x7f1   :  { %6807 = vmatprep.subr.bf16.mxu0 %v20110_v52  ;;  %6893 = vmatprep.subr.bf16.mxu1 %v20113_v56  ;;  %v20183_v52 = vld [vmem:[#allocation13 + $0xe8] ss:$16 sps:$4 sm:$0xff]   ;;  %v20188_v56 = vld [vmem:[#allocation13 + $0x104] ss:$16 sps:$4 sm:$0xff]  }
 0x7f4   :  { %6808 = vmatpush1.bf16.msra.mxu0 %v20108_v40  ;;  %6894 = vmatpush1.bf16.msra.mxu1 %v20111_v61  ;;  %v20191_v40 = vld [vmem:[#allocation13 + $0x10c] ss:$16 sps:$4 sm:$0xff]   ;;  %v20186_v61 = vld [vmem:[#allocation13 + $0x100] ss:$16 sps:$4 sm:$0xff]  }
 0x7f5   :  { %6809 = vmatprep.subr.bf16.mxu0 %v20116_v57  ;;  %6895 = vmatprep.subr.bf16.mxu1 %v20119_v17  ;;  %v20189_v57 = vld [vmem:[#allocation13 + $0x108] ss:$16 sps:$4 sm:$0xff]   ;;  %v20194_v17 = vld [vmem:[#allocation13 + $0x124] ss:$16 sps:$4 sm:$0xff]  }
 0x7f8   :  { %6810 = vmatpush1.bf16.msra.mxu0 %v20114_v63  ;;  %6896 = vmatpush1.bf16.msra.mxu1 %v20117_v39  ;;  %v20197_v63 = vld [vmem:[#allocation13 + $0x12c] ss:$16 sps:$4 sm:$0xff]   ;;  %v20192_v39 = vld [vmem:[#allocation13 + $0x120] ss:$16 sps:$4 sm:$0xff]  }
 0x7f9   :  { %6811 = vmatprep.subr.bf16.mxu0 %v20122_v62  ;;  %6897 = vmatprep.subr.bf16.mxu1 %v20125_v53  ;;  %v20195_v62 = vld [vmem:[#allocation13 + $0x128] ss:$16 sps:$4 sm:$0xff]   ;;  %v20200_v53 = vld [vmem:[#allocation13 + $0x144] ss:$16 sps:$4 sm:$0xff]  }
 0x7fc   :  { %6812 = vmatpush1.bf16.msra.mxu0 %v20120_v5  ;;  %6898 = vmatpush1.bf16.msra.mxu1 %v20123_v0  ;;  %v20203_v5 = vld [vmem:[#allocation13 + $0x14c] ss:$16 sps:$4 sm:$0xff]   ;;  %v20198_v0 = vld [vmem:[#allocation13 + $0x140] ss:$16 sps:$4 sm:$0xff]  }
 0x7fd   :  { %6813 = vmatprep.subr.bf16.mxu0 %v20128_v7  ;;  %6899 = vmatprep.subr.bf16.mxu1 %v20131_v14  ;;  %v20201_v7 = vld [vmem:[#allocation13 + $0x148] ss:$16 sps:$4 sm:$0xff]   ;;  %v20206_v14 = vld [vmem:[#allocation13 + $0x164] ss:$16 sps:$4 sm:$0xff]  }
 0x800   :  { %6814 = vmatpush1.bf16.msra.mxu0 %v20126_v49  ;;  %6900 = vmatpush1.bf16.msra.mxu1 %v20129_v23  ;;  %v20209_v49 = vld [vmem:[#allocation13 + $0x16c] ss:$16 sps:$4 sm:$0xff]   ;;  %v20204_v23 = vld [vmem:[#allocation13 + $0x160] ss:$16 sps:$4 sm:$0xff]  }
 0x801   :  { %6815 = vmatprep.subr.bf16.mxu0 %v20134_v11  ;;  %6901 = vmatprep.subr.bf16.mxu1 %v20137_v18  ;;  %v20207_v11 = vld [vmem:[#allocation13 + $0x168] ss:$16 sps:$4 sm:$0xff]   ;;  %v20212_v18 = vld [vmem:[#allocation13 + $0x184] ss:$16 sps:$4 sm:$0xff]  }
 0x804   :  { %6816 = vmatpush1.bf16.msra.mxu0 %v20132_v29  ;;  %6902 = vmatpush1.bf16.msra.mxu1 %v20135_v9  ;;  %v20215_v29 = vld [vmem:[#allocation13 + $0x18c] ss:$16 sps:$4 sm:$0xff]   ;;  %v20210_v9 = vld [vmem:[#allocation13 + $0x180] ss:$16 sps:$4 sm:$0xff]  }
 0x805   :  { %8046 = vmatprep.subr.bf16.mxu0 %v20140_v60  ;;  %8132 = vmatprep.subr.bf16.mxu1 %v20143_v42  ;;  %v20213_v60 = vld [vmem:[#allocation13 + $0x188] ss:$16 sps:$4 sm:$0xff]   ;;  %v20218_v42 = vld [vmem:[#allocation13 + $0x1a4] ss:$16 sps:$4 sm:$0xff]  }
 0x807   :  { %6818 = vmatmul.mubr.bf16.vlgmr.msra.gmra.mrb[20].mxu0 %v23027_v46  ;;  %6904 = vmatmul.mubr.bf16.vlgmr.msra.gmra.mrb[20].mxu1 %v23027_v46  ;;  %v20161_v46 = vld [vmem:[#allocation13 + $0x6c] ss:$16 sps:$4 sm:$0xff]  }
 0x808   :  { %8047 = vmatpush1.bf16.msra.mxu0 %v20138_v30  ;;  %8133 = vmatpush1.bf16.msra.mxu1 %v20141_v13  ;;  %v20221_v30 = vld [vmem:[#allocation13 + $0x1ac] ss:$16 sps:$4 sm:$0xff]   ;;  %v20216_v13 = vld [vmem:[#allocation13 + $0x1a0] ss:$16 sps:$4 sm:$0xff]  }
 0x809   :  { %8048 = vmatprep.subr.bf16.mxu0 %v20146_v32  ;;  %8134 = vmatprep.subr.bf16.mxu1 %v20149_v31  ;;  %v20219_v32 = vld [vmem:[#allocation13 + $0x1a8] ss:$16 sps:$4 sm:$0xff]   ;;  %v20222_v31 = vld [vmem:[#allocation13 + $0x1c0] ss:$16 sps:$4 sm:$0xff]  }
 0x80c   :  { %8049 = vmatpush1.bf16.msra.mxu0 %v20144_v35  ;;  %8135 = vmatpush1.bf16.msra.mxu1 %v20147_v19  ;;  %v20224_v35 = vld [vmem:[#allocation13 + $0x1c4] ss:$16 sps:$4 sm:$0xff]   ;;  %v20225_v19 = vld [vmem:[#allocation13 + $0x1c8] ss:$16 sps:$4 sm:$0xff]  }
 0x80d   :  { %8050 = vmatprep.subr.bf16.mxu0 %v20152_v1  ;;  %8136 = vmatprep.subr.bf16.mxu1 %v20155_v36  ;;  %v20227_v1 = vld [vmem:[#allocation13 + $0x1cc] ss:$16 sps:$4 sm:$0xff]   ;;  %v20230_v36 = vld [vmem:[#allocation13 + $0x1e4] ss:$16 sps:$4 sm:$0xff]  }
 0x810   :  { %8051 = vmatpush1.bf16.msra.mxu0 %v20150_v38  ;;  %8137 = vmatpush1.bf16.msra.mxu1 %v20153_v15  ;;  %v20233_v38 = vld [vmem:[#allocation13 + $0x1ec] ss:$16 sps:$4 sm:$0xff]   ;;  %v20228_v15 = vld [vmem:[#allocation13 + $0x1e0] ss:$16 sps:$4 sm:$0xff]  }
 0x811   :  { %8052 = vmatprep.subr.bf16.mxu0 %v20158_v50  ;;  %8138 = vmatprep.subr.bf16.mxu1 %v20161_v46  ;;  %v20231_v50 = vld [vmem:[#allocation13 + $0x1e8] ss:$16 sps:$4 sm:$0xff]   ;;  %v20236_v46 = vld [vmem:[#allocation13 + $0x204] ss:$16 sps:$4 sm:$0xff]  }
 0x814   :  { %8053 = vmatpush1.bf16.msra.mxu0 %v20156_v2  ;;  %8139 = vmatpush1.bf16.msra.mxu1 %v20159_v10  ;;  %v20239_v2 = vld [vmem:[#allocation13 + $0x20c] ss:$16 sps:$4 sm:$0xff]   ;;  %v6080_v10 = vld [vmem:[%s23614_s0] sm:$0xf] }
 0x815   :  { %8054 = vmatprep.subr.bf16.mxu0 %v20164_v43  ;;  %8140 = vmatprep.subr.bf16.mxu1 %v20167_v54  ;;  %v6085_v43 = vrot.slane %v6080_v10, %v22680_v25  ;;  %v6093_v54 = vrot.slane %v6080_v10, %v22686_v27 }
 0x818   :  { %8055 = vmatpush1.bf16.msra.mxu0 %v20162_v44  ;;  %8141 = vmatpush1.bf16.msra.mxu1 %v20165_v45  ;;  %v6089_v44 = vrot.slane %v6080_v10, %v22683_v26  ;;  %v6097_v45 = vrot.slane %v6080_v10, %v22689_v28 }
 0x819   :  { %8056 = vmatprep.subr.bf16.mxu0 %v20170_v47  ;;  %8142 = vmatprep.subr.bf16.mxu1 %v20173_v22 }
 0x81c   :  { %8057 = vmatpush1.bf16.msra.mxu0 %v20168_v41  ;;  %8143 = vmatpush1.bf16.msra.mxu1 %v20171_v20 }
 0x81d   :  { %8058 = vmatprep.subr.bf16.mxu0 %v20176_v21  ;;  %8144 = vmatprep.subr.bf16.mxu1 %v20179_v59 }
 0x820   :  { %8059 = vmatpush1.bf16.msra.mxu0 %v20174_v4  ;;  %8145 = vmatpush1.bf16.msra.mxu1 %v20177_v34 }
 0x821   :  { %8060 = vmatprep.subr.bf16.mxu0 %v20182_v51  ;;  %8146 = vmatprep.subr.bf16.mxu1 %v20185_v12 }
 0x824   :  { %8061 = vmatpush1.bf16.msra.mxu0 %v20180_v48  ;;  %8147 = vmatpush1.bf16.msra.mxu1 %v20183_v52 }
 0x825   :  { %8062 = vmatprep.subr.bf16.mxu0 %v20188_v56  ;;  %8148 = vmatprep.subr.bf16.mxu1 %v20191_v40 }
 0x828   :  { %8063 = vmatpush1.bf16.msra.mxu0 %v20186_v61  ;;  %8149 = vmatpush1.bf16.msra.mxu1 %v20189_v57 }
 0x829   :  { %8064 = vmatprep.subr.bf16.mxu0 %v20194_v17  ;;  %8150 = vmatprep.subr.bf16.mxu1 %v20197_v63 }
 0x82c   :  { %8065 = vmatpush1.bf16.msra.mxu0 %v20192_v39  ;;  %8151 = vmatpush1.bf16.msra.mxu1 %v20195_v62 }
 0x82d   :  { %8066 = vmatprep.subr.bf16.mxu0 %v20200_v53  ;;  %8152 = vmatprep.subr.bf16.mxu1 %v20203_v5 }
 0x830   :  { %8067 = vmatpush1.bf16.msra.mxu0 %v20198_v0  ;;  %8153 = vmatpush1.bf16.msra.mxu1 %v20201_v7 }
 0x831   :  { %8068 = vmatprep.subr.bf16.mxu0 %v20206_v14  ;;  %8154 = vmatprep.subr.bf16.mxu1 %v20209_v49 }
 0x834   :  { %8069 = vmatpush1.bf16.msra.mxu0 %v20204_v23  ;;  %8155 = vmatpush1.bf16.msra.mxu1 %v20207_v11 }
 0x835   :  { %8070 = vmatprep.subr.bf16.mxu0 %v20212_v18  ;;  %8156 = vmatprep.subr.bf16.mxu1 %v20215_v29 }
 0x838   :  { %8071 = vmatpush1.bf16.msra.mxu0 %v20210_v9  ;;  %8157 = vmatpush1.bf16.msra.mxu1 %v20213_v60 }
 0x839   :  { %8072 = vmatprep.subr.bf16.mxu0 %v20218_v42  ;;  %8158 = vmatprep.subr.bf16.mxu1 %v20221_v30 }
 0x83c   :  { %8073 = vmatpush1.bf16.msra.mxu0 %v20216_v13  ;;  %8159 = vmatpush1.bf16.msra.mxu1 %v20219_v32 }
 0x83d   :  { %8074 = vmatprep.subr.bf16.mxu0 %v20224_v35  ;;  %8160 = vmatprep.subr.bf16.mxu1 %v20227_v1 }
 0x840   :  { %8075 = vmatpush1.bf16.msra.mxu0 %v20222_v31  ;;  %8161 = vmatpush1.bf16.msra.mxu1 %v20225_v19 }
 0x841   :  { %8076 = vmatprep.subr.bf16.mxu0 %v20230_v36  ;;  %8162 = vmatprep.subr.bf16.mxu1 %v20233_v38 }
 0x844   :  { %8077 = vmatpush1.bf16.msra.mxu0 %v20228_v15  ;;  %8163 = vmatpush1.bf16.msra.mxu1 %v20231_v50 }
 0x845   :  { %8089 = vmatprep.subr.bf16.mxu0 %v20236_v46  ;;  %8175 = vmatprep.subr.bf16.mxu1 %v20239_v2 }
 0x8da   :  { %v6819_v47 = vpop.f32.mrb[20].mxu0  ;;  %v6905_v22 = vpop.f32.mrb[20].mxu1 }
 0x8db   :  { %v18717_v41 = vadd.f32 %v6819_v47, %v6085_v43  ;;  %v18721_v20 = vadd.f32 %v6905_v22, %v6093_v54  ;;  %v6821_v21 = vpop.f32.mrb[21].mxu0  ;;  %v6907_v59 = vpop.f32.mrb[21].mxu1 }
 0x8dc   :  { %v18718_v4 = vadd.f32 %v6821_v21, %v6089_v44  ;;  %v18722_v34 = vadd.f32 %v6907_v59, %v6097_v45  ;;  %v6823_v51 = vpop.f32.mrb[22].mxu0  ;;  %v6909_v12 = vpop.f32.mrb[22].mxu1 }
 0x8dd   :  { %v6922_v48 = vmul.f32 1.442695, %v18717_v41  ;;  %v6926_v52 = vmul.f32 1.442695, %v18721_v20  ;;  %v18719_v61 = vadd.f32 %v6823_v51, %v6085_v43  ;;  %v18723_v57 = vadd.f32 %v6909_v12, %v6093_v54  ;;  %v6825_v17 = vpop.f32.mrb[23].mxu0  ;;  %v6911_v63 = vpop.f32.mrb[23].mxu1 }
 0x8de   :  { %v6924_v56 = vmul.f32 1.442695, %v18718_v4  ;;  %v6928_v40 = vmul.f32 1.442695, %v18722_v34  ;;  %v18720_v39 = vadd.f32 %v6825_v17, %v6089_v44  ;;  %v23038_v62 = vadd.f32 %v6911_v63, %v6097_v45 }
 0x8df   :  { %21839 = vpow2.f32 %v6922_v48  ;;  %v6930_v53 = vmul.f32 1.442695, %v18719_v61  ;;  %v6934_v5 = vmul.f32 1.442695, %v18723_v57  ;;  %vm6914_vm1 = vcmp.gt.f32.partialorder %v18717_v41, 0.0 }
 0x8e0   :  { %21841 = vpow2.f32 %v6926_v52  ;;  %v6932_v0 = vmul.f32 1.442695, %v18720_v39  ;;  %v6936_v7 = vmul.f32 1.442695, %v23038_v62  ;;  %vm6916_vm4 = vcmp.gt.f32.partialorder %v18721_v20, 0.0 }
 0x8e1   :  { %21843 = vpow2.f32 %v6924_v56  ;;  %vm6915_vm5 = vcmp.gt.f32.partialorder %v18718_v4, 0.0  ;;  %vm6917_vm6 = vcmp.gt.f32.partialorder %v18722_v34, 0.0  ;;  %vm6918_vm7 = vcmp.gt.f32.partialorder %v18719_v61, 0.0 }
 0x8e2   :  { %21845 = vpow2.f32 %v6928_v40  ;;  %vm6920_vm8 = vcmp.gt.f32.partialorder %v18723_v57, 0.0  ;;  %vm6919_vm9 = vcmp.gt.f32.partialorder %v18720_v39, 0.0  ;;  %vm6921_vm11 = vcmp.gt.f32.partialorder %v23038_v62, 0.0 }
 0x8e3   :  { %21847 = vpow2.f32 %v6930_v53 }
 0x8e4   :  { %21849 = vpow2.f32 %v6934_v5 }
 0x8e5   :  { %21851 = vpow2.f32 %v6932_v0 }
 0x8e6   :  { %21853 = vpow2.f32 %v6936_v7 }
 0x8e9   :  { %v21840_v14 = vpop.eup %21839 }
 0x8ea   :  { %v21842_v49 = vpop.eup %21841  ;;  %v17471_v23 = vadd.f32 -1.0, %v21840_v14 }
 0x8eb   :  { %v21844_v11 = vpop.eup %21843  ;;  %v17473_v18 = vadd.f32 -1.0, %v21842_v49 }
 0x8ec   :  { %v21846_v29 = vpop.eup %21845  ;;  %v23041_v9 = vsel %vm6914_vm1, %v18717_v41, %v17471_v23  ;;  %v17472_v60 = vadd.f32 -1.0, %v21844_v11 }
 0x8ed   :  { %v21848_v42 = vpop.eup %21847  ;;  %v23043_v30 = vsel %vm6916_vm4, %v18721_v20, %v17473_v18  ;;  %v17474_v13 = vadd.f32 -1.0, %v21846_v29  ;;  %v6990_v1 = vmul.f32 %v23041_v9, %v23041_v9 }
 0x8ee   :  { %v21850_v32 = vpop.eup %21849  ;;  %v23045_v31 = vsel %vm6915_vm5, %v18718_v4, %v17472_v60  ;;  %v17475_v35 = vadd.f32 -1.0, %v21848_v42  ;;  %v6992_v36 = vmul.f32 %v23043_v30, %v23043_v30 }
 0x8ef   :  { %v21852_v19 = vpop.eup %21851  ;;  %v23052_v38 = vsel %vm6917_vm6, %v18722_v34, %v17474_v13  ;;  %v17477_v15 = vadd.f32 -1.0, %v21850_v32  ;;  %v6991_v46 = vmul.f32 %v23045_v31, %v23045_v31 }
 0x8f0   :  { %v21854_v50 = vpop.eup %21853  ;;  %v6993_v2 = vmul.f32 %v23052_v38, %v23052_v38  ;;  %v23058_v10 = vsel %vm6918_vm7, %v18719_v61, %v17475_v35  ;;  %v17476_v43 = vadd.f32 -1.0, %v21852_v19 }
 0x8f1   :  { %v6954_v54 = vsel %vm1584_vm10, %v23058_v10, 0.0  ;;  %v6994_v44 = vmul.f32 %v23058_v10, %v23058_v10  ;;  %v23065_v45 = vsel %vm6920_vm8, %v18723_v57, %v17477_v15  ;;  %v17478_v47 = vadd.f32 -1.0, %v21854_v50 }
 0x8f2   :  { %v6955_v22 = vadd.f32 %v6954_v54, %v23041_v9  ;;  %v6970_v41 = vsel %vm1584_vm10, %v23065_v45, 0.0  ;;  %v6996_v20 = vmul.f32 %v23065_v45, %v23065_v45  ;;  %v23073_v21 = vsel %vm6919_vm9, %v18720_v39, %v17476_v43 }
 0x8f3   :  { %v6998_v59 = vsel %vm1584_vm10, %v6994_v44, 0.0  ;;  %v6971_v4 = vadd.f32 %v6970_v41, %v23043_v30  ;;  %v6962_v34 = vsel %vm1584_vm10, %v23073_v21, 0.0  ;;  %v6995_v51 = vmul.f32 %v23073_v21, %v23073_v21 }
 0x8f4   :  { %v6956_v12 = vrot.slane %v6955_v22, 4  ;;  %v6999_v48 = vadd.f32 %v6998_v59, %v6990_v1  ;;  %v7014_v52 = vsel %vm1584_vm10, %v6996_v20, 0.0  ;;  %v6963_v56 = vadd.f32 %v6962_v34, %v23045_v31 }
 0x8f5   :  { %v6972_v40 = vrot.slane %v6971_v4, 4  ;;  %v7015_v61 = vadd.f32 %v7014_v52, %v6992_v36  ;;  %v7006_v57 = vsel %vm1584_vm10, %v6995_v51, 0.0  ;;  %v23087_v17 = vsel %vm6921_vm11, %v23038_v62, %v17478_v47 }
 0x8f6   :  { %v6957_v63 = vadd.f32 %v6956_v12, %v6955_v22  ;;  %v7000_v39 = vrot.slane %v6999_v48, 4  ;;  %v6964_v53 = vrot.slane %v6963_v56, 4  ;;  %v7007_v5 = vadd.f32 %v7006_v57, %v6991_v46 }
 0x8f7   :  { %v6973_v0 = vadd.f32 %v6972_v40, %v6971_v4  ;;  %v7016_v7 = vrot.slane %v7015_v61, 4  ;;  %v6978_v14 = vsel %vm1584_vm10, %v23087_v17, 0.0  ;;  %v6997_v49 = vmul.f32 %v23087_v17, %v23087_v17 }
 0x8f8   :  { %v6958_v23 = vrot.slane %v6957_v63, 2  ;;  %v7001_v11 = vadd.f32 %v7000_v39, %v6999_v48  ;;  %v6965_v18 = vadd.f32 %v6964_v53, %v6963_v56  ;;  %v7008_v29 = vrot.slane %v7007_v5, 4 }
 0x8f9   :  { %v6974_v60 = vrot.slane %v6973_v0, 2  ;;  %v7017_v42 = vadd.f32 %v7016_v7, %v7015_v61  ;;  %v6979_v62 = vadd.f32 %v6978_v14, %v23052_v38  ;;  %v7022_v13 = vsel %vm1584_vm10, %v6997_v49, 0.0 }
 0x8fa   :  { %v6959_v32 = vadd.f32 %v6958_v23, %v6957_v63  ;;  %v7002_v35 = vrot.slane %v7001_v11, 2  ;;  %v6966_v19 = vrot.slane %v6965_v18, 2  ;;  %v7009_v1 = vadd.f32 %v7008_v29, %v7007_v5 }
 0x8fb   :  { %v6975_v36 = vadd.f32 %v6974_v60, %v6973_v0  ;;  %v7018_v15 = vrot.slane %v7017_v42, 2  ;;  %v6980_v50 = vrot.slane %v6979_v62, 4  ;;  %v7023_v46 = vadd.f32 %v7022_v13, %v6993_v2 }
 0x8fc   :  { %v6960_v43 = vrot.slane %v6959_v32, 1  ;;  %v7003_v54 = vadd.f32 %v7002_v35, %v7001_v11  ;;  %v6967_v44 = vadd.f32 %v6966_v19, %v6965_v18  ;;  %v7010_v47 = vrot.slane %v7009_v1, 2 }
 0x8fd   :  { %v6976_v22 = vrot.slane %v6975_v36, 1  ;;  %v7019_v41 = vadd.f32 %v7018_v15, %v7017_v42  ;;  %v6981_v20 = vadd.f32 %v6980_v50, %v6979_v62  ;;  %v7024_v59 = vrot.slane %v7023_v46, 4 }
 0x8fe   :  { %v6961_v4 = vadd.f32 %v6960_v43, %v6959_v32  ;;  %v7004_v34 = vrot.slane %v7003_v54, 1  ;;  %v6968_v51 = vrot.slane %v6967_v44, 1  ;;  %v7011_v12 = vadd.f32 %v7010_v47, %v7009_v1 }
 0x8ff   :  { %v6977_v48 = vadd.f32 %v6976_v22, %v6975_v36  ;;  %v7020_v52 = vrot.slane %v7019_v41, 1  ;;  %v6982_v56 = vrot.slane %v6981_v20, 2  ;;  %v7025_v40 = vadd.f32 %v7024_v59, %v7023_v46 }
 0x900   :  { %v6986_v61 = vmul.f32 0.083333336, %v6961_v4  ;;  %v7005_v57 = vadd.f32 %v7004_v34, %v7003_v54  ;;  %v6969_v63 = vadd.f32 %v6968_v51, %v6967_v44  ;;  %v7012_v2 = vrot.slane %v7011_v12, 1 }
 0x901   :  { %v6988_v39 = vmul.f32 0.083333336, %v6977_v48  ;;  %v7021_v53 = vadd.f32 %v7020_v52, %v7019_v41  ;;  %v6983_v5 = vadd.f32 %v6982_v56, %v6981_v20  ;;  %v7026_v0 = vrot.slane %v7025_v40, 2 }
 0x902   :  { %v7030_v7 = vmul.f32 0.083333336, %v7005_v57  ;;  %v7034_v14 = vmul.f32 %v6986_v61, %v6986_v61  ;;  %v7042_v49 = vsub.f32 %v23041_v9, %v6986_v61  ;;  %v7046_v23 = vsub.f32 %v23058_v10, %v6986_v61 }
 0x903   :  { %v7032_v11 = vmul.f32 0.083333336, %v7021_v53  ;;  %v7036_v18 = vmul.f32 %v6988_v39, %v6988_v39  ;;  %v7044_v29 = vsub.f32 %v23043_v30, %v6988_v39  ;;  %v7048_v60 = vsub.f32 %v23065_v45, %v6988_v39  ;;  %v20234_v39 = vld [vmem:[#allocation13 + $0x200] ss:$16 sps:$4 sm:$0xff]  }
 0x904   :  { %v7038_v42 = vsub.f32 %v7030_v7, %v7034_v14  ;;  %v6987_v62 = vmul.f32 0.083333336, %v6969_v63  ;;  %v7013_v13 = vadd.f32 %v7012_v2, %v7011_v12  ;;  %v6984_v32 = vrot.slane %v6983_v5, 1  ;;  %v20237_v7 = vld [vmem:[#allocation13 + $0x208] ss:$16 sps:$4 sm:$0xff]  }
 0x905   :  { %v7040_v35 = vsub.f32 %v7032_v11, %v7036_v18  ;;  %v7027_v19 = vadd.f32 %v7026_v0, %v7025_v40 }
 0x906   :  { %v7050_v1 = vadd.f32 1e-05, %v7038_v42  ;;  %v7031_v36 = vmul.f32 0.083333336, %v7013_v13  ;;  %v7035_v15 = vmul.f32 %v6987_v62, %v6987_v62  ;;  %v7043_v50 = vsub.f32 %v23045_v31, %v6987_v62 }
 0x907   :  { %v7052_v9 = vadd.f32 1e-05, %v7040_v35  ;;  %v7047_v10 = vsub.f32 %v23073_v21, %v6987_v62  ;;  %v6985_v46 = vadd.f32 %v6984_v32, %v6983_v5  ;;  %v7028_v43 = vrot.slane %v7027_v19, 1  ;;  %v20245_v62 = vld [vmem:[#allocation13 + $0x22c] ss:$16 sps:$4 sm:$0xff]  }
 0x908   :  { %21855 = vrsqrt.f32 %v7050_v1  ;;  %v7039_v30 = vsub.f32 %v7031_v36, %v7035_v15 }
 0x909   :  { %21857 = vrsqrt.f32 %v7052_v9  ;;  %v6989_v45 = vmul.f32 0.083333336, %v6985_v46  ;;  %v7029_v54 = vadd.f32 %v7028_v43, %v7027_v19 }
 0x90a   :  { %v7051_v44 = vadd.f32 1e-05, %v7039_v30 }
 0x90b   :  { %v7033_v47 = vmul.f32 0.083333336, %v7029_v54  ;;  %v7037_v22 = vmul.f32 %v6989_v45, %v6989_v45  ;;  %v7045_v41 = vsub.f32 %v23052_v38, %v6989_v45  ;;  %v7049_v20 = vsub.f32 %v23087_v17, %v6989_v45  ;;  %v20240_v45 = vld [vmem:[#allocation13 + $0x220] ss:$16 sps:$4 sm:$0xff]   ;;  %v20243_v54 = vld [vmem:[#allocation13 + $0x228] ss:$16 sps:$4 sm:$0xff]  }
 0x90c   :  { %21859 = vrsqrt.f32 %v7051_v44 }
 0x90d   :  { %v7041_v59 = vsub.f32 %v7033_v47, %v7037_v22 }
 0x90f   :  { %v7053_v31 = vadd.f32 1e-05, %v7041_v59 }
 0x911   :  { %21861 = vrsqrt.f32 %v7053_v31 }
 0x912   :  { %v21856_v4 = vpop.eup %21855 }
 0x913   :  { %v21858_v21 = vpop.eup %21857  ;;  %v7058_v34 = vmul.f32 %v21856_v4, %v7042_v49  ;;  %v7062_v51 = vmul.f32 %v21856_v4, %v7046_v23  ;;  %v20251_v4 = vld [vmem:[#allocation13 + $0x24c] ss:$16 sps:$4 sm:$0xff]  }
 0x914   :  { %v23103_v12 = vmul.f32 %v21858_v21, %v7044_v29  ;;  %v23105_v48 = vmul.f32 %v21858_v21, %v7048_v60  ;;  %v20242_v29 = vld [vmem:[#allocation13 + $0x224] ss:$16 sps:$4 sm:$0xff]  }
 0x915   :  { %v7075_v52 = vrot.slane %v7062_v51, 1  ;;  %v7274_v56 = vpack.c.bf16 %v7062_v51, %v7058_v34  ;;  %v7074_v40 = vrot.slane %v7058_v34, 1  ;;  %v7107_v57 = vrot.slane %v7062_v51, 7 }
 0x916   :  { %v21860_v61 = vpop.eup %21859  ;;  %v7081_v38 = vrot.slane %v23105_v48, 1  ;;  %v23110_v17 = vpack.c.bf16 %v23105_v48, %v23103_v12  ;;  %v7094_v5 = vrot.slane %v7058_v34, 5  ;;  %v7113_v0 = vrot.slane %v23105_v48, 7  ;;  %v20252_v48 = vld [vmem:[#allocation13 + $0x260] ss:$16 sps:$4 sm:$0xff]  }
 0x917   :  { %v7059_v63 = vmul.f32 %v21860_v61, %v7043_v50  ;;  %v7063_v2 = vmul.f32 %v21860_v61, %v7047_v10  ;;  %v7076_v53 = vsel %vm1706_vm12, %v7074_v40, %v7075_v52  ;;  %v7106_v14 = vrot.slane %v7058_v34, 7 }
 0x918   :  { %v7122_v49 = vrot.slane %v7058_v34, 3  ;;  %v7080_v23 = vrot.slane %v23103_v12, 1  ;;  %v7102_v19 = vsel %vm1735_vm13, %v7075_v52, %v7094_v5  ;;  %v7096_v9 = vrot.slane %v23103_v12, 5 }
 0x919   :  { %v7110_v11 = vrot.slane %v7063_v2, 7  ;;  %v7275_v18 = vpack.c.bf16 %v7063_v2, %v7059_v63  ;;  %v7077_v60 = vrot.slane %v7059_v63, 1  ;;  %v7078_v42 = vrot.slane %v7063_v2, 1  ;;  %v20246_v2 = vld [vmem:[#allocation13 + $0x240] ss:$16 sps:$4 sm:$0xff]  }
 0x91a   :  { %v7095_v13 = vrot.slane %v7059_v63, 5  ;;  %v7109_v32 = vrot.slane %v7059_v63, 7  ;;  %v7123_v35 = vrot.slane %v7059_v63, 3  ;;  %v7108_v15 = vsel %vm1740_vm14, %v7106_v14, %v7107_v57  ;;  %v20254_v14 = vld [vmem:[#allocation13 + $0x264] ss:$16 sps:$4 sm:$0xff]  }
 0x91b   :  { %v21862_v1 = vpop.eup %21861  ;;  %8078 = vmatprep.mubr.bf16.mxu0 %v7275_v18  ;;  %8164 = vmatprep.mubr.bf16.mxu1 %v7275_v18  ;;  %v7079_v36 = vsel %vm1706_vm12, %v7077_v60, %v7078_v42  ;;  %v7138_v50 = vsel %vm1771_vm3, %v7122_v49, %v7102_v19  ;;  %v7112_v30 = vrot.slane %v23103_v12, 7  ;;  %v7130_v22 = vsel %vm1765_vm15, %v7108_v15, %v7122_v49  ;;  %v20257_v49 = vld [vmem:[#allocation13 + $0x26c] ss:$16 sps:$4 sm:$0xff]   ;;  %v20260_v19 = vld [vmem:[#allocation13 + $0x284] ss:$16 sps:$4 sm:$0xff]  }
 0x91c   :  { %8079 = vmatmul.mubr.bf16.vlgmr.msra.gmra.mrb[24].mxu0 %v7274_v56  ;;  %8165 = vmatmul.mubr.bf16.vlgmr.msra.gmra.mrb[24].mxu1 %v7274_v56  ;;  %v7061_v10 = vmul.f32 %v21862_v1, %v7045_v41  ;;  %v7065_v46 = vmul.f32 %v21862_v1, %v7049_v20  ;;  %v7103_v43 = vsel %vm1735_vm13, %v7078_v42, %v7095_v13  ;;  %v7124_v59 = vrot.slane %v23103_v12, 3  ;;  %v20248_v20 = vld [vmem:[#allocation13 + $0x244] ss:$16 sps:$4 sm:$0xff]   ;;  %v20263_v1 = vld [vmem:[#allocation13 + $0x28c] ss:$16 sps:$4 sm:$0xff]  }
 0x91d   :  { %8090 = vmatpush1.bf16.msra.mxu0 %v20234_v39  ;;  %8176 = vmatpush1.bf16.msra.mxu1 %v20237_v7  ;;  %v7111_v44 = vsel %vm1740_vm14, %v7109_v32, %v7110_v11  ;;  %v7139_v47 = vsel %vm1771_vm3, %v7123_v35, %v7103_v43  ;;  %v7134_v34 = vsel %vm1770_vm2, %v7130_v22, %v7076_v53  ;;  %v20249_v39 = vld [vmem:[#allocation13 + $0x248] ss:$16 sps:$4 sm:$0xff]   ;;  %v20272_v43 = vld [vmem:[#allocation13 + $0x2c4] ss:$16 sps:$4 sm:$0xff]   ;;  %v20276_v22 = vld [vmem:[#allocation13 + $0x2e0] ss:$16 sps:$4 sm:$0xff]  }
 0x91e   :  { %v7116_v31 = vrot.slane %v7065_v46, 7  ;;  %v7277_v41 = vpack.c.bf16 %v7065_v46, %v7061_v10  ;;  %8091 = vmatprep.subr.bf16.mxu0 %v20242_v29  ;;  %8177 = vmatprep.subr.bf16.mxu1 %v20245_v62  ;;  %v7131_v21 = vsel %vm1765_vm15, %v7111_v44, %v7123_v35  ;;  %v23133_v52 = vpack.c.bf16 %v7138_v50, %v7134_v34  ;;  %v20261_v15 = vld [vmem:[#allocation13 + $0x288] ss:$16 sps:$4 sm:$0xff]   ;;  %v20266_v50 = vld [vmem:[#allocation13 + $0x2a4] ss:$16 sps:$4 sm:$0xff]  }
 0x91f   :  { %v7135_v51 = vsel %vm1770_vm2, %v7131_v21, %v7079_v36  ;;  %v7083_v56 = vrot.slane %v7061_v10, 1  ;;  %v7084_v40 = vrot.slane %v7065_v46, 1  ;;  %v7097_v61 = vrot.slane %v7061_v10, 5  ;;  %v20258_v36 = vld [vmem:[#allocation13 + $0x280] ss:$16 sps:$4 sm:$0xff]  }
 0x920   :  { %8121 = vmatprep.mubr.bf16.mxu0 %v7277_v41  ;;  %8207 = vmatprep.mubr.bf16.mxu1 %v7277_v41  ;;  %v23135_v12 = vpack.c.bf16 %v7139_v47, %v7135_v51  ;;  %v7115_v57 = vrot.slane %v7061_v10, 7  ;;  %v7125_v63 = vrot.slane %v7061_v10, 3  ;;  %v7082_v5 = vsel %vm1706_vm12, %v7080_v23, %v7081_v38  ;;  %v20264_v10 = vld [vmem:[#allocation13 + $0x2a0] ss:$16 sps:$4 sm:$0xff]   ;;  %v20267_v46 = vld [vmem:[#allocation13 + $0x2a8] ss:$16 sps:$4 sm:$0xff]  }
 0x921   :  { %8092 = vmatpush1.bf16.msra.mxu0 %v20240_v45  ;;  %8178 = vmatpush1.bf16.msra.mxu1 %v20243_v54  ;;  %v7085_v53 = vsel %vm1706_vm12, %v7083_v56, %v7084_v40  ;;  %v7104_v7 = vsel %vm1735_vm13, %v7081_v38, %v7096_v9  ;;  %v7105_v11 = vsel %vm1735_vm13, %v7084_v40, %v7097_v61  ;;  %v20269_v9 = vld [vmem:[#allocation13 + $0x2ac] ss:$16 sps:$4 sm:$0xff]   ;;  %v20270_v45 = vld [vmem:[#allocation13 + $0x2c0] ss:$16 sps:$4 sm:$0xff]   ;;  %v20273_v54 = vld [vmem:[#allocation13 + $0x2c8] ss:$16 sps:$4 sm:$0xff]  }
 0x922   :  { %8093 = vmatprep.subr.bf16.mxu0 %v20248_v20  ;;  %8179 = vmatprep.subr.bf16.mxu1 %v20251_v4  ;;  %v7117_v18 = vsel %vm1740_vm14, %v7115_v57, %v7116_v31  ;;  %v7114_v29 = vsel %vm1740_vm14, %v7112_v30, %v7113_v0  ;;  %v7141_v23 = vsel %vm1771_vm3, %v7125_v63, %v7105_v11  ;;  %v20255_v0 = vld [vmem:[#allocation13 + $0x268] ss:$16 sps:$4 sm:$0xff]   ;;  %v20275_v30 = vld [vmem:[#allocation13 + $0x2cc] ss:$16 sps:$4 sm:$0xff]   ;;  %v20278_v44 = vld [vmem:[#allocation13 + $0x2e4] ss:$16 sps:$4 sm:$0xff]  }
 0x923   :  { %v7133_v60 = vsel %vm1765_vm15, %v7117_v18, %v7125_v63  ;;  %v7132_v42 = vsel %vm1765_vm15, %v7114_v29, %v7124_v59  ;;  %v7140_v38 = vsel %vm1771_vm3, %v7124_v59, %v7104_v7  ;;  %v20281_v47 = vld [vmem:[#allocation13 + $0x2ec] ss:$16 sps:$4 sm:$0xff]   ;;  %v20279_v59 = vld [vmem:[#allocation13 + $0x2e8] ss:$16 sps:$4 sm:$0xff]   ;;  %v20284_v31 = vld [vmem:[#allocation13 + $0x304] ss:$16 sps:$4 sm:$0xff]  }
 0x924   :  { %v7137_v62 = vsel %vm1770_vm2, %v7133_v60, %v7085_v53  ;;  %v7136_v13 = vsel %vm1770_vm2, %v7132_v42, %v7082_v5  ;;  %v20287_v41 = vld [vmem:[#allocation13 + $0x30c] ss:$16 sps:$4 sm:$0xff]   ;;  %v20282_v20 = vld [vmem:[#allocation13 + $0x300] ss:$16 sps:$4 sm:$0xff]   ;;  %v20285_v4 = vld [vmem:[#allocation13 + $0x308] ss:$16 sps:$4 sm:$0xff]  }
 0x925   :  { %8094 = vmatpush1.bf16.msra.mxu0 %v20246_v2  ;;  %8180 = vmatpush1.bf16.msra.mxu1 %v20249_v39  ;;  %v23159_v32 = vpack.c.bf16 %v7141_v23, %v7137_v62  ;;  %v23161_v35 = vpack.c.bf16 %v7140_v38, %v7136_v13  ;;  %v20290_v21 = vld [vmem:[#allocation13 + $0x324] ss:$16 sps:$4 sm:$0xff]   ;;  %v20293_v34 = vld [vmem:[#allocation13 + $0x32c] ss:$16 sps:$4 sm:$0xff]   ;;  %v20288_v51 = vld [vmem:[#allocation13 + $0x320] ss:$16 sps:$4 sm:$0xff]  }
 0x926   :  { %8095 = vmatprep.subr.bf16.mxu0 %v20254_v14  ;;  %8181 = vmatprep.subr.bf16.mxu1 %v20257_v49  ;;  %v20291_v56 = vld [vmem:[#allocation13 + $0x328] ss:$16 sps:$4 sm:$0xff]   ;;  %v20296_v40 = vld [vmem:[#allocation13 + $0x344] ss:$16 sps:$4 sm:$0xff]   ;;  %v20299_v61 = vld [vmem:[#allocation13 + $0x34c] ss:$16 sps:$4 sm:$0xff]  }
 0x927   :  { %v20294_v57 = vld [vmem:[#allocation13 + $0x340] ss:$16 sps:$4 sm:$0xff]   ;;  %v20297_v63 = vld [vmem:[#allocation13 + $0x348] ss:$16 sps:$4 sm:$0xff]   ;;  %v20302_v2 = vld [vmem:[#allocation13 + $0x364] ss:$16 sps:$4 sm:$0xff]  }
 0x928   :  { %v20305_v39 = vld [vmem:[#allocation13 + $0x36c] ss:$16 sps:$4 sm:$0xff]   ;;  %v20300_v53 = vld [vmem:[#allocation13 + $0x360] ss:$16 sps:$4 sm:$0xff]   ;;  %v20303_v5 = vld [vmem:[#allocation13 + $0x368] ss:$16 sps:$4 sm:$0xff]  }
 0x929   :  { %8096 = vmatpush1.bf16.msra.mxu0 %v20252_v48  ;;  %8182 = vmatpush1.bf16.msra.mxu1 %v20255_v0  ;;  %v20308_v7 = vld [vmem:[#allocation13 + $0x384] ss:$16 sps:$4 sm:$0xff]   ;;  %v20311_v14 = vld [vmem:[#allocation13 + $0x38c] ss:$16 sps:$4 sm:$0xff]   ;;  %v20306_v49 = vld [vmem:[#allocation13 + $0x380] ss:$16 sps:$4 sm:$0xff]  }
 0x92a   :  { %8097 = vmatprep.subr.bf16.mxu0 %v20260_v19  ;;  %8183 = vmatprep.subr.bf16.mxu1 %v20263_v1  ;;  %v20309_v11 = vld [vmem:[#allocation13 + $0x388] ss:$16 sps:$4 sm:$0xff]   ;;  %v20314_v18 = vld [vmem:[#allocation13 + $0x3a4] ss:$16 sps:$4 sm:$0xff]   ;;  %v20317_v29 = vld [vmem:[#allocation13 + $0x3ac] ss:$16 sps:$4 sm:$0xff]  }
 0x92b   :  { %v20312_v60 = vld [vmem:[#allocation13 + $0x3a0] ss:$16 sps:$4 sm:$0xff]   ;;  %v20315_v23 = vld [vmem:[#allocation13 + $0x3a8] ss:$16 sps:$4 sm:$0xff]   ;;  %v20320_v42 = vld [vmem:[#allocation13 + $0x3c4] ss:$16 sps:$4 sm:$0xff]  }
 0x92c   :  { %v20323_v38 = vld [vmem:[#allocation13 + $0x3cc] ss:$16 sps:$4 sm:$0xff]   ;;  %v20318_v62 = vld [vmem:[#allocation13 + $0x3c0] ss:$16 sps:$4 sm:$0xff]   ;;  %v20321_v13 = vld [vmem:[#allocation13 + $0x3c8] ss:$16 sps:$4 sm:$0xff]  }
 0x92d   :  { %8098 = vmatpush1.bf16.msra.mxu0 %v20258_v36  ;;  %8184 = vmatpush1.bf16.msra.mxu1 %v20261_v15  ;;  %v20326_v48 = vld [vmem:[#allocation13 + $0x3e4] ss:$16 sps:$4 sm:$0xff]   ;;  %v20329_v0 = vld [vmem:[#allocation13 + $0x3ec] ss:$16 sps:$4 sm:$0xff]   ;;  %v20324_v19 = vld [vmem:[#allocation13 + $0x3e0] ss:$16 sps:$4 sm:$0xff]  }
 0x92e   :  { %8099 = vmatprep.subr.bf16.mxu0 %v20266_v50  ;;  %8185 = vmatprep.subr.bf16.mxu1 %v20269_v9  ;;  %v20327_v1 = vld [vmem:[#allocation13 + $0x3e8] ss:$16 sps:$4 sm:$0xff]   ;;  %v20332_v36 = vld [vmem:[#allocation12 + $0x4] ss:$16 sps:$4 sm:$0xff]   ;;  %v20335_v15 = vld [vmem:[#allocation12 + $0xc] ss:$16 sps:$4 sm:$0xff]  }
 0x92f   :  { %v20330_v50 = vld [vmem:[#allocation12] ss:$16 sps:$4 sm:$0xff]   ;;  %v20333_v9 = vld [vmem:[#allocation12 + $0x8] ss:$16 sps:$4 sm:$0xff]  }
 0x931   :  { %8100 = vmatpush1.bf16.msra.mxu0 %v20264_v10  ;;  %8186 = vmatpush1.bf16.msra.mxu1 %v20267_v46  ;;  %v20338_v10 = vld [vmem:[#allocation12 + $0x24] ss:$16 sps:$4 sm:$0xff]   ;;  %v20341_v46 = vld [vmem:[#allocation12 + $0x2c] ss:$16 sps:$4 sm:$0xff]  }
 0x932   :  { %8101 = vmatprep.subr.bf16.mxu0 %v20272_v43  ;;  %8187 = vmatprep.subr.bf16.mxu1 %v20275_v30  ;;  %v20336_v43 = vld [vmem:[#allocation12 + $0x20] ss:$16 sps:$4 sm:$0xff]   ;;  %v20339_v30 = vld [vmem:[#allocation12 + $0x28] ss:$16 sps:$4 sm:$0xff]  }
 0x935   :  { %8102 = vmatpush1.bf16.msra.mxu0 %v20270_v45  ;;  %8188 = vmatpush1.bf16.msra.mxu1 %v20273_v54  ;;  %v20344_v45 = vld [vmem:[#allocation12 + $0x44] ss:$16 sps:$4 sm:$0xff]   ;;  %v20347_v54 = vld [vmem:[#allocation12 + $0x4c] ss:$16 sps:$4 sm:$0xff]  }
 0x936   :  { %8103 = vmatprep.subr.bf16.mxu0 %v20278_v44  ;;  %8189 = vmatprep.subr.bf16.mxu1 %v20281_v47  ;;  %v20342_v44 = vld [vmem:[#allocation12 + $0x40] ss:$16 sps:$4 sm:$0xff]   ;;  %v20345_v47 = vld [vmem:[#allocation12 + $0x48] ss:$16 sps:$4 sm:$0xff]  }
 0x939   :  { %8104 = vmatpush1.bf16.msra.mxu0 %v20276_v22  ;;  %8190 = vmatpush1.bf16.msra.mxu1 %v20279_v59  ;;  %v20350_v22 = vld [vmem:[#allocation12 + $0x64] ss:$16 sps:$4 sm:$0xff]   ;;  %v20348_v59 = vld [vmem:[#allocation12 + $0x60] ss:$16 sps:$4 sm:$0xff]  }
 0x93a   :  { %8105 = vmatprep.subr.bf16.mxu0 %v20284_v31  ;;  %8191 = vmatprep.subr.bf16.mxu1 %v20287_v41  ;;  %v20351_v31 = vld [vmem:[#allocation12 + $0x68] ss:$16 sps:$4 sm:$0xff]   ;;  %v20356_v41 = vld [vmem:[#allocation12 + $0x84] ss:$16 sps:$4 sm:$0xff]  }
 0x93d   :  { %8106 = vmatpush1.bf16.msra.mxu0 %v20282_v20  ;;  %8192 = vmatpush1.bf16.msra.mxu1 %v20285_v4  ;;  %v20354_v20 = vld [vmem:[#allocation12 + $0x80] ss:$16 sps:$4 sm:$0xff]   ;;  %v20357_v4 = vld [vmem:[#allocation12 + $0x88] ss:$16 sps:$4 sm:$0xff]  }
 0x93e   :  { %8107 = vmatprep.subr.bf16.mxu0 %v20290_v21  ;;  %8193 = vmatprep.subr.bf16.mxu1 %v20293_v34  ;;  %v20362_v21 = vld [vmem:[#allocation12 + $0xa4] ss:$16 sps:$4 sm:$0xff]   ;;  %v20365_v34 = vld [vmem:[#allocation12 + $0xac] ss:$16 sps:$4 sm:$0xff]  }
 0x941   :  { %8108 = vmatpush1.bf16.msra.mxu0 %v20288_v51  ;;  %8194 = vmatpush1.bf16.msra.mxu1 %v20291_v56  ;;  %v20360_v51 = vld [vmem:[#allocation12 + $0xa0] ss:$16 sps:$4 sm:$0xff]   ;;  %v20363_v56 = vld [vmem:[#allocation12 + $0xa8] ss:$16 sps:$4 sm:$0xff]  }
 0x942   :  { %8109 = vmatprep.subr.bf16.mxu0 %v20296_v40  ;;  %8195 = vmatprep.subr.bf16.mxu1 %v20299_v61  ;;  %v20368_v40 = vld [vmem:[#allocation12 + $0xc4] ss:$16 sps:$4 sm:$0xff]   ;;  %v20371_v61 = vld [vmem:[#allocation12 + $0xcc] ss:$16 sps:$4 sm:$0xff]  }
 0x945   :  { %8110 = vmatpush1.bf16.msra.mxu0 %v20294_v57  ;;  %8196 = vmatpush1.bf16.msra.mxu1 %v20297_v63  ;;  %v20366_v57 = vld [vmem:[#allocation12 + $0xc0] ss:$16 sps:$4 sm:$0xff]   ;;  %v20369_v63 = vld [vmem:[#allocation12 + $0xc8] ss:$16 sps:$4 sm:$0xff]  }
 0x946   :  { %8111 = vmatprep.subr.bf16.mxu0 %v20302_v2  ;;  %8197 = vmatprep.subr.bf16.mxu1 %v20305_v39  ;;  %v20374_v2 = vld [vmem:[#allocation12 + $0xe4] ss:$16 sps:$4 sm:$0xff]   ;;  %v20377_v39 = vld [vmem:[#allocation12 + $0xec] ss:$16 sps:$4 sm:$0xff]  }
 0x949   :  { %8112 = vmatpush1.bf16.msra.mxu0 %v20300_v53  ;;  %8198 = vmatpush1.bf16.msra.mxu1 %v20303_v5  ;;  %v20372_v53 = vld [vmem:[#allocation12 + $0xe0] ss:$16 sps:$4 sm:$0xff]   ;;  %v20375_v5 = vld [vmem:[#allocation12 + $0xe8] ss:$16 sps:$4 sm:$0xff]  }
 0x94a   :  { %8113 = vmatprep.subr.bf16.mxu0 %v20308_v7  ;;  %8199 = vmatprep.subr.bf16.mxu1 %v20311_v14  ;;  %v20380_v7 = vld [vmem:[#allocation12 + $0x104] ss:$16 sps:$4 sm:$0xff]   ;;  %v20383_v14 = vld [vmem:[#allocation12 + $0x10c] ss:$16 sps:$4 sm:$0xff]  }
 0x94d   :  { %8114 = vmatpush1.bf16.msra.mxu0 %v20306_v49  ;;  %8200 = vmatpush1.bf16.msra.mxu1 %v20309_v11  ;;  %v20378_v49 = vld [vmem:[#allocation12 + $0x100] ss:$16 sps:$4 sm:$0xff]   ;;  %v20381_v11 = vld [vmem:[#allocation12 + $0x108] ss:$16 sps:$4 sm:$0xff]  }
 0x94e   :  { %8115 = vmatprep.subr.bf16.mxu0 %v20314_v18  ;;  %8201 = vmatprep.subr.bf16.mxu1 %v20317_v29  ;;  %v20386_v18 = vld [vmem:[#allocation12 + $0x124] ss:$16 sps:$4 sm:$0xff]   ;;  %v20389_v29 = vld [vmem:[#allocation12 + $0x12c] ss:$16 sps:$4 sm:$0xff]  }
 0x951   :  { %8116 = vmatpush1.bf16.msra.mxu0 %v20312_v60  ;;  %8202 = vmatpush1.bf16.msra.mxu1 %v20315_v23  ;;  %v20384_v60 = vld [vmem:[#allocation12 + $0x120] ss:$16 sps:$4 sm:$0xff]   ;;  %v20387_v23 = vld [vmem:[#allocation12 + $0x128] ss:$16 sps:$4 sm:$0xff]  }
 0x952   :  { %8117 = vmatprep.subr.bf16.mxu0 %v20320_v42  ;;  %8203 = vmatprep.subr.bf16.mxu1 %v20323_v38  ;;  %v20392_v42 = vld [vmem:[#allocation12 + $0x144] ss:$16 sps:$4 sm:$0xff]   ;;  %v20395_v38 = vld [vmem:[#allocation12 + $0x14c] ss:$16 sps:$4 sm:$0xff]  }
 0x955   :  { %8118 = vmatpush1.bf16.msra.mxu0 %v20318_v62  ;;  %8204 = vmatpush1.bf16.msra.mxu1 %v20321_v13  ;;  %v20390_v62 = vld [vmem:[#allocation12 + $0x140] ss:$16 sps:$4 sm:$0xff]   ;;  %v20393_v13 = vld [vmem:[#allocation12 + $0x148] ss:$16 sps:$4 sm:$0xff]  }
 0x956   :  { %8119 = vmatprep.subr.bf16.mxu0 %v20326_v48  ;;  %8205 = vmatprep.subr.bf16.mxu1 %v20329_v0  ;;  %v20398_v48 = vld [vmem:[#allocation12 + $0x164] ss:$16 sps:$4 sm:$0xff]   ;;  %v20401_v0 = vld [vmem:[#allocation12 + $0x16c] ss:$16 sps:$4 sm:$0xff]  }
 0x959   :  { %8120 = vmatpush1.bf16.msra.mxu0 %v20324_v19  ;;  %8206 = vmatpush1.bf16.msra.mxu1 %v20327_v1  ;;  %v20396_v19 = vld [vmem:[#allocation12 + $0x160] ss:$16 sps:$4 sm:$0xff]   ;;  %v20399_v1 = vld [vmem:[#allocation12 + $0x168] ss:$16 sps:$4 sm:$0xff]  }
 0x95a   :  { %8858 = vmatprep.subr.bf16.mxu0 %v20332_v36  ;;  %8944 = vmatprep.subr.bf16.mxu1 %v20335_v15  ;;  %v20404_v36 = vld [vmem:[#allocation12 + $0x184] ss:$16 sps:$4 sm:$0xff]   ;;  %v20407_v15 = vld [vmem:[#allocation12 + $0x18c] ss:$16 sps:$4 sm:$0xff]  }
 0x95c   :  { %8122 = vmatmul.mubr.bf16.vlgmr.msra.gmra.mrb[24].mxu0 %v23110_v17  ;;  %8208 = vmatmul.mubr.bf16.vlgmr.msra.gmra.mrb[24].mxu1 %v23110_v17  ;;  %v20353_v17 = vld [vmem:[#allocation12 + $0x6c] ss:$16 sps:$4 sm:$0xff]  }
 0x95d   :  { %8859 = vmatpush1.bf16.msra.mxu0 %v20330_v50  ;;  %8890 = vmatprep.mubr.bf16.mxu0 %v23135_v12  ;;  %v20402_v50 = vld [vmem:[#allocation12 + $0x180] ss:$16 sps:$4 sm:$0xff]  }
 0x95e   :  { %8945 = vmatpush1.bf16.msra.mxu1 %v20333_v9  ;;  %8976 = vmatprep.mubr.bf16.mxu1 %v23135_v12  ;;  %v20359_v12 = vld [vmem:[#allocation12 + $0x8c] ss:$16 sps:$4 sm:$0xff]   ;;  %v20405_v9 = vld [vmem:[#allocation12 + $0x188] ss:$16 sps:$4 sm:$0xff]  }
 0x95f   :  { %8860 = vmatprep.subr.bf16.mxu0 %v20338_v10  ;;  %8946 = vmatprep.subr.bf16.mxu1 %v20341_v46  ;;  %v20410_v10 = vld [vmem:[#allocation12 + $0x1a4] ss:$16 sps:$4 sm:$0xff]   ;;  %v20413_v46 = vld [vmem:[#allocation12 + $0x1ac] ss:$16 sps:$4 sm:$0xff]  }
 0x961   :  { %8861 = vmatpush1.bf16.msra.mxu0 %v20336_v43  ;;  %v20408_v43 = vld [vmem:[#allocation12 + $0x1a0] ss:$16 sps:$4 sm:$0xff]  }
 0x962   :  { %8947 = vmatpush1.bf16.msra.mxu1 %v20339_v30  ;;  %8862 = vmatprep.subr.bf16.mxu0 %v20344_v45  ;;  %v20411_v30 = vld [vmem:[#allocation12 + $0x1a8] ss:$16 sps:$4 sm:$0xff]   ;;  %v20416_v45 = vld [vmem:[#allocation12 + $0x1c4] ss:$16 sps:$4 sm:$0xff]  }
 0x963   :  { %8948 = vmatprep.subr.bf16.mxu1 %v20347_v54  ;;  %v20419_v54 = vld [vmem:[#allocation12 + $0x1cc] ss:$16 sps:$4 sm:$0xff]  }
 0x965   :  { %8863 = vmatpush1.bf16.msra.mxu0 %v20342_v44  ;;  %v20414_v44 = vld [vmem:[#allocation12 + $0x1c0] ss:$16 sps:$4 sm:$0xff]  }
 0x966   :  { %8949 = vmatpush1.bf16.msra.mxu1 %v20345_v47  ;;  %8864 = vmatprep.subr.bf16.mxu0 %v20350_v22  ;;  %v20417_v47 = vld [vmem:[#allocation12 + $0x1c8] ss:$16 sps:$4 sm:$0xff]   ;;  %v20422_v22 = vld [vmem:[#allocation12 + $0x1e4] ss:$16 sps:$4 sm:$0xff]  }
 0x967   :  { %8950 = vmatprep.subr.bf16.mxu1 %v20353_v17  ;;  %v20425_v17 = vld [vmem:[#allocation12 + $0x1ec] ss:$16 sps:$4 sm:$0xff]  }
 0x969   :  { %8865 = vmatpush1.bf16.msra.mxu0 %v20348_v59  ;;  %v20420_v59 = vld [vmem:[#allocation12 + $0x1e0] ss:$16 sps:$4 sm:$0xff]  }
 0x96a   :  { %8951 = vmatpush1.bf16.msra.mxu1 %v20351_v31  ;;  %8866 = vmatprep.subr.bf16.mxu0 %v20356_v41  ;;  %v20423_v31 = vld [vmem:[#allocation12 + $0x1e8] ss:$16 sps:$4 sm:$0xff]   ;;  %v20428_v41 = vld [vmem:[#allocation12 + $0x204] ss:$16 sps:$4 sm:$0xff]  }
 0x96b   :  { %8952 = vmatprep.subr.bf16.mxu1 %v20359_v12  ;;  %v20431_v12 = vld [vmem:[#allocation12 + $0x20c] ss:$16 sps:$4 sm:$0xff]  }
 0x96d   :  { %8867 = vmatpush1.bf16.msra.mxu0 %v20354_v20  ;;  %v20426_v20 = vld [vmem:[#allocation12 + $0x200] ss:$16 sps:$4 sm:$0xff]  }
 0x96e   :  { %8953 = vmatpush1.bf16.msra.mxu1 %v20357_v4  ;;  %8868 = vmatprep.subr.bf16.mxu0 %v20362_v21  ;;  %v20429_v4 = vld [vmem:[#allocation12 + $0x208] ss:$16 sps:$4 sm:$0xff]   ;;  %v20434_v21 = vld [vmem:[#allocation12 + $0x224] ss:$16 sps:$4 sm:$0xff]  }
 0x96f   :  { %8954 = vmatprep.subr.bf16.mxu1 %v20365_v34  ;;  %v20437_v34 = vld [vmem:[#allocation12 + $0x22c] ss:$16 sps:$4 sm:$0xff]  }
 0x971   :  { %8869 = vmatpush1.bf16.msra.mxu0 %v20360_v51  ;;  %v20432_v51 = vld [vmem:[#allocation12 + $0x220] ss:$16 sps:$4 sm:$0xff]  }
 0x972   :  { %8955 = vmatpush1.bf16.msra.mxu1 %v20363_v56  ;;  %8870 = vmatprep.subr.bf16.mxu0 %v20368_v40  ;;  %v20435_v56 = vld [vmem:[#allocation12 + $0x228] ss:$16 sps:$4 sm:$0xff]   ;;  %v20440_v40 = vld [vmem:[#allocation12 + $0x244] ss:$16 sps:$4 sm:$0xff]  }
 0x973   :  { %8956 = vmatprep.subr.bf16.mxu1 %v20371_v61  ;;  %v20443_v61 = vld [vmem:[#allocation12 + $0x24c] ss:$16 sps:$4 sm:$0xff]  }
 0x975   :  { %8871 = vmatpush1.bf16.msra.mxu0 %v20366_v57  ;;  %v20438_v57 = vld [vmem:[#allocation12 + $0x240] ss:$16 sps:$4 sm:$0xff]  }
 0x976   :  { %8957 = vmatpush1.bf16.msra.mxu1 %v20369_v63  ;;  %8872 = vmatprep.subr.bf16.mxu0 %v20374_v2  ;;  %v20441_v63 = vld [vmem:[#allocation12 + $0x248] ss:$16 sps:$4 sm:$0xff]   ;;  %v20446_v2 = vld [vmem:[#allocation12 + $0x264] ss:$16 sps:$4 sm:$0xff]  }
 0x977   :  { %8958 = vmatprep.subr.bf16.mxu1 %v20377_v39  ;;  %v20444_v39 = vld [vmem:[#allocation12 + $0x260] ss:$16 sps:$4 sm:$0xff]  }
 0x979   :  { %8873 = vmatpush1.bf16.msra.mxu0 %v20372_v53  ;;  %v20447_v53 = vld [vmem:[#allocation12 + $0x268] ss:$16 sps:$4 sm:$0xff]  }
 0x97a   :  { %8959 = vmatpush1.bf16.msra.mxu1 %v20375_v5  ;;  %8874 = vmatprep.subr.bf16.mxu0 %v20380_v7  ;;  %v20452_v5 = vld [vmem:[#allocation12 + $0x284] ss:$16 sps:$4 sm:$0xff]   ;;  %v20455_v7 = vld [vmem:[#allocation12 + $0x28c] ss:$16 sps:$4 sm:$0xff]  }
 0x97b   :  { %8960 = vmatprep.subr.bf16.mxu1 %v20383_v14  ;;  %v20453_v14 = vld [vmem:[#allocation12 + $0x288] ss:$16 sps:$4 sm:$0xff]  }
 0x97d   :  { %8875 = vmatpush1.bf16.msra.mxu0 %v20378_v49  ;;  %v20458_v49 = vld [vmem:[#allocation12 + $0x2a4] ss:$16 sps:$4 sm:$0xff]  }
 0x97e   :  { %8961 = vmatpush1.bf16.msra.mxu1 %v20381_v11  ;;  %8876 = vmatprep.subr.bf16.mxu0 %v20386_v18  ;;  %v20461_v11 = vld [vmem:[#allocation12 + $0x2ac] ss:$16 sps:$4 sm:$0xff]   ;;  %v20456_v18 = vld [vmem:[#allocation12 + $0x2a0] ss:$16 sps:$4 sm:$0xff]  }
 0x97f   :  { %8962 = vmatprep.subr.bf16.mxu1 %v20389_v29  ;;  %v20459_v29 = vld [vmem:[#allocation12 + $0x2a8] ss:$16 sps:$4 sm:$0xff]  }
 0x981   :  { %8877 = vmatpush1.bf16.msra.mxu0 %v20384_v60  ;;  %v20464_v60 = vld [vmem:[#allocation12 + $0x2c4] ss:$16 sps:$4 sm:$0xff]  }
 0x982   :  { %8963 = vmatpush1.bf16.msra.mxu1 %v20387_v23  ;;  %8878 = vmatprep.subr.bf16.mxu0 %v20392_v42  ;;  %v20467_v23 = vld [vmem:[#allocation12 + $0x2cc] ss:$16 sps:$4 sm:$0xff]   ;;  %v20462_v42 = vld [vmem:[#allocation12 + $0x2c0] ss:$16 sps:$4 sm:$0xff]  }
 0x983   :  { %8964 = vmatprep.subr.bf16.mxu1 %v20395_v38  ;;  %v20465_v38 = vld [vmem:[#allocation12 + $0x2c8] ss:$16 sps:$4 sm:$0xff]  }
 0x985   :  { %8879 = vmatpush1.bf16.msra.mxu0 %v20390_v62  ;;  %v20470_v62 = vld [vmem:[#allocation12 + $0x2e4] ss:$16 sps:$4 sm:$0xff]  }
 0x986   :  { %8965 = vmatpush1.bf16.msra.mxu1 %v20393_v13  ;;  %8880 = vmatprep.subr.bf16.mxu0 %v20398_v48  ;;  %v20473_v13 = vld [vmem:[#allocation12 + $0x2ec] ss:$16 sps:$4 sm:$0xff]   ;;  %v20468_v48 = vld [vmem:[#allocation12 + $0x2e0] ss:$16 sps:$4 sm:$0xff]  }
 0x987   :  { %8966 = vmatprep.subr.bf16.mxu1 %v20401_v0  ;;  %v20471_v0 = vld [vmem:[#allocation12 + $0x2e8] ss:$16 sps:$4 sm:$0xff]  }
 0x989   :  { %8881 = vmatpush1.bf16.msra.mxu0 %v20396_v19  ;;  %v20476_v19 = vld [vmem:[#allocation12 + $0x304] ss:$16 sps:$4 sm:$0xff]  }
 0x98a   :  { %8967 = vmatpush1.bf16.msra.mxu1 %v20399_v1  ;;  %8882 = vmatprep.subr.bf16.mxu0 %v20404_v36  ;;  %v20479_v1 = vld [vmem:[#allocation12 + $0x30c] ss:$16 sps:$4 sm:$0xff]   ;;  %v20474_v36 = vld [vmem:[#allocation12 + $0x300] ss:$16 sps:$4 sm:$0xff]  }
 0x98b   :  { %8968 = vmatprep.subr.bf16.mxu1 %v20407_v15  ;;  %v20477_v15 = vld [vmem:[#allocation12 + $0x308] ss:$16 sps:$4 sm:$0xff]  }
 0x98d   :  { %8883 = vmatpush1.bf16.msra.mxu0 %v20402_v50  ;;  %v20482_v50 = vld [vmem:[#allocation12 + $0x324] ss:$16 sps:$4 sm:$0xff]  }
 0x98e   :  { %8969 = vmatpush1.bf16.msra.mxu1 %v20405_v9  ;;  %8884 = vmatprep.subr.bf16.mxu0 %v20410_v10  ;;  %v20485_v9 = vld [vmem:[#allocation12 + $0x32c] ss:$16 sps:$4 sm:$0xff]   ;;  %v20480_v10 = vld [vmem:[#allocation12 + $0x320] ss:$16 sps:$4 sm:$0xff]  }
 0x98f   :  { %8970 = vmatprep.subr.bf16.mxu1 %v20413_v46  ;;  %v20483_v46 = vld [vmem:[#allocation12 + $0x328] ss:$16 sps:$4 sm:$0xff]  }
 0x991   :  { %8885 = vmatpush1.bf16.msra.mxu0 %v20408_v43  ;;  %v20488_v43 = vld [vmem:[#allocation12 + $0x344] ss:$16 sps:$4 sm:$0xff]  }
 0x992   :  { %8971 = vmatpush1.bf16.msra.mxu1 %v20411_v30  ;;  %8886 = vmatprep.subr.bf16.mxu0 %v20416_v45  ;;  %v20491_v30 = vld [vmem:[#allocation12 + $0x34c] ss:$16 sps:$4 sm:$0xff]   ;;  %v20486_v45 = vld [vmem:[#allocation12 + $0x340] ss:$16 sps:$4 sm:$0xff]  }
 0x993   :  { %8972 = vmatprep.subr.bf16.mxu1 %v20419_v54  ;;  %v20489_v54 = vld [vmem:[#allocation12 + $0x348] ss:$16 sps:$4 sm:$0xff]  }
 0x995   :  { %8887 = vmatpush1.bf16.msra.mxu0 %v20414_v44  ;;  %v20494_v44 = vld [vmem:[#allocation12 + $0x364] ss:$16 sps:$4 sm:$0xff]  }
 0x996   :  { %8973 = vmatpush1.bf16.msra.mxu1 %v20417_v47  ;;  %8888 = vmatprep.subr.bf16.mxu0 %v20422_v22  ;;  %v20497_v47 = vld [vmem:[#allocation12 + $0x36c] ss:$16 sps:$4 sm:$0xff]   ;;  %v20492_v22 = vld [vmem:[#allocation12 + $0x360] ss:$16 sps:$4 sm:$0xff]  }
 0x997   :  { %8974 = vmatprep.subr.bf16.mxu1 %v20425_v17  ;;  %v20495_v17 = vld [vmem:[#allocation12 + $0x368] ss:$16 sps:$4 sm:$0xff]  }
 0x999   :  { %8889 = vmatpush1.bf16.msra.mxu0 %v20420_v59  ;;  %v20500_v59 = vld [vmem:[#allocation12 + $0x384] ss:$16 sps:$4 sm:$0xff]  }
 0x99a   :  { %8975 = vmatpush1.bf16.msra.mxu1 %v20423_v31  ;;  %8901 = vmatprep.subr.bf16.mxu0 %v20428_v41  ;;  %v20503_v31 = vld [vmem:[#allocation12 + $0x38c] ss:$16 sps:$4 sm:$0xff]   ;;  %v20498_v41 = vld [vmem:[#allocation12 + $0x380] ss:$16 sps:$4 sm:$0xff]  }
 0x99b   :  { %8987 = vmatprep.subr.bf16.mxu1 %v20431_v12  ;;  %v20501_v12 = vld [vmem:[#allocation12 + $0x388] ss:$16 sps:$4 sm:$0xff]  }
 0x99c   :  { %8891 = vmatmul.mubr.bf16.vlgmr.msra.gmra.mrb[24].mxu0 %v23133_v52 }
 0x99d   :  { %8977 = vmatmul.mubr.bf16.vlgmr.msra.gmra.mrb[24].mxu1 %v23133_v52  ;;  %8902 = vmatpush1.bf16.msra.mxu0 %v20426_v20  ;;  %v20449_v52 = vld [vmem:[#allocation12 + $0x26c] ss:$16 sps:$4 sm:$0xff]   ;;  %v20506_v20 = vld [vmem:[#allocation12 + $0x3a4] ss:$16 sps:$4 sm:$0xff]  }
 0x99e   :  { %8933 = vmatprep.mubr.bf16.mxu0 %v23159_v32  ;;  %8988 = vmatpush1.bf16.msra.mxu1 %v20429_v4  ;;  %v20509_v4 = vld [vmem:[#allocation12 + $0x3ac] ss:$16 sps:$4 sm:$0xff]  }
 0x99f   :  { %9019 = vmatprep.mubr.bf16.mxu1 %v23159_v32  ;;  %8903 = vmatprep.subr.bf16.mxu0 %v20434_v21  ;;  %v20450_v32 = vld [vmem:[#allocation12 + $0x280] ss:$16 sps:$4 sm:$0xff]  }
 0x9a0   :  { %8989 = vmatprep.subr.bf16.mxu1 %v20437_v34  ;;  %v20504_v21 = vld [vmem:[#allocation12 + $0x3a0] ss:$16 sps:$4 sm:$0xff]   ;;  %v20507_v34 = vld [vmem:[#allocation12 + $0x3a8] ss:$16 sps:$4 sm:$0xff]  }
 0x9a1   :  { %8904 = vmatpush1.bf16.msra.mxu0 %v20432_v51  ;;  %v20512_v51 = vld [vmem:[#allocation12 + $0x3c4] ss:$16 sps:$4 sm:$0xff]  }
 0x9a2   :  { %8990 = vmatpush1.bf16.msra.mxu1 %v20435_v56  ;;  %8905 = vmatprep.subr.bf16.mxu0 %v20440_v40  ;;  %v20515_v56 = vld [vmem:[#allocation12 + $0x3cc] ss:$16 sps:$4 sm:$0xff]   ;;  %v20510_v40 = vld [vmem:[#allocation12 + $0x3c0] ss:$16 sps:$4 sm:$0xff]  }
 0x9a3   :  { %8991 = vmatprep.subr.bf16.mxu1 %v20443_v61  ;;  %v20513_v61 = vld [vmem:[#allocation12 + $0x3c8] ss:$16 sps:$4 sm:$0xff]  }
 0x9a5   :  { %8906 = vmatpush1.bf16.msra.mxu0 %v20438_v57  ;;  %v20518_v57 = vld [vmem:[#allocation12 + $0x3e4] ss:$16 sps:$4 sm:$0xff]  }
 0x9a6   :  { %8992 = vmatpush1.bf16.msra.mxu1 %v20441_v63  ;;  %8907 = vmatprep.subr.bf16.mxu0 %v20446_v2  ;;  %v20521_v63 = vld [vmem:[#allocation12 + $0x3ec] ss:$16 sps:$4 sm:$0xff]   ;;  %v20516_v2 = vld [vmem:[#allocation12 + $0x3e0] ss:$16 sps:$4 sm:$0xff]  }
 0x9a7   :  { %8993 = vmatprep.subr.bf16.mxu1 %v20449_v52  ;;  %v20519_v52 = vld [vmem:[#allocation12 + $0x3e8] ss:$16 sps:$4 sm:$0xff]  }
 0x9a9   :  { %8908 = vmatpush1.bf16.msra.mxu0 %v20444_v39  ;;  %v20524_v39 = vld [vmem:[#allocation15 + $0x4] ss:$16 sps:$4 sm:$0xff]  }
 0x9aa   :  { %8994 = vmatpush1.bf16.msra.mxu1 %v20447_v53  ;;  %8909 = vmatprep.subr.bf16.mxu0 %v20452_v5  ;;  %v20527_v53 = vld [vmem:[#allocation15 + $0xc] ss:$16 sps:$4 sm:$0xff]   ;;  %v20522_v5 = vld [vmem:[#allocation15] ss:$16 sps:$4 sm:$0xff]  }
 0x9ab   :  { %8995 = vmatprep.subr.bf16.mxu1 %v20455_v7  ;;  %v20525_v7 = vld [vmem:[#allocation15 + $0x8] ss:$16 sps:$4 sm:$0xff]  }
 0x9ad   :  { %8910 = vmatpush1.bf16.msra.mxu0 %v20450_v32  ;;  %v20530_v32 = vld [vmem:[#allocation15 + $0x24] ss:$16 sps:$4 sm:$0xff]  }
 0x9ae   :  { %8996 = vmatpush1.bf16.msra.mxu1 %v20453_v14  ;;  %8911 = vmatprep.subr.bf16.mxu0 %v20458_v49  ;;  %v20533_v14 = vld [vmem:[#allocation15 + $0x2c] ss:$16 sps:$4 sm:$0xff]   ;;  %v20528_v49 = vld [vmem:[#allocation15 + $0x20] ss:$16 sps:$4 sm:$0xff]  }
 0x9af   :  { %8997 = vmatprep.subr.bf16.mxu1 %v20461_v11  ;;  %v20531_v11 = vld [vmem:[#allocation15 + $0x28] ss:$16 sps:$4 sm:$0xff]  }
 0x9b1   :  { %8912 = vmatpush1.bf16.msra.mxu0 %v20456_v18  ;;  %v20536_v18 = vld [vmem:[#allocation15 + $0x44] ss:$16 sps:$4 sm:$0xff]  }
 0x9b2   :  { %8998 = vmatpush1.bf16.msra.mxu1 %v20459_v29  ;;  %8913 = vmatprep.subr.bf16.mxu0 %v20464_v60  ;;  %v20539_v29 = vld [vmem:[#allocation15 + $0x4c] ss:$16 sps:$4 sm:$0xff]   ;;  %v20534_v60 = vld [vmem:[#allocation15 + $0x40] ss:$16 sps:$4 sm:$0xff]  }
 0x9b3   :  { %8999 = vmatprep.subr.bf16.mxu1 %v20467_v23  ;;  %v20537_v23 = vld [vmem:[#allocation15 + $0x48] ss:$16 sps:$4 sm:$0xff]  }
 0x9b5   :  { %8914 = vmatpush1.bf16.msra.mxu0 %v20462_v42  ;;  %v20542_v42 = vld [vmem:[#allocation15 + $0x64] ss:$16 sps:$4 sm:$0xff]  }
 0x9b6   :  { %9000 = vmatpush1.bf16.msra.mxu1 %v20465_v38  ;;  %8915 = vmatprep.subr.bf16.mxu0 %v20470_v62  ;;  %v20540_v38 = vld [vmem:[#allocation15 + $0x60] ss:$16 sps:$4 sm:$0xff]   ;;  %v20543_v62 = vld [vmem:[#allocation15 + $0x68] ss:$16 sps:$4 sm:$0xff]  }
 0x9b7   :  { %9001 = vmatprep.subr.bf16.mxu1 %v20473_v13  ;;  %v20548_v13 = vld [vmem:[#allocation15 + $0x84] ss:$16 sps:$4 sm:$0xff]  }
 0x9b9   :  { %8916 = vmatpush1.bf16.msra.mxu0 %v20468_v48  ;;  %v20551_v48 = vld [vmem:[#allocation15 + $0x8c] ss:$16 sps:$4 sm:$0xff]  }
 0x9ba   :  { %9002 = vmatpush1.bf16.msra.mxu1 %v20471_v0  ;;  %8917 = vmatprep.subr.bf16.mxu0 %v20476_v19  ;;  %v20549_v0 = vld [vmem:[#allocation15 + $0x88] ss:$16 sps:$4 sm:$0xff]   ;;  %v20554_v19 = vld [vmem:[#allocation15 + $0xa4] ss:$16 sps:$4 sm:$0xff]  }
 0x9bb   :  { %9003 = vmatprep.subr.bf16.mxu1 %v20479_v1  ;;  %v20557_v1 = vld [vmem:[#allocation15 + $0xac] ss:$16 sps:$4 sm:$0xff]  }
 0x9bd   :  { %8918 = vmatpush1.bf16.msra.mxu0 %v20474_v36  ;;  %v20552_v36 = vld [vmem:[#allocation15 + $0xa0] ss:$16 sps:$4 sm:$0xff]  }
 0x9be   :  { %9004 = vmatpush1.bf16.msra.mxu1 %v20477_v15  ;;  %8919 = vmatprep.subr.bf16.mxu0 %v20482_v50  ;;  %v20555_v15 = vld [vmem:[#allocation15 + $0xa8] ss:$16 sps:$4 sm:$0xff]   ;;  %v20560_v50 = vld [vmem:[#allocation15 + $0xc4] ss:$16 sps:$4 sm:$0xff]  }
 0x9bf   :  { %9005 = vmatprep.subr.bf16.mxu1 %v20485_v9  ;;  %v20563_v9 = vld [vmem:[#allocation15 + $0xcc] ss:$16 sps:$4 sm:$0xff]  }
 0x9c1   :  { %8920 = vmatpush1.bf16.msra.mxu0 %v20480_v10  ;;  %v20558_v10 = vld [vmem:[#allocation15 + $0xc0] ss:$16 sps:$4 sm:$0xff]  }
 0x9c2   :  { %9006 = vmatpush1.bf16.msra.mxu1 %v20483_v46  ;;  %8921 = vmatprep.subr.bf16.mxu0 %v20488_v43  ;;  %v20561_v46 = vld [vmem:[#allocation15 + $0xc8] ss:$16 sps:$4 sm:$0xff]   ;;  %v20566_v43 = vld [vmem:[#allocation15 + $0xe4] ss:$16 sps:$4 sm:$0xff]  }
 0x9c3   :  { %9007 = vmatprep.subr.bf16.mxu1 %v20491_v30  ;;  %v20569_v30 = vld [vmem:[#allocation15 + $0xec] ss:$16 sps:$4 sm:$0xff]  }
 0x9c5   :  { %8922 = vmatpush1.bf16.msra.mxu0 %v20486_v45  ;;  %v20564_v45 = vld [vmem:[#allocation15 + $0xe0] ss:$16 sps:$4 sm:$0xff]  }
 0x9c6   :  { %9008 = vmatpush1.bf16.msra.mxu1 %v20489_v54  ;;  %8923 = vmatprep.subr.bf16.mxu0 %v20494_v44  ;;  %v20567_v54 = vld [vmem:[#allocation15 + $0xe8] ss:$16 sps:$4 sm:$0xff]   ;;  %v20572_v44 = vld [vmem:[#allocation15 + $0x104] ss:$16 sps:$4 sm:$0xff]  }
 0x9c7   :  { %9009 = vmatprep.subr.bf16.mxu1 %v20497_v47  ;;  %v20575_v47 = vld [vmem:[#allocation15 + $0x10c] ss:$16 sps:$4 sm:$0xff]  }
 0x9c9   :  { %8924 = vmatpush1.bf16.msra.mxu0 %v20492_v22  ;;  %v20570_v22 = vld [vmem:[#allocation15 + $0x100] ss:$16 sps:$4 sm:$0xff]  }
 0x9ca   :  { %9010 = vmatpush1.bf16.msra.mxu1 %v20495_v17  ;;  %8925 = vmatprep.subr.bf16.mxu0 %v20500_v59  ;;  %v20573_v17 = vld [vmem:[#allocation15 + $0x108] ss:$16 sps:$4 sm:$0xff]   ;;  %v20578_v59 = vld [vmem:[#allocation15 + $0x124] ss:$16 sps:$4 sm:$0xff]  }
 0x9cb   :  { %9011 = vmatprep.subr.bf16.mxu1 %v20503_v31  ;;  %v20581_v31 = vld [vmem:[#allocation15 + $0x12c] ss:$16 sps:$4 sm:$0xff]  }
 0x9cd   :  { %8926 = vmatpush1.bf16.msra.mxu0 %v20498_v41  ;;  %v20576_v41 = vld [vmem:[#allocation15 + $0x120] ss:$16 sps:$4 sm:$0xff]  }
 0x9ce   :  { %9012 = vmatpush1.bf16.msra.mxu1 %v20501_v12  ;;  %8927 = vmatprep.subr.bf16.mxu0 %v20506_v20  ;;  %v20579_v12 = vld [vmem:[#allocation15 + $0x128] ss:$16 sps:$4 sm:$0xff]   ;;  %v20584_v20 = vld [vmem:[#allocation15 + $0x144] ss:$16 sps:$4 sm:$0xff]  }
 0x9cf   :  { %9013 = vmatprep.subr.bf16.mxu1 %v20509_v4  ;;  %v20587_v4 = vld [vmem:[#allocation15 + $0x14c] ss:$16 sps:$4 sm:$0xff]  }
 0x9d1   :  { %8928 = vmatpush1.bf16.msra.mxu0 %v20504_v21  ;;  %v20582_v21 = vld [vmem:[#allocation15 + $0x140] ss:$16 sps:$4 sm:$0xff]  }
 0x9d2   :  { %9014 = vmatpush1.bf16.msra.mxu1 %v20507_v34  ;;  %8929 = vmatprep.subr.bf16.mxu0 %v20512_v51  ;;  %v20585_v34 = vld [vmem:[#allocation15 + $0x148] ss:$16 sps:$4 sm:$0xff]   ;;  %v20590_v51 = vld [vmem:[#allocation15 + $0x164] ss:$16 sps:$4 sm:$0xff]  }
 0x9d3   :  { %9015 = vmatprep.subr.bf16.mxu1 %v20515_v56  ;;  %v20593_v56 = vld [vmem:[#allocation15 + $0x16c] ss:$16 sps:$4 sm:$0xff]  }
 0x9d5   :  { %8930 = vmatpush1.bf16.msra.mxu0 %v20510_v40  ;;  %v20588_v40 = vld [vmem:[#allocation15 + $0x160] ss:$16 sps:$4 sm:$0xff]  }
 0x9d6   :  { %9016 = vmatpush1.bf16.msra.mxu1 %v20513_v61  ;;  %8931 = vmatprep.subr.bf16.mxu0 %v20518_v57  ;;  %v20591_v61 = vld [vmem:[#allocation15 + $0x168] ss:$16 sps:$4 sm:$0xff]   ;;  %v20596_v57 = vld [vmem:[#allocation15 + $0x184] ss:$16 sps:$4 sm:$0xff]  }
 0x9d7   :  { %9017 = vmatprep.subr.bf16.mxu1 %v20521_v63  ;;  %v20599_v63 = vld [vmem:[#allocation15 + $0x18c] ss:$16 sps:$4 sm:$0xff]  }
 0x9d9   :  { %8932 = vmatpush1.bf16.msra.mxu0 %v20516_v2  ;;  %v20594_v2 = vld [vmem:[#allocation15 + $0x180] ss:$16 sps:$4 sm:$0xff]  }
 0x9da   :  { %9018 = vmatpush1.bf16.msra.mxu1 %v20519_v52  ;;  %9802 = vmatprep.subr.bf16.mxu0 %v20524_v39  ;;  %v20597_v52 = vld [vmem:[#allocation15 + $0x188] ss:$16 sps:$4 sm:$0xff]   ;;  %v20602_v39 = vld [vmem:[#allocation15 + $0x1a4] ss:$16 sps:$4 sm:$0xff]  }
 0x9db   :  { %9888 = vmatprep.subr.bf16.mxu1 %v20527_v53  ;;  %v20605_v53 = vld [vmem:[#allocation15 + $0x1ac] ss:$16 sps:$4 sm:$0xff]  }
 0x9dc   :  { %8934 = vmatmul.mubr.bf16.vlgmr.msra.gmra.mrb[24].mxu0 %v23161_v35 }
 0x9dd   :  { %9020 = vmatmul.mubr.bf16.vlgmr.msra.gmra.mrb[24].mxu1 %v23161_v35  ;;  %9803 = vmatpush1.bf16.msra.mxu0 %v20522_v5  ;;  %v20545_v35 = vld [vmem:[#allocation15 + $0x6c] ss:$16 sps:$4 sm:$0xff]   ;;  %v20600_v5 = vld [vmem:[#allocation15 + $0x1a0] ss:$16 sps:$4 sm:$0xff]  }
 0x9de   :  { %9834 = vmatprep.mubr.bf16.mxu0 %v22996_v8  ;;  %9889 = vmatpush1.bf16.msra.mxu1 %v20525_v7  ;;  %v20603_v7 = vld [vmem:[#allocation15 + $0x1a8] ss:$16 sps:$4 sm:$0xff]  }
 0x9df   :  { %9920 = vmatprep.mubr.bf16.mxu1 %v22996_v8  ;;  %9804 = vmatprep.subr.bf16.mxu0 %v20530_v32  ;;  %v20546_v8 = vld [vmem:[#allocation15 + $0x80] ss:$16 sps:$4 sm:$0xff]   ;;  %v20608_v32 = vld [vmem:[#allocation15 + $0x1c4] ss:$16 sps:$4 sm:$0xff]  }
 0x9e0   :  { %9890 = vmatprep.subr.bf16.mxu1 %v20533_v14  ;;  %v20611_v14 = vld [vmem:[#allocation15 + $0x1cc] ss:$16 sps:$4 sm:$0xff]  }
 0x9e1   :  { %9805 = vmatpush1.bf16.msra.mxu0 %v20528_v49  ;;  %v20606_v49 = vld [vmem:[#allocation15 + $0x1c0] ss:$16 sps:$4 sm:$0xff]  }
 0x9e2   :  { %9891 = vmatpush1.bf16.msra.mxu1 %v20531_v11  ;;  %9806 = vmatprep.subr.bf16.mxu0 %v20536_v18  ;;  %v20609_v11 = vld [vmem:[#allocation15 + $0x1c8] ss:$16 sps:$4 sm:$0xff]   ;;  %v20614_v18 = vld [vmem:[#allocation15 + $0x1e4] ss:$16 sps:$4 sm:$0xff]  }
 0x9e3   :  { %9892 = vmatprep.subr.bf16.mxu1 %v20539_v29  ;;  %v20617_v29 = vld [vmem:[#allocation15 + $0x1ec] ss:$16 sps:$4 sm:$0xff]  }
 0x9e5   :  { %9807 = vmatpush1.bf16.msra.mxu0 %v20534_v60  ;;  %v20612_v60 = vld [vmem:[#allocation15 + $0x1e0] ss:$16 sps:$4 sm:$0xff]  }
 0x9e6   :  { %9893 = vmatpush1.bf16.msra.mxu1 %v20537_v23  ;;  %9808 = vmatprep.subr.bf16.mxu0 %v20542_v42  ;;  %v20615_v23 = vld [vmem:[#allocation15 + $0x1e8] ss:$16 sps:$4 sm:$0xff]   ;;  %v20620_v42 = vld [vmem:[#allocation15 + $0x204] ss:$16 sps:$4 sm:$0xff]  }
 0x9e7   :  { %9894 = vmatprep.subr.bf16.mxu1 %v20545_v35  ;;  %v20623_v35 = vld [vmem:[#allocation15 + $0x20c] ss:$16 sps:$4 sm:$0xff]  }
 0x9e9   :  { %9809 = vmatpush1.bf16.msra.mxu0 %v20540_v38  ;;  %v20618_v38 = vld [vmem:[#allocation15 + $0x200] ss:$16 sps:$4 sm:$0xff]  }
 0x9ea   :  { %9895 = vmatpush1.bf16.msra.mxu1 %v20543_v62  ;;  %9810 = vmatprep.subr.bf16.mxu0 %v20548_v13  ;;  %v20621_v62 = vld [vmem:[#allocation15 + $0x208] ss:$16 sps:$4 sm:$0xff]   ;;  %v20626_v13 = vld [vmem:[#allocation15 + $0x224] ss:$16 sps:$4 sm:$0xff]  }
 0x9eb   :  { %9896 = vmatprep.subr.bf16.mxu1 %v20551_v48  ;;  %v20629_v48 = vld [vmem:[#allocation15 + $0x22c] ss:$16 sps:$4 sm:$0xff]  }
 0x9ed   :  { %9811 = vmatpush1.bf16.msra.mxu0 %v20546_v8  ;;  %v20624_v8 = vld [vmem:[#allocation15 + $0x220] ss:$16 sps:$4 sm:$0xff]  }
 0x9ee   :  { %9897 = vmatpush1.bf16.msra.mxu1 %v20549_v0  ;;  %9812 = vmatprep.subr.bf16.mxu0 %v20554_v19  ;;  %v20627_v0 = vld [vmem:[#allocation15 + $0x228] ss:$16 sps:$4 sm:$0xff]   ;;  %v20632_v19 = vld [vmem:[#allocation15 + $0x244] ss:$16 sps:$4 sm:$0xff]  }
 0x9ef   :  { %9898 = vmatprep.subr.bf16.mxu1 %v20557_v1  ;;  %v20635_v1 = vld [vmem:[#allocation15 + $0x24c] ss:$16 sps:$4 sm:$0xff]  }
 0x9f1   :  { %9813 = vmatpush1.bf16.msra.mxu0 %v20552_v36  ;;  %v20630_v36 = vld [vmem:[#allocation15 + $0x240] ss:$16 sps:$4 sm:$0xff]  }
 0x9f2   :  { %9899 = vmatpush1.bf16.msra.mxu1 %v20555_v15  ;;  %9814 = vmatprep.subr.bf16.mxu0 %v20560_v50  ;;  %v20633_v15 = vld [vmem:[#allocation15 + $0x248] ss:$16 sps:$4 sm:$0xff]   ;;  %v20638_v50 = vld [vmem:[#allocation15 + $0x264] ss:$16 sps:$4 sm:$0xff]  }
 0x9f3   :  { %9900 = vmatprep.subr.bf16.mxu1 %v20563_v9  ;;  %v20636_v9 = vld [vmem:[#allocation15 + $0x260] ss:$16 sps:$4 sm:$0xff]  }
 0x9f5   :  { %9815 = vmatpush1.bf16.msra.mxu0 %v20558_v10  ;;  %v20639_v10 = vld [vmem:[#allocation15 + $0x268] ss:$16 sps:$4 sm:$0xff]  }
 0x9f6   :  { %9901 = vmatpush1.bf16.msra.mxu1 %v20561_v46  ;;  %9816 = vmatprep.subr.bf16.mxu0 %v20566_v43  ;;  %v20644_v46 = vld [vmem:[#allocation15 + $0x284] ss:$16 sps:$4 sm:$0xff]   ;;  %v20647_v43 = vld [vmem:[#allocation15 + $0x28c] ss:$16 sps:$4 sm:$0xff]  }
 0x9f7   :  { %9902 = vmatprep.subr.bf16.mxu1 %v20569_v30  ;;  %v20645_v30 = vld [vmem:[#allocation15 + $0x288] ss:$16 sps:$4 sm:$0xff]  }
 0x9f9   :  { %9817 = vmatpush1.bf16.msra.mxu0 %v20564_v45  ;;  %v20650_v45 = vld [vmem:[#allocation15 + $0x2a4] ss:$16 sps:$4 sm:$0xff]  }
 0x9fa   :  { %9903 = vmatpush1.bf16.msra.mxu1 %v20567_v54  ;;  %9818 = vmatprep.subr.bf16.mxu0 %v20572_v44  ;;  %v20653_v54 = vld [vmem:[#allocation15 + $0x2ac] ss:$16 sps:$4 sm:$0xff]   ;;  %v20648_v44 = vld [vmem:[#allocation15 + $0x2a0] ss:$16 sps:$4 sm:$0xff]  }
 0x9fb   :  { %9904 = vmatprep.subr.bf16.mxu1 %v20575_v47  ;;  %v20651_v47 = vld [vmem:[#allocation15 + $0x2a8] ss:$16 sps:$4 sm:$0xff]  }
 0x9fd   :  { %9819 = vmatpush1.bf16.msra.mxu0 %v20570_v22  ;;  %v20656_v22 = vld [vmem:[#allocation15 + $0x2c4] ss:$16 sps:$4 sm:$0xff]  }
 0x9fe   :  { %9905 = vmatpush1.bf16.msra.mxu1 %v20573_v17  ;;  %9820 = vmatprep.subr.bf16.mxu0 %v20578_v59  ;;  %v20659_v17 = vld [vmem:[#allocation15 + $0x2cc] ss:$16 sps:$4 sm:$0xff]   ;;  %v20654_v59 = vld [vmem:[#allocation15 + $0x2c0] ss:$16 sps:$4 sm:$0xff]  }
 0x9ff   :  { %9906 = vmatprep.subr.bf16.mxu1 %v20581_v31  ;;  %v20657_v31 = vld [vmem:[#allocation15 + $0x2c8] ss:$16 sps:$4 sm:$0xff]  }
 0xa01   :  { %9821 = vmatpush1.bf16.msra.mxu0 %v20576_v41  ;;  %v20662_v41 = vld [vmem:[#allocation15 + $0x2e4] ss:$16 sps:$4 sm:$0xff]  }
 0xa02   :  { %9907 = vmatpush1.bf16.msra.mxu1 %v20579_v12  ;;  %9822 = vmatprep.subr.bf16.mxu0 %v20584_v20  ;;  %v20665_v12 = vld [vmem:[#allocation15 + $0x2ec] ss:$16 sps:$4 sm:$0xff]   ;;  %v20660_v20 = vld [vmem:[#allocation15 + $0x2e0] ss:$16 sps:$4 sm:$0xff]  }
 0xa03   :  { %9908 = vmatprep.subr.bf16.mxu1 %v20587_v4  ;;  %v20663_v4 = vld [vmem:[#allocation15 + $0x2e8] ss:$16 sps:$4 sm:$0xff]  }
 0xa05   :  { %9823 = vmatpush1.bf16.msra.mxu0 %v20582_v21  ;;  %v20668_v21 = vld [vmem:[#allocation15 + $0x304] ss:$16 sps:$4 sm:$0xff]  }
 0xa06   :  { %9909 = vmatpush1.bf16.msra.mxu1 %v20585_v34  ;;  %9824 = vmatprep.subr.bf16.mxu0 %v20590_v51  ;;  %v20671_v34 = vld [vmem:[#allocation15 + $0x30c] ss:$16 sps:$4 sm:$0xff]   ;;  %v20666_v51 = vld [vmem:[#allocation15 + $0x300] ss:$16 sps:$4 sm:$0xff]  }
 0xa07   :  { %9910 = vmatprep.subr.bf16.mxu1 %v20593_v56  ;;  %v20669_v56 = vld [vmem:[#allocation15 + $0x308] ss:$16 sps:$4 sm:$0xff]  }
 0xa09   :  { %9825 = vmatpush1.bf16.msra.mxu0 %v20588_v40  ;;  %v20674_v40 = vld [vmem:[#allocation15 + $0x324] ss:$16 sps:$4 sm:$0xff]  }
 0xa0a   :  { %9911 = vmatpush1.bf16.msra.mxu1 %v20591_v61  ;;  %9826 = vmatprep.subr.bf16.mxu0 %v20596_v57  ;;  %v20677_v61 = vld [vmem:[#allocation15 + $0x32c] ss:$16 sps:$4 sm:$0xff]   ;;  %v20672_v57 = vld [vmem:[#allocation15 + $0x320] ss:$16 sps:$4 sm:$0xff]  }
 0xa0b   :  { %9912 = vmatprep.subr.bf16.mxu1 %v20599_v63  ;;  %v20675_v63 = vld [vmem:[#allocation15 + $0x328] ss:$16 sps:$4 sm:$0xff]  }
 0xa0d   :  { %9827 = vmatpush1.bf16.msra.mxu0 %v20594_v2  ;;  %v20680_v2 = vld [vmem:[#allocation15 + $0x344] ss:$16 sps:$4 sm:$0xff]  }
 0xa0e   :  { %9913 = vmatpush1.bf16.msra.mxu1 %v20597_v52  ;;  %9828 = vmatprep.subr.bf16.mxu0 %v20602_v39  ;;  %v20683_v52 = vld [vmem:[#allocation15 + $0x34c] ss:$16 sps:$4 sm:$0xff]   ;;  %v20678_v39 = vld [vmem:[#allocation15 + $0x340] ss:$16 sps:$4 sm:$0xff]  }
 0xa0f   :  { %9914 = vmatprep.subr.bf16.mxu1 %v20605_v53  ;;  %v20681_v53 = vld [vmem:[#allocation15 + $0x348] ss:$16 sps:$4 sm:$0xff]  }
 0xa11   :  { %9829 = vmatpush1.bf16.msra.mxu0 %v20600_v5  ;;  %v20686_v5 = vld [vmem:[#allocation15 + $0x364] ss:$16 sps:$4 sm:$0xff]  }
 0xa12   :  { %9915 = vmatpush1.bf16.msra.mxu1 %v20603_v7  ;;  %9830 = vmatprep.subr.bf16.mxu0 %v20608_v32  ;;  %v20689_v7 = vld [vmem:[#allocation15 + $0x36c] ss:$16 sps:$4 sm:$0xff]   ;;  %v20684_v32 = vld [vmem:[#allocation15 + $0x360] ss:$16 sps:$4 sm:$0xff]  }
 0xa13   :  { %9916 = vmatprep.subr.bf16.mxu1 %v20611_v14  ;;  %v20687_v14 = vld [vmem:[#allocation15 + $0x368] ss:$16 sps:$4 sm:$0xff]  }
 0xa15   :  { %9831 = vmatpush1.bf16.msra.mxu0 %v20606_v49  ;;  %v20692_v49 = vld [vmem:[#allocation15 + $0x384] ss:$16 sps:$4 sm:$0xff]  }
 0xa16   :  { %9917 = vmatpush1.bf16.msra.mxu1 %v20609_v11  ;;  %9832 = vmatprep.subr.bf16.mxu0 %v20614_v18  ;;  %v20695_v11 = vld [vmem:[#allocation15 + $0x38c] ss:$16 sps:$4 sm:$0xff]   ;;  %v20690_v18 = vld [vmem:[#allocation15 + $0x380] ss:$16 sps:$4 sm:$0xff]  }
 0xa17   :  { %9918 = vmatprep.subr.bf16.mxu1 %v20617_v29  ;;  %v20693_v29 = vld [vmem:[#allocation15 + $0x388] ss:$16 sps:$4 sm:$0xff]  }
 0xa19   :  { %9833 = vmatpush1.bf16.msra.mxu0 %v20612_v60  ;;  %v20698_v60 = vld [vmem:[#allocation15 + $0x3a4] ss:$16 sps:$4 sm:$0xff]  }
 0xa1a   :  { %9919 = vmatpush1.bf16.msra.mxu1 %v20615_v23  ;;  %9845 = vmatprep.subr.bf16.mxu0 %v20620_v42  ;;  %v20701_v23 = vld [vmem:[#allocation15 + $0x3ac] ss:$16 sps:$4 sm:$0xff]   ;;  %v20696_v42 = vld [vmem:[#allocation15 + $0x3a0] ss:$16 sps:$4 sm:$0xff]  }
 0xa1b   :  { %9931 = vmatprep.subr.bf16.mxu1 %v20623_v35  ;;  %v20699_v35 = vld [vmem:[#allocation15 + $0x3a8] ss:$16 sps:$4 sm:$0xff]  }
 0xa1c   :  { %9835 = vmatmul.mubr.bf16.vlgmr.msra.gmra.mrb[24].mxu0 %v22998_v24 }
 0xa1d   :  { %9921 = vmatmul.mubr.bf16.vlgmr.msra.gmra.mrb[24].mxu1 %v22998_v24  ;;  %9846 = vmatpush1.bf16.msra.mxu0 %v20618_v38  ;;  %v20641_v24 = vld [vmem:[#allocation15 + $0x26c] ss:$16 sps:$4 sm:$0xff]   ;;  %v20704_v38 = vld [vmem:[#allocation15 + $0x3c4] ss:$16 sps:$4 sm:$0xff]  }
 0xa1e   :  { %9877 = vmatprep.mubr.bf16.mxu0 %v23011_v33  ;;  %9932 = vmatpush1.bf16.msra.mxu1 %v20621_v62  ;;  %v20707_v62 = vld [vmem:[#allocation15 + $0x3cc] ss:$16 sps:$4 sm:$0xff]  }
 0xa1f   :  { %9963 = vmatprep.mubr.bf16.mxu1 %v23011_v33  ;;  %9847 = vmatprep.subr.bf16.mxu0 %v20626_v13  ;;  %v20642_v33 = vld [vmem:[#allocation15 + $0x280] ss:$16 sps:$4 sm:$0xff]  }
 0xa20   :  { %9933 = vmatprep.subr.bf16.mxu1 %v20629_v48  ;;  %v20702_v13 = vld [vmem:[#allocation15 + $0x3c0] ss:$16 sps:$4 sm:$0xff]   ;;  %v20705_v48 = vld [vmem:[#allocation15 + $0x3c8] ss:$16 sps:$4 sm:$0xff]  }
 0xa21   :  { %9848 = vmatpush1.bf16.msra.mxu0 %v20624_v8  ;;  %v20710_v8 = vld [vmem:[#allocation15 + $0x3e4] ss:$16 sps:$4 sm:$0xff]  }
 0xa22   :  { %9934 = vmatpush1.bf16.msra.mxu1 %v20627_v0  ;;  %9849 = vmatprep.subr.bf16.mxu0 %v20632_v19  ;;  %v20713_v0 = vld [vmem:[#allocation15 + $0x3ec] ss:$16 sps:$4 sm:$0xff]   ;;  %v20708_v19 = vld [vmem:[#allocation15 + $0x3e0] ss:$16 sps:$4 sm:$0xff]  }
 0xa23   :  { %9935 = vmatprep.subr.bf16.mxu1 %v20635_v1  ;;  %v20711_v1 = vld [vmem:[#allocation15 + $0x3e8] ss:$16 sps:$4 sm:$0xff]  }
 0xa25   :  { %9850 = vmatpush1.bf16.msra.mxu0 %v20630_v36  ;;  %v20716_v36 = vld [vmem:[#allocation16 + $0x4] ss:$16 sps:$4 sm:$0xff]  }
 0xa26   :  { %9936 = vmatpush1.bf16.msra.mxu1 %v20633_v15  ;;  %9851 = vmatprep.subr.bf16.mxu0 %v20638_v50  ;;  %v20719_v15 = vld [vmem:[#allocation16 + $0xc] ss:$16 sps:$4 sm:$0xff]   ;;  %v20714_v50 = vld [vmem:[#allocation16] ss:$16 sps:$4 sm:$0xff]  }
 0xa27   :  { %9937 = vmatprep.subr.bf16.mxu1 %v20641_v24  ;;  %v20717_v24 = vld [vmem:[#allocation16 + $0x8] ss:$16 sps:$4 sm:$0xff]  }
 0xa29   :  { %9852 = vmatpush1.bf16.msra.mxu0 %v20636_v9  ;;  %v20722_v9 = vld [vmem:[#allocation16 + $0x24] ss:$16 sps:$4 sm:$0xff]  }
 0xa2a   :  { %9938 = vmatpush1.bf16.msra.mxu1 %v20639_v10  ;;  %9853 = vmatprep.subr.bf16.mxu0 %v20644_v46  ;;  %v20725_v10 = vld [vmem:[#allocation16 + $0x2c] ss:$16 sps:$4 sm:$0xff]   ;;  %v20720_v46 = vld [vmem:[#allocation16 + $0x20] ss:$16 sps:$4 sm:$0xff]  }
 0xa2b   :  { %9939 = vmatprep.subr.bf16.mxu1 %v20647_v43  ;;  %v20723_v43 = vld [vmem:[#allocation16 + $0x28] ss:$16 sps:$4 sm:$0xff]  }
 0xa2d   :  { %9854 = vmatpush1.bf16.msra.mxu0 %v20642_v33  ;;  %v20728_v33 = vld [vmem:[#allocation16 + $0x44] ss:$16 sps:$4 sm:$0xff]  }
 0xa2e   :  { %9940 = vmatpush1.bf16.msra.mxu1 %v20645_v30  ;;  %9855 = vmatprep.subr.bf16.mxu0 %v20650_v45  ;;  %v20731_v30 = vld [vmem:[#allocation16 + $0x4c] ss:$16 sps:$4 sm:$0xff]   ;;  %v20726_v45 = vld [vmem:[#allocation16 + $0x40] ss:$16 sps:$4 sm:$0xff]  }
 0xa2f   :  { %9941 = vmatprep.subr.bf16.mxu1 %v20653_v54  ;;  %v20729_v54 = vld [vmem:[#allocation16 + $0x48] ss:$16 sps:$4 sm:$0xff]  }
 0xa31   :  { %9856 = vmatpush1.bf16.msra.mxu0 %v20648_v44  ;;  %v20734_v44 = vld [vmem:[#allocation16 + $0x64] ss:$16 sps:$4 sm:$0xff]  }
 0xa32   :  { %9942 = vmatpush1.bf16.msra.mxu1 %v20651_v47  ;;  %9857 = vmatprep.subr.bf16.mxu0 %v20656_v22  ;;  %v20737_v47 = vld [vmem:[#allocation16 + $0x6c] ss:$16 sps:$4 sm:$0xff]   ;;  %v20732_v22 = vld [vmem:[#allocation16 + $0x60] ss:$16 sps:$4 sm:$0xff]  }
 0xa33   :  { %9943 = vmatprep.subr.bf16.mxu1 %v20659_v17  ;;  %v20740_v17 = vld [vmem:[#allocation16 + $0x84] ss:$16 sps:$4 sm:$0xff]  }
 0xa35   :  { %9858 = vmatpush1.bf16.msra.mxu0 %v20654_v59  ;;  %v20743_v59 = vld [vmem:[#allocation16 + $0x8c] ss:$16 sps:$4 sm:$0xff]  }
 0xa36   :  { %9944 = vmatpush1.bf16.msra.mxu1 %v20657_v31  ;;  %9859 = vmatprep.subr.bf16.mxu0 %v20662_v41  ;;  %v20738_v31 = vld [vmem:[#allocation16 + $0x80] ss:$16 sps:$4 sm:$0xff]   ;;  %v20741_v41 = vld [vmem:[#allocation16 + $0x88] ss:$16 sps:$4 sm:$0xff]  }
 0xa37   :  { %9945 = vmatprep.subr.bf16.mxu1 %v20665_v12  ;;  %v20746_v12 = vld [vmem:[#allocation16 + $0xa4] ss:$16 sps:$4 sm:$0xff]  }
 0xa39   :  { %9860 = vmatpush1.bf16.msra.mxu0 %v20660_v20  ;;  %v20749_v20 = vld [vmem:[#allocation16 + $0xac] ss:$16 sps:$4 sm:$0xff]  }
 0xa3a   :  { %9946 = vmatpush1.bf16.msra.mxu1 %v20663_v4  ;;  %9861 = vmatprep.subr.bf16.mxu0 %v20668_v21  ;;  %v20744_v4 = vld [vmem:[#allocation16 + $0xa0] ss:$16 sps:$4 sm:$0xff]   ;;  %v20747_v21 = vld [vmem:[#allocation16 + $0xa8] ss:$16 sps:$4 sm:$0xff]  }
 0xa3b   :  { %9947 = vmatprep.subr.bf16.mxu1 %v20671_v34  ;;  %v20752_v34 = vld [vmem:[#allocation16 + $0xc4] ss:$16 sps:$4 sm:$0xff]  }
 0xa3d   :  { %9862 = vmatpush1.bf16.msra.mxu0 %v20666_v51  ;;  %v20755_v51 = vld [vmem:[#allocation16 + $0xcc] ss:$16 sps:$4 sm:$0xff]  }
 0xa3e   :  { %9948 = vmatpush1.bf16.msra.mxu1 %v20669_v56  ;;  %9863 = vmatprep.subr.bf16.mxu0 %v20674_v40  ;;  %v20750_v56 = vld [vmem:[#allocation16 + $0xc0] ss:$16 sps:$4 sm:$0xff]   ;;  %v20753_v40 = vld [vmem:[#allocation16 + $0xc8] ss:$16 sps:$4 sm:$0xff]  }
 0xa3f   :  { %9949 = vmatprep.subr.bf16.mxu1 %v20677_v61  ;;  %v20758_v61 = vld [vmem:[#allocation16 + $0xe4] ss:$16 sps:$4 sm:$0xff]  }
 0xa41   :  { %9864 = vmatpush1.bf16.msra.mxu0 %v20672_v57  ;;  %v20761_v57 = vld [vmem:[#allocation16 + $0xec] ss:$16 sps:$4 sm:$0xff]  }
 0xa42   :  { %9950 = vmatpush1.bf16.msra.mxu1 %v20675_v63  ;;  %9865 = vmatprep.subr.bf16.mxu0 %v20680_v2  ;;  %v20756_v63 = vld [vmem:[#allocation16 + $0xe0] ss:$16 sps:$4 sm:$0xff]   ;;  %v20759_v2 = vld [vmem:[#allocation16 + $0xe8] ss:$16 sps:$4 sm:$0xff]  }
 0xa43   :  { %9951 = vmatprep.subr.bf16.mxu1 %v20683_v52  ;;  %v20764_v52 = vld [vmem:[#allocation16 + $0x104] ss:$16 sps:$4 sm:$0xff]  }
 0xa45   :  { %9866 = vmatpush1.bf16.msra.mxu0 %v20678_v39  ;;  %v20767_v39 = vld [vmem:[#allocation16 + $0x10c] ss:$16 sps:$4 sm:$0xff]  }
 0xa46   :  { %9952 = vmatpush1.bf16.msra.mxu1 %v20681_v53  ;;  %9867 = vmatprep.subr.bf16.mxu0 %v20686_v5  ;;  %v20762_v53 = vld [vmem:[#allocation16 + $0x100] ss:$16 sps:$4 sm:$0xff]   ;;  %v20765_v5 = vld [vmem:[#allocation16 + $0x108] ss:$16 sps:$4 sm:$0xff]  }
 0xa47   :  { %9953 = vmatprep.subr.bf16.mxu1 %v20689_v7  ;;  %v20770_v7 = vld [vmem:[#allocation16 + $0x124] ss:$16 sps:$4 sm:$0xff]  }
 0xa49   :  { %9868 = vmatpush1.bf16.msra.mxu0 %v20684_v32  ;;  %v20773_v32 = vld [vmem:[#allocation16 + $0x12c] ss:$16 sps:$4 sm:$0xff]  }
 0xa4a   :  { %9954 = vmatpush1.bf16.msra.mxu1 %v20687_v14  ;;  %9869 = vmatprep.subr.bf16.mxu0 %v20692_v49  ;;  %v20768_v14 = vld [vmem:[#allocation16 + $0x120] ss:$16 sps:$4 sm:$0xff]   ;;  %v20771_v49 = vld [vmem:[#allocation16 + $0x128] ss:$16 sps:$4 sm:$0xff]  }
 0xa4b   :  { %9955 = vmatprep.subr.bf16.mxu1 %v20695_v11  ;;  %v20776_v11 = vld [vmem:[#allocation16 + $0x144] ss:$16 sps:$4 sm:$0xff]  }
 0xa4d   :  { %9870 = vmatpush1.bf16.msra.mxu0 %v20690_v18  ;;  %v20779_v18 = vld [vmem:[#allocation16 + $0x14c] ss:$16 sps:$4 sm:$0xff]  }
 0xa4e   :  { %9956 = vmatpush1.bf16.msra.mxu1 %v20693_v29  ;;  %9871 = vmatprep.subr.bf16.mxu0 %v20698_v60  ;;  %v20774_v29 = vld [vmem:[#allocation16 + $0x140] ss:$16 sps:$4 sm:$0xff]   ;;  %v20777_v60 = vld [vmem:[#allocation16 + $0x148] ss:$16 sps:$4 sm:$0xff]  }
 0xa4f   :  { %9957 = vmatprep.subr.bf16.mxu1 %v20701_v23  ;;  %v20782_v23 = vld [vmem:[#allocation16 + $0x164] ss:$16 sps:$4 sm:$0xff]  }
 0xa51   :  { %9872 = vmatpush1.bf16.msra.mxu0 %v20696_v42  ;;  %v20785_v42 = vld [vmem:[#allocation16 + $0x16c] ss:$16 sps:$4 sm:$0xff]  }
 0xa52   :  { %9958 = vmatpush1.bf16.msra.mxu1 %v20699_v35  ;;  %9873 = vmatprep.subr.bf16.mxu0 %v20704_v38  ;;  %v20780_v35 = vld [vmem:[#allocation16 + $0x160] ss:$16 sps:$4 sm:$0xff]   ;;  %v20783_v38 = vld [vmem:[#allocation16 + $0x168] ss:$16 sps:$4 sm:$0xff]  }
 0xa53   :  { %9959 = vmatprep.subr.bf16.mxu1 %v20707_v62  ;;  %v20788_v62 = vld [vmem:[#allocation16 + $0x184] ss:$16 sps:$4 sm:$0xff]  }
 0xa55   :  { %9874 = vmatpush1.bf16.msra.mxu0 %v20702_v13  ;;  %v20791_v13 = vld [vmem:[#allocation16 + $0x18c] ss:$16 sps:$4 sm:$0xff]  }
 0xa56   :  { %9960 = vmatpush1.bf16.msra.mxu1 %v20705_v48  ;;  %9875 = vmatprep.subr.bf16.mxu0 %v20710_v8  ;;  %v20786_v48 = vld [vmem:[#allocation16 + $0x180] ss:$16 sps:$4 sm:$0xff]   ;;  %v20789_v8 = vld [vmem:[#allocation16 + $0x188] ss:$16 sps:$4 sm:$0xff]  }
 0xa57   :  { %9961 = vmatprep.subr.bf16.mxu1 %v20713_v0  ;;  %v20794_v0 = vld [vmem:[#allocation16 + $0x1a4] ss:$16 sps:$4 sm:$0xff]  }
 0xa59   :  { %9876 = vmatpush1.bf16.msra.mxu0 %v20708_v19  ;;  %v20797_v19 = vld [vmem:[#allocation16 + $0x1ac] ss:$16 sps:$4 sm:$0xff]  }
 0xa5a   :  { %9962 = vmatpush1.bf16.msra.mxu1 %v20711_v1  ;;  %10846 = vmatprep.subr.bf16.mxu0 %v20716_v36  ;;  %v20792_v1 = vld [vmem:[#allocation16 + $0x1a0] ss:$16 sps:$4 sm:$0xff]   ;;  %v20795_v36 = vld [vmem:[#allocation16 + $0x1a8] ss:$16 sps:$4 sm:$0xff]  }
 0xa5b   :  { %10932 = vmatprep.subr.bf16.mxu1 %v20719_v15  ;;  %v20800_v15 = vld [vmem:[#allocation16 + $0x1c4] ss:$16 sps:$4 sm:$0xff]  }
 0xa5c   :  { %9878 = vmatmul.mubr.bf16.vlgmr.msra.gmra.mrb[24].mxu0 %v23017_v37 }
 0xa5d   :  { %9964 = vmatmul.mubr.bf16.vlgmr.msra.gmra.mrb[24].mxu1 %v23017_v37  ;;  %10847 = vmatpush1.bf16.msra.mxu0 %v20714_v50  ;;  %v20735_v37 = vld [vmem:[#allocation16 + $0x68] ss:$16 sps:$4 sm:$0xff]   ;;  %v20803_v50 = vld [vmem:[#allocation16 + $0x1cc] ss:$16 sps:$4 sm:$0xff]  }
 0xa5e   :  { %10933 = vmatpush1.bf16.msra.mxu1 %v20717_v24  ;;  %10848 = vmatprep.subr.bf16.mxu0 %v20722_v9  ;;  %v20798_v24 = vld [vmem:[#allocation16 + $0x1c0] ss:$16 sps:$4 sm:$0xff]   ;;  %v20801_v9 = vld [vmem:[#allocation16 + $0x1c8] ss:$16 sps:$4 sm:$0xff]  }
 0xa5f   :  { %10934 = vmatprep.subr.bf16.mxu1 %v20725_v10  ;;  %v20804_v10 = vld [vmem:[#allocation16 + $0x1e0] ss:$16 sps:$4 sm:$0xff]  }
 0xa61   :  { %10849 = vmatpush1.bf16.msra.mxu0 %v20720_v46  ;;  %v20806_v46 = vld [vmem:[#allocation16 + $0x1e4] ss:$16 sps:$4 sm:$0xff]  }
 0xa62   :  { %10935 = vmatpush1.bf16.msra.mxu1 %v20723_v43  ;;  %10850 = vmatprep.subr.bf16.mxu0 %v20728_v33  ;;  %v20807_v43 = vld [vmem:[#allocation16 + $0x1e8] ss:$16 sps:$4 sm:$0xff]   ;;  %v20809_v33 = vld [vmem:[#allocation16 + $0x1ec] ss:$16 sps:$4 sm:$0xff]  }
 0xa63   :  { %10936 = vmatprep.subr.bf16.mxu1 %v20731_v30  ;;  %v20812_v30 = vld [vmem:[#allocation16 + $0x204] ss:$16 sps:$4 sm:$0xff]  }
 0xa65   :  { %10851 = vmatpush1.bf16.msra.mxu0 %v20726_v45  ;;  %v20815_v45 = vld [vmem:[#allocation16 + $0x20c] ss:$16 sps:$4 sm:$0xff]  }
 0xa66   :  { %10937 = vmatpush1.bf16.msra.mxu1 %v20729_v54  ;;  %10852 = vmatprep.subr.bf16.mxu0 %v20734_v44  ;;  %v9982_v54 = vld [vmem:[%s23615_s10] sm:$0xf] }
 0xa67   :  { %10938 = vmatprep.subr.bf16.mxu1 %v20737_v47  ;;  %v9987_v44 = vrot.slane %v9982_v54, %v22680_v25  ;;  %v9995_v47 = vrot.slane %v9982_v54, %v22686_v27 }
 0xa69   :  { %10853 = vmatpush1.bf16.msra.mxu0 %v20732_v22  ;;  %v9991_v22 = vrot.slane %v9982_v54, %v22683_v26 }
 0xa6a   :  { %10939 = vmatpush1.bf16.msra.mxu1 %v20735_v37  ;;  %10854 = vmatprep.subr.bf16.mxu0 %v20740_v17  ;;  %v9999_v37 = vrot.slane %v9982_v54, %v22689_v28  ;;  %v20813_v54 = vld [vmem:[#allocation16 + $0x208] ss:$16 sps:$4 sm:$0xff]  }
 0xa6b   :  { %10940 = vmatprep.subr.bf16.mxu1 %v20743_v59 }
 0xa6d   :  { %10855 = vmatpush1.bf16.msra.mxu0 %v20738_v31 }
 0xa6e   :  { %10941 = vmatpush1.bf16.msra.mxu1 %v20741_v41  ;;  %10856 = vmatprep.subr.bf16.mxu0 %v20746_v12 }
 0xa6f   :  { %10942 = vmatprep.subr.bf16.mxu1 %v20749_v20 }
 0xa71   :  { %10857 = vmatpush1.bf16.msra.mxu0 %v20744_v4 }
 0xa72   :  { %10943 = vmatpush1.bf16.msra.mxu1 %v20747_v21  ;;  %10858 = vmatprep.subr.bf16.mxu0 %v20752_v34 }
 0xa73   :  { %10944 = vmatprep.subr.bf16.mxu1 %v20755_v51 }
 0xa75   :  { %10859 = vmatpush1.bf16.msra.mxu0 %v20750_v56 }
 0xa76   :  { %10945 = vmatpush1.bf16.msra.mxu1 %v20753_v40  ;;  %10860 = vmatprep.subr.bf16.mxu0 %v20758_v61 }
 0xa77   :  { %10946 = vmatprep.subr.bf16.mxu1 %v20761_v57 }
 0xa79   :  { %10861 = vmatpush1.bf16.msra.mxu0 %v20756_v63 }
 0xa7a   :  { %10947 = vmatpush1.bf16.msra.mxu1 %v20759_v2  ;;  %10862 = vmatprep.subr.bf16.mxu0 %v20764_v52 }
 0xa7b   :  { %10948 = vmatprep.subr.bf16.mxu1 %v20767_v39 }
 0xa7d   :  { %10863 = vmatpush1.bf16.msra.mxu0 %v20762_v53 }
 0xa7e   :  { %10949 = vmatpush1.bf16.msra.mxu1 %v20765_v5  ;;  %10864 = vmatprep.subr.bf16.mxu0 %v20770_v7 }
 0xa7f   :  { %10950 = vmatprep.subr.bf16.mxu1 %v20773_v32 }
 0xa81   :  { %10865 = vmatpush1.bf16.msra.mxu0 %v20768_v14 }
 0xa82   :  { %10951 = vmatpush1.bf16.msra.mxu1 %v20771_v49  ;;  %10866 = vmatprep.subr.bf16.mxu0 %v20776_v11 }
 0xa83   :  { %10952 = vmatprep.subr.bf16.mxu1 %v20779_v18 }
 0xa85   :  { %10867 = vmatpush1.bf16.msra.mxu0 %v20774_v29 }
 0xa86   :  { %10953 = vmatpush1.bf16.msra.mxu1 %v20777_v60  ;;  %10868 = vmatprep.subr.bf16.mxu0 %v20782_v23 }
 0xa87   :  { %10954 = vmatprep.subr.bf16.mxu1 %v20785_v42 }
 0xa89   :  { %10869 = vmatpush1.bf16.msra.mxu0 %v20780_v35 }
 0xa8a   :  { %10955 = vmatpush1.bf16.msra.mxu1 %v20783_v38  ;;  %10870 = vmatprep.subr.bf16.mxu0 %v20788_v62 }
 0xa8b   :  { %10956 = vmatprep.subr.bf16.mxu1 %v20791_v13 }
 0xa8d   :  { %10871 = vmatpush1.bf16.msra.mxu0 %v20786_v48 }
 0xa8e   :  { %10957 = vmatpush1.bf16.msra.mxu1 %v20789_v8  ;;  %10872 = vmatprep.subr.bf16.mxu0 %v20794_v0 }
 0xa8f   :  { %10958 = vmatprep.subr.bf16.mxu1 %v20797_v19 }
 0xa91   :  { %10873 = vmatpush1.bf16.msra.mxu0 %v20792_v1 }
 0xa92   :  { %10959 = vmatpush1.bf16.msra.mxu1 %v20795_v36  ;;  %10874 = vmatprep.subr.bf16.mxu0 %v20800_v15 }
 0xa93   :  { %10960 = vmatprep.subr.bf16.mxu1 %v20803_v50 }
 0xa95   :  { %10875 = vmatpush1.bf16.msra.mxu0 %v20798_v24 }
 0xa96   :  { %10961 = vmatpush1.bf16.msra.mxu1 %v20801_v9  ;;  %10876 = vmatprep.subr.bf16.mxu0 %v20806_v46 }
 0xa97   :  { %10962 = vmatprep.subr.bf16.mxu1 %v20809_v33 }
 0xa99   :  { %10877 = vmatpush1.bf16.msra.mxu0 %v20804_v10 }
 0xa9a   :  { %10963 = vmatpush1.bf16.msra.mxu1 %v20807_v43  ;;  %10889 = vmatprep.subr.bf16.mxu0 %v20812_v30 }
 0xa9b   :  { %10975 = vmatprep.subr.bf16.mxu1 %v20815_v45  ;;  %v20810_v45 = vld [vmem:[#allocation16 + $0x200] ss:$16 sps:$4 sm:$0xff]  }
 0xb2f   :  { %v9879_v17 = vpop.f32.mrb[24].mxu0 }
 0xb30   :  { %v10004_v59 = vadd.f32 %v9987_v44, %v9879_v17  ;;  %v9965_v31 = vpop.f32.mrb[24].mxu1  ;;  %v9881_v41 = vpop.f32.mrb[25].mxu0  ;;  %v20821_v17 = vld [vmem:[#allocation16 + $0x22c] ss:$16 sps:$4 sm:$0xff]  }
 0xb31   :  { %v10006_v12 = vadd.f32 %v9995_v47, %v9965_v31  ;;  %v10005_v20 = vadd.f32 %v9991_v22, %v9881_v41  ;;  %v9967_v4 = vpop.f32.mrb[25].mxu1  ;;  %v9883_v21 = vpop.f32.mrb[26].mxu0  ;;  %v20819_v31 = vld [vmem:[#allocation16 + $0x228] ss:$16 sps:$4 sm:$0xff]   ;;  %v20824_v41 = vld [vmem:[#allocation16 + $0x244] ss:$16 sps:$4 sm:$0xff]  }
 0xb32   :  { %v10020_v34 = vmul.f32 1.442695, %v10004_v59  ;;  %v10007_v51 = vadd.f32 %v9999_v37, %v9967_v4  ;;  %v10008_v56 = vadd.f32 %v9987_v44, %v9883_v21  ;;  %v9969_v40 = vpop.f32.mrb[26].mxu1  ;;  %v9885_v61 = vpop.f32.mrb[27].mxu0  ;;  %vm10012_vm1 = vcmp.gt.f32.partialorder %v10004_v59, 0.0 }
 0xb33   :  { %v10024_v57 = vmul.f32 1.442695, %v10006_v12  ;;  %v10022_v63 = vmul.f32 1.442695, %v10005_v20  ;;  %v9971_v52 = vpop.f32.mrb[27].mxu1  ;;  %v10010_v53 = vadd.f32 %v9995_v47, %v9969_v40  ;;  %v10009_v5 = vadd.f32 %v9991_v22, %v9885_v61 }
 0xb34   :  { %21863 = vpow2.f32 %v10020_v34  ;;  %v10026_v2 = vmul.f32 1.442695, %v10007_v51  ;;  %v10028_v39 = vmul.f32 1.442695, %v10008_v56  ;;  %v10011_v7 = vadd.f32 %v9999_v37, %v9971_v52  ;;  %v20818_v37 = vld [vmem:[#allocation16 + $0x224] ss:$16 sps:$4 sm:$0xff]  }
 0xb35   :  { %21865 = vpow2.f32 %v10024_v57  ;;  %v10032_v32 = vmul.f32 1.442695, %v10010_v53  ;;  %v10030_v14 = vmul.f32 1.442695, %v10009_v5  ;;  %vm10014_vm4 = vcmp.gt.f32.partialorder %v10006_v12, 0.0 }
 0xb36   :  { %21867 = vpow2.f32 %v10022_v63  ;;  %v10034_v49 = vmul.f32 1.442695, %v10011_v7  ;;  %vm10013_vm5 = vcmp.gt.f32.partialorder %v10005_v20, 0.0  ;;  %vm10015_vm6 = vcmp.gt.f32.partialorder %v10007_v51, 0.0  ;;  %v20825_v4 = vld [vmem:[#allocation16 + $0x248] ss:$16 sps:$4 sm:$0xff]  }
 0xb37   :  { %21869 = vpow2.f32 %v10026_v2  ;;  %vm10016_vm7 = vcmp.gt.f32.partialorder %v10008_v56, 0.0  ;;  %vm10018_vm8 = vcmp.gt.f32.partialorder %v10010_v53, 0.0  ;;  %vm10017_vm9 = vcmp.gt.f32.partialorder %v10009_v5, 0.0  ;;  %v20830_v21 = vld [vmem:[#allocation16 + $0x264] ss:$16 sps:$4 sm:$0xff]  }
 0xb38   :  { %21871 = vpow2.f32 %v10028_v39  ;;  %vm10019_vm11 = vcmp.gt.f32.partialorder %v10011_v7, 0.0  ;;  %v20833_v34 = vld [vmem:[#allocation16 + $0x26c] ss:$16 sps:$4 sm:$0xff]   ;;  %v20836_v40 = vld [vmem:[#allocation16 + $0x284] ss:$16 sps:$4 sm:$0xff]  }
 0xb39   :  { %21873 = vpow2.f32 %v10032_v32  ;;  %v20839_v61 = vld [vmem:[#allocation16 + $0x28c] ss:$16 sps:$4 sm:$0xff]   ;;  %v20834_v57 = vld [vmem:[#allocation16 + $0x280] ss:$16 sps:$4 sm:$0xff]   ;;  %v20837_v63 = vld [vmem:[#allocation16 + $0x288] ss:$16 sps:$4 sm:$0xff]  }
 0xb3a   :  { %21875 = vpow2.f32 %v10030_v14  ;;  %v20842_v2 = vld [vmem:[#allocation16 + $0x2a4] ss:$16 sps:$4 sm:$0xff]   ;;  %v20845_v52 = vld [vmem:[#allocation16 + $0x2ac] ss:$16 sps:$4 sm:$0xff]   ;;  %v20840_v39 = vld [vmem:[#allocation16 + $0x2a0] ss:$16 sps:$4 sm:$0xff]  }
 0xb3b   :  { %21877 = vpow2.f32 %v10034_v49  ;;  %v20846_v32 = vld [vmem:[#allocation16 + $0x2c0] ss:$16 sps:$4 sm:$0xff]   ;;  %v20849_v14 = vld [vmem:[#allocation16 + $0x2c8] ss:$16 sps:$4 sm:$0xff]   ;;  %v20854_v49 = vld [vmem:[#allocation16 + $0x2e4] ss:$16 sps:$4 sm:$0xff]  }
 0xb3e   :  { %v21864_v11 = vpop.eup %21863 }
 0xb3f   :  { %v21866_v18 = vpop.eup %21865  ;;  %v17863_v23 = vadd.f32 -1.0, %v21864_v11  ;;  %v20857_v11 = vld [vmem:[#allocation16 + $0x2ec] ss:$16 sps:$4 sm:$0xff]  }
 0xb40   :  { %v21868_v29 = vpop.eup %21867  ;;  %v17865_v35 = vadd.f32 -1.0, %v21866_v18  ;;  %v20852_v18 = vld [vmem:[#allocation16 + $0x2e0] ss:$16 sps:$4 sm:$0xff]  }
 0xb41   :  { %v21870_v60 = vpop.eup %21869  ;;  %v17864_v62 = vadd.f32 -1.0, %v21868_v29  ;;  %v10044_v1 = vsel %vm10012_vm1, %v10004_v59, %v17863_v23  ;;  %v20816_v59 = vld [vmem:[#allocation16 + $0x220] ss:$16 sps:$4 sm:$0xff]   ;;  %v20855_v29 = vld [vmem:[#allocation16 + $0x2e8] ss:$16 sps:$4 sm:$0xff]  }
 0xb42   :  { %v21872_v42 = vpop.eup %21871  ;;  %v17866_v8 = vadd.f32 -1.0, %v21870_v60  ;;  %v10046_v50 = vsel %vm10014_vm4, %v10006_v12, %v17865_v35  ;;  %v20827_v12 = vld [vmem:[#allocation16 + $0x24c] ss:$16 sps:$4 sm:$0xff]   ;;  %v20860_v60 = vld [vmem:[#allocation16 + $0x304] ss:$16 sps:$4 sm:$0xff]  }
 0xb43   :  { %v21874_v38 = vpop.eup %21873  ;;  %v17867_v13 = vadd.f32 -1.0, %v21872_v42  ;;  %v10045_v43 = vsel %vm10013_vm5, %v10005_v20, %v17864_v62  ;;  %v20822_v20 = vld [vmem:[#allocation16 + $0x240] ss:$16 sps:$4 sm:$0xff]   ;;  %v20863_v23 = vld [vmem:[#allocation16 + $0x30c] ss:$16 sps:$4 sm:$0xff]  }
 0xb44   :  { %v21876_v48 = vpop.eup %21875  ;;  %v17869_v0 = vadd.f32 -1.0, %v21874_v38  ;;  %v10047_v44 = vsel %vm10015_vm6, %v10007_v51, %v17866_v8  ;;  %v20828_v51 = vld [vmem:[#allocation16 + $0x260] ss:$16 sps:$4 sm:$0xff]   ;;  %v20861_v35 = vld [vmem:[#allocation16 + $0x308] ss:$16 sps:$4 sm:$0xff]  }
 0xb45   :  { %v21878_v19 = vpop.eup %21877  ;;  %v10048_v36 = vsel %vm10016_vm7, %v10008_v56, %v17867_v13  ;;  %v17868_v15 = vadd.f32 -1.0, %v21876_v48  ;;  %v20831_v56 = vld [vmem:[#allocation16 + $0x268] ss:$16 sps:$4 sm:$0xff]   ;;  %v20858_v42 = vld [vmem:[#allocation16 + $0x300] ss:$16 sps:$4 sm:$0xff]  }
 0xb46   :  { %v10052_v24 = vpack.c.bf16 %v10048_v36, %v10044_v1  ;;  %v10050_v9 = vsel %vm10018_vm8, %v10010_v53, %v17869_v0  ;;  %v17870_v10 = vadd.f32 -1.0, %v21878_v19  ;;  %v20843_v53 = vld [vmem:[#allocation16 + $0x2a8] ss:$16 sps:$4 sm:$0xff]   ;;  %v20866_v38 = vld [vmem:[#allocation16 + $0x324] ss:$16 sps:$4 sm:$0xff]  }
 0xb47   :  { %v23187_v46 = vpack.c.bf16 %v10050_v9, %v10046_v50  ;;  %v10049_v33 = vsel %vm10017_vm9, %v10009_v5, %v17868_v15  ;;  %v20848_v5 = vld [vmem:[#allocation16 + $0x2c4] ss:$16 sps:$4 sm:$0xff]   ;;  %v20869_v62 = vld [vmem:[#allocation16 + $0x32c] ss:$16 sps:$4 sm:$0xff]   ;;  %v20864_v13 = vld [vmem:[#allocation16 + $0x320] ss:$16 sps:$4 sm:$0xff]  }
 0xb48   :  { %v10053_v30 = vpack.c.bf16 %v10049_v33, %v10045_v43  ;;  %v10051_v47 = vsel %vm10019_vm11, %v10011_v7, %v17870_v10  ;;  %v20851_v7 = vld [vmem:[#allocation16 + $0x2cc] ss:$16 sps:$4 sm:$0xff]   ;;  %v20867_v48 = vld [vmem:[#allocation16 + $0x328] ss:$16 sps:$4 sm:$0xff]   ;;  %v20872_v8 = vld [vmem:[#allocation16 + $0x344] ss:$16 sps:$4 sm:$0xff]  }
 0xb49   :  { %v10055_v22 = vpack.c.bf16 %v10051_v47, %v10047_v44  ;;  %v20875_v0 = vld [vmem:[#allocation16 + $0x34c] ss:$16 sps:$4 sm:$0xff]   ;;  %v20870_v19 = vld [vmem:[#allocation16 + $0x340] ss:$16 sps:$4 sm:$0xff]   ;;  %v20873_v1 = vld [vmem:[#allocation16 + $0x348] ss:$16 sps:$4 sm:$0xff]  }
 0xb4a   :  { %10878 = vmatprep.mubr.bf16.mxu0 %v10053_v30  ;;  %10964 = vmatprep.mubr.bf16.mxu1 %v10053_v30  ;;  %v20878_v36 = vld [vmem:[#allocation16 + $0x364] ss:$16 sps:$4 sm:$0xff]   ;;  %v20881_v15 = vld [vmem:[#allocation16 + $0x36c] ss:$16 sps:$4 sm:$0xff]   ;;  %v20876_v50 = vld [vmem:[#allocation16 + $0x360] ss:$16 sps:$4 sm:$0xff]  }
 0xb4b   :  { %10879 = vmatmul.mubr.bf16.vlgmr.msra.gmra.mrb[28].mxu0 %v10052_v24  ;;  %10965 = vmatmul.mubr.bf16.vlgmr.msra.gmra.mrb[28].mxu1 %v10052_v24  ;;  %v20879_v24 = vld [vmem:[#allocation16 + $0x368] ss:$16 sps:$4 sm:$0xff]   ;;  %v20884_v9 = vld [vmem:[#allocation16 + $0x384] ss:$16 sps:$4 sm:$0xff]   ;;  %v20887_v10 = vld [vmem:[#allocation16 + $0x38c] ss:$16 sps:$4 sm:$0xff]  }
 0xb4c   :  { %10890 = vmatpush1.bf16.msra.mxu0 %v20810_v45  ;;  %10976 = vmatpush1.bf16.msra.mxu1 %v20813_v54  ;;  %v20882_v43 = vld [vmem:[#allocation16 + $0x380] ss:$16 sps:$4 sm:$0xff]   ;;  %v20885_v33 = vld [vmem:[#allocation16 + $0x388] ss:$16 sps:$4 sm:$0xff]   ;;  %v20890_v30 = vld [vmem:[#allocation16 + $0x3a4] ss:$16 sps:$4 sm:$0xff]  }
 0xb4d   :  { %10921 = vmatprep.mubr.bf16.mxu0 %v10055_v22  ;;  %11007 = vmatprep.mubr.bf16.mxu1 %v10055_v22  ;;  %v20893_v45 = vld [vmem:[#allocation16 + $0x3ac] ss:$16 sps:$4 sm:$0xff]   ;;  %v20888_v54 = vld [vmem:[#allocation16 + $0x3a0] ss:$16 sps:$4 sm:$0xff]   ;;  %v20891_v44 = vld [vmem:[#allocation16 + $0x3a8] ss:$16 sps:$4 sm:$0xff]  }
 0xb4e   :  { %10891 = vmatprep.subr.bf16.mxu0 %v20818_v37  ;;  %10977 = vmatprep.subr.bf16.mxu1 %v20821_v17  ;;  %v20896_v47 = vld [vmem:[#allocation16 + $0x3c4] ss:$16 sps:$4 sm:$0xff]   ;;  %v20899_v22 = vld [vmem:[#allocation16 + $0x3cc] ss:$16 sps:$4 sm:$0xff]   ;;  %v20894_v37 = vld [vmem:[#allocation16 + $0x3c0] ss:$16 sps:$4 sm:$0xff]  }
 0xb4f   :  { %v20897_v17 = vld [vmem:[#allocation16 + $0x3c8] ss:$16 sps:$4 sm:$0xff]  }
 0xb50   :  { %10892 = vmatpush1.bf16.msra.mxu0 %v20816_v59  ;;  %10978 = vmatpush1.bf16.msra.mxu1 %v20819_v31  ;;  %v20902_v59 = vld [vmem:[#allocation16 + $0x3e4] ss:$16 sps:$4 sm:$0xff]   ;;  %v20905_v31 = vld [vmem:[#allocation16 + $0x3ec] ss:$16 sps:$4 sm:$0xff]  }
 0xb51   :  { %10893 = vmatprep.subr.bf16.mxu0 %v20824_v41  ;;  %10979 = vmatprep.subr.bf16.mxu1 %v20827_v12  ;;  %v20900_v41 = vld [vmem:[#allocation16 + $0x3e0] ss:$16 sps:$4 sm:$0xff]   ;;  %v20903_v12 = vld [vmem:[#allocation16 + $0x3e8] ss:$16 sps:$4 sm:$0xff]  }
 0xb54   :  { %10894 = vmatpush1.bf16.msra.mxu0 %v20822_v20  ;;  %10980 = vmatpush1.bf16.msra.mxu1 %v20825_v4  ;;  %v20906_v20 = vld [vmem:[%s23616_s29 + $0x40] sm:$0xff]  }
 0xb55   :  { %10895 = vmatprep.subr.bf16.mxu0 %v20830_v21  ;;  %10981 = vmatprep.subr.bf16.mxu1 %v20833_v34  ;;  %v20907_v4 = vld [vmem:[%s23616_s29 + $0xc0] sm:$0xff]  }
 0xb56   :  { %v20908_v21 = vld [vmem:[%s23616_s29] sm:$0xff]  }
 0xb57   :  { %v20909_v34 = vld [vmem:[%s23616_s29 + $0x80] sm:$0xff]  }
 0xb58   :  { %10896 = vmatpush1.bf16.msra.mxu0 %v20828_v51  ;;  %10982 = vmatpush1.bf16.msra.mxu1 %v20831_v56  ;;  %v20910_v51 = vld [vmem:[%s23616_s29 + $0x48] sm:$0xff]  }
 0xb59   :  { %10897 = vmatprep.subr.bf16.mxu0 %v20836_v40  ;;  %10983 = vmatprep.subr.bf16.mxu1 %v20839_v61  ;;  %v20911_v56 = vld [vmem:[%s23616_s29 + $0xc8] sm:$0xff]  }
 0xb5a   :  { %v20912_v40 = vld [vmem:[%s23616_s29 + $0x8] sm:$0xff]  }
 0xb5b   :  { %v20913_v61 = vld [vmem:[%s23616_s29 + $0x88] sm:$0xff]  }
 0xb5c   :  { %10898 = vmatpush1.bf16.msra.mxu0 %v20834_v57  ;;  %10984 = vmatpush1.bf16.msra.mxu1 %v20837_v63  ;;  %v20915_v57 = vld [vmem:[%s23616_s29 + $0xd0] sm:$0xff]  }
 0xb5d   :  { %10899 = vmatprep.subr.bf16.mxu0 %v20842_v2  ;;  %10985 = vmatprep.subr.bf16.mxu1 %v20845_v52  ;;  %v20916_v63 = vld [vmem:[%s23616_s29 + $0x10] sm:$0xff]   ;;  %v20918_v52 = vld [vmem:[%s23616_s29 + $0x58] sm:$0xff]  }
 0xb5e   :  { %v20917_v2 = vld [vmem:[%s23616_s29 + $0x90] sm:$0xff]  }
 0xb60   :  { %10900 = vmatpush1.bf16.msra.mxu0 %v20840_v39  ;;  %10986 = vmatpush1.bf16.msra.mxu1 %v20843_v53  ;;  %v20919_v39 = vld [vmem:[%s23616_s29 + $0xd8] sm:$0xff]  }
 0xb61   :  { %10901 = vmatprep.subr.bf16.mxu0 %v20848_v5  ;;  %10987 = vmatprep.subr.bf16.mxu1 %v20851_v7  ;;  %v20920_v53 = vld [vmem:[%s23616_s29 + $0x18] sm:$0xff]   ;;  %v20922_v7 = vld [vmem:[%s23616_s29 + $0x60] sm:$0xff]  }
 0xb62   :  { %v20921_v5 = vld [vmem:[%s23616_s29 + $0x98] sm:$0xff]  }
 0xb64   :  { %10902 = vmatpush1.bf16.msra.mxu0 %v20846_v32  ;;  %10988 = vmatpush1.bf16.msra.mxu1 %v20849_v14  ;;  %v20923_v32 = vld [vmem:[%s23616_s29 + $0xe0] sm:$0xff]  }
 0xb65   :  { %10903 = vmatprep.subr.bf16.mxu0 %v20854_v49  ;;  %10989 = vmatprep.subr.bf16.mxu1 %v20857_v11  ;;  %v20924_v14 = vld [vmem:[%s23616_s29 + $0x20] sm:$0xff]   ;;  %v20926_v11 = vld [vmem:[%s23616_s29 + $0x68] sm:$0xff]  }
 0xb66   :  { %v20925_v49 = vld [vmem:[%s23616_s29 + $0xa0] sm:$0xff]  }
 0xb68   :  { %10904 = vmatpush1.bf16.msra.mxu0 %v20852_v18  ;;  %10990 = vmatpush1.bf16.msra.mxu1 %v20855_v29  ;;  %v20927_v18 = vld [vmem:[%s23616_s29 + $0xe8] sm:$0xff]  }
 0xb69   :  { %10905 = vmatprep.subr.bf16.mxu0 %v20860_v60  ;;  %10991 = vmatprep.subr.bf16.mxu1 %v20863_v23  ;;  %v20928_v29 = vld [vmem:[%s23616_s29 + $0x28] sm:$0xff]   ;;  %v20930_v23 = vld [vmem:[%s23616_s29 + $0x70] sm:$0xff]  }
 0xb6a   :  { %v20929_v60 = vld [vmem:[%s23616_s29 + $0xa8] sm:$0xff]  }
 0xb6c   :  { %10906 = vmatpush1.bf16.msra.mxu0 %v20858_v42  ;;  %10992 = vmatpush1.bf16.msra.mxu1 %v20861_v35  ;;  %v20931_v42 = vld [vmem:[%s23616_s29 + $0xf0] sm:$0xff]  }
 0xb6d   :  { %10907 = vmatprep.subr.bf16.mxu0 %v20866_v38  ;;  %10993 = vmatprep.subr.bf16.mxu1 %v20869_v62  ;;  %v20932_v35 = vld [vmem:[%s23616_s29 + $0x30] sm:$0xff]   ;;  %v20934_v62 = vld [vmem:[%s23616_s29 + $0x78] sm:$0xff]  }
 0xb6e   :  { %v20933_v38 = vld [vmem:[%s23616_s29 + $0xb0] sm:$0xff]  }
 0xb70   :  { %10908 = vmatpush1.bf16.msra.mxu0 %v20864_v13  ;;  %10994 = vmatpush1.bf16.msra.mxu1 %v20867_v48  ;;  %v20935_v13 = vld [vmem:[%s23616_s29 + $0xf8] sm:$0xff]  }
 0xb71   :  { %10909 = vmatprep.subr.bf16.mxu0 %v20872_v8  ;;  %10995 = vmatprep.subr.bf16.mxu1 %v20875_v0  ;;  %v20936_v48 = vld [vmem:[%s23616_s29 + $0x38] sm:$0xff]   ;;  %v11565_v0 = vld [vmem:[%s23617_s16] sm:$0xff] }
 0xb72   :  { %v20937_v8 = vld [vmem:[%s23616_s29 + $0xb8] sm:$0xff]  }
 0xb74   :  { %10910 = vmatpush1.bf16.msra.mxu0 %v20870_v19  ;;  %10996 = vmatpush1.bf16.msra.mxu1 %v20873_v1  ;;  %v23227_v19 = vrot.slane %v11565_v0, %v22661_v6 }
 0xb75   :  { %10911 = vmatprep.subr.bf16.mxu0 %v20878_v36  ;;  %10997 = vmatprep.subr.bf16.mxu1 %v20881_v15  ;;  %v11567_v36 = vcombine.high %v11565_v0, %v11565_v0 }
 0xb76   :  { %v11582_v1 = vcombine.high %v23227_v19, %v23227_v19 }
 0xb77   :  { %v23233_v15 = vrot.slane %v11567_v36, %v22661_v6 }
 0xb78   :  { %10912 = vmatpush1.bf16.msra.mxu0 %v20876_v50  ;;  %10998 = vmatpush1.bf16.msra.mxu1 %v20879_v24  ;;  %v10184_v24 = vld [vmem:[%s23618_s19] sm:$0xf] }
 0xb79   :  { %10913 = vmatprep.subr.bf16.mxu0 %v20884_v9  ;;  %10999 = vmatprep.subr.bf16.mxu1 %v20887_v10  ;;  %v11583_v50 = vcombine.high %v23233_v15, %v23233_v15  ;;  %v10189_v9 = vrot.slane %v10184_v24, %v22680_v25  ;;  %v10197_v10 = vrot.slane %v10184_v24, %v22686_v27 }
 0xb7c   :  { %10914 = vmatpush1.bf16.msra.mxu0 %v20882_v43  ;;  %11000 = vmatpush1.bf16.msra.mxu1 %v20885_v33  ;;  %v10193_v43 = vrot.slane %v10184_v24, %v22683_v26  ;;  %v10201_v33 = vrot.slane %v10184_v24, %v22689_v28 }
 0xb7d   :  { %10915 = vmatprep.subr.bf16.mxu0 %v20890_v30  ;;  %11001 = vmatprep.subr.bf16.mxu1 %v20893_v45 }
 0xb80   :  { %10916 = vmatpush1.bf16.msra.mxu0 %v20888_v54  ;;  %11002 = vmatpush1.bf16.msra.mxu1 %v20891_v44 }
 0xb81   :  { %10917 = vmatprep.subr.bf16.mxu0 %v20896_v47  ;;  %11003 = vmatprep.subr.bf16.mxu1 %v20899_v22 }
 0xb84   :  { %10918 = vmatpush1.bf16.msra.mxu0 %v20894_v37  ;;  %11004 = vmatpush1.bf16.msra.mxu1 %v20897_v17 }
 0xb85   :  { %10919 = vmatprep.subr.bf16.mxu0 %v20902_v59  ;;  %11005 = vmatprep.subr.bf16.mxu1 %v20905_v31 }
 0xb88   :  { %10920 = vmatpush1.bf16.msra.mxu0 %v20900_v41  ;;  %11006 = vmatpush1.bf16.msra.mxu1 %v20903_v12 }
 0xb89   :  { %18605 = vmatprep.subr.bf16.mxu0 %v20906_v20  ;;  %18627 = vmatprep.subr.bf16.mxu1 %v20907_v4 }
 0xb8b   :  { %10922 = vmatmul.mubr.bf16.vlgmr.msra.gmra.mrb[28].mxu0 %v23187_v46  ;;  %11008 = vmatmul.mubr.bf16.vlgmr.msra.gmra.mrb[28].mxu1 %v23187_v46  ;;  %v20914_v46 = vld [vmem:[%s23616_s29 + $0x50] sm:$0xff]  }
 0xb8c   :  { %18606 = vmatpush3.bf16.msra.mxu0 %v20908_v21  ;;  %18628 = vmatpush3.bf16.msra.mxu1 %v20909_v34 }
 0xb8d   :  { %18607 = vmatprep.subr.bf16.mxu0 %v20910_v51  ;;  %18629 = vmatprep.subr.bf16.mxu1 %v20911_v56 }
 0xb90   :  { %18608 = vmatpush3.bf16.msra.mxu0 %v20912_v40  ;;  %18630 = vmatpush3.bf16.msra.mxu1 %v20913_v61 }
 0xb91   :  { %18609 = vmatprep.subr.bf16.mxu0 %v20914_v46  ;;  %18631 = vmatprep.subr.bf16.mxu1 %v20915_v57 }
 0xb94   :  { %18610 = vmatpush3.bf16.msra.mxu0 %v20916_v63  ;;  %18632 = vmatpush3.bf16.msra.mxu1 %v20917_v2 }
 0xb95   :  { %18611 = vmatprep.subr.bf16.mxu0 %v20918_v52  ;;  %18633 = vmatprep.subr.bf16.mxu1 %v20919_v39 }
 0xb98   :  { %18612 = vmatpush3.bf16.msra.mxu0 %v20920_v53  ;;  %18634 = vmatpush3.bf16.msra.mxu1 %v20921_v5 }
 0xb99   :  { %18613 = vmatprep.subr.bf16.mxu0 %v20922_v7  ;;  %18635 = vmatprep.subr.bf16.mxu1 %v20923_v32 }
 0xb9c   :  { %18614 = vmatpush3.bf16.msra.mxu0 %v20924_v14  ;;  %18636 = vmatpush3.bf16.msra.mxu1 %v20925_v49 }
 0xb9d   :  { %18615 = vmatprep.subr.bf16.mxu0 %v20926_v11  ;;  %18637 = vmatprep.subr.bf16.mxu1 %v20927_v18 }
 0xba0   :  { %18616 = vmatpush3.bf16.msra.mxu0 %v20928_v29  ;;  %18638 = vmatpush3.bf16.msra.mxu1 %v20929_v60 }
 0xba1   :  { %18617 = vmatprep.subr.bf16.mxu0 %v20930_v23  ;;  %18639 = vmatprep.subr.bf16.mxu1 %v20931_v42 }
 0xba4   :  { %18618 = vmatpush3.bf16.msra.mxu0 %v20932_v35  ;;  %18640 = vmatpush3.bf16.msra.mxu1 %v20933_v38 }
 0xba5   :  { %18619 = vmatprep.subr.bf16.mxu0 %v20934_v62  ;;  %18641 = vmatprep.subr.bf16.mxu1 %v20935_v13 }
 0xba8   :  { %18620 = vmatpush3.bf16.msra.mxu0 %v20936_v48  ;;  %18642 = vmatpush3.bf16.msra.mxu1 %v20937_v8 }
 0xba9   :  { %18040 = vmatprep.subr.msk.bf16.mxu0 %vm439_vm0, %v11582_v1  ;;  %18042 = vmatprep.subr.msk.bf16.mxu1 %vm439_vm0, %v11583_v50 }
 0xc5e   :  { %v10923_v30 = vpop.f32.mrb[28].mxu0  ;;  %v11009_v45 = vpop.f32.mrb[28].mxu1 }
 0xc5f   :  { %v18725_v54 = vadd.f32 %v10923_v30, %v10189_v9  ;;  %v18729_v44 = vadd.f32 %v11009_v45, %v10197_v10  ;;  %v10925_v47 = vpop.f32.mrb[29].mxu0  ;;  %v11011_v22 = vpop.f32.mrb[29].mxu1 }
 0xc60   :  { %v18726_v37 = vadd.f32 %v10925_v47, %v10193_v43  ;;  %v18730_v17 = vadd.f32 %v11011_v22, %v10201_v33  ;;  %v10927_v59 = vpop.f32.mrb[30].mxu0  ;;  %v11013_v31 = vpop.f32.mrb[30].mxu1 }
 0xc61   :  { %v11026_v41 = vmul.f32 1.442695, %v18725_v54  ;;  %v11030_v12 = vmul.f32 1.442695, %v18729_v44  ;;  %v18727_v21 = vadd.f32 %v10927_v59, %v10189_v9  ;;  %v18731_v34 = vadd.f32 %v11013_v31, %v10197_v10  ;;  %v10929_v51 = vpop.f32.mrb[31].mxu0  ;;  %v11015_v56 = vpop.f32.mrb[31].mxu1 }
 0xc62   :  { %v11028_v20 = vmul.f32 1.442695, %v18726_v37  ;;  %v11032_v4 = vmul.f32 1.442695, %v18730_v17  ;;  %v18728_v40 = vadd.f32 %v10929_v51, %v10193_v43  ;;  %v23243_v61 = vadd.f32 %v11015_v56, %v10201_v33 }
 0xc63   :  { %21879 = vpow2.f32 %v11026_v41  ;;  %v11034_v46 = vmul.f32 1.442695, %v18727_v21  ;;  %v11038_v57 = vmul.f32 1.442695, %v18731_v34  ;;  %vm11018_vm1 = vcmp.gt.f32.partialorder %v18725_v54, 0.0 }
 0xc64   :  { %21881 = vpow2.f32 %v11030_v12  ;;  %v11036_v63 = vmul.f32 1.442695, %v18728_v40  ;;  %v11040_v2 = vmul.f32 1.442695, %v23243_v61  ;;  %vm11020_vm4 = vcmp.gt.f32.partialorder %v18729_v44, 0.0 }
 0xc65   :  { %21883 = vpow2.f32 %v11028_v20  ;;  %vm11019_vm5 = vcmp.gt.f32.partialorder %v18726_v37, 0.0  ;;  %vm11021_vm6 = vcmp.gt.f32.partialorder %v18730_v17, 0.0  ;;  %vm11022_vm7 = vcmp.gt.f32.partialorder %v18727_v21, 0.0 }
 0xc66   :  { %21885 = vpow2.f32 %v11032_v4  ;;  %vm11024_vm8 = vcmp.gt.f32.partialorder %v18731_v34, 0.0  ;;  %vm11023_vm9 = vcmp.gt.f32.partialorder %v18728_v40, 0.0  ;;  %vm11025_vm11 = vcmp.gt.f32.partialorder %v23243_v61, 0.0 }
 0xc67   :  { %21887 = vpow2.f32 %v11034_v46 }
 0xc68   :  { %21889 = vpow2.f32 %v11038_v57 }
 0xc69   :  { %21891 = vpow2.f32 %v11036_v63 }
 0xc6a   :  { %21893 = vpow2.f32 %v11040_v2 }
 0xc6d   :  { %v21880_v52 = vpop.eup %21879 }
 0xc6e   :  { %v21882_v39 = vpop.eup %21881  ;;  %v17999_v53 = vadd.f32 -1.0, %v21880_v52 }
 0xc6f   :  { %v21884_v5 = vpop.eup %21883  ;;  %v18001_v7 = vadd.f32 -1.0, %v21882_v39 }
 0xc70   :  { %v21886_v32 = vpop.eup %21885  ;;  %v23246_v14 = vsel %vm11018_vm1, %v18725_v54, %v17999_v53  ;;  %v18000_v49 = vadd.f32 -1.0, %v21884_v5 }
 0xc71   :  { %v21888_v11 = vpop.eup %21887  ;;  %v23248_v18 = vsel %vm11020_vm4, %v18729_v44, %v18001_v7  ;;  %v18002_v29 = vadd.f32 -1.0, %v21886_v32  ;;  %v11094_v38 = vmul.f32 %v23246_v14, %v23246_v14 }
 0xc72   :  { %v21890_v60 = vpop.eup %21889  ;;  %v23250_v23 = vsel %vm11019_vm5, %v18726_v37, %v18000_v49  ;;  %v18003_v42 = vadd.f32 -1.0, %v21888_v11  ;;  %v11096_v62 = vmul.f32 %v23248_v18, %v23248_v18 }
 0xc73   :  { %v21892_v35 = vpop.eup %21891  ;;  %v23257_v13 = vsel %vm11021_vm6, %v18730_v17, %v18002_v29  ;;  %v18005_v48 = vadd.f32 -1.0, %v21890_v60  ;;  %v11095_v0 = vmul.f32 %v23250_v23, %v23250_v23 }
 0xc74   :  { %v21894_v8 = vpop.eup %21893  ;;  %v11097_v1 = vmul.f32 %v23257_v13, %v23257_v13  ;;  %v23263_v36 = vsel %vm11022_vm7, %v18727_v21, %v18003_v42  ;;  %v18004_v50 = vadd.f32 -1.0, %v21892_v35 }
 0xc75   :  { %v11058_v24 = vsel %vm1584_vm10, %v23263_v36, 0.0  ;;  %v11098_v9 = vmul.f32 %v23263_v36, %v23263_v36  ;;  %v23270_v10 = vsel %vm11024_vm8, %v18731_v34, %v18005_v48  ;;  %v18006_v43 = vadd.f32 -1.0, %v21894_v8 }
 0xc76   :  { %v11059_v33 = vadd.f32 %v11058_v24, %v23246_v14  ;;  %v11074_v30 = vsel %vm1584_vm10, %v23270_v10, 0.0  ;;  %v11100_v45 = vmul.f32 %v23270_v10, %v23270_v10  ;;  %v23278_v54 = vsel %vm11023_vm9, %v18728_v40, %v18004_v50 }
 0xc77   :  { %v11102_v44 = vsel %vm1584_vm10, %v11098_v9, 0.0  ;;  %v11075_v47 = vadd.f32 %v11074_v30, %v23248_v18  ;;  %v11066_v22 = vsel %vm1584_vm10, %v23278_v54, 0.0  ;;  %v11099_v37 = vmul.f32 %v23278_v54, %v23278_v54 }
 0xc78   :  { %v11060_v17 = vrot.slane %v11059_v33, 4  ;;  %v11103_v59 = vadd.f32 %v11102_v44, %v11094_v38  ;;  %v11118_v31 = vsel %vm1584_vm10, %v11100_v45, 0.0  ;;  %v11067_v41 = vadd.f32 %v11066_v22, %v23250_v23 }
 0xc79   :  { %v11076_v12 = vrot.slane %v11075_v47, 4  ;;  %v11119_v20 = vadd.f32 %v11118_v31, %v11096_v62  ;;  %v11110_v4 = vsel %vm1584_vm10, %v11099_v37, 0.0  ;;  %v23292_v21 = vsel %vm11025_vm11, %v23243_v61, %v18006_v43 }
 0xc7a   :  { %v11061_v34 = vadd.f32 %v11060_v17, %v11059_v33  ;;  %v11104_v51 = vrot.slane %v11103_v59, 4  ;;  %v11068_v56 = vrot.slane %v11067_v41, 4  ;;  %v11111_v40 = vadd.f32 %v11110_v4, %v11095_v0 }
 0xc7b   :  { %v11077_v46 = vadd.f32 %v11076_v12, %v11075_v47  ;;  %v11120_v57 = vrot.slane %v11119_v20, 4  ;;  %v11082_v63 = vsel %vm1584_vm10, %v23292_v21, 0.0  ;;  %v11101_v2 = vmul.f32 %v23292_v21, %v23292_v21 }
 0xc7c   :  { %v11062_v52 = vrot.slane %v11061_v34, 2  ;;  %v11105_v39 = vadd.f32 %v11104_v51, %v11103_v59  ;;  %v11069_v53 = vadd.f32 %v11068_v56, %v11067_v41  ;;  %v11112_v5 = vrot.slane %v11111_v40, 4 }
 0xc7d   :  { %v11078_v7 = vrot.slane %v11077_v46, 2  ;;  %v11121_v32 = vadd.f32 %v11120_v57, %v11119_v20  ;;  %v11083_v61 = vadd.f32 %v11082_v63, %v23257_v13  ;;  %v11126_v49 = vsel %vm1584_vm10, %v11101_v2, 0.0 }
 0xc7e   :  { %v11063_v11 = vadd.f32 %v11062_v52, %v11061_v34  ;;  %v11106_v29 = vrot.slane %v11105_v39, 2  ;;  %v11070_v60 = vrot.slane %v11069_v53, 2  ;;  %v11113_v42 = vadd.f32 %v11112_v5, %v11111_v40 }
 0xc7f   :  { %v11079_v35 = vadd.f32 %v11078_v7, %v11077_v46  ;;  %v11122_v38 = vrot.slane %v11121_v32, 2  ;;  %v11084_v62 = vrot.slane %v11083_v61, 4  ;;  %v11127_v48 = vadd.f32 %v11126_v49, %v11097_v1 }
 0xc80   :  { %v11064_v8 = vrot.slane %v11063_v11, 1  ;;  %v11107_v0 = vadd.f32 %v11106_v29, %v11105_v39  ;;  %v11071_v50 = vadd.f32 %v11070_v60, %v11069_v53  ;;  %v11114_v24 = vrot.slane %v11113_v42, 2 }
 0xc81   :  { %v11080_v9 = vrot.slane %v11079_v35, 1  ;;  %v11123_v43 = vadd.f32 %v11122_v38, %v11121_v32  ;;  %v11085_v33 = vadd.f32 %v11084_v62, %v11083_v61  ;;  %v11128_v30 = vrot.slane %v11127_v48, 4 }
 0xc82   :  { %v11065_v45 = vadd.f32 %v11064_v8, %v11063_v11  ;;  %v11108_v44 = vrot.slane %v11107_v0, 1  ;;  %v11072_v47 = vrot.slane %v11071_v50, 1  ;;  %v11115_v22 = vadd.f32 %v11114_v24, %v11113_v42 }
 0xc83   :  { %v11081_v37 = vadd.f32 %v11080_v9, %v11079_v35  ;;  %v11124_v17 = vrot.slane %v11123_v43, 1  ;;  %v11086_v59 = vrot.slane %v11085_v33, 2  ;;  %v11129_v31 = vadd.f32 %v11128_v30, %v11127_v48 }
 0xc84   :  { %v11090_v41 = vmul.f32 0.083333336, %v11065_v45  ;;  %v11109_v12 = vadd.f32 %v11108_v44, %v11107_v0  ;;  %v11073_v20 = vadd.f32 %v11072_v47, %v11071_v50  ;;  %v11116_v1 = vrot.slane %v11115_v22, 1 }
 0xc85   :  { %v11092_v4 = vmul.f32 0.083333336, %v11081_v37  ;;  %v11125_v34 = vadd.f32 %v11124_v17, %v11123_v43  ;;  %v11087_v51 = vadd.f32 %v11086_v59, %v11085_v33  ;;  %v11130_v56 = vrot.slane %v11129_v31, 2  ;;  %v11564_v33 = vld [vmem:[%s23619_s18] sm:$0xff] }
 0xc86   :  { %v11134_v40 = vmul.f32 0.083333336, %v11109_v12  ;;  %v11138_v46 = vmul.f32 %v11090_v41, %v11090_v41  ;;  %v11150_v57 = vsub.f32 %v23263_v36, %v11090_v41  ;;  %v11091_v63 = vmul.f32 0.083333336, %v11073_v20 }
 0xc87   :  { %v11136_v2 = vmul.f32 0.083333336, %v11125_v34  ;;  %v11140_v52 = vmul.f32 %v11092_v4, %v11092_v4  ;;  %v11152_v39 = vsub.f32 %v23270_v10, %v11092_v4  ;;  %v11117_v53 = vadd.f32 %v11116_v1, %v11115_v22 }
 0xc88   :  { %v11142_v5 = vsub.f32 %v11134_v40, %v11138_v46  ;;  %v11139_v7 = vmul.f32 %v11091_v63, %v11091_v63  ;;  %v11151_v32 = vsub.f32 %v23278_v54, %v11091_v63  ;;  %v11088_v61 = vrot.slane %v11087_v51, 1  ;;  %v21911_v46 = vld [vmem:[%s23608_s2] sm:$0xff] }
 0xc89   :  { %v11144_v49 = vsub.f32 %v11136_v2, %v11140_v52  ;;  %v11135_v11 = vmul.f32 0.083333336, %v11117_v53  ;;  %v11131_v29 = vadd.f32 %v11130_v56, %v11129_v31  ;;  %v11147_v60 = vsub.f32 %v23250_v23, %v11091_v63  ;;  %v21912_v63 = vld [vmem:[%s23608_s2 + $0x8] sm:$0xf] }
 0xc8a   :  { %v11154_v42 = vadd.f32 1e-05, %v11142_v5  ;;  %v11089_v35 = vadd.f32 %v11088_v61, %v11087_v51  ;;  %v11146_v36 = vsub.f32 %v23246_v14, %v11090_v41  ;;  %v11148_v38 = vsub.f32 %v23248_v18, %v11092_v4  ;;  %v20942_v61 = vld [vmem:[#allocation18 + $0x4] ss:$16 sps:$4 sm:$0xff]  }
 0xc8b   :  { %v11156_v62 = vadd.f32 1e-05, %v11144_v49  ;;  %v11132_v48 = vrot.slane %v11131_v29, 1  ;;  %v11143_v10 = vsub.f32 %v11135_v11, %v11139_v7  ;;  %v11690_v59 = vrot.slane %v11564_v33, %v22661_v6 }
 0xc8c   :  { %21895 = vrsqrt.f32 %v11154_v42  ;;  %v11093_v8 = vmul.f32 0.083333336, %v11089_v35  ;;  %v11683_v41 = vcombine.high %v11564_v33, %v11564_v33  ;;  %v11585_v20 = vsel %vm439_vm0, %v23227_v19, 0  ;;  %v20945_v42 = vld [vmem:[#allocation18 + $0xc] ss:$16 sps:$4 sm:$0xff]  }
 0xc8d   :  { %21897 = vrsqrt.f32 %v11156_v62  ;;  %v11133_v54 = vadd.f32 %v11132_v48, %v11131_v29  ;;  %v11155_v0 = vadd.f32 1e-05, %v11143_v10  ;;  %v11698_v1 = vcombine.high %v11690_v59, %v11690_v59  ;;  %v20940_v62 = vld [vmem:[#allocation18] ss:$16 sps:$4 sm:$0xff]   ;;  %v20948_v48 = vld [vmem:[#allocation18 + $0x24] ss:$16 sps:$4 sm:$0xff]  }
 0xc8e   :  { %v11141_v50 = vmul.f32 %v11093_v8, %v11093_v8  ;;  %v11153_v24 = vsub.f32 %v23292_v21, %v11093_v8  ;;  %v11149_v23 = vsub.f32 %v23257_v13, %v11093_v8  ;;  %v11697_v34 = vrot.slane %v11683_v41, %v22661_v6  ;;  %v20946_v10 = vld [vmem:[#allocation18 + $0x20] ss:$16 sps:$4 sm:$0xff]   ;;  %v20954_v8 = vld [vmem:[#allocation18 + $0x44] ss:$16 sps:$4 sm:$0xff]   ;;  %v20963_v33 = vld [vmem:[#allocation18 + $0x6c] ss:$16 sps:$4 sm:$0xff]  }
 0xc8f   :  { %v11137_v9 = vmul.f32 0.083333336, %v11133_v54  ;;  %21899 = vrsqrt.f32 %v11155_v0  ;;  %v11555_v2 = vrot.slane %v21912_v63, 7  ;;  %v11591_v19 = vsel %vm439_vm0, %v23233_v15, 0  ;;  %v20943_v54 = vld [vmem:[#allocation18 + $0x8] ss:$16 sps:$4 sm:$0xff]  }
 0xc90   :  { %v11699_v52 = vcombine.high %v11697_v34, %v11697_v34  ;;  %v11704_v53 = vsel %vm439_vm0, %v11690_v59, 0  ;;  %v11547_v5 = vrot.slane %v21912_v63, 1  ;;  %v11551_v7 = vrot.slane %v21911_v46, 5  ;;  %v20951_v0 = vld [vmem:[#allocation18 + $0x2c] ss:$16 sps:$4 sm:$0xff]  }
 0xc91   :  { %v11145_v43 = vsub.f32 %v11137_v9, %v11141_v50  ;;  %vm23620_vm10 = vcmask 31744   ;;  %v20952_v50 = vld [vmem:[#allocation18 + $0x40] ss:$16 sps:$4 sm:$0xff]   ;;  %v20957_v9 = vld [vmem:[#allocation18 + $0x4c] ss:$16 sps:$4 sm:$0xff]  }
 0xc92   :  { %v11553_v11 = vsel %vm1735_vm13, %v11547_v5, %v11551_v7  ;;  %vm23621_vm1 = vmmov %vm23620_vm10  ;;  %v20975_v59 = vld [vmem:[#allocation18 + $0xac] ss:$16 sps:$4 sm:$0xff]   ;;  %v20994_v63 = vld [vmem:[#allocation18 + $0x120] ss:$16 sps:$4 sm:$0xff]  }
 0xc93   :  { %v11157_v14 = vadd.f32 1e-05, %v11145_v43  ;;  %v20958_v43 = vld [vmem:[#allocation18 + $0x60] ss:$16 sps:$4 sm:$0xff]   ;;  %v20981_v41 = vld [vmem:[#allocation18 + $0xcc] ss:$16 sps:$4 sm:$0xff]   ;;  %vm23626_vm4 = vmmov %vm23621_vm1 }
 0xc94   :  { %v21008_v7 = vld [vmem:[#allocation18 + $0x164] ss:$16 sps:$4 sm:$0xff]   ;;  %vm23627_vm5 = vmmov %vm23621_vm1 }
 0xc95   :  { %21901 = vrsqrt.f32 %v11157_v14  ;;  %v20966_v14 = vld [vmem:[#allocation18 + $0x84] ss:$16 sps:$4 sm:$0xff]   ;;  %vm23630_vm6 = vmmov %vm23621_vm1 }
 0xc96   :  { %v21896_v18 = vpop.eup %21895  ;;  %vm23631_vm7 = vmmov %vm23621_vm1 }
 0xc97   :  { %v21898_v30 = vpop.eup %21897  ;;  %v11166_v45 = vmul.f32 %v21896_v18, %v11150_v57  ;;  %v11162_v44 = vmul.f32 %v21896_v18, %v11146_v36  ;;  %v11554_v57 = vrot.slane %v21911_v46, 7  ;;  %v20955_v18 = vld [vmem:[#allocation18 + $0x48] ss:$16 sps:$4 sm:$0xff]   ;;  %vm23632_vm8 = vmmov %vm23621_vm1 }
 0xc98   :  { %v11168_v47 = vmul.f32 %v21898_v30, %v11152_v39  ;;  %v11164_v22 = vmul.f32 %v21898_v30, %v11148_v38  ;;  %v11546_v39 = vrot.slane %v21911_v46, 1  ;;  %v20964_v30 = vld [vmem:[#allocation18 + $0x80] ss:$16 sps:$4 sm:$0xff]   ;;  %vm23633_vm9 = vmmov %vm23621_vm1 }
 0xc99   :  { %v21900_v37 = vpop.eup %21899  ;;  %v11170_v17 = vpack.c.bf16 %v11166_v45, %v11162_v44  ;;  %v11556_v49 = vsel %vm1740_vm14, %v11554_v57, %v11555_v2  ;;  %v20972_v45 = vld [vmem:[#allocation18 + $0xa4] ss:$16 sps:$4 sm:$0xff]   ;;  %v20961_v44 = vld [vmem:[#allocation18 + $0x68] ss:$16 sps:$4 sm:$0xff]   ;;  %v20999_v57 = vld [vmem:[#allocation18 + $0x12c] ss:$16 sps:$4 sm:$0xff]  }
 0xc9a   :  { %v11163_v31 = vmul.f32 %v21900_v37, %v11147_v60  ;;  %v11167_v21 = vmul.f32 %v21900_v37, %v11151_v32  ;;  %v11172_v13 = vpack.c.bf16 %v11168_v47, %v11164_v22  ;;  %v11558_v32 = vrot.slane %v21911_v46, 3  ;;  %v20969_v47 = vld [vmem:[#allocation18 + $0x8c] ss:$16 sps:$4 sm:$0xff]   ;;  %v20970_v22 = vld [vmem:[#allocation18 + $0xa0] ss:$16 sps:$4 sm:$0xff]   ;;  %vm23634_vm11 = vmmov %vm23621_vm1 }
 0xc9b   :  { %v11548_v15 = vsel %vm1706_vm12, %v11546_v39, %v11547_v5  ;;  %v11710_v60 = vsel %vm439_vm0, %v11697_v34, 0  ;;  %v20978_v37 = vld [vmem:[#allocation18 + $0xc4] ss:$16 sps:$4 sm:$0xff]   ;;  %v20988_v34 = vld [vmem:[#allocation18 + $0x100] ss:$16 sps:$4 sm:$0xff]  }
 0xc9c   :  { %v11171_v12 = vpack.c.bf16 %v11167_v21, %v11163_v31  ;;  %v11560_v29 = vsel %vm1765_vm15, %v11556_v49, %v11558_v32  ;;  %v11562_v36 = vsel %vm1771_vm3, %v11558_v32, %v11553_v11  ;;  %vm23622_vm15 = vmmov %vm23621_vm1  ;;  %v20976_v31 = vld [vmem:[#allocation18 + $0xc0] ss:$16 sps:$4 sm:$0xff]   ;;  %v20984_v21 = vld [vmem:[#allocation18 + $0xe4] ss:$16 sps:$4 sm:$0xff]   ;;  %vm11520_vm3 = vcmask 27648  }
 0xc9d   :  { %v11561_v35 = vsel %vm1770_vm2, %v11560_v29, %v11548_v15  ;;  %vm23623_vm2 = vmmov %vm23621_vm1  ;;  %v20996_v46 = vld [vmem:[#allocation18 + $0x124] ss:$16 sps:$4 sm:$0xff]   ;;  %v20997_v2 = vld [vmem:[#allocation18 + $0x128] ss:$16 sps:$4 sm:$0xff]  }
 0xc9e   :  { %11469 = vmatprep.mubr.bf16.mxu0 %v11171_v12  ;;  %v23337_v38 = vpack.c.bf16 %v11562_v36, %v11561_v35  ;;  %v20982_v12 = vld [vmem:[#allocation18 + $0xe0] ss:$16 sps:$4 sm:$0xff]   ;;  %v21009_v32 = vld [vmem:[#allocation18 + $0x168] ss:$16 sps:$4 sm:$0xff]   ;;  %v21014_v15 = vld [vmem:[#allocation18 + $0x184] ss:$16 sps:$4 sm:$0xff]  }
 0xc9f   :  { %v21902_v4 = vpop.eup %21901  ;;  %11470 = vmatmul.mubr.bf16.vlgmr.msra.gmra.mrb[32].mxu0 %v11170_v17  ;;  %v20967_v17 = vld [vmem:[#allocation18 + $0x88] ss:$16 sps:$4 sm:$0xff]   ;;  %v21000_v39 = vld [vmem:[#allocation18 + $0x140] ss:$16 sps:$4 sm:$0xff]   ;;  %v21017_v29 = vld [vmem:[#allocation18 + $0x18c] ss:$16 sps:$4 sm:$0xff]  }
 0xca0   :  { %v11165_v51 = vmul.f32 %v21902_v4, %v11149_v23  ;;  %v11169_v56 = vmul.f32 %v21902_v4, %v11153_v24  ;;  %11597 = vmatpush1.bf16.msra.mxu0 %v11585_v20  ;;  %11628 = vmatprep.mubr.bf16.mxu0 %v22296_v3  ;;  %v20960_v24 = vld [vmem:[#allocation18 + $0x64] ss:$16 sps:$4 sm:$0xff]   ;;  %v20949_v23 = vld [vmem:[#allocation18 + $0x28] ss:$16 sps:$4 sm:$0xff]   ;;  %v20987_v4 = vld [vmem:[#allocation18 + $0xec] ss:$16 sps:$4 sm:$0xff]  }
 0xca1   :  { %18044 = vmatprep.subr.msk.bf16.mxu0 %vm439_vm0, %v11698_v1  ;;  %v20990_v20 = vld [vmem:[#allocation18 + $0x104] ss:$16 sps:$4 sm:$0xff]   ;;  %v20979_v1 = vld [vmem:[#allocation18 + $0xc8] ss:$16 sps:$4 sm:$0xff]   ;;  %v21006_v5 = vld [vmem:[#allocation18 + $0x160] ss:$16 sps:$4 sm:$0xff]  }
 0xca2   :  { %v11173_v40 = vpack.c.bf16 %v11169_v56, %v11165_v51  ;;  %v20985_v51 = vld [vmem:[#allocation18 + $0xe8] ss:$16 sps:$4 sm:$0xff]   ;;  %v20993_v56 = vld [vmem:[#allocation18 + $0x10c] ss:$16 sps:$4 sm:$0xff]   ;;  %v21012_v49 = vld [vmem:[#allocation18 + $0x180] ss:$16 sps:$4 sm:$0xff]  }
 0xca3   :  { %v21015_v11 = vld [vmem:[#allocation18 + $0x188] ss:$16 sps:$4 sm:$0xff]   ;;  %v21018_v35 = vld [vmem:[#allocation18 + $0x1a0] ss:$16 sps:$4 sm:$0xff]  }
 0xca4   :  { %11510 = vmatprep.mubr.bf16.mxu1 %v11173_v40  ;;  %v20991_v40 = vld [vmem:[#allocation18 + $0x108] ss:$16 sps:$4 sm:$0xff]  }
 0xca5   :  { %11511 = vmatmul.mubr.bf16.vlgmr.msra.gmra.mrb[32].mxu1 %v11172_v13  ;;  %v20973_v13 = vld [vmem:[#allocation18 + $0xa8] ss:$16 sps:$4 sm:$0xff]  }
 0xca6   :  { %11640 = vmatpush1.bf16.msra.mxu1 %v11591_v19  ;;  %11671 = vmatprep.mubr.bf16.mxu1 %v22296_v3  ;;  %v21002_v19 = vld [vmem:[#allocation18 + $0x144] ss:$16 sps:$4 sm:$0xff]   ;;  %v21021_v36 = vld [vmem:[#allocation18 + $0x1a8] ss:$16 sps:$4 sm:$0xff]  }
 0xca7   :  { %18041 = vmatmul.mubr.msk.bf16.vlgmr.msra.gmra.mrb[36].mxu0 %vm23620_vm10, %v22670_v16  ;;  %18046 = vmatprep.subr.msk.bf16.mxu1 %vm439_vm0, %v11699_v52  ;;  %v21005_v52 = vld [vmem:[#allocation18 + $0x14c] ss:$16 sps:$4 sm:$0xff]   ;;  %vm23638_vm10 = vcmp.eq.s32.totalorder %v22807_v58, 0  ;;  %v21436_v58 = vld [vmem:[#allocation21 + $0x244] ss:$16 sps:$4 sm:$0xff]  }
 0xca8   :  { %11716 = vmatpush1.bf16.msra.mxu0 %v11704_v53  ;;  %11747 = vmatprep.mubr.bf16.mxu0 %v22296_v3  ;;  %v21003_v53 = vld [vmem:[#allocation18 + $0x148] ss:$16 sps:$4 sm:$0xff]  }
 0xca9   :  { %12633 = vmatprep.subr.bf16.mxu0 %v20942_v61  ;;  %v21011_v61 = vld [vmem:[#allocation18 + $0x16c] ss:$16 sps:$4 sm:$0xff]  }
 0xcad   :  { %18043 = vmatmul.mubr.msk.bf16.vlgmr.msra.gmra.mrb[36].mxu1 %vm23621_vm1, %v22670_v16  ;;  %vm23639_vm1 = vmmov %vm23638_vm10 }
 0xcae   :  { %11759 = vmatpush1.bf16.msra.mxu1 %v11710_v60  ;;  %11790 = vmatprep.mubr.bf16.mxu1 %v22296_v3  ;;  %v21020_v60 = vld [vmem:[#allocation18 + $0x1a4] ss:$16 sps:$4 sm:$0xff]  }
 0xcaf   :  { %12719 = vmatprep.subr.bf16.mxu1 %v20945_v42  ;;  %v21023_v42 = vld [vmem:[#allocation18 + $0x1ac] ss:$16 sps:$4 sm:$0xff]  }
 0xcb3   :  { %18045 = vmatmul.mubr.msk.bf16.vlgmr.msra.gmra.mrb[36].mxu0 %vm23622_vm15, %v23337_v38  ;;  %vm23640_vm15 = vcmp.eq.s32.totalorder %v22805_v55, 0  ;;  %v21442_v55 = vld [vmem:[#allocation21 + $0x264] ss:$16 sps:$4 sm:$0xff]  }
 0xcb4   :  { %12634 = vmatpush1.bf16.msra.mxu0 %v20940_v62  ;;  %v21026_v62 = vld [vmem:[#allocation18 + $0x1c4] ss:$16 sps:$4 sm:$0xff]  }
 0xcb5   :  { %12635 = vmatprep.subr.bf16.mxu0 %v20948_v48  ;;  %v21029_v48 = vld [vmem:[#allocation18 + $0x1cc] ss:$16 sps:$4 sm:$0xff]  }
 0xcb8   :  { %12636 = vmatpush1.bf16.msra.mxu0 %v20946_v10  ;;  %v21024_v10 = vld [vmem:[#allocation18 + $0x1c0] ss:$16 sps:$4 sm:$0xff]  }
 0xcb9   :  { %18047 = vmatmul.mubr.msk.bf16.vlgmr.msra.gmra.mrb[36].mxu1 %vm23623_vm2, %v23337_v38  ;;  %12637 = vmatprep.subr.bf16.mxu0 %v20954_v8  ;;  %v21027_v8 = vld [vmem:[#allocation18 + $0x1c8] ss:$16 sps:$4 sm:$0xff]   ;;  %vm23641_vm2 = vmmov %vm23640_vm15 }
 0xcba   :  { %12720 = vmatpush1.bf16.msra.mxu1 %v20943_v54  ;;  %v21032_v54 = vld [vmem:[#allocation18 + $0x1e4] ss:$16 sps:$4 sm:$0xff]  }
 0xcbb   :  { %12721 = vmatprep.subr.bf16.mxu1 %v20951_v0  ;;  %v21030_v0 = vld [vmem:[#allocation18 + $0x1e0] ss:$16 sps:$4 sm:$0xff]  }
 0xcbc   :  { %12638 = vmatpush1.bf16.msra.mxu0 %v20952_v50  ;;  %v21033_v50 = vld [vmem:[#allocation18 + $0x1e8] ss:$16 sps:$4 sm:$0xff]  }
 0xcbd   :  { %12639 = vmatprep.subr.bf16.mxu0 %v20960_v24  ;;  %v21035_v24 = vld [vmem:[#allocation18 + $0x1ec] ss:$16 sps:$4 sm:$0xff]  }
 0xcbe   :  { %12722 = vmatpush1.bf16.msra.mxu1 %v20949_v23  ;;  %v21038_v23 = vld [vmem:[#allocation18 + $0x204] ss:$16 sps:$4 sm:$0xff]  }
 0xcbf   :  { %12723 = vmatprep.subr.bf16.mxu1 %v20957_v9  ;;  %v21041_v9 = vld [vmem:[#allocation18 + $0x20c] ss:$16 sps:$4 sm:$0xff]  }
 0xcc0   :  { %12640 = vmatpush1.bf16.msra.mxu0 %v20958_v43 }
 0xcc1   :  { %12641 = vmatprep.subr.bf16.mxu0 %v20966_v14 }
 0xcc2   :  { %12724 = vmatpush1.bf16.msra.mxu1 %v20955_v18 }
 0xcc3   :  { %12725 = vmatprep.subr.bf16.mxu1 %v20963_v33 }
 0xcc4   :  { %12642 = vmatpush1.bf16.msra.mxu0 %v20964_v30  ;;  %v18007_v30 = vld [vmem:[%s23624_s20] ss:$0 sm:$0xff] }
 0xcc5   :  { %12643 = vmatprep.subr.bf16.mxu0 %v20972_v45 }
 0xcc6   :  { %12726 = vmatpush1.bf16.msra.mxu1 %v20961_v44 }
 0xcc7   :  { %12727 = vmatprep.subr.bf16.mxu1 %v20969_v47 }
 0xcc8   :  { %12644 = vmatpush1.bf16.msra.mxu0 %v20970_v22 }
 0xcc9   :  { %12645 = vmatprep.subr.bf16.mxu0 %v20978_v37 }
 0xcca   :  { %12728 = vmatpush1.bf16.msra.mxu1 %v20967_v17 }
 0xccb   :  { %12729 = vmatprep.subr.bf16.mxu1 %v20975_v59 }
 0xccc   :  { %12646 = vmatpush1.bf16.msra.mxu0 %v20976_v31 }
 0xccd   :  { %12647 = vmatprep.subr.bf16.mxu0 %v20984_v21 }
 0xcce   :  { %12730 = vmatpush1.bf16.msra.mxu1 %v20973_v13 }
 0xccf   :  { %12731 = vmatprep.subr.bf16.mxu1 %v20981_v41 }
 0xcd0   :  { %12648 = vmatpush1.bf16.msra.mxu0 %v20982_v12 }
 0xcd1   :  { %12649 = vmatprep.subr.bf16.mxu0 %v20990_v20 }
 0xcd2   :  { %12732 = vmatpush1.bf16.msra.mxu1 %v20979_v1  ;;  %v11801_v1 = vld [vmem:[%s23625_s25] sm:$0xf] }
 0xcd3   :  { %12733 = vmatprep.subr.bf16.mxu1 %v20987_v4 }
 0xcd4   :  { %12650 = vmatpush1.bf16.msra.mxu0 %v20988_v34  ;;  %v11806_v34 = vrot.slane %v11801_v1, %v22680_v25 }
 0xcd5   :  { %12651 = vmatprep.subr.bf16.mxu0 %v20996_v46 }
 0xcd6   :  { %12734 = vmatpush1.bf16.msra.mxu1 %v20985_v51  ;;  %v11810_v51 = vrot.slane %v11801_v1, %v22683_v26 }
 0xcd7   :  { %12735 = vmatprep.subr.bf16.mxu1 %v20993_v56 }
 0xcd8   :  { %12652 = vmatpush1.bf16.msra.mxu0 %v20994_v63 }
 0xcd9   :  { %12653 = vmatprep.subr.bf16.mxu0 %v21002_v19 }
 0xcda   :  { %12736 = vmatpush1.bf16.msra.mxu1 %v20991_v40 }
 0xcdb   :  { %12737 = vmatprep.subr.bf16.mxu1 %v20999_v57 }
 0xcdc   :  { %12654 = vmatpush1.bf16.msra.mxu0 %v21000_v39 }
 0xcdd   :  { %12655 = vmatprep.subr.bf16.mxu0 %v21008_v7 }
 0xcde   :  { %12738 = vmatpush1.bf16.msra.mxu1 %v20997_v2 }
 0xcdf   :  { %12739 = vmatprep.subr.bf16.mxu1 %v21005_v52  ;;  %v11814_v52 = vrot.slane %v11801_v1, %v22686_v27 }
 0xce0   :  { %12656 = vmatpush1.bf16.msra.mxu0 %v21006_v5 }
 0xce1   :  { %12657 = vmatprep.subr.bf16.mxu0 %v21014_v15 }
 0xce2   :  { %12740 = vmatpush1.bf16.msra.mxu1 %v21003_v53  ;;  %v11818_v53 = vrot.slane %v11801_v1, %v22689_v28  ;;  %v21068_v1 = vld [vmem:[#allocation18 + $0x2a4] ss:$16 sps:$4 sm:$0xff]  }
 0xce3   :  { %12741 = vmatprep.subr.bf16.mxu1 %v21011_v61 }
 0xce4   :  { %12658 = vmatpush1.bf16.msra.mxu0 %v21012_v49 }
 0xce5   :  { %12659 = vmatprep.subr.bf16.mxu0 %v21020_v60 }
 0xce6   :  { %12742 = vmatpush1.bf16.msra.mxu1 %v21009_v32 }
 0xce7   :  { %12743 = vmatprep.subr.bf16.mxu1 %v21017_v29 }
 0xce8   :  { %12660 = vmatpush1.bf16.msra.mxu0 %v21018_v35  ;;  %v21039_v35 = vld [vmem:[#allocation18 + $0x208] ss:$16 sps:$4 sm:$0xff]  }
 0xce9   :  { %12661 = vmatprep.subr.bf16.mxu0 %v21026_v62 }
 0xcea   :  { %12744 = vmatpush1.bf16.msra.mxu1 %v21015_v11 }
 0xceb   :  { %12745 = vmatprep.subr.bf16.mxu1 %v21023_v42  ;;  %v21036_v42 = vld [vmem:[#allocation18 + $0x200] ss:$16 sps:$4 sm:$0xff]  }
 0xcec   :  { %12662 = vmatpush1.bf16.msra.mxu0 %v21024_v10  ;;  %v21047_v10 = vld [vmem:[#allocation18 + $0x22c] ss:$16 sps:$4 sm:$0xff]  }
 0xced   :  { %12663 = vmatprep.subr.bf16.mxu0 %v21032_v54 }
 0xcee   :  { %12746 = vmatpush1.bf16.msra.mxu1 %v21021_v36 }
 0xcef   :  { %12747 = vmatprep.subr.bf16.mxu1 %v21029_v48  ;;  %v21044_v48 = vld [vmem:[#allocation18 + $0x224] ss:$16 sps:$4 sm:$0xff]  }
 0xcf0   :  { %12664 = vmatpush1.bf16.msra.mxu0 %v21030_v0 }
 0xcf1   :  { %12676 = vmatprep.subr.bf16.mxu0 %v21038_v23 }
 0xcf2   :  { %12748 = vmatpush1.bf16.msra.mxu1 %v21027_v8 }
 0xcf3   :  { %12749 = vmatprep.subr.bf16.mxu1 %v21035_v24 }
 0xcf6   :  { %12750 = vmatpush1.bf16.msra.mxu1 %v21033_v50 }
 0xcf7   :  { %12762 = vmatprep.subr.bf16.mxu1 %v21041_v9  ;;  %v21042_v9 = vld [vmem:[#allocation18 + $0x220] ss:$16 sps:$4 sm:$0xff]  }
 0xd72   :  { %v18621_v43 = vpop.f32.mrb[32].mxu0 }
 0xd73   :  { %v18622_v14 = vpop.f32.mrb[33].mxu0 }
 0xd74   :  { %v18623_v18 = vadd.f32 %v18622_v14, %v18621_v43  ;;  %v18624_v33 = vpop.f32.mrb[34].mxu0  ;;  %v21045_v43 = vld [vmem:[#allocation18 + $0x228] ss:$16 sps:$4 sm:$0xff]  }
 0xd75   :  { %v18625_v45 = vpop.f32.mrb[35].mxu0 }
 0xd76   :  { %v18626_v44 = vadd.f32 %v18625_v45, %v18624_v33  ;;  %v11472_v22 = vadd.f32 %v18623_v18, %v18007_v30  ;;  %v21050_v18 = vld [vmem:[#allocation18 + $0x244] ss:$16 sps:$4 sm:$0xff]   ;;  %v21053_v33 = vld [vmem:[#allocation18 + $0x24c] ss:$16 sps:$4 sm:$0xff]  }
 0xd78   :  { %v18643_v47 = vpop.f32.mrb[32].mxu1  ;;  %v11475_v31 = vadd.f32 %v18626_v44, %v18007_v30  ;;  %v21048_v44 = vld [vmem:[#allocation18 + $0x240] ss:$16 sps:$4 sm:$0xff]  }
 0xd79   :  { %v18644_v37 = vpop.f32.mrb[33].mxu1 }
 0xd7a   :  { %v18645_v17 = vadd.f32 %v18644_v37, %v18643_v47  ;;  %v18646_v59 = vpop.f32.mrb[34].mxu1  ;;  %v21051_v47 = vld [vmem:[#allocation18 + $0x248] ss:$16 sps:$4 sm:$0xff]   ;;  %v21059_v37 = vld [vmem:[#allocation18 + $0x26c] ss:$16 sps:$4 sm:$0xff]  }
 0xd7b   :  { %v18647_v21 = vpop.f32.mrb[35].mxu1 }
 0xd7c   :  { %v23344_v13 = vadd.f32 %v18645_v17, %v11472_v22  ;;  %v18648_v41 = vadd.f32 %v18647_v21, %v18646_v59  ;;  %v21056_v22 = vld [vmem:[#allocation18 + $0x264] ss:$16 sps:$4 sm:$0xff]   ;;  %v21054_v17 = vld [vmem:[#allocation18 + $0x260] ss:$16 sps:$4 sm:$0xff]   ;;  %v21057_v59 = vld [vmem:[#allocation18 + $0x268] ss:$16 sps:$4 sm:$0xff]  }
 0xd7d   :  { %v21065_v21 = vld [vmem:[#allocation18 + $0x28c] ss:$16 sps:$4 sm:$0xff]  }
 0xd7e   :  { %11519 = vst.msk [vmem:[%s22501_s9] sm:$0xff] %vm23626_vm4, %v23344_v13  ;;  %v23349_v12 = vadd.f32 %v18648_v41, %v11475_v31  ;;  %v11522_v20 = vsel %vm23627_vm5, %v23344_v13, -inf  ;;  %v21062_v31 = vld [vmem:[#allocation18 + $0x284] ss:$16 sps:$4 sm:$0xff]   ;;  %v21060_v41 = vld [vmem:[#allocation18 + $0x280] ss:$16 sps:$4 sm:$0xff]   ;;  %vm23642_vm4 = vmmov %vm23639_vm1 }
 0xd7f   :  { %11523 = vmax.xlane.f32.xlu0 %v11522_v20  ;;  %v21063_v20 = vld [vmem:[#allocation18 + $0x288] ss:$16 sps:$4 sm:$0xff]   ;;  %vm23643_vm5 = vmmov %vm23641_vm2 }
 0xd80   :  { %11521 = vst.msk [vmem:[%s22501_s9 + $0x8] sm:$0xf] %vm11520_vm3, %v23349_v12  ;;  %v11525_v4 = vsel %vm11520_vm3, %v23349_v12, -inf  ;;  %s23628_s9 = sld [smem:[#allocation49_spill]] }
 0xd83   :  { %11526 = vmax.xlane.f32.xlu0 %v11525_v4  ;;  %v21071_v4 = vld [vmem:[#allocation18 + $0x2ac] ss:$16 sps:$4 sm:$0xff]  }
 0xd86   :  { %v11749_v56 = vpop.f32.mrb[36].mxu0 }
 0xd87   :  { %v11823_v40 = vadd.f32 %v11806_v34, %v11749_v56  ;;  %v11751_v46 = vpop.f32.mrb[37].mxu0  ;;  %v21074_v56 = vld [vmem:[#allocation18 + $0x2c4] ss:$16 sps:$4 sm:$0xff]  }
 0xd88   :  { %v11824_v57 = vadd.f32 %v11810_v51, %v11751_v46  ;;  %v11753_v63 = vpop.f32.mrb[38].mxu0  ;;  %v21072_v46 = vld [vmem:[#allocation18 + $0x2c0] ss:$16 sps:$4 sm:$0xff]  }
 0xd89   :  { %v11827_v2 = vadd.f32 %v11806_v34, %v11753_v63  ;;  %v11755_v19 = vpop.f32.mrb[39].mxu0  ;;  %v11831_v5 = vmax.f32 %v11823_v40, 0.0  ;;  %v21066_v34 = vld [vmem:[#allocation18 + $0x2a0] ss:$16 sps:$4 sm:$0xff]   ;;  %v21077_v40 = vld [vmem:[#allocation18 + $0x2cc] ss:$16 sps:$4 sm:$0xff]  }
 0xd8a   :  { %v11828_v39 = vadd.f32 %v11810_v51, %v11755_v19  ;;  %v11832_v32 = vmax.f32 %v11824_v57, 0.0  ;;  %v21069_v51 = vld [vmem:[#allocation18 + $0x2a8] ss:$16 sps:$4 sm:$0xff]   ;;  %v21080_v63 = vld [vmem:[#allocation18 + $0x2e4] ss:$16 sps:$4 sm:$0xff]  }
 0xd8b   :  { %v11835_v7 = vmax.f32 %v11827_v2, 0.0  ;;  %v21075_v57 = vld [vmem:[#allocation18 + $0x2c8] ss:$16 sps:$4 sm:$0xff]   ;;  %v21083_v2 = vld [vmem:[#allocation18 + $0x2ec] ss:$16 sps:$4 sm:$0xff]  }
 0xd8c   :  { %v11836_v61 = vmax.f32 %v11828_v39, 0.0  ;;  %v11792_v49 = vpop.f32.mrb[36].mxu1  ;;  %v21078_v19 = vld [vmem:[#allocation18 + $0x2e0] ss:$16 sps:$4 sm:$0xff]   ;;  %v21086_v39 = vld [vmem:[#allocation18 + $0x304] ss:$16 sps:$4 sm:$0xff]  }
 0xd8d   :  { %v11839_v15 = vpack.c.bf16 %v11835_v7, %v11831_v5  ;;  %v11825_v11 = vadd.f32 %v11814_v52, %v11792_v49  ;;  %v11794_v29 = vpop.f32.mrb[37].mxu1  ;;  %v21084_v5 = vld [vmem:[#allocation18 + $0x300] ss:$16 sps:$4 sm:$0xff]   ;;  %v21087_v7 = vld [vmem:[#allocation18 + $0x308] ss:$16 sps:$4 sm:$0xff]  }
 0xd8e   :  { %v11840_v60 = vpack.c.bf16 %v11836_v61, %v11832_v32  ;;  %v11826_v36 = vadd.f32 %v11818_v53, %v11794_v29  ;;  %v11796_v62 = vpop.f32.mrb[38].mxu1  ;;  %v21092_v32 = vld [vmem:[#allocation18 + $0x324] ss:$16 sps:$4 sm:$0xff]   ;;  %v21095_v61 = vld [vmem:[#allocation18 + $0x32c] ss:$16 sps:$4 sm:$0xff]  }
 0xd8f   :  { %v11833_v8 = vmax.f32 %v11825_v11, 0.0  ;;  %v11829_v54 = vadd.f32 %v11814_v52, %v11796_v62  ;;  %v11798_v0 = vpop.f32.mrb[39].mxu1  ;;  %v21081_v52 = vld [vmem:[#allocation18 + $0x2e8] ss:$16 sps:$4 sm:$0xff]   ;;  %v21090_v49 = vld [vmem:[#allocation18 + $0x320] ss:$16 sps:$4 sm:$0xff]  }
 0xd90   :  { %12665 = vmatprep.mubr.bf16.mxu0 %v11840_v60  ;;  %12751 = vmatprep.mubr.bf16.mxu1 %v11840_v60  ;;  %v11834_v50 = vmax.f32 %v11826_v36, 0.0  ;;  %v11830_v24 = vadd.f32 %v11818_v53, %v11798_v0  ;;  %v21089_v53 = vld [vmem:[#allocation18 + $0x30c] ss:$16 sps:$4 sm:$0xff]   ;;  %v21098_v11 = vld [vmem:[#allocation18 + $0x344] ss:$16 sps:$4 sm:$0xff]  }
 0xd91   :  { %12666 = vmatmul.mubr.bf16.vlgmr.msra.gmra.mrb[40].mxu0 %v11839_v15  ;;  %12752 = vmatmul.mubr.bf16.vlgmr.msra.gmra.mrb[40].mxu1 %v11839_v15  ;;  %v11837_v23 = vmax.f32 %v11829_v54, 0.0  ;;  %v21093_v15 = vld [vmem:[#allocation18 + $0x328] ss:$16 sps:$4 sm:$0xff]   ;;  %v21101_v29 = vld [vmem:[#allocation18 + $0x34c] ss:$16 sps:$4 sm:$0xff]  }
 0xd92   :  { %12677 = vmatpush1.bf16.msra.mxu0 %v21036_v42  ;;  %12763 = vmatpush1.bf16.msra.mxu1 %v21039_v35  ;;  %v11838_v14 = vmax.f32 %v11830_v24, 0.0  ;;  %v21096_v60 = vld [vmem:[#allocation18 + $0x340] ss:$16 sps:$4 sm:$0xff]   ;;  %v21099_v42 = vld [vmem:[#allocation18 + $0x348] ss:$16 sps:$4 sm:$0xff]  }
 0xd93   :  { %12678 = vmatprep.subr.bf16.mxu0 %v21044_v48  ;;  %12764 = vmatprep.subr.bf16.mxu1 %v21047_v10  ;;  %v23363_v30 = vpack.c.bf16 %v11837_v23, %v11833_v8  ;;  %v21104_v35 = vld [vmem:[#allocation18 + $0x364] ss:$16 sps:$4 sm:$0xff]   ;;  %v21107_v36 = vld [vmem:[#allocation18 + $0x36c] ss:$16 sps:$4 sm:$0xff]   ;;  %v21102_v62 = vld [vmem:[#allocation18 + $0x360] ss:$16 sps:$4 sm:$0xff]  }
 0xd94   :  { %v11842_v45 = vpack.c.bf16 %v11838_v14, %v11834_v50  ;;  %v21105_v48 = vld [vmem:[#allocation18 + $0x368] ss:$16 sps:$4 sm:$0xff]   ;;  %v21110_v10 = vld [vmem:[#allocation18 + $0x384] ss:$16 sps:$4 sm:$0xff]   ;;  %v21113_v8 = vld [vmem:[#allocation18 + $0x38c] ss:$16 sps:$4 sm:$0xff]  }
 0xd95   :  { %v21108_v54 = vld [vmem:[#allocation18 + $0x380] ss:$16 sps:$4 sm:$0xff]   ;;  %v21111_v0 = vld [vmem:[#allocation18 + $0x388] ss:$16 sps:$4 sm:$0xff]   ;;  %v21116_v50 = vld [vmem:[#allocation18 + $0x3a4] ss:$16 sps:$4 sm:$0xff]  }
 0xd96   :  { %12679 = vmatpush1.bf16.msra.mxu0 %v21042_v9  ;;  %12765 = vmatpush1.bf16.msra.mxu1 %v21045_v43  ;;  %v21119_v24 = vld [vmem:[#allocation18 + $0x3ac] ss:$16 sps:$4 sm:$0xff]   ;;  %v21114_v23 = vld [vmem:[#allocation18 + $0x3a0] ss:$16 sps:$4 sm:$0xff]   ;;  %v21117_v9 = vld [vmem:[#allocation18 + $0x3a8] ss:$16 sps:$4 sm:$0xff]  }
 0xd97   :  { %12680 = vmatprep.subr.bf16.mxu0 %v21050_v18  ;;  %12766 = vmatprep.subr.bf16.mxu1 %v21053_v33  ;;  %v12832_v43 = vld [vmem:[%s23628_s9] sm:$0xff]  ;;  %v21125_v18 = vld [vmem:[#allocation18 + $0x3cc] ss:$16 sps:$4 sm:$0xff]  }
 0xd98   :  { %12708 = vmatprep.mubr.bf16.mxu0 %v11842_v45  ;;  %12794 = vmatprep.mubr.bf16.mxu1 %v11842_v45  ;;  %v21122_v14 = vld [vmem:[#allocation18 + $0x3c4] ss:$16 sps:$4 sm:$0xff]   ;;  %v12834_v33 = vcombine.high %v12832_v43, %v12832_v43  ;;  %v21120_v45 = vld [vmem:[#allocation18 + $0x3c0] ss:$16 sps:$4 sm:$0xff]  }
 0xd9a   :  { %12681 = vmatpush1.bf16.msra.mxu0 %v21048_v44  ;;  %12767 = vmatpush1.bf16.msra.mxu1 %v21051_v47  ;;  %v21123_v44 = vld [vmem:[#allocation18 + $0x3c8] ss:$16 sps:$4 sm:$0xff]   ;;  %v21128_v47 = vld [vmem:[#allocation18 + $0x3e4] ss:$16 sps:$4 sm:$0xff]  }
 0xd9b   :  { %12682 = vmatprep.subr.bf16.mxu0 %v21056_v22  ;;  %12768 = vmatprep.subr.bf16.mxu1 %v21059_v37  ;;  %v21131_v22 = vld [vmem:[#allocation18 + $0x3ec] ss:$16 sps:$4 sm:$0xff]   ;;  %v12841_v37 = vrot.slane %v12832_v43, %v22661_v6 }
 0xd9c   :  { %v21181_v43 = vld [vmem:[#allocation19 + $0xec] ss:$16 sps:$4 sm:$0xff]  }
 0xd9e   :  { %12683 = vmatpush1.bf16.msra.mxu0 %v21054_v17  ;;  %12769 = vmatpush1.bf16.msra.mxu1 %v21057_v59  ;;  %v12831_v17 = vld [vmem:[%s23629_s6] sm:$0xff]  ;;  %v12848_v59 = vrot.slane %v12834_v33, %v22661_v6 }
 0xd9f   :  { %12684 = vmatprep.subr.bf16.mxu0 %v21062_v31  ;;  %12770 = vmatprep.subr.bf16.mxu1 %v21065_v21  ;;  %v12950_v31 = vcombine.high %v12831_v17, %v12831_v17  ;;  %v21126_v21 = vld [vmem:[#allocation18 + $0x3e0] ss:$16 sps:$4 sm:$0xff]   ;;  %v21184_v33 = vld [vmem:[#allocation19 + $0x104] ss:$16 sps:$4 sm:$0xff]  }
 0xda2   :  { %12685 = vmatpush1.bf16.msra.mxu0 %v21060_v41  ;;  %12771 = vmatpush1.bf16.msra.mxu1 %v21063_v20  ;;  %v21129_v41 = vld [vmem:[#allocation18 + $0x3e8] ss:$16 sps:$4 sm:$0xff]   ;;  %v12849_v20 = vcombine.high %v12841_v37, %v12841_v37 }
 0xda3   :  { %12686 = vmatprep.subr.bf16.mxu0 %v21068_v1  ;;  %12772 = vmatprep.subr.bf16.mxu1 %v21071_v4  ;;  %v12957_v1 = vrot.slane %v12831_v17, %v22661_v6  ;;  %v12850_v4 = vcombine.high %v12848_v59, %v12848_v59 }
 0xda6   :  { %12687 = vmatpush1.bf16.msra.mxu0 %v21066_v34  ;;  %12773 = vmatpush1.bf16.msra.mxu1 %v21069_v51  ;;  %v12964_v34 = vrot.slane %v12950_v31, %v22661_v6  ;;  %v12852_v51 = vsel %vm439_vm0, %v12841_v37, 0 }
 0xda7   :  { %12688 = vmatprep.subr.bf16.mxu0 %v21074_v56  ;;  %12774 = vmatprep.subr.bf16.mxu1 %v21077_v40  ;;  %v12965_v56 = vcombine.high %v12957_v1, %v12957_v1  ;;  %v12858_v40 = vsel %vm439_vm0, %v12848_v59, 0 }
 0xdaa   :  { %12689 = vmatpush1.bf16.msra.mxu0 %v21072_v46  ;;  %12775 = vmatpush1.bf16.msra.mxu1 %v21075_v57  ;;  %v12966_v46 = vcombine.high %v12964_v34, %v12964_v34  ;;  %v12968_v57 = vsel %vm439_vm0, %v12957_v1, 0 }
 0xdab   :  { %12690 = vmatprep.subr.bf16.mxu0 %v21080_v63  ;;  %12776 = vmatprep.subr.bf16.mxu1 %v21083_v2  ;;  %v12974_v63 = vsel %vm439_vm0, %v12964_v34, 0  ;;  %v21136_v2 = vld [vmem:[#allocation19 + $0x4] ss:$16 sps:$4 sm:$0xff]  }
 0xdac   :  { %v21190_v34 = vld [vmem:[#allocation19 + $0x124] ss:$16 sps:$4 sm:$0xff]  }
 0xdae   :  { %12691 = vmatpush1.bf16.msra.mxu0 %v21078_v19  ;;  %12777 = vmatpush1.bf16.msra.mxu1 %v21081_v52  ;;  %v21139_v19 = vld [vmem:[#allocation19 + $0xc] ss:$16 sps:$4 sm:$0xff]   ;;  %v21137_v52 = vld [vmem:[#allocation19 + $0x8] ss:$16 sps:$4 sm:$0xff]  }
 0xdaf   :  { %12692 = vmatprep.subr.bf16.mxu0 %v21086_v39  ;;  %12778 = vmatprep.subr.bf16.mxu1 %v21089_v53  ;;  %v21142_v39 = vld [vmem:[#allocation19 + $0x24] ss:$16 sps:$4 sm:$0xff]   ;;  %v21145_v53 = vld [vmem:[#allocation19 + $0x2c] ss:$16 sps:$4 sm:$0xff]  }
 0xdb2   :  { %12693 = vmatpush1.bf16.msra.mxu0 %v21084_v5  ;;  %12779 = vmatpush1.bf16.msra.mxu1 %v21087_v7  ;;  %v21140_v5 = vld [vmem:[#allocation19 + $0x20] ss:$16 sps:$4 sm:$0xff]   ;;  %v21143_v7 = vld [vmem:[#allocation19 + $0x28] ss:$16 sps:$4 sm:$0xff]  }
 0xdb3   :  { %12694 = vmatprep.subr.bf16.mxu0 %v21092_v32  ;;  %12780 = vmatprep.subr.bf16.mxu1 %v21095_v61  ;;  %v21148_v32 = vld [vmem:[#allocation19 + $0x44] ss:$16 sps:$4 sm:$0xff]   ;;  %v21151_v61 = vld [vmem:[#allocation19 + $0x4c] ss:$16 sps:$4 sm:$0xff]  }
 0xdb6   :  { %12695 = vmatpush1.bf16.msra.mxu0 %v21090_v49  ;;  %12781 = vmatpush1.bf16.msra.mxu1 %v21093_v15  ;;  %v21146_v49 = vld [vmem:[#allocation19 + $0x40] ss:$16 sps:$4 sm:$0xff]   ;;  %v21149_v15 = vld [vmem:[#allocation19 + $0x48] ss:$16 sps:$4 sm:$0xff]  }
 0xdb7   :  { %12696 = vmatprep.subr.bf16.mxu0 %v21098_v11  ;;  %12782 = vmatprep.subr.bf16.mxu1 %v21101_v29  ;;  %v21154_v11 = vld [vmem:[#allocation19 + $0x64] ss:$16 sps:$4 sm:$0xff]   ;;  %v21157_v29 = vld [vmem:[#allocation19 + $0x6c] ss:$16 sps:$4 sm:$0xff]  }
 0xdba   :  { %12697 = vmatpush1.bf16.msra.mxu0 %v21096_v60  ;;  %12783 = vmatpush1.bf16.msra.mxu1 %v21099_v42  ;;  %v21152_v60 = vld [vmem:[#allocation19 + $0x60] ss:$16 sps:$4 sm:$0xff]   ;;  %v21160_v42 = vld [vmem:[#allocation19 + $0x84] ss:$16 sps:$4 sm:$0xff]  }
 0xdbb   :  { %12698 = vmatprep.subr.bf16.mxu0 %v21104_v35  ;;  %12784 = vmatprep.subr.bf16.mxu1 %v21107_v36  ;;  %v21163_v35 = vld [vmem:[#allocation19 + $0x8c] ss:$16 sps:$4 sm:$0xff]   ;;  %v21158_v36 = vld [vmem:[#allocation19 + $0x80] ss:$16 sps:$4 sm:$0xff]  }
 0xdbe   :  { %12699 = vmatpush1.bf16.msra.mxu0 %v21102_v62  ;;  %12785 = vmatpush1.bf16.msra.mxu1 %v21105_v48  ;;  %v21161_v62 = vld [vmem:[#allocation19 + $0x88] ss:$16 sps:$4 sm:$0xff]   ;;  %v21166_v48 = vld [vmem:[#allocation19 + $0xa4] ss:$16 sps:$4 sm:$0xff]  }
 0xdbf   :  { %12700 = vmatprep.subr.bf16.mxu0 %v21110_v10  ;;  %12786 = vmatprep.subr.bf16.mxu1 %v21113_v8  ;;  %v21169_v10 = vld [vmem:[#allocation19 + $0xac] ss:$16 sps:$4 sm:$0xff]   ;;  %v21164_v8 = vld [vmem:[#allocation19 + $0xa0] ss:$16 sps:$4 sm:$0xff]  }
 0xdc2   :  { %12701 = vmatpush1.bf16.msra.mxu0 %v21108_v54  ;;  %12787 = vmatpush1.bf16.msra.mxu1 %v21111_v0  ;;  %v21167_v54 = vld [vmem:[#allocation19 + $0xa8] ss:$16 sps:$4 sm:$0xff]   ;;  %v21172_v0 = vld [vmem:[#allocation19 + $0xc4] ss:$16 sps:$4 sm:$0xff]  }
 0xdc3   :  { %12702 = vmatprep.subr.bf16.mxu0 %v21116_v50  ;;  %12788 = vmatprep.subr.bf16.mxu1 %v21119_v24  ;;  %v21175_v50 = vld [vmem:[#allocation19 + $0xcc] ss:$16 sps:$4 sm:$0xff]   ;;  %v21170_v24 = vld [vmem:[#allocation19 + $0xc0] ss:$16 sps:$4 sm:$0xff]  }
 0xdc6   :  { %12703 = vmatpush1.bf16.msra.mxu0 %v21114_v23  ;;  %12789 = vmatpush1.bf16.msra.mxu1 %v21117_v9  ;;  %v21173_v23 = vld [vmem:[#allocation19 + $0xc8] ss:$16 sps:$4 sm:$0xff]   ;;  %v21178_v9 = vld [vmem:[#allocation19 + $0xe4] ss:$16 sps:$4 sm:$0xff]  }
 0xdc7   :  { %12704 = vmatprep.subr.bf16.mxu0 %v21122_v14  ;;  %12790 = vmatprep.subr.bf16.mxu1 %v21125_v18  ;;  %v21176_v14 = vld [vmem:[#allocation19 + $0xe0] ss:$16 sps:$4 sm:$0xff]   ;;  %v21179_v18 = vld [vmem:[#allocation19 + $0xe8] ss:$16 sps:$4 sm:$0xff]  }
 0xdca   :  { %12705 = vmatpush1.bf16.msra.mxu0 %v21120_v45  ;;  %12791 = vmatpush1.bf16.msra.mxu1 %v21123_v44  ;;  %v21187_v45 = vld [vmem:[#allocation19 + $0x10c] ss:$16 sps:$4 sm:$0xff]   ;;  %v21182_v44 = vld [vmem:[#allocation19 + $0x100] ss:$16 sps:$4 sm:$0xff]  }
 0xdcb   :  { %12706 = vmatprep.subr.bf16.mxu0 %v21128_v47  ;;  %12792 = vmatprep.subr.bf16.mxu1 %v21131_v22  ;;  %v21185_v47 = vld [vmem:[#allocation19 + $0x108] ss:$16 sps:$4 sm:$0xff]  }
 0xdce   :  { %12707 = vmatpush1.bf16.msra.mxu0 %v21126_v21  ;;  %12793 = vmatpush1.bf16.msra.mxu1 %v21129_v41 }
 0xdcf   :  { %18176 = vmatprep.subr.msk.bf16.mxu0 %vm439_vm0, %v12849_v20  ;;  %18178 = vmatprep.subr.msk.bf16.mxu1 %vm439_vm0, %v12850_v4 }
 0xdd1   :  { %12709 = vmatmul.mubr.bf16.vlgmr.msra.gmra.mrb[40].mxu0 %v23363_v30  ;;  %12795 = vmatmul.mubr.bf16.vlgmr.msra.gmra.mrb[40].mxu1 %v23363_v30  ;;  %v21134_v30 = vld [vmem:[#allocation19] ss:$16 sps:$4 sm:$0xff]  }
 0xdd2   :  { %12864 = vmatpush1.bf16.msra.mxu0 %v12852_v51  ;;  %12895 = vmatprep.mubr.bf16.mxu0 %v22296_v3  ;;  %v21191_v51 = vld [vmem:[#allocation19 + $0x128] ss:$16 sps:$4 sm:$0xff]  }
 0xdd3   :  { %18180 = vmatprep.subr.msk.bf16.mxu0 %vm439_vm0, %v12965_v56  ;;  %12907 = vmatpush1.bf16.msra.mxu1 %v12858_v40  ;;  %v21193_v56 = vld [vmem:[#allocation19 + $0x12c] ss:$16 sps:$4 sm:$0xff]   ;;  %v21194_v40 = vld [vmem:[#allocation19 + $0x140] ss:$16 sps:$4 sm:$0xff]  }
 0xdd4   :  { %12938 = vmatprep.mubr.bf16.mxu1 %v22296_v3  ;;  %18182 = vmatprep.subr.msk.bf16.mxu1 %vm439_vm0, %v12966_v46  ;;  %v21199_v46 = vld [vmem:[#allocation19 + $0x14c] ss:$16 sps:$4 sm:$0xff]  }
 0xdd9   :  { %18177 = vmatmul.mubr.msk.bf16.vlgmr.msra.gmra.mrb[44].mxu0 %vm23630_vm6, %v22670_v16  ;;  %18179 = vmatmul.mubr.msk.bf16.vlgmr.msra.gmra.mrb[44].mxu1 %vm23631_vm7, %v22670_v16  ;;  %vm23644_vm6 = vmmov %vm23639_vm1 }
 0xdda   :  { %12980 = vmatpush1.bf16.msra.mxu0 %v12968_v57  ;;  %13011 = vmatprep.mubr.bf16.mxu0 %v22296_v3  ;;  %v21197_v57 = vld [vmem:[#allocation19 + $0x148] ss:$16 sps:$4 sm:$0xff]   ;;  %vm23645_vm7 = vmmov %vm23641_vm2 }
 0xddb   :  { %13023 = vmatpush1.bf16.msra.mxu1 %v12974_v63  ;;  %13054 = vmatprep.mubr.bf16.mxu1 %v22296_v3  ;;  %v21202_v63 = vld [vmem:[#allocation19 + $0x164] ss:$16 sps:$4 sm:$0xff]  }
 0xddc   :  { %13897 = vmatprep.subr.bf16.mxu0 %v21136_v2  ;;  %13983 = vmatprep.subr.bf16.mxu1 %v21139_v19  ;;  %v21200_v2 = vld [vmem:[#allocation19 + $0x160] ss:$16 sps:$4 sm:$0xff]   ;;  %v21205_v19 = vld [vmem:[#allocation19 + $0x16c] ss:$16 sps:$4 sm:$0xff]  }
 0xde5   :  { %18181 = vmatmul.mubr.msk.bf16.vlgmr.msra.gmra.mrb[44].mxu0 %vm23632_vm8, %v23337_v38  ;;  %18183 = vmatmul.mubr.msk.bf16.vlgmr.msra.gmra.mrb[44].mxu1 %vm23633_vm9, %v23337_v38  ;;  %v21155_v38 = vld [vmem:[#allocation19 + $0x68] ss:$16 sps:$4 sm:$0xff]  }
 0xde6   :  { %13898 = vmatpush1.bf16.msra.mxu0 %v21134_v30  ;;  %13984 = vmatpush1.bf16.msra.mxu1 %v21137_v52  ;;  %v21203_v30 = vld [vmem:[#allocation19 + $0x168] ss:$16 sps:$4 sm:$0xff]   ;;  %v21208_v52 = vld [vmem:[#allocation19 + $0x184] ss:$16 sps:$4 sm:$0xff]  }
 0xde7   :  { %13899 = vmatprep.subr.bf16.mxu0 %v21142_v39  ;;  %13985 = vmatprep.subr.bf16.mxu1 %v21145_v53  ;;  %v21211_v39 = vld [vmem:[#allocation19 + $0x18c] ss:$16 sps:$4 sm:$0xff]   ;;  %v22297_v53 = vmov 1  }
 0xde8   :  { %18981 = vset.pattern.permute.xlu1 %v22297_v53 }
 0xdea   :  { %13900 = vmatpush1.bf16.msra.mxu0 %v21140_v5  ;;  %13986 = vmatpush1.bf16.msra.mxu1 %v21143_v7  ;;  %v21206_v5 = vld [vmem:[#allocation19 + $0x180] ss:$16 sps:$4 sm:$0xff]   ;;  %v21209_v7 = vld [vmem:[#allocation19 + $0x188] ss:$16 sps:$4 sm:$0xff]  }
 0xdeb   :  { %13901 = vmatprep.subr.bf16.mxu0 %v21148_v32  ;;  %13987 = vmatprep.subr.bf16.mxu1 %v21151_v61  ;;  %v21212_v32 = vld [vmem:[#allocation19 + $0x1a0] ss:$16 sps:$4 sm:$0xff]   ;;  %v21214_v61 = vld [vmem:[#allocation19 + $0x1a4] ss:$16 sps:$4 sm:$0xff]  }
 0xdee   :  { %13902 = vmatpush1.bf16.msra.mxu0 %v21146_v49  ;;  %13988 = vmatpush1.bf16.msra.mxu1 %v21149_v15  ;;  %v21215_v49 = vld [vmem:[#allocation19 + $0x1a8] ss:$16 sps:$4 sm:$0xff]   ;;  %v21217_v15 = vld [vmem:[#allocation19 + $0x1ac] ss:$16 sps:$4 sm:$0xff]  }
 0xdef   :  { %13903 = vmatprep.subr.bf16.mxu0 %v21154_v11  ;;  %13989 = vmatprep.subr.bf16.mxu1 %v21157_v29  ;;  %v21220_v11 = vld [vmem:[#allocation19 + $0x1c4] ss:$16 sps:$4 sm:$0xff]   ;;  %v21223_v29 = vld [vmem:[#allocation19 + $0x1cc] ss:$16 sps:$4 sm:$0xff]  }
 0xdf2   :  { %13904 = vmatpush1.bf16.msra.mxu0 %v21152_v60  ;;  %13990 = vmatpush1.bf16.msra.mxu1 %v21155_v38  ;;  %v21218_v60 = vld [vmem:[#allocation19 + $0x1c0] ss:$16 sps:$4 sm:$0xff]   ;;  %v21221_v38 = vld [vmem:[#allocation19 + $0x1c8] ss:$16 sps:$4 sm:$0xff]  }
 0xdf3   :  { %13905 = vmatprep.subr.bf16.mxu0 %v21160_v42  ;;  %13991 = vmatprep.subr.bf16.mxu1 %v21163_v35  ;;  %v21224_v42 = vld [vmem:[#allocation19 + $0x1e0] ss:$16 sps:$4 sm:$0xff]   ;;  %v21226_v35 = vld [vmem:[#allocation19 + $0x1e4] ss:$16 sps:$4 sm:$0xff]  }
 0xdf6   :  { %13906 = vmatpush1.bf16.msra.mxu0 %v21158_v36  ;;  %13992 = vmatpush1.bf16.msra.mxu1 %v21161_v62  ;;  %v21227_v36 = vld [vmem:[#allocation19 + $0x1e8] ss:$16 sps:$4 sm:$0xff]   ;;  %v21229_v62 = vld [vmem:[#allocation19 + $0x1ec] ss:$16 sps:$4 sm:$0xff]  }
 0xdf7   :  { %13907 = vmatprep.subr.bf16.mxu0 %v21166_v48  ;;  %13993 = vmatprep.subr.bf16.mxu1 %v21169_v10  ;;  %v21232_v48 = vld [vmem:[#allocation19 + $0x204] ss:$16 sps:$4 sm:$0xff]   ;;  %v21235_v10 = vld [vmem:[#allocation19 + $0x20c] ss:$16 sps:$4 sm:$0xff]  }
 0xdfa   :  { %13908 = vmatpush1.bf16.msra.mxu0 %v21164_v8  ;;  %13994 = vmatpush1.bf16.msra.mxu1 %v21167_v54 }
 0xdfb   :  { %13909 = vmatprep.subr.bf16.mxu0 %v21172_v0  ;;  %13995 = vmatprep.subr.bf16.mxu1 %v21175_v50 }
 0xdfe   :  { %13910 = vmatpush1.bf16.msra.mxu0 %v21170_v24  ;;  %13996 = vmatpush1.bf16.msra.mxu1 %v21173_v23 }
 0xdff   :  { %13911 = vmatprep.subr.bf16.mxu0 %v21178_v9  ;;  %13997 = vmatprep.subr.bf16.mxu1 %v21181_v43 }
 0xe02   :  { %13912 = vmatpush1.bf16.msra.mxu0 %v21176_v14  ;;  %13998 = vmatpush1.bf16.msra.mxu1 %v21179_v18 }
 0xe03   :  { %13913 = vmatprep.subr.bf16.mxu0 %v21184_v33  ;;  %13999 = vmatprep.subr.bf16.mxu1 %v21187_v45  ;;  %v13065_v33 = vld [vmem:[%s23635_s22] sm:$0xf] }
 0xe06   :  { %13914 = vmatpush1.bf16.msra.mxu0 %v21182_v44  ;;  %14000 = vmatpush1.bf16.msra.mxu1 %v21185_v47  ;;  %v13070_v44 = vrot.slane %v13065_v33, %v22680_v25  ;;  %v13078_v47 = vrot.slane %v13065_v33, %v22686_v27 }
 0xe07   :  { %13915 = vmatprep.subr.bf16.mxu0 %v21190_v34  ;;  %14001 = vmatprep.subr.bf16.mxu1 %v21193_v56 }
 0xe0a   :  { %14002 = vmatpush1.bf16.msra.mxu1 %v21191_v51 }
 0xe0b   :  { %14003 = vmatprep.subr.bf16.mxu1 %v21199_v46 }
 0xe0c   :  { %v11524_v22 = vpop.xlane.xlu0 %11523 }
 0xe0d   :  { %v11528_v37 = vsub.f32 %v23344_v13, %v11524_v22  ;;  %v21188_v13 = vld [vmem:[#allocation19 + $0x120] ss:$16 sps:$4 sm:$0xff]  }
 0xe0e   :  { %13916 = vmatpush1.bf16.msra.mxu0 %v21188_v13  ;;  %14004 = vmatpush1.bf16.msra.mxu1 %v21197_v57 }
 0xe0f   :  { %v11530_v17 = vmul.f32 1.442695, %v11528_v37  ;;  %14005 = vmatprep.subr.bf16.mxu1 %v21205_v19  ;;  %v13074_v37 = vrot.slane %v13065_v33, %v22683_v26 }
 0xe10   :  { %v11527_v59 = vpop.xlane.xlu0 %11526 }
 0xe11   :  { %21903 = vpow2.f32 %v11530_v17  ;;  %v11529_v31 = vsub.f32 %v23349_v12, %v11527_v59  ;;  %v21196_v12 = vld [vmem:[#allocation19 + $0x144] ss:$16 sps:$4 sm:$0xff]   ;;  %v13082_v17 = vrot.slane %v13065_v33, %v22689_v28 }
 0xe12   :  { %13917 = vmatprep.subr.bf16.mxu0 %v21196_v12  ;;  %14006 = vmatpush1.bf16.msra.mxu1 %v21203_v30  ;;  %v21250_v33 = vld [vmem:[#allocation19 + $0x264] ss:$16 sps:$4 sm:$0xff]  }
 0xe13   :  { %v11532_v21 = vmul.f32 1.442695, %v11529_v31  ;;  %13918 = vmatpush1.bf16.msra.mxu0 %v21194_v40  ;;  %14007 = vmatprep.subr.bf16.mxu1 %v21211_v39 }
 0xe14   :  { %13919 = vmatprep.subr.bf16.mxu0 %v21202_v63 }
 0xe15   :  { %21905 = vpow2.f32 %v11532_v21 }
 0xe16   :  { %14008 = vmatpush1.bf16.msra.mxu1 %v21209_v7 }
 0xe17   :  { %13920 = vmatpush1.bf16.msra.mxu0 %v21200_v2  ;;  %14009 = vmatprep.subr.bf16.mxu1 %v21217_v15 }
 0xe18   :  { %13921 = vmatprep.subr.bf16.mxu0 %v21208_v52 }
 0xe1a   :  { %14010 = vmatpush1.bf16.msra.mxu1 %v21215_v49 }
 0xe1b   :  { %v23395_v41 = vpop.eup %21903  ;;  %13922 = vmatpush1.bf16.msra.mxu0 %v21206_v5  ;;  %14011 = vmatprep.subr.bf16.mxu1 %v21223_v29 }
 0xe1c   :  { %v11534_v20 = vsel %vm23634_vm11, %v23395_v41, 0.0  ;;  %13923 = vmatprep.subr.bf16.mxu0 %v21214_v61 }
 0xe1d   :  { %11535 = vadd.xlane.f32.xlu1 %v11534_v20 }
 0xe1e   :  { %14012 = vmatpush1.bf16.msra.mxu1 %v21221_v38 }
 0xe1f   :  { %v23399_v1 = vpop.eup %21905  ;;  %13924 = vmatpush1.bf16.msra.mxu0 %v21212_v32  ;;  %14013 = vmatprep.subr.bf16.mxu1 %v21229_v62  ;;  %v21236_v62 = vld [vmem:[#allocation19 + $0x220] ss:$16 sps:$4 sm:$0xff]  }
 0xe20   :  { %v11537_v4 = vsel %vm11520_vm3, %v23399_v1, 0.0  ;;  %13925 = vmatprep.subr.bf16.mxu0 %v21220_v11 }
 0xe21   :  { %11538 = vadd.xlane.f32.xlu1 %v11537_v4 }
 0xe22   :  { %14014 = vmatpush1.bf16.msra.mxu1 %v21227_v36  ;;  %v21241_v36 = vld [vmem:[#allocation19 + $0x22c] ss:$16 sps:$4 sm:$0xff]  }
 0xe23   :  { %13926 = vmatpush1.bf16.msra.mxu0 %v21218_v60  ;;  %14026 = vmatprep.subr.bf16.mxu1 %v21235_v10  ;;  %v21230_v60 = vld [vmem:[#allocation19 + $0x200] ss:$16 sps:$4 sm:$0xff]   ;;  %v21244_v10 = vld [vmem:[#allocation19 + $0x244] ss:$16 sps:$4 sm:$0xff]  }
 0xe24   :  { %13927 = vmatprep.subr.bf16.mxu0 %v21226_v35  ;;  %v21238_v35 = vld [vmem:[#allocation19 + $0x224] ss:$16 sps:$4 sm:$0xff]  }
 0xe27   :  { %13928 = vmatpush1.bf16.msra.mxu0 %v21224_v42  ;;  %v21233_v42 = vld [vmem:[#allocation19 + $0x208] ss:$16 sps:$4 sm:$0xff]  }
 0xe28   :  { %13940 = vmatprep.subr.bf16.mxu0 %v21232_v48  ;;  %v21239_v48 = vld [vmem:[#allocation19 + $0x228] ss:$16 sps:$4 sm:$0xff]  }
 0xea4   :  { %v23404_v8 = vpop.f32.mrb[40].mxu0  ;;  %v23406_v54 = vpop.f32.mrb[40].mxu1 }
 0xea5   :  { %v23408_v0 = vpop.f32.mrb[41].mxu0  ;;  %v23410_v50 = vpop.f32.mrb[41].mxu1 }
 0xea6   :  { %v23412_v24 = vpop.f32.mrb[42].mxu0  ;;  %v23414_v23 = vpop.f32.mrb[42].mxu1 }
 0xea7   :  { %v23416_v9 = vpop.f32.mrb[43].mxu0  ;;  %v23418_v43 = vpop.f32.mrb[43].mxu1 }
 0xeaa   :  { %v11536_v14 = vpop.xlane.xlu1 %11535 }
 0xeab   :  { %21907 = vrcp.f32 %v11536_v14  ;;  %v21247_v14 = vld [vmem:[#allocation19 + $0x24c] ss:$16 sps:$4 sm:$0xff]  }
 0xeae   :  { %v11539_v18 = vpop.xlane.xlu1 %11538 }
 0xeaf   :  { %21909 = vrcp.f32 %v11539_v18  ;;  %v21245_v18 = vld [vmem:[#allocation19 + $0x248] ss:$16 sps:$4 sm:$0xff]  }
 0xeb5   :  { %v21908_v45 = vpop.eup %21907 }
 0xeb6   :  { %v11541_v22 = vmul.f32 %v21908_v45, %v23395_v41  ;;  %v21253_v45 = vld [vmem:[#allocation19 + $0x26c] ss:$16 sps:$4 sm:$0xff]  }
 0xeb8   :  { %12815 = vperm.xlu0 %18980, %v11541_v22   ;;  %14078 = vperm.xlu1 %18981, %v11541_v22   ;;  %v13013_v59 = vpop.f32.mrb[44].mxu0  ;;  %v13056_v31 = vpop.f32.mrb[44].mxu1  ;;  %v21256_v22 = vld [vmem:[#allocation19 + $0x284] ss:$16 sps:$4 sm:$0xff]  }
 0xeb9   :  { %v21910_v21 = vpop.eup %21909  ;;  %v13087_v20 = vadd.f32 %v13070_v44, %v13013_v59  ;;  %v13015_v4 = vpop.f32.mrb[45].mxu0  ;;  %v13089_v13 = vadd.f32 %v13078_v47, %v13056_v31  ;;  %v21257_v59 = vld [vmem:[#allocation19 + $0x288] ss:$16 sps:$4 sm:$0xff]   ;;  %v21262_v31 = vld [vmem:[#allocation19 + $0x2a4] ss:$16 sps:$4 sm:$0xff]  }
 0xeba   :  { %v13058_v34 = vpop.f32.mrb[45].mxu1  ;;  %v13088_v51 = vadd.f32 %v13074_v37, %v13015_v4  ;;  %v13017_v56 = vpop.f32.mrb[46].mxu0  ;;  %v11543_v12 = vmul.f32 %v21910_v21, %v23399_v1  ;;  %v21265_v21 = vld [vmem:[#allocation19 + $0x2ac] ss:$16 sps:$4 sm:$0xff]   ;;  %v21263_v4 = vld [vmem:[#allocation19 + $0x2a8] ss:$16 sps:$4 sm:$0xff]  }
 0xebb   :  { %v13090_v40 = vadd.f32 %v13082_v17, %v13058_v34  ;;  %v13060_v46 = vpop.f32.mrb[46].mxu1  ;;  %v13091_v41 = vadd.f32 %v13070_v44, %v13017_v56  ;;  %v13019_v57 = vpop.f32.mrb[47].mxu0  ;;  %v13097_v63 = vmax.f32 %v13089_v13, 0.0  ;;  %v13095_v5 = vmax.f32 %v13087_v20, 0.0  ;;  %v21248_v44 = vld [vmem:[#allocation19 + $0x260] ss:$16 sps:$4 sm:$0xff]  }
 0xebc   :  { %v13093_v2 = vadd.f32 %v13078_v47, %v13060_v46  ;;  %v13062_v19 = vpop.f32.mrb[47].mxu1  ;;  %18982 = vset.pattern.permute.xlu1 %v22296_v3  ;;  %v13092_v30 = vadd.f32 %v13074_v37, %v13019_v57  ;;  %18984 = vset.pattern.permute.xlu0 %v22297_v53  ;;  %v13096_v61 = vmax.f32 %v13088_v51, 0.0  ;;  %v21251_v47 = vld [vmem:[#allocation19 + $0x268] ss:$16 sps:$4 sm:$0xff]   ;;  %v21259_v37 = vld [vmem:[#allocation19 + $0x28c] ss:$16 sps:$4 sm:$0xff]  }
 0xebd   :  { %v13098_v52 = vmax.f32 %v13090_v40, 0.0  ;;  %v13094_v39 = vadd.f32 %v13082_v17, %v13062_v19  ;;  %v13099_v7 = vmax.f32 %v13091_v41, 0.0  ;;  %12820 = vperm.xlu1 %18982, %v11543_v12   ;;  %v21254_v17 = vld [vmem:[#allocation19 + $0x280] ss:$16 sps:$4 sm:$0xff]   ;;  %v21268_v13 = vld [vmem:[#allocation19 + $0x2c4] ss:$16 sps:$4 sm:$0xff]  }
 0xebe   :  { %v13101_v32 = vmax.f32 %v13093_v2, 0.0  ;;  %v13100_v1 = vmax.f32 %v13092_v30, 0.0  ;;  %v21260_v20 = vld [vmem:[#allocation19 + $0x2a0] ss:$16 sps:$4 sm:$0xff]   ;;  %v21271_v34 = vld [vmem:[#allocation19 + $0x2cc] ss:$16 sps:$4 sm:$0xff]  }
 0xebf   :  { %v13102_v49 = vmax.f32 %v13094_v39, 0.0  ;;  %v13103_v15 = vpack.c.bf16 %v13099_v7, %v13095_v5  ;;  %v21266_v51 = vld [vmem:[#allocation19 + $0x2c0] ss:$16 sps:$4 sm:$0xff]   ;;  %v21269_v56 = vld [vmem:[#allocation19 + $0x2c8] ss:$16 sps:$4 sm:$0xff]  }
 0xec0   :  { %v23429_v11 = vpack.c.bf16 %v13101_v32, %v13097_v63  ;;  %v13104_v29 = vpack.c.bf16 %v13100_v1, %v13096_v61  ;;  %v21277_v40 = vld [vmem:[#allocation19 + $0x2ec] ss:$16 sps:$4 sm:$0xff]   ;;  %v21272_v46 = vld [vmem:[#allocation19 + $0x2e0] ss:$16 sps:$4 sm:$0xff]   ;;  %v21275_v41 = vld [vmem:[#allocation19 + $0x2e8] ss:$16 sps:$4 sm:$0xff]  }
 0xec1   :  { %v13106_v38 = vpack.c.bf16 %v13102_v49, %v13098_v52  ;;  %18983 = vset.pattern.permute.xlu1 %v22297_v53  ;;  %v21242_v53 = vld [vmem:[#allocation19 + $0x240] ss:$16 sps:$4 sm:$0xff]   ;;  %v21280_v57 = vld [vmem:[#allocation19 + $0x304] ss:$16 sps:$4 sm:$0xff]   ;;  %v21283_v63 = vld [vmem:[#allocation19 + $0x30c] ss:$16 sps:$4 sm:$0xff]  }
 0xec2   :  { %14082 = vperm.xlu1 %18983, %v11543_v12   ;;  %13929 = vmatprep.mubr.bf16.mxu0 %v13104_v29  ;;  %v21274_v12 = vld [vmem:[#allocation19 + $0x2e4] ss:$16 sps:$4 sm:$0xff]   ;;  %v21278_v2 = vld [vmem:[#allocation19 + $0x300] ss:$16 sps:$4 sm:$0xff]   ;;  %v21281_v19 = vld [vmem:[#allocation19 + $0x308] ss:$16 sps:$4 sm:$0xff]  }
 0xec3   :  { %14015 = vmatprep.mubr.bf16.mxu1 %v13104_v29  ;;  %13930 = vmatmul.mubr.bf16.vlgmr.msra.gmra.mrb[48].mxu0 %v13103_v15  ;;  %v21286_v30 = vld [vmem:[#allocation19 + $0x324] ss:$16 sps:$4 sm:$0xff]   ;;  %v21289_v52 = vld [vmem:[#allocation19 + $0x32c] ss:$16 sps:$4 sm:$0xff]   ;;  %v21284_v39 = vld [vmem:[#allocation19 + $0x320] ss:$16 sps:$4 sm:$0xff]  }
 0xec4   :  { %13941 = vmatpush1.bf16.msra.mxu0 %v21230_v60  ;;  %14016 = vmatmul.mubr.bf16.vlgmr.msra.gmra.mrb[48].mxu1 %v13103_v15  ;;  %v21287_v5 = vld [vmem:[#allocation19 + $0x328] ss:$16 sps:$4 sm:$0xff]   ;;  %v21292_v7 = vld [vmem:[#allocation19 + $0x344] ss:$16 sps:$4 sm:$0xff]   ;;  %v21295_v32 = vld [vmem:[#allocation19 + $0x34c] ss:$16 sps:$4 sm:$0xff]  }
 0xec5   :  { %14027 = vmatpush1.bf16.msra.mxu1 %v21233_v42  ;;  %13942 = vmatprep.subr.bf16.mxu0 %v21238_v35  ;;  %v21290_v61 = vld [vmem:[#allocation19 + $0x340] ss:$16 sps:$4 sm:$0xff]   ;;  %v21293_v1 = vld [vmem:[#allocation19 + $0x348] ss:$16 sps:$4 sm:$0xff]   ;;  %v21298_v49 = vld [vmem:[#allocation19 + $0x364] ss:$16 sps:$4 sm:$0xff]  }
 0xec6   :  { %14028 = vmatprep.subr.bf16.mxu1 %v21241_v36  ;;  %13972 = vmatprep.mubr.bf16.mxu0 %v13106_v38  ;;  %v21301_v15 = vld [vmem:[#allocation19 + $0x36c] ss:$16 sps:$4 sm:$0xff]   ;;  %v21296_v29 = vld [vmem:[#allocation19 + $0x360] ss:$16 sps:$4 sm:$0xff]   ;;  %v21299_v60 = vld [vmem:[#allocation19 + $0x368] ss:$16 sps:$4 sm:$0xff]  }
 0xec7   :  { %14058 = vmatprep.mubr.bf16.mxu1 %v13106_v38  ;;  %v21304_v38 = vld [vmem:[#allocation19 + $0x384] ss:$16 sps:$4 sm:$0xff]   ;;  %v21307_v42 = vld [vmem:[#allocation19 + $0x38c] ss:$16 sps:$4 sm:$0xff]   ;;  %v21302_v35 = vld [vmem:[#allocation19 + $0x380] ss:$16 sps:$4 sm:$0xff]  }
 0xec8   :  { %13943 = vmatpush1.bf16.msra.mxu0 %v21236_v62  ;;  %v21305_v36 = vld [vmem:[#allocation19 + $0x388] ss:$16 sps:$4 sm:$0xff]   ;;  %v21310_v62 = vld [vmem:[#allocation19 + $0x3a4] ss:$16 sps:$4 sm:$0xff]  }
 0xec9   :  { %14029 = vmatpush1.bf16.msra.mxu1 %v21239_v48  ;;  %13944 = vmatprep.subr.bf16.mxu0 %v21244_v10  ;;  %v21313_v48 = vld [vmem:[#allocation19 + $0x3ac] ss:$16 sps:$4 sm:$0xff]   ;;  %v21308_v10 = vld [vmem:[#allocation19 + $0x3a0] ss:$16 sps:$4 sm:$0xff]  }
 0xeca   :  { %14030 = vmatprep.subr.bf16.mxu1 %v21247_v14  ;;  %v21311_v14 = vld [vmem:[#allocation19 + $0x3a8] ss:$16 sps:$4 sm:$0xff]  }
 0xecc   :  { %13945 = vmatpush1.bf16.msra.mxu0 %v21242_v53  ;;  %v21316_v53 = vld [vmem:[#allocation19 + $0x3c4] ss:$16 sps:$4 sm:$0xff]  }
 0xecd   :  { %14031 = vmatpush1.bf16.msra.mxu1 %v21245_v18  ;;  %13946 = vmatprep.subr.bf16.mxu0 %v21250_v33  ;;  %v21319_v18 = vld [vmem:[#allocation19 + $0x3cc] ss:$16 sps:$4 sm:$0xff]   ;;  %v21314_v33 = vld [vmem:[#allocation19 + $0x3c0] ss:$16 sps:$4 sm:$0xff]  }
 0xece   :  { %14032 = vmatprep.subr.bf16.mxu1 %v21253_v45  ;;  %v21317_v45 = vld [vmem:[#allocation19 + $0x3c8] ss:$16 sps:$4 sm:$0xff]  }
 0xed0   :  { %13947 = vmatpush1.bf16.msra.mxu0 %v21248_v44  ;;  %v21322_v44 = vld [vmem:[#allocation19 + $0x3e4] ss:$16 sps:$4 sm:$0xff]  }
 0xed1   :  { %14033 = vmatpush1.bf16.msra.mxu1 %v21251_v47  ;;  %13948 = vmatprep.subr.bf16.mxu0 %v21256_v22  ;;  %v21325_v47 = vld [vmem:[#allocation19 + $0x3ec] ss:$16 sps:$4 sm:$0xff]   ;;  %v21320_v22 = vld [vmem:[#allocation19 + $0x3e0] ss:$16 sps:$4 sm:$0xff]  }
 0xed2   :  { %14034 = vmatprep.subr.bf16.mxu1 %v21259_v37  ;;  %v21323_v37 = vld [vmem:[#allocation19 + $0x3e8] ss:$16 sps:$4 sm:$0xff]  }
 0xed4   :  { %13949 = vmatpush1.bf16.msra.mxu0 %v21254_v17  ;;  %v21328_v17 = vld [vmem:[#allocation21 + $0x4] ss:$16 sps:$4 sm:$0xff]  }
 0xed5   :  { %14035 = vmatpush1.bf16.msra.mxu1 %v21257_v59  ;;  %13950 = vmatprep.subr.bf16.mxu0 %v21262_v31  ;;  %v21331_v59 = vld [vmem:[#allocation21 + $0xc] ss:$16 sps:$4 sm:$0xff]   ;;  %v21326_v31 = vld [vmem:[#allocation21] ss:$16 sps:$4 sm:$0xff]  }
 0xed6   :  { %14036 = vmatprep.subr.bf16.mxu1 %v21265_v21  ;;  %v21329_v21 = vld [vmem:[#allocation21 + $0x8] ss:$16 sps:$4 sm:$0xff]  }
 0xed8   :  { %13951 = vmatpush1.bf16.msra.mxu0 %v21260_v20  ;;  %v21334_v20 = vld [vmem:[#allocation21 + $0x24] ss:$16 sps:$4 sm:$0xff]  }
 0xed9   :  { %14037 = vmatpush1.bf16.msra.mxu1 %v21263_v4  ;;  %13952 = vmatprep.subr.bf16.mxu0 %v21268_v13  ;;  %v21337_v4 = vld [vmem:[#allocation21 + $0x2c] ss:$16 sps:$4 sm:$0xff]   ;;  %v21332_v13 = vld [vmem:[#allocation21 + $0x20] ss:$16 sps:$4 sm:$0xff]  }
 0xeda   :  { %14038 = vmatprep.subr.bf16.mxu1 %v21271_v34  ;;  %v21335_v34 = vld [vmem:[#allocation21 + $0x28] ss:$16 sps:$4 sm:$0xff]  }
 0xedc   :  { %13953 = vmatpush1.bf16.msra.mxu0 %v21266_v51  ;;  %v21340_v51 = vld [vmem:[#allocation21 + $0x44] ss:$16 sps:$4 sm:$0xff]  }
 0xedd   :  { %14039 = vmatpush1.bf16.msra.mxu1 %v21269_v56  ;;  %13954 = vmatprep.subr.bf16.mxu0 %v21274_v12  ;;  %v21343_v56 = vld [vmem:[#allocation21 + $0x4c] ss:$16 sps:$4 sm:$0xff]   ;;  %v21338_v12 = vld [vmem:[#allocation21 + $0x40] ss:$16 sps:$4 sm:$0xff]  }
 0xede   :  { %14040 = vmatprep.subr.bf16.mxu1 %v21277_v40  ;;  %v21341_v40 = vld [vmem:[#allocation21 + $0x48] ss:$16 sps:$4 sm:$0xff]  }
 0xee0   :  { %13955 = vmatpush1.bf16.msra.mxu0 %v21272_v46  ;;  %v21346_v46 = vld [vmem:[#allocation21 + $0x64] ss:$16 sps:$4 sm:$0xff]  }
 0xee1   :  { %14041 = vmatpush1.bf16.msra.mxu1 %v21275_v41  ;;  %13956 = vmatprep.subr.bf16.mxu0 %v21280_v57  ;;  %v21349_v41 = vld [vmem:[#allocation21 + $0x6c] ss:$16 sps:$4 sm:$0xff]   ;;  %v21344_v57 = vld [vmem:[#allocation21 + $0x60] ss:$16 sps:$4 sm:$0xff]  }
 0xee2   :  { %14042 = vmatprep.subr.bf16.mxu1 %v21283_v63  ;;  %v21352_v63 = vld [vmem:[#allocation21 + $0x84] ss:$16 sps:$4 sm:$0xff]  }
 0xee4   :  { %13957 = vmatpush1.bf16.msra.mxu0 %v21278_v2  ;;  %v21355_v2 = vld [vmem:[#allocation21 + $0x8c] ss:$16 sps:$4 sm:$0xff]  }
 0xee5   :  { %14043 = vmatpush1.bf16.msra.mxu1 %v21281_v19  ;;  %13958 = vmatprep.subr.bf16.mxu0 %v21286_v30  ;;  %v21350_v19 = vld [vmem:[#allocation21 + $0x80] ss:$16 sps:$4 sm:$0xff]   ;;  %v21353_v30 = vld [vmem:[#allocation21 + $0x88] ss:$16 sps:$4 sm:$0xff]  }
 0xee6   :  { %14044 = vmatprep.subr.bf16.mxu1 %v21289_v52  ;;  %v21358_v52 = vld [vmem:[#allocation21 + $0xa4] ss:$16 sps:$4 sm:$0xff]  }
 0xee8   :  { %13959 = vmatpush1.bf16.msra.mxu0 %v21284_v39  ;;  %v21361_v39 = vld [vmem:[#allocation21 + $0xac] ss:$16 sps:$4 sm:$0xff]  }
 0xee9   :  { %14045 = vmatpush1.bf16.msra.mxu1 %v21287_v5  ;;  %13960 = vmatprep.subr.bf16.mxu0 %v21292_v7  ;;  %v21356_v5 = vld [vmem:[#allocation21 + $0xa0] ss:$16 sps:$4 sm:$0xff]   ;;  %v21359_v7 = vld [vmem:[#allocation21 + $0xa8] ss:$16 sps:$4 sm:$0xff]  }
 0xeea   :  { %14046 = vmatprep.subr.bf16.mxu1 %v21295_v32  ;;  %v21364_v32 = vld [vmem:[#allocation21 + $0xc4] ss:$16 sps:$4 sm:$0xff]  }
 0xeec   :  { %13961 = vmatpush1.bf16.msra.mxu0 %v21290_v61  ;;  %v21367_v61 = vld [vmem:[#allocation21 + $0xcc] ss:$16 sps:$4 sm:$0xff]  }
 0xeed   :  { %14047 = vmatpush1.bf16.msra.mxu1 %v21293_v1  ;;  %13962 = vmatprep.subr.bf16.mxu0 %v21298_v49  ;;  %v21362_v1 = vld [vmem:[#allocation21 + $0xc0] ss:$16 sps:$4 sm:$0xff]   ;;  %v21365_v49 = vld [vmem:[#allocation21 + $0xc8] ss:$16 sps:$4 sm:$0xff]  }
 0xeee   :  { %14048 = vmatprep.subr.bf16.mxu1 %v21301_v15  ;;  %v21370_v15 = vld [vmem:[#allocation21 + $0xe4] ss:$16 sps:$4 sm:$0xff]  }
 0xef0   :  { %13963 = vmatpush1.bf16.msra.mxu0 %v21296_v29  ;;  %v21373_v29 = vld [vmem:[#allocation21 + $0xec] ss:$16 sps:$4 sm:$0xff]  }
 0xef1   :  { %14049 = vmatpush1.bf16.msra.mxu1 %v21299_v60  ;;  %13964 = vmatprep.subr.bf16.mxu0 %v21304_v38  ;;  %v21368_v60 = vld [vmem:[#allocation21 + $0xe0] ss:$16 sps:$4 sm:$0xff]   ;;  %v21371_v38 = vld [vmem:[#allocation21 + $0xe8] ss:$16 sps:$4 sm:$0xff]  }
 0xef2   :  { %14050 = vmatprep.subr.bf16.mxu1 %v21307_v42  ;;  %v21376_v42 = vld [vmem:[#allocation21 + $0x104] ss:$16 sps:$4 sm:$0xff]  }
 0xef4   :  { %13965 = vmatpush1.bf16.msra.mxu0 %v21302_v35  ;;  %v21379_v35 = vld [vmem:[#allocation21 + $0x10c] ss:$16 sps:$4 sm:$0xff]  }
 0xef5   :  { %14051 = vmatpush1.bf16.msra.mxu1 %v21305_v36  ;;  %13966 = vmatprep.subr.bf16.mxu0 %v21310_v62  ;;  %v21374_v36 = vld [vmem:[#allocation21 + $0x100] ss:$16 sps:$4 sm:$0xff]   ;;  %v21377_v62 = vld [vmem:[#allocation21 + $0x108] ss:$16 sps:$4 sm:$0xff]  }
 0xef6   :  { %14052 = vmatprep.subr.bf16.mxu1 %v21313_v48  ;;  %v21382_v48 = vld [vmem:[#allocation21 + $0x124] ss:$16 sps:$4 sm:$0xff]  }
 0xef8   :  { %13967 = vmatpush1.bf16.msra.mxu0 %v21308_v10  ;;  %v21385_v10 = vld [vmem:[#allocation21 + $0x12c] ss:$16 sps:$4 sm:$0xff]  }
 0xef9   :  { %14053 = vmatpush1.bf16.msra.mxu1 %v21311_v14  ;;  %13968 = vmatprep.subr.bf16.mxu0 %v21316_v53  ;;  %v21380_v14 = vld [vmem:[#allocation21 + $0x120] ss:$16 sps:$4 sm:$0xff]   ;;  %v21383_v53 = vld [vmem:[#allocation21 + $0x128] ss:$16 sps:$4 sm:$0xff]  }
 0xefa   :  { %14054 = vmatprep.subr.bf16.mxu1 %v21319_v18  ;;  %v21388_v18 = vld [vmem:[#allocation21 + $0x144] ss:$16 sps:$4 sm:$0xff]  }
 0xefc   :  { %13969 = vmatpush1.bf16.msra.mxu0 %v21314_v33  ;;  %v21391_v33 = vld [vmem:[#allocation21 + $0x14c] ss:$16 sps:$4 sm:$0xff]  }
 0xefd   :  { %14055 = vmatpush1.bf16.msra.mxu1 %v21317_v45  ;;  %13970 = vmatprep.subr.bf16.mxu0 %v21322_v44  ;;  %v21386_v45 = vld [vmem:[#allocation21 + $0x140] ss:$16 sps:$4 sm:$0xff]   ;;  %v21389_v44 = vld [vmem:[#allocation21 + $0x148] ss:$16 sps:$4 sm:$0xff]  }
 0xefe   :  { %14056 = vmatprep.subr.bf16.mxu1 %v21325_v47  ;;  %v21394_v47 = vld [vmem:[#allocation21 + $0x164] ss:$16 sps:$4 sm:$0xff]  }
 0xf00   :  { %13971 = vmatpush1.bf16.msra.mxu0 %v21320_v22  ;;  %v21397_v22 = vld [vmem:[#allocation21 + $0x16c] ss:$16 sps:$4 sm:$0xff]  }
 0xf01   :  { %14057 = vmatpush1.bf16.msra.mxu1 %v21323_v37  ;;  %14950 = vmatprep.subr.bf16.mxu0 %v21328_v17  ;;  %v11971_v37 = vld [vmem:[%s23636_s12] sm:$0xf] }
 0xf02   :  { %15036 = vmatprep.subr.bf16.mxu1 %v21331_v59  ;;  %v21392_v17 = vld [vmem:[#allocation21 + $0x160] ss:$16 sps:$4 sm:$0xff]   ;;  %v21395_v59 = vld [vmem:[#allocation21 + $0x168] ss:$16 sps:$4 sm:$0xff]  }
 0xf03   :  { %13973 = vmatmul.mubr.bf16.vlgmr.msra.gmra.mrb[48].mxu0 %v23429_v11 }
 0xf04   :  { %14059 = vmatmul.mubr.bf16.vlgmr.msra.gmra.mrb[48].mxu1 %v23429_v11  ;;  %14951 = vmatpush1.bf16.msra.mxu0 %v21326_v31  ;;  %v21347_v11 = vld [vmem:[#allocation21 + $0x68] ss:$16 sps:$4 sm:$0xff]   ;;  %v11984_v31 = vrot.slane %v11971_v37, %v22686_v27 }
 0xf05   :  { %15037 = vmatpush1.bf16.msra.mxu1 %v21329_v21  ;;  %14952 = vmatprep.subr.bf16.mxu0 %v21334_v20 }
 0xf06   :  { %15038 = vmatprep.subr.bf16.mxu1 %v21337_v4  ;;  %v18737_v21 = vadd.f32 %v23406_v54, %v11984_v31  ;;  %v18739_v4 = vadd.f32 %v23414_v23, %v11984_v31  ;;  %v21401_v54 = vld [vmem:[#allocation21 + $0x188] ss:$16 sps:$4 sm:$0xff]   ;;  %v21406_v23 = vld [vmem:[#allocation21 + $0x1a4] ss:$16 sps:$4 sm:$0xff]  }
 0xf08   :  { %14953 = vmatpush1.bf16.msra.mxu0 %v21332_v13  ;;  %v12807_v20 = vmax.f32 %v18737_v21, 0.0 }
 0xf09   :  { %15039 = vmatpush1.bf16.msra.mxu1 %v21335_v34  ;;  %14954 = vmatprep.subr.bf16.mxu0 %v21340_v51 }
 0xf0a   :  { %15040 = vmatprep.subr.bf16.mxu1 %v21343_v56  ;;  %v12811_v56 = vmax.f32 %v18739_v4, 0.0 }
 0xf0c   :  { %14955 = vmatpush1.bf16.msra.mxu0 %v21338_v12 }
 0xf0d   :  { %15041 = vmatpush1.bf16.msra.mxu1 %v21341_v40  ;;  %14956 = vmatprep.subr.bf16.mxu0 %v21346_v46  ;;  %v21400_v46 = vld [vmem:[#allocation21 + $0x184] ss:$16 sps:$4 sm:$0xff]  }
 0xf0e   :  { %15042 = vmatprep.subr.bf16.mxu1 %v21349_v41  ;;  %v21403_v41 = vld [vmem:[#allocation21 + $0x18c] ss:$16 sps:$4 sm:$0xff]  }
 0xf10   :  { %14957 = vmatpush1.bf16.msra.mxu0 %v21344_v57  ;;  %v21398_v57 = vld [vmem:[#allocation21 + $0x180] ss:$16 sps:$4 sm:$0xff]  }
 0xf11   :  { %15043 = vmatpush1.bf16.msra.mxu1 %v21347_v11  ;;  %14958 = vmatprep.subr.bf16.mxu0 %v21352_v63  ;;  %v21409_v11 = vld [vmem:[#allocation21 + $0x1ac] ss:$16 sps:$4 sm:$0xff]   ;;  %v21404_v63 = vld [vmem:[#allocation21 + $0x1a0] ss:$16 sps:$4 sm:$0xff]  }
 0xf12   :  { %15044 = vmatprep.subr.bf16.mxu1 %v21355_v2  ;;  %v21407_v2 = vld [vmem:[#allocation21 + $0x1a8] ss:$16 sps:$4 sm:$0xff]  }
 0xf14   :  { %14959 = vmatpush1.bf16.msra.mxu0 %v21350_v19  ;;  %v21412_v19 = vld [vmem:[#allocation21 + $0x1c4] ss:$16 sps:$4 sm:$0xff]  }
 0xf15   :  { %15045 = vmatpush1.bf16.msra.mxu1 %v21353_v30  ;;  %14960 = vmatprep.subr.bf16.mxu0 %v21358_v52  ;;  %v21415_v30 = vld [vmem:[#allocation21 + $0x1cc] ss:$16 sps:$4 sm:$0xff]   ;;  %v21410_v52 = vld [vmem:[#allocation21 + $0x1c0] ss:$16 sps:$4 sm:$0xff]  }
 0xf16   :  { %15046 = vmatprep.subr.bf16.mxu1 %v21361_v39  ;;  %v21413_v39 = vld [vmem:[#allocation21 + $0x1c8] ss:$16 sps:$4 sm:$0xff]  }
 0xf18   :  { %14961 = vmatpush1.bf16.msra.mxu0 %v21356_v5  ;;  %v21416_v5 = vld [vmem:[#allocation21 + $0x1e0] ss:$16 sps:$4 sm:$0xff]  }
 0xf19   :  { %15047 = vmatpush1.bf16.msra.mxu1 %v21359_v7  ;;  %14962 = vmatprep.subr.bf16.mxu0 %v21364_v32  ;;  %v21418_v7 = vld [vmem:[#allocation21 + $0x1e4] ss:$16 sps:$4 sm:$0xff]   ;;  %v21419_v32 = vld [vmem:[#allocation21 + $0x1e8] ss:$16 sps:$4 sm:$0xff]  }
 0xf1a   :  { %15048 = vmatprep.subr.bf16.mxu1 %v21367_v61  ;;  %v21421_v61 = vld [vmem:[#allocation21 + $0x1ec] ss:$16 sps:$4 sm:$0xff]  }
 0xf1c   :  { %14963 = vmatpush1.bf16.msra.mxu0 %v21362_v1  ;;  %v21424_v1 = vld [vmem:[#allocation21 + $0x204] ss:$16 sps:$4 sm:$0xff]  }
 0xf1d   :  { %15049 = vmatpush1.bf16.msra.mxu1 %v21365_v49  ;;  %14964 = vmatprep.subr.bf16.mxu0 %v21370_v15  ;;  %v21427_v49 = vld [vmem:[#allocation21 + $0x20c] ss:$16 sps:$4 sm:$0xff]   ;;  %v11976_v15 = vrot.slane %v11971_v37, %v22680_v25 }
 0xf1e   :  { %15050 = vmatprep.subr.bf16.mxu1 %v21373_v29  ;;  %v11980_v29 = vrot.slane %v11971_v37, %v22683_v26 }
 0xf20   :  { %14965 = vmatpush1.bf16.msra.mxu0 %v21368_v60  ;;  %v11988_v60 = vrot.slane %v11971_v37, %v22689_v28 }
 0xf21   :  { %15051 = vmatpush1.bf16.msra.mxu1 %v21371_v38  ;;  %14966 = vmatprep.subr.bf16.mxu0 %v21376_v42  ;;  %v13235_v38 = vld [vmem:[%s23637_s23] sm:$0xf]  ;;  %v18733_v42 = vadd.f32 %v23404_v8, %v11976_v15 }
 0xf22   :  { %15052 = vmatprep.subr.bf16.mxu1 %v21379_v35  ;;  %v18734_v35 = vadd.f32 %v23408_v0, %v11980_v29  ;;  %v13252_v8 = vrot.slane %v13235_v38, %v22689_v28 }
 0xf24   :  { %14967 = vmatpush1.bf16.msra.mxu0 %v21374_v36  ;;  %v18738_v36 = vadd.f32 %v23410_v50, %v11988_v60 }
 0xf25   :  { %15053 = vmatpush1.bf16.msra.mxu1 %v21377_v62  ;;  %14968 = vmatprep.subr.bf16.mxu0 %v21382_v48  ;;  %v18735_v62 = vadd.f32 %v23412_v24, %v11976_v15  ;;  %v18736_v48 = vadd.f32 %v23416_v9, %v11980_v29 }
 0xf26   :  { %15054 = vmatprep.subr.bf16.mxu1 %v21385_v10  ;;  %v18740_v10 = vadd.f32 %v23418_v43, %v11988_v60 }
 0xf27   :  { %v12809_v0 = vmax.f32 %v18735_v62, 0.0 }
 0xf28   :  { %14969 = vmatpush1.bf16.msra.mxu0 %v21380_v14  ;;  %v13240_v14 = vrot.slane %v13235_v38, %v22680_v25  ;;  %v12812_v50 = vmax.f32 %v18740_v10, 0.0 }
 0xf29   :  { %15055 = vmatpush1.bf16.msra.mxu1 %v21383_v53  ;;  %14970 = vmatprep.subr.bf16.mxu0 %v21388_v18  ;;  %v13248_v53 = vrot.slane %v13235_v38, %v22686_v27  ;;  %v13244_v18 = vrot.slane %v13235_v38, %v22683_v26 }
 0xf2a   :  { %15056 = vmatprep.subr.bf16.mxu1 %v21391_v33  ;;  %v12805_v33 = vmax.f32 %v18733_v42, 0.0 }
 0xf2c   :  { %14971 = vmatpush1.bf16.msra.mxu0 %v21386_v45  ;;  %v12806_v45 = vmax.f32 %v18734_v35, 0.0 }
 0xf2d   :  { %15057 = vmatpush1.bf16.msra.mxu1 %v21389_v44  ;;  %14972 = vmatprep.subr.bf16.mxu0 %v21394_v47  ;;  %v12808_v44 = vmax.f32 %v18738_v36, 0.0  ;;  %v12810_v47 = vmax.f32 %v18736_v48, 0.0 }
 0xf2e   :  { %15058 = vmatprep.subr.bf16.mxu1 %v21397_v22 }
 0xf30   :  { %14973 = vmatpush1.bf16.msra.mxu0 %v21392_v17 }
 0xf31   :  { %15059 = vmatpush1.bf16.msra.mxu1 %v21395_v59  ;;  %14974 = vmatprep.subr.bf16.mxu0 %v21400_v46 }
 0xf32   :  { %15060 = vmatprep.subr.bf16.mxu1 %v21403_v41 }
 0xf34   :  { %14975 = vmatpush1.bf16.msra.mxu0 %v21398_v57 }
 0xf35   :  { %15061 = vmatpush1.bf16.msra.mxu1 %v21401_v54  ;;  %14976 = vmatprep.subr.bf16.mxu0 %v21406_v23 }
 0xf36   :  { %15062 = vmatprep.subr.bf16.mxu1 %v21409_v11 }
 0xf37   :  { %v23438_v13 = vpop.permute.xlu1 %14078  ;;  %v23440_v34 = vpop.permute.xlu0 %12815 }
 0xf38   :  { %v23443_v51 = vmul.f32 %v23440_v34, %v12807_v20  ;;  %14977 = vmatpush1.bf16.msra.mxu0 %v21404_v63  ;;  %v12823_v24 = vmul.f32 %v23440_v34, %v12805_v33  ;;  %v12824_v9 = vmul.f32 %v23440_v34, %v12806_v45  ;;  %v12826_v43 = vmul.f32 %v23440_v34, %v12808_v44 }
 0xf39   :  { %15063 = vmatpush1.bf16.msra.mxu1 %v21407_v2  ;;  %14978 = vmatprep.subr.bf16.mxu0 %v21412_v19 }
 0xf3a   :  { %15064 = vmatprep.subr.bf16.mxu1 %v21415_v30 }
 0xf3c   :  { %v23445_v12 = vpop.permute.xlu1 %12820  ;;  %14979 = vmatpush1.bf16.msra.mxu0 %v21410_v52 }
 0xf3d   :  { %v23448_v40 = vmul.f32 %v23445_v12, %v12811_v56  ;;  %15065 = vmatpush1.bf16.msra.mxu1 %v21413_v39  ;;  %14980 = vmatprep.subr.bf16.mxu0 %v21418_v7  ;;  %v12827_v31 = vmul.f32 %v23445_v12, %v12809_v0  ;;  %v12828_v21 = vmul.f32 %v23445_v12, %v12810_v47 }
 0xf3e   :  { %15066 = vmatprep.subr.bf16.mxu1 %v21421_v61  ;;  %v12830_v41 = vmul.f32 %v23445_v12, %v12812_v50 }
 0xf40   :  { %14981 = vmatpush1.bf16.msra.mxu0 %v21416_v5 }
 0xf41   :  { %15067 = vmatpush1.bf16.msra.mxu1 %v21419_v32  ;;  %14993 = vmatprep.subr.bf16.mxu0 %v21424_v1  ;;  %v14083_v61 = vpop.permute.xlu1 %14082 }
 0xf42   :  { %15079 = vmatprep.subr.bf16.mxu1 %v21427_v49 }
 0xfd6   :  { %v13974_v22 = vpop.f32.mrb[48].mxu0 }
 0xfd7   :  { %v18741_v37 = vadd.f32 %v13974_v22, %v13240_v14  ;;  %v14060_v17 = vpop.f32.mrb[48].mxu1  ;;  %v13976_v59 = vpop.f32.mrb[49].mxu0 }
 0xfd8   :  { %v18745_v20 = vadd.f32 %v14060_v17, %v13248_v53  ;;  %v18742_v4 = vadd.f32 %v13976_v59, %v13244_v18  ;;  %v14062_v56 = vpop.f32.mrb[49].mxu1  ;;  %v13978_v46 = vpop.f32.mrb[50].mxu0 }
 0xfd9   :  { %v14069_v57 = vmax.f32 %v18741_v37, 0.0  ;;  %v18746_v54 = vadd.f32 %v14062_v56, %v13252_v8  ;;  %v18743_v23 = vadd.f32 %v13978_v46, %v13240_v14  ;;  %v14064_v11 = vpop.f32.mrb[50].mxu1  ;;  %v13980_v63 = vpop.f32.mrb[51].mxu0 }
 0xfda   :  { %v14071_v2 = vmax.f32 %v18745_v20, 0.0  ;;  %v14070_v34 = vmax.f32 %v18742_v4, 0.0  ;;  %v18747_v19 = vadd.f32 %v14064_v11, %v13248_v53  ;;  %v18744_v30 = vadd.f32 %v13980_v63, %v13244_v18  ;;  %v14066_v52 = vpop.f32.mrb[51].mxu1 }
 0xfdb   :  { %v14085_v39 = vmul.f32 %v23438_v13, %v14069_v57  ;;  %v14072_v5 = vmax.f32 %v18746_v54, 0.0  ;;  %v14073_v7 = vmax.f32 %v18743_v23, 0.0  ;;  %v18748_v32 = vadd.f32 %v14066_v52, %v13252_v8 }
 0xfdc   :  { %v14087_v1 = vmul.f32 %v23438_v13, %v14071_v2  ;;  %v14086_v12 = vmul.f32 %v23438_v13, %v14070_v34  ;;  %v14075_v49 = vmax.f32 %v18747_v19, 0.0  ;;  %v14074_v15 = vmax.f32 %v18744_v30, 0.0 }
 0xfdd   :  { %v14093_v29 = vadd.f32 %v14085_v39, %v12823_v24  ;;  %v14088_v60 = vmul.f32 %v23438_v13, %v14072_v5  ;;  %v14089_v38 = vmul.f32 %v14083_v61, %v14073_v7  ;;  %v14076_v42 = vmax.f32 %v18748_v32, 0.0 }
 0xfde   :  { %v14095_v35 = vadd.f32 %v14087_v1, %v23443_v51  ;;  %v14094_v36 = vadd.f32 %v14086_v12, %v12824_v9  ;;  %v14091_v62 = vmul.f32 %v14083_v61, %v14075_v49  ;;  %v14090_v48 = vmul.f32 %v14083_v61, %v14074_v15 }
 0xfdf   :  { %v14117_v10 = vrot.slane %v14093_v29, 7  ;;  %v14141_v14 = vrot.slane %v14093_v29, 5  ;;  %v14157_v53 = vrot.slane %v14093_v29, 1  ;;  %v14096_v18 = vadd.f32 %v14088_v60, %v12826_v43 }
 0xfe0   :  { %v14119_v33 = vrot.slane %v14095_v35, 7  ;;  %v14147_v45 = vrot.slane %v14095_v35, 5  ;;  %v14159_v44 = vrot.slane %v14095_v35, 1  ;;  %v14118_v8 = vrot.slane %v14094_v36, 7 }
 0xfe1   :  { %v14144_v0 = vrot.slane %v14094_v36, 5  ;;  %v14120_v47 = vrot.slane %v14096_v18, 7  ;;  %v14150_v50 = vrot.slane %v14096_v18, 5  ;;  %v14097_v22 = vadd.f32 %v14089_v38, %v12827_v31  ;;  %v21422_v38 = vld [vmem:[#allocation21 + $0x200] ss:$16 sps:$4 sm:$0xff]  }
 0xfe2   :  { %v14099_v13 = vadd.f32 %v14091_v62, %v23448_v40  ;;  %v14098_v24 = vadd.f32 %v14090_v48, %v12828_v21  ;;  %v14092_v37 = vmul.f32 %v14083_v61, %v14076_v42  ;;  %v14158_v51 = vrot.slane %v14094_v36, 1  ;;  %v21425_v42 = vld [vmem:[#allocation21 + $0x208] ss:$16 sps:$4 sm:$0xff]  }
 0xfe3   :  { %v14105_v9 = vrot.slane %v14097_v22, 3  ;;  %v14121_v17 = vrot.slane %v14097_v22, 7  ;;  %v14142_v59 = vrot.slane %v14097_v22, 5  ;;  %v14160_v20 = vrot.slane %v14096_v18, 1  ;;  %v21430_v18 = vld [vmem:[#allocation21 + $0x224] ss:$16 sps:$4 sm:$0xff]  }
 0xfe4   :  { %v14107_v4 = vrot.slane %v14099_v13, 3  ;;  %v14125_v56 = vrot.slane %v14099_v13, 7  ;;  %v14148_v43 = vrot.slane %v14099_v13, 5  ;;  %v14106_v46 = vrot.slane %v14098_v24, 3  ;;  %v21437_v22 = vld [vmem:[#allocation21 + $0x248] ss:$16 sps:$4 sm:$0xff]  }
 0xfe5   :  { %v14123_v57 = vrot.slane %v14098_v24, 7  ;;  %v14145_v54 = vrot.slane %v14098_v24, 5  ;;  %v14100_v23 = vadd.f32 %v14092_v37, %v12830_v41  ;;  %v14122_v11 = vsel %vm1740_vm14, %v14117_v10, %v14121_v17  ;;  %v21445_v13 = vld [vmem:[#allocation21 + $0x26c] ss:$16 sps:$4 sm:$0xff]   ;;  %v21440_v24 = vld [vmem:[#allocation21 + $0x260] ss:$16 sps:$4 sm:$0xff]  }
 0xfe6   :  { %v14138_v31 = vsel %vm1740_vm14, %v14106_v46, %v14118_v8  ;;  %v14137_v40 = vsel %vm1740_vm14, %v14105_v9, %v14117_v10  ;;  %v14143_v21 = vsel %vm1735_vm13, %v14141_v14, %v14142_v59  ;;  %v14173_v63 = vsel %vm23638_vm10, %v14157_v53, %v14122_v11  ;;  %v21443_v37 = vld [vmem:[#allocation21 + $0x268] ss:$16 sps:$4 sm:$0xff]   ;;  %v21451_v9 = vld [vmem:[#allocation21 + $0x28c] ss:$16 sps:$4 sm:$0xff]   ;;  %v21446_v17 = vld [vmem:[#allocation21 + $0x280] ss:$16 sps:$4 sm:$0xff]  }
 0xfe7   :  { %v14108_v2 = vrot.slane %v14100_v23, 3  ;;  %v14127_v34 = vrot.slane %v14100_v23, 7  ;;  %v14151_v19 = vrot.slane %v14100_v23, 5  ;;  %v14124_v30 = vsel %vm1740_vm14, %v14118_v8, %v14123_v57  ;;  %v21433_v8 = vld [vmem:[#allocation21 + $0x22c] ss:$16 sps:$4 sm:$0xff]  }
 0xfe8   :  { %v14146_v52 = vsel %vm1735_vm13, %v14144_v0, %v14145_v54  ;;  %v14174_v41 = vsel %vm23639_vm1, %v14158_v51, %v14124_v30  ;;  %v14165_v39 = vsel %vm1706_vm12, %v14143_v21, %v14157_v53  ;;  %v14126_v5 = vsel %vm1740_vm14, %v14119_v33, %v14125_v56  ;;  %v21449_v59 = vld [vmem:[#allocation21 + $0x288] ss:$16 sps:$4 sm:$0xff]   ;;  %v21452_v56 = vld [vmem:[#allocation21 + $0x2a0] ss:$16 sps:$4 sm:$0xff]   ;;  %v21460_v46 = vld [vmem:[#allocation21 + $0x2c4] ss:$16 sps:$4 sm:$0xff]  }
 0xfe9   :  { %v14166_v7 = vsel %vm1706_vm12, %v14146_v52, %v14158_v51  ;;  %v14169_v32 = vsel %vm23640_vm15, %v14165_v39, %v14137_v40  ;;  %v14128_v61 = vsel %vm1740_vm14, %v14120_v47, %v14127_v34  ;;  %v14140_v1 = vsel %vm1740_vm14, %v14108_v2, %v14120_v47  ;;  %v21431_v47 = vld [vmem:[#allocation21 + $0x228] ss:$16 sps:$4 sm:$0xff]   ;;  %v21448_v51 = vld [vmem:[#allocation21 + $0x284] ss:$16 sps:$4 sm:$0xff]   ;;  %v21463_v57 = vld [vmem:[#allocation21 + $0x2cc] ss:$16 sps:$4 sm:$0xff]  }
 0xfea   :  { %v14170_v12 = vsel %vm23641_vm2, %v14166_v7, %v14138_v31  ;;  %v14178_v49 = vpack.c.bf16 %v14173_v63, %v14169_v32  ;;  %v14152_v15 = vsel %vm1735_vm13, %v14150_v50, %v14151_v19  ;;  %v14176_v29 = vsel %vm23642_vm4, %v14160_v20, %v14128_v61  ;;  %v21434_v50 = vld [vmem:[#allocation21 + $0x240] ss:$16 sps:$4 sm:$0xff]   ;;  %v21461_v23 = vld [vmem:[#allocation21 + $0x2c8] ss:$16 sps:$4 sm:$0xff]   ;;  %v21466_v11 = vld [vmem:[#allocation21 + $0x2e4] ss:$16 sps:$4 sm:$0xff]  }
 0xfeb   :  { %v14179_v60 = vpack.c.bf16 %v14174_v41, %v14170_v12  ;;  %v14168_v35 = vsel %vm1706_vm12, %v14152_v15, %v14160_v20  ;;  %v14139_v36 = vsel %vm1740_vm14, %v14107_v4, %v14119_v33  ;;  %v14149_v62 = vsel %vm1735_vm13, %v14147_v45, %v14148_v43  ;;  %v21428_v45 = vld [vmem:[#allocation21 + $0x220] ss:$16 sps:$4 sm:$0xff]   ;;  %v21454_v20 = vld [vmem:[#allocation21 + $0x2a4] ss:$16 sps:$4 sm:$0xff]   ;;  %v21457_v4 = vld [vmem:[#allocation21 + $0x2ac] ss:$16 sps:$4 sm:$0xff]  }
 0xfec   :  { %v14172_v48 = vsel %vm23643_vm5, %v14168_v35, %v14140_v1  ;;  %v14167_v10 = vsel %vm1706_vm12, %v14149_v62, %v14159_v44  ;;  %v14175_v14 = vsel %vm23644_vm6, %v14159_v44, %v14126_v5  ;;  %v21439_v44 = vld [vmem:[#allocation21 + $0x24c] ss:$16 sps:$4 sm:$0xff]   ;;  %v21455_v43 = vld [vmem:[#allocation21 + $0x2a8] ss:$16 sps:$4 sm:$0xff]   ;;  %v21458_v54 = vld [vmem:[#allocation21 + $0x2c0] ss:$16 sps:$4 sm:$0xff]  }
 0xfed   :  { %14982 = vmatprep.mubr.bf16.mxu0 %v14179_v60  ;;  %15068 = vmatprep.mubr.bf16.mxu1 %v14179_v60  ;;  %v14181_v53 = vpack.c.bf16 %v14176_v29, %v14172_v48  ;;  %v14171_v0 = vsel %vm23645_vm7, %v14167_v10, %v14139_v36  ;;  %v21469_v31 = vld [vmem:[#allocation21 + $0x2ec] ss:$16 sps:$4 sm:$0xff]   ;;  %v21464_v40 = vld [vmem:[#allocation21 + $0x2e0] ss:$16 sps:$4 sm:$0xff]   ;;  %v21467_v21 = vld [vmem:[#allocation21 + $0x2e8] ss:$16 sps:$4 sm:$0xff]  }
 0xfee   :  { %14983 = vmatmul.mubr.bf16.vlgmr.msra.gmra.mrb[52].mxu0 %v14178_v49  ;;  %15069 = vmatmul.mubr.bf16.vlgmr.msra.gmra.mrb[52].mxu1 %v14178_v49  ;;  %v23508_v33 = vpack.c.bf16 %v14175_v14, %v14171_v0  ;;  %v21472_v63 = vld [vmem:[#allocation21 + $0x304] ss:$16 sps:$4 sm:$0xff]   ;;  %v21475_v2 = vld [vmem:[#allocation21 + $0x30c] ss:$16 sps:$4 sm:$0xff]   ;;  %v21470_v34 = vld [vmem:[#allocation21 + $0x300] ss:$16 sps:$4 sm:$0xff]  }
 0xfef   :  { %14994 = vmatpush1.bf16.msra.mxu0 %v21422_v38  ;;  %15080 = vmatpush1.bf16.msra.mxu1 %v21425_v42  ;;  %v21473_v19 = vld [vmem:[#allocation21 + $0x308] ss:$16 sps:$4 sm:$0xff]   ;;  %v21478_v30 = vld [vmem:[#allocation21 + $0x324] ss:$16 sps:$4 sm:$0xff]   ;;  %v21481_v52 = vld [vmem:[#allocation21 + $0x32c] ss:$16 sps:$4 sm:$0xff]  }
 0xff0   :  { %15025 = vmatprep.mubr.bf16.mxu0 %v14181_v53  ;;  %15111 = vmatprep.mubr.bf16.mxu1 %v14181_v53  ;;  %v21476_v41 = vld [vmem:[#allocation21 + $0x320] ss:$16 sps:$4 sm:$0xff]   ;;  %v21479_v39 = vld [vmem:[#allocation21 + $0x328] ss:$16 sps:$4 sm:$0xff]   ;;  %v21484_v5 = vld [vmem:[#allocation21 + $0x344] ss:$16 sps:$4 sm:$0xff]  }
 0xff1   :  { %14995 = vmatprep.subr.bf16.mxu0 %v21430_v18  ;;  %15081 = vmatprep.subr.bf16.mxu1 %v21433_v8  ;;  %v21487_v7 = vld [vmem:[#allocation21 + $0x34c] ss:$16 sps:$4 sm:$0xff]   ;;  %v21482_v32 = vld [vmem:[#allocation21 + $0x340] ss:$16 sps:$4 sm:$0xff]   ;;  %v21485_v61 = vld [vmem:[#allocation21 + $0x348] ss:$16 sps:$4 sm:$0xff]  }
 0xff2   :  { %v21490_v1 = vld [vmem:[#allocation21 + $0x364] ss:$16 sps:$4 sm:$0xff]   ;;  %v21493_v12 = vld [vmem:[#allocation21 + $0x36c] ss:$16 sps:$4 sm:$0xff]   ;;  %v21488_v49 = vld [vmem:[#allocation21 + $0x360] ss:$16 sps:$4 sm:$0xff]  }
 0xff3   :  { %14996 = vmatpush1.bf16.msra.mxu0 %v21428_v45  ;;  %15082 = vmatpush1.bf16.msra.mxu1 %v21431_v47  ;;  %v21491_v15 = vld [vmem:[#allocation21 + $0x368] ss:$16 sps:$4 sm:$0xff]   ;;  %v21496_v29 = vld [vmem:[#allocation21 + $0x384] ss:$16 sps:$4 sm:$0xff]   ;;  %v21499_v60 = vld [vmem:[#allocation21 + $0x38c] ss:$16 sps:$4 sm:$0xff]  }
 0xff4   :  { %14997 = vmatprep.subr.bf16.mxu0 %v21436_v58  ;;  %15083 = vmatprep.subr.bf16.mxu1 %v21439_v44  ;;  %v21494_v38 = vld [vmem:[#allocation21 + $0x380] ss:$16 sps:$4 sm:$0xff]   ;;  %v21497_v42 = vld [vmem:[#allocation21 + $0x388] ss:$16 sps:$4 sm:$0xff]   ;;  %v21502_v35 = vld [vmem:[#allocation21 + $0x3a4] ss:$16 sps:$4 sm:$0xff]  }
 0xff5   :  { %v21505_v36 = vld [vmem:[#allocation21 + $0x3ac] ss:$16 sps:$4 sm:$0xff]   ;;  %v14177_v62 = vld [vmem:[%s23646_s27] sm:$0xff]  ;;  %v21503_v10 = vld [vmem:[#allocation21 + $0x3a8] ss:$16 sps:$4 sm:$0xff]  }
 0xff6   :  { %v21500_v48 = vld [vmem:[#allocation21 + $0x3a0] ss:$16 sps:$4 sm:$0xff]   ;;  %v21508_v14 = vld [vmem:[#allocation21 + $0x3c4] ss:$16 sps:$4 sm:$0xff]   ;;  %v21511_v53 = vld [vmem:[#allocation21 + $0x3cc] ss:$16 sps:$4 sm:$0xff]   ;;  %v15123_v18 = vcombine.high %v14177_v62, %v14177_v62  ;;  %v15130_v58 = vrot.slane %v14177_v62, %v22661_v6 }
 0xff7   :  { %14998 = vmatpush1.bf16.msra.mxu0 %v21434_v50  ;;  %15084 = vmatpush1.bf16.msra.mxu1 %v21437_v22  ;;  %v21506_v8 = vld [vmem:[#allocation21 + $0x3c0] ss:$16 sps:$4 sm:$0xff]   ;;  %v21509_v0 = vld [vmem:[#allocation21 + $0x3c8] ss:$16 sps:$4 sm:$0xff]   ;;  %v21514_v45 = vld [vmem:[#allocation21 + $0x3e4] ss:$16 sps:$4 sm:$0xff]  }
 0xff8   :  { %14999 = vmatprep.subr.bf16.mxu0 %v21442_v55  ;;  %15085 = vmatprep.subr.bf16.mxu1 %v21445_v13  ;;  %v21517_v47 = vld [vmem:[#allocation21 + $0x3ec] ss:$16 sps:$4 sm:$0xff]   ;;  %v15137_v44 = vrot.slane %v15123_v18, %v22661_v6  ;;  %v21512_v50 = vld [vmem:[#allocation21 + $0x3e0] ss:$16 sps:$4 sm:$0xff]   ;;  %v21515_v22 = vld [vmem:[#allocation21 + $0x3e8] ss:$16 sps:$4 sm:$0xff]   ;;  %v15138_v55 = vcombine.high %v15130_v58, %v15130_v58 }
 0xff9   :  { %v21524_v6 = vld [vmem:[#allocation22 + $0xc] ss:$16 sps:$4 sm:$0xff]   ;;  %v21579_v62 = vld [vmem:[#allocation22 + $0x140] ss:$16 sps:$4 sm:$0xff]   ;;  %v21588_v18 = vld [vmem:[#allocation22 + $0x168] ss:$16 sps:$4 sm:$0xff]  }
 0xffa   :  { %v15139_v13 = vcombine.high %v15137_v44, %v15137_v44 }
 0xffb   :  { %15000 = vmatpush1.bf16.msra.mxu0 %v21440_v24  ;;  %15086 = vmatpush1.bf16.msra.mxu1 %v21443_v37  ;;  %v15141_v24 = vsel %vm439_vm0, %v15130_v58, 0  ;;  %v15147_v37 = vsel %vm439_vm0, %v15137_v44, 0  ;;  %v21599_v58 = vld [vmem:[#allocation22 + $0x1a4] ss:$16 sps:$4 sm:$0xff]   ;;  %v21602_v44 = vld [vmem:[#allocation22 + $0x1ac] ss:$16 sps:$4 sm:$0xff]  }
 0xffc   :  { %15001 = vmatprep.subr.bf16.mxu0 %v21448_v51  ;;  %15087 = vmatprep.subr.bf16.mxu1 %v21451_v9  ;;  %v21521_v51 = vld [vmem:[#allocation22 + $0x4] ss:$16 sps:$4 sm:$0xff]   ;;  %v21519_v9 = vld [vmem:[#allocation22] ss:$16 sps:$4 sm:$0xff]  }
 0xfff   :  { %15002 = vmatpush1.bf16.msra.mxu0 %v21446_v17  ;;  %15088 = vmatpush1.bf16.msra.mxu1 %v21449_v59  ;;  %v21522_v17 = vld [vmem:[#allocation22 + $0x8] ss:$16 sps:$4 sm:$0xff]   ;;  %v21527_v59 = vld [vmem:[#allocation22 + $0x24] ss:$16 sps:$4 sm:$0xff]  }
0x1000   :  { %15003 = vmatprep.subr.bf16.mxu0 %v21454_v20  ;;  %15089 = vmatprep.subr.bf16.mxu1 %v21457_v4  ;;  %v21530_v20 = vld [vmem:[#allocation22 + $0x2c] ss:$16 sps:$4 sm:$0xff]   ;;  %v21528_v4 = vld [vmem:[#allocation22 + $0x28] ss:$16 sps:$4 sm:$0xff]  }
0x1003   :  { %15004 = vmatpush1.bf16.msra.mxu0 %v21452_v56  ;;  %15090 = vmatpush1.bf16.msra.mxu1 %v21455_v43  ;;  %v21533_v56 = vld [vmem:[#allocation22 + $0x44] ss:$16 sps:$4 sm:$0xff]   ;;  %v21531_v43 = vld [vmem:[#allocation22 + $0x40] ss:$16 sps:$4 sm:$0xff]  }
0x1004   :  { %15005 = vmatprep.subr.bf16.mxu0 %v21460_v46  ;;  %15091 = vmatprep.subr.bf16.mxu1 %v21463_v57  ;;  %v21534_v46 = vld [vmem:[#allocation22 + $0x48] ss:$16 sps:$4 sm:$0xff]   ;;  %v21539_v57 = vld [vmem:[#allocation22 + $0x64] ss:$16 sps:$4 sm:$0xff]  }
0x1007   :  { %15006 = vmatpush1.bf16.msra.mxu0 %v21458_v54  ;;  %15092 = vmatpush1.bf16.msra.mxu1 %v21461_v23  ;;  %v21542_v54 = vld [vmem:[#allocation22 + $0x6c] ss:$16 sps:$4 sm:$0xff]   ;;  %v21537_v23 = vld [vmem:[#allocation22 + $0x60] ss:$16 sps:$4 sm:$0xff]  }
0x1008   :  { %15007 = vmatprep.subr.bf16.mxu0 %v21466_v11  ;;  %15093 = vmatprep.subr.bf16.mxu1 %v21469_v31  ;;  %v21545_v11 = vld [vmem:[#allocation22 + $0x84] ss:$16 sps:$4 sm:$0xff]   ;;  %v21548_v31 = vld [vmem:[#allocation22 + $0x8c] ss:$16 sps:$4 sm:$0xff]  }
0x100b   :  { %15008 = vmatpush1.bf16.msra.mxu0 %v21464_v40  ;;  %15094 = vmatpush1.bf16.msra.mxu1 %v21467_v21  ;;  %v21543_v40 = vld [vmem:[#allocation22 + $0x80] ss:$16 sps:$4 sm:$0xff]   ;;  %v21546_v21 = vld [vmem:[#allocation22 + $0x88] ss:$16 sps:$4 sm:$0xff]  }
0x100c   :  { %15009 = vmatprep.subr.bf16.mxu0 %v21472_v63  ;;  %15095 = vmatprep.subr.bf16.mxu1 %v21475_v2  ;;  %v21551_v63 = vld [vmem:[#allocation22 + $0xa4] ss:$16 sps:$4 sm:$0xff]   ;;  %v21554_v2 = vld [vmem:[#allocation22 + $0xac] ss:$16 sps:$4 sm:$0xff]  }
0x100f   :  { %15010 = vmatpush1.bf16.msra.mxu0 %v21470_v34  ;;  %15096 = vmatpush1.bf16.msra.mxu1 %v21473_v19  ;;  %v21549_v34 = vld [vmem:[#allocation22 + $0xa0] ss:$16 sps:$4 sm:$0xff]   ;;  %v21552_v19 = vld [vmem:[#allocation22 + $0xa8] ss:$16 sps:$4 sm:$0xff]  }
0x1010   :  { %15011 = vmatprep.subr.bf16.mxu0 %v21478_v30  ;;  %15097 = vmatprep.subr.bf16.mxu1 %v21481_v52  ;;  %v21557_v30 = vld [vmem:[#allocation22 + $0xc4] ss:$16 sps:$4 sm:$0xff]   ;;  %v21560_v52 = vld [vmem:[#allocation22 + $0xcc] ss:$16 sps:$4 sm:$0xff]  }
0x1013   :  { %15012 = vmatpush1.bf16.msra.mxu0 %v21476_v41  ;;  %15098 = vmatpush1.bf16.msra.mxu1 %v21479_v39  ;;  %v21555_v41 = vld [vmem:[#allocation22 + $0xc0] ss:$16 sps:$4 sm:$0xff]   ;;  %v21558_v39 = vld [vmem:[#allocation22 + $0xc8] ss:$16 sps:$4 sm:$0xff]  }
0x1014   :  { %15013 = vmatprep.subr.bf16.mxu0 %v21484_v5  ;;  %15099 = vmatprep.subr.bf16.mxu1 %v21487_v7  ;;  %v21563_v5 = vld [vmem:[#allocation22 + $0xe4] ss:$16 sps:$4 sm:$0xff]   ;;  %v21566_v7 = vld [vmem:[#allocation22 + $0xec] ss:$16 sps:$4 sm:$0xff]  }
0x1017   :  { %15014 = vmatpush1.bf16.msra.mxu0 %v21482_v32  ;;  %15100 = vmatpush1.bf16.msra.mxu1 %v21485_v61  ;;  %v21561_v32 = vld [vmem:[#allocation22 + $0xe0] ss:$16 sps:$4 sm:$0xff]   ;;  %v21564_v61 = vld [vmem:[#allocation22 + $0xe8] ss:$16 sps:$4 sm:$0xff]  }
0x1018   :  { %15015 = vmatprep.subr.bf16.mxu0 %v21490_v1  ;;  %15101 = vmatprep.subr.bf16.mxu1 %v21493_v12  ;;  %v21569_v1 = vld [vmem:[#allocation22 + $0x104] ss:$16 sps:$4 sm:$0xff]   ;;  %v21572_v12 = vld [vmem:[#allocation22 + $0x10c] ss:$16 sps:$4 sm:$0xff]  }
0x101b   :  { %15016 = vmatpush1.bf16.msra.mxu0 %v21488_v49  ;;  %15102 = vmatpush1.bf16.msra.mxu1 %v21491_v15  ;;  %v21567_v49 = vld [vmem:[#allocation22 + $0x100] ss:$16 sps:$4 sm:$0xff]   ;;  %v21570_v15 = vld [vmem:[#allocation22 + $0x108] ss:$16 sps:$4 sm:$0xff]  }
0x101c   :  { %15017 = vmatprep.subr.bf16.mxu0 %v21496_v29  ;;  %15103 = vmatprep.subr.bf16.mxu1 %v21499_v60  ;;  %v21575_v29 = vld [vmem:[#allocation22 + $0x124] ss:$16 sps:$4 sm:$0xff]   ;;  %v21578_v60 = vld [vmem:[#allocation22 + $0x12c] ss:$16 sps:$4 sm:$0xff]  }
0x101f   :  { %15018 = vmatpush1.bf16.msra.mxu0 %v21494_v38  ;;  %15104 = vmatpush1.bf16.msra.mxu1 %v21497_v42  ;;  %v21573_v38 = vld [vmem:[#allocation22 + $0x120] ss:$16 sps:$4 sm:$0xff]   ;;  %v21576_v42 = vld [vmem:[#allocation22 + $0x128] ss:$16 sps:$4 sm:$0xff]  }
0x1020   :  { %15019 = vmatprep.subr.bf16.mxu0 %v21502_v35  ;;  %15105 = vmatprep.subr.bf16.mxu1 %v21505_v36  ;;  %v21581_v35 = vld [vmem:[#allocation22 + $0x144] ss:$16 sps:$4 sm:$0xff]   ;;  %v21584_v36 = vld [vmem:[#allocation22 + $0x14c] ss:$16 sps:$4 sm:$0xff]  }
0x1023   :  { %15020 = vmatpush1.bf16.msra.mxu0 %v21500_v48  ;;  %15106 = vmatpush1.bf16.msra.mxu1 %v21503_v10  ;;  %v21582_v48 = vld [vmem:[#allocation22 + $0x148] ss:$16 sps:$4 sm:$0xff]   ;;  %v21587_v10 = vld [vmem:[#allocation22 + $0x164] ss:$16 sps:$4 sm:$0xff]  }
0x1024   :  { %15021 = vmatprep.subr.bf16.mxu0 %v21508_v14  ;;  %15107 = vmatprep.subr.bf16.mxu1 %v21511_v53  ;;  %v21590_v14 = vld [vmem:[#allocation22 + $0x16c] ss:$16 sps:$4 sm:$0xff]   ;;  %v21585_v53 = vld [vmem:[#allocation22 + $0x160] ss:$16 sps:$4 sm:$0xff]  }
0x1027   :  { %15022 = vmatpush1.bf16.msra.mxu0 %v21506_v8  ;;  %15108 = vmatpush1.bf16.msra.mxu1 %v21509_v0  ;;  %v21593_v8 = vld [vmem:[#allocation22 + $0x184] ss:$16 sps:$4 sm:$0xff]   ;;  %v21596_v0 = vld [vmem:[#allocation22 + $0x18c] ss:$16 sps:$4 sm:$0xff]  }
0x1028   :  { %15023 = vmatprep.subr.bf16.mxu0 %v21514_v45  ;;  %15109 = vmatprep.subr.bf16.mxu1 %v21517_v47  ;;  %v21591_v45 = vld [vmem:[#allocation22 + $0x180] ss:$16 sps:$4 sm:$0xff]   ;;  %v21594_v47 = vld [vmem:[#allocation22 + $0x188] ss:$16 sps:$4 sm:$0xff]  }
0x102b   :  { %15024 = vmatpush1.bf16.msra.mxu0 %v21512_v50  ;;  %15110 = vmatpush1.bf16.msra.mxu1 %v21515_v22  ;;  %v21597_v50 = vld [vmem:[#allocation22 + $0x1a0] ss:$16 sps:$4 sm:$0xff]   ;;  %v21600_v22 = vld [vmem:[#allocation22 + $0x1a8] ss:$16 sps:$4 sm:$0xff]  }
0x102c   :  { %18440 = vmatprep.subr.msk.bf16.mxu0 %vm439_vm0, %v15138_v55  ;;  %18442 = vmatprep.subr.msk.bf16.mxu1 %vm439_vm0, %v15139_v13  ;;  %vm23647_vm0 = vmmov %vm23632_vm8  ;;  %v21605_v55 = vld [vmem:[#allocation22 + $0x1c4] ss:$16 sps:$4 sm:$0xff]   ;;  %v21608_v13 = vld [vmem:[#allocation22 + $0x1cc] ss:$16 sps:$4 sm:$0xff]  }
0x102d   :  { %vm23648_vm12 = vmmov %vm23647_vm0 }
0x102e   :  { %15026 = vmatmul.mubr.bf16.vlgmr.msra.gmra.mrb[52].mxu0 %v23508_v33  ;;  %15112 = vmatmul.mubr.bf16.vlgmr.msra.gmra.mrb[52].mxu1 %v23508_v33  ;;  %v21525_v33 = vld [vmem:[#allocation22 + $0x20] ss:$16 sps:$4 sm:$0xff]   ;;  %vm23651_vm13 = vmmov %vm23647_vm0 }
0x102f   :  { %15153 = vmatpush1.bf16.msra.mxu0 %v15141_v24  ;;  %15196 = vmatpush1.bf16.msra.mxu1 %v15147_v37  ;;  %v21603_v24 = vld [vmem:[#allocation22 + $0x1c0] ss:$16 sps:$4 sm:$0xff]   ;;  %v21606_v37 = vld [vmem:[#allocation22 + $0x1c8] ss:$16 sps:$4 sm:$0xff]  }
0x1030   :  { %15184 = vmatprep.mubr.bf16.mxu0 %v22296_v3  ;;  %15227 = vmatprep.mubr.bf16.mxu1 %v22296_v3  ;;  %v21536_v3 = vld [vmem:[#allocation22 + $0x4c] ss:$16 sps:$4 sm:$0xff]  }
0x1031   :  { %16070 = vmatprep.subr.bf16.mxu0 %v21521_v51  ;;  %16156 = vmatprep.subr.bf16.mxu1 %v21524_v6  ;;  %v21611_v51 = vld [vmem:[#allocation22 + $0x1e4] ss:$16 sps:$4 sm:$0xff]   ;;  %v21614_v6 = vld [vmem:[#allocation22 + $0x1ec] ss:$16 sps:$4 sm:$0xff]  }
0x103a   :  { %18441 = vmatmul.mubr.msk.bf16.vlgmr.msra.gmra.mrb[52].mxu0 %vm23647_vm0, %v22670_v16  ;;  %18443 = vmatmul.mubr.msk.bf16.vlgmr.msra.gmra.mrb[52].mxu1 %vm23648_vm12, %v22670_v16  ;;  %v21540_v16 = vld [vmem:[#allocation22 + $0x68] ss:$16 sps:$4 sm:$0xff]  }
0x103b   :  { %16071 = vmatpush1.bf16.msra.mxu0 %v21519_v9  ;;  %16157 = vmatpush1.bf16.msra.mxu1 %v21522_v17  ;;  %v21609_v9 = vld [vmem:[#allocation22 + $0x1e0] ss:$16 sps:$4 sm:$0xff]   ;;  %v21612_v17 = vld [vmem:[#allocation22 + $0x1e8] ss:$16 sps:$4 sm:$0xff]  }
0x103c   :  { %16072 = vmatprep.subr.bf16.mxu0 %v21527_v59  ;;  %16158 = vmatprep.subr.bf16.mxu1 %v21530_v20  ;;  %v21617_v59 = vld [vmem:[#allocation22 + $0x204] ss:$16 sps:$4 sm:$0xff]   ;;  %v21620_v20 = vld [vmem:[#allocation22 + $0x20c] ss:$16 sps:$4 sm:$0xff]  }
0x103f   :  { %16073 = vmatpush1.bf16.msra.mxu0 %v21525_v33  ;;  %16159 = vmatpush1.bf16.msra.mxu1 %v21528_v4  ;;  %v15238_v33 = vld [vmem:[%s23649_s26] sm:$0xf] }
0x1040   :  { %16074 = vmatprep.subr.bf16.mxu0 %v21533_v56  ;;  %16160 = vmatprep.subr.bf16.mxu1 %v21536_v3  ;;  %v15243_v4 = vrot.slane %v15238_v33, %v22680_v25  ;;  %v15251_v56 = vrot.slane %v15238_v33, %v22686_v27  ;;  %v15247_v3 = vrot.slane %v15238_v33, %v22683_v26 }
0x1043   :  { %16075 = vmatpush1.bf16.msra.mxu0 %v21531_v43  ;;  %16161 = vmatpush1.bf16.msra.mxu1 %v21534_v46  ;;  %v15255_v43 = vrot.slane %v15238_v33, %v22689_v28  ;;  %v21662_v33 = vld [vmem:[#allocation22 + $0x2ec] ss:$16 sps:$4 sm:$0xff]  }
0x1044   :  { %16076 = vmatprep.subr.bf16.mxu0 %v21539_v57  ;;  %16162 = vmatprep.subr.bf16.mxu1 %v21542_v54 }
0x1047   :  { %16077 = vmatpush1.bf16.msra.mxu0 %v21537_v23  ;;  %16163 = vmatpush1.bf16.msra.mxu1 %v21540_v16 }
0x1048   :  { %16078 = vmatprep.subr.bf16.mxu0 %v21545_v11  ;;  %16164 = vmatprep.subr.bf16.mxu1 %v21548_v31 }
0x104b   :  { %16079 = vmatpush1.bf16.msra.mxu0 %v21543_v40  ;;  %16165 = vmatpush1.bf16.msra.mxu1 %v21546_v21 }
0x104c   :  { %16080 = vmatprep.subr.bf16.mxu0 %v21551_v63  ;;  %16166 = vmatprep.subr.bf16.mxu1 %v21554_v2 }
0x104f   :  { %16081 = vmatpush1.bf16.msra.mxu0 %v21549_v34  ;;  %16167 = vmatpush1.bf16.msra.mxu1 %v21552_v19 }
0x1050   :  { %16082 = vmatprep.subr.bf16.mxu0 %v21557_v30  ;;  %16168 = vmatprep.subr.bf16.mxu1 %v21560_v52 }
0x1053   :  { %16083 = vmatpush1.bf16.msra.mxu0 %v21555_v41  ;;  %16169 = vmatpush1.bf16.msra.mxu1 %v21558_v39 }
0x1054   :  { %16084 = vmatprep.subr.bf16.mxu0 %v21563_v5  ;;  %16170 = vmatprep.subr.bf16.mxu1 %v21566_v7 }
0x1057   :  { %16085 = vmatpush1.bf16.msra.mxu0 %v21561_v32  ;;  %16171 = vmatpush1.bf16.msra.mxu1 %v21564_v61 }
0x1058   :  { %16086 = vmatprep.subr.bf16.mxu0 %v21569_v1  ;;  %16172 = vmatprep.subr.bf16.mxu1 %v21572_v12 }
0x105b   :  { %16087 = vmatpush1.bf16.msra.mxu0 %v21567_v49  ;;  %16173 = vmatpush1.bf16.msra.mxu1 %v21570_v15 }
0x105c   :  { %16088 = vmatprep.subr.bf16.mxu0 %v21575_v29  ;;  %16174 = vmatprep.subr.bf16.mxu1 %v21578_v60 }
0x105f   :  { %16089 = vmatpush1.bf16.msra.mxu0 %v21573_v38  ;;  %16175 = vmatpush1.bf16.msra.mxu1 %v21576_v42  ;;  %v21615_v42 = vld [vmem:[#allocation22 + $0x200] ss:$16 sps:$4 sm:$0xff]  }
0x1060   :  { %16090 = vmatprep.subr.bf16.mxu0 %v21581_v35  ;;  %16176 = vmatprep.subr.bf16.mxu1 %v21584_v36  ;;  %v21618_v35 = vld [vmem:[#allocation22 + $0x208] ss:$16 sps:$4 sm:$0xff]   ;;  %v21623_v36 = vld [vmem:[#allocation22 + $0x224] ss:$16 sps:$4 sm:$0xff]  }
0x1063   :  { %16091 = vmatpush1.bf16.msra.mxu0 %v21579_v62  ;;  %16177 = vmatpush1.bf16.msra.mxu1 %v21582_v48  ;;  %v21626_v62 = vld [vmem:[#allocation22 + $0x22c] ss:$16 sps:$4 sm:$0xff]   ;;  %v21621_v48 = vld [vmem:[#allocation22 + $0x220] ss:$16 sps:$4 sm:$0xff]  }
0x1064   :  { %16092 = vmatprep.subr.bf16.mxu0 %v21587_v10  ;;  %16178 = vmatprep.subr.bf16.mxu1 %v21590_v14  ;;  %v21624_v10 = vld [vmem:[#allocation22 + $0x228] ss:$16 sps:$4 sm:$0xff]   ;;  %v21629_v14 = vld [vmem:[#allocation22 + $0x244] ss:$16 sps:$4 sm:$0xff]  }
0x1067   :  { %16093 = vmatpush1.bf16.msra.mxu0 %v21585_v53  ;;  %16179 = vmatpush1.bf16.msra.mxu1 %v21588_v18  ;;  %v21632_v53 = vld [vmem:[#allocation22 + $0x24c] ss:$16 sps:$4 sm:$0xff]   ;;  %v21627_v18 = vld [vmem:[#allocation22 + $0x240] ss:$16 sps:$4 sm:$0xff]  }
0x1068   :  { %16094 = vmatprep.subr.bf16.mxu0 %v21593_v8  ;;  %16180 = vmatprep.subr.bf16.mxu1 %v21596_v0  ;;  %v21630_v8 = vld [vmem:[#allocation22 + $0x248] ss:$16 sps:$4 sm:$0xff]   ;;  %v21635_v0 = vld [vmem:[#allocation22 + $0x264] ss:$16 sps:$4 sm:$0xff]  }
0x106b   :  { %16095 = vmatpush1.bf16.msra.mxu0 %v21591_v45  ;;  %16181 = vmatpush1.bf16.msra.mxu1 %v21594_v47  ;;  %v21638_v45 = vld [vmem:[#allocation22 + $0x26c] ss:$16 sps:$4 sm:$0xff]   ;;  %v21633_v47 = vld [vmem:[#allocation22 + $0x260] ss:$16 sps:$4 sm:$0xff]  }
0x106c   :  { %16096 = vmatprep.subr.bf16.mxu0 %v21599_v58  ;;  %16182 = vmatprep.subr.bf16.mxu1 %v21602_v44  ;;  %v21636_v58 = vld [vmem:[#allocation22 + $0x268] ss:$16 sps:$4 sm:$0xff]   ;;  %v21641_v44 = vld [vmem:[#allocation22 + $0x284] ss:$16 sps:$4 sm:$0xff]  }
0x106f   :  { %16097 = vmatpush1.bf16.msra.mxu0 %v21597_v50  ;;  %16183 = vmatpush1.bf16.msra.mxu1 %v21600_v22  ;;  %v21644_v50 = vld [vmem:[#allocation22 + $0x28c] ss:$16 sps:$4 sm:$0xff]   ;;  %v21639_v22 = vld [vmem:[#allocation22 + $0x280] ss:$16 sps:$4 sm:$0xff]  }
0x1070   :  { %16098 = vmatprep.subr.bf16.mxu0 %v21605_v55  ;;  %16184 = vmatprep.subr.bf16.mxu1 %v21608_v13  ;;  %v21642_v55 = vld [vmem:[#allocation22 + $0x288] ss:$16 sps:$4 sm:$0xff]   ;;  %v21647_v13 = vld [vmem:[#allocation22 + $0x2a4] ss:$16 sps:$4 sm:$0xff]  }
0x1073   :  { %16099 = vmatpush1.bf16.msra.mxu0 %v21603_v24  ;;  %16185 = vmatpush1.bf16.msra.mxu1 %v21606_v37  ;;  %v21650_v24 = vld [vmem:[#allocation22 + $0x2ac] ss:$16 sps:$4 sm:$0xff]   ;;  %v21645_v37 = vld [vmem:[#allocation22 + $0x2a0] ss:$16 sps:$4 sm:$0xff]  }
0x1074   :  { %16100 = vmatprep.subr.bf16.mxu0 %v21611_v51  ;;  %16186 = vmatprep.subr.bf16.mxu1 %v21614_v6  ;;  %v21648_v51 = vld [vmem:[#allocation22 + $0x2a8] ss:$16 sps:$4 sm:$0xff]   ;;  %v21653_v6 = vld [vmem:[#allocation22 + $0x2c4] ss:$16 sps:$4 sm:$0xff]  }
0x1077   :  { %16101 = vmatpush1.bf16.msra.mxu0 %v21609_v9  ;;  %16187 = vmatpush1.bf16.msra.mxu1 %v21612_v17  ;;  %v21656_v9 = vld [vmem:[#allocation22 + $0x2cc] ss:$16 sps:$4 sm:$0xff]   ;;  %v21651_v17 = vld [vmem:[#allocation22 + $0x2c0] ss:$16 sps:$4 sm:$0xff]  }
0x1078   :  { %16113 = vmatprep.subr.bf16.mxu0 %v21617_v59  ;;  %16199 = vmatprep.subr.bf16.mxu1 %v21620_v20  ;;  %v21654_v59 = vld [vmem:[#allocation22 + $0x2c8] ss:$16 sps:$4 sm:$0xff]   ;;  %v21659_v20 = vld [vmem:[#allocation22 + $0x2e4] ss:$16 sps:$4 sm:$0xff]  }
0x110d   :  { %v15186_v46 = vpop.f32.mrb[52].mxu0  ;;  %v15229_v57 = vpop.f32.mrb[52].mxu1 }
0x110e   :  { %v15260_v54 = vadd.f32 %v15243_v4, %v15186_v46  ;;  %v15262_v23 = vadd.f32 %v15251_v56, %v15229_v57  ;;  %v15188_v16 = vpop.f32.mrb[53].mxu0  ;;  %v15231_v11 = vpop.f32.mrb[53].mxu1  ;;  %v21663_v46 = vld [vmem:[#allocation22 + $0x300] ss:$16 sps:$4 sm:$0xff]   ;;  %v21666_v57 = vld [vmem:[#allocation22 + $0x308] ss:$16 sps:$4 sm:$0xff]  }
0x110f   :  { %v15261_v31 = vadd.f32 %v15247_v3, %v15188_v16  ;;  %v15263_v40 = vadd.f32 %v15255_v43, %v15231_v11  ;;  %v15190_v21 = vpop.f32.mrb[54].mxu0  ;;  %v15233_v63 = vpop.f32.mrb[54].mxu1  ;;  %v21669_v16 = vld [vmem:[#allocation22 + $0x320] ss:$16 sps:$4 sm:$0xff]   ;;  %v21672_v11 = vld [vmem:[#allocation22 + $0x328] ss:$16 sps:$4 sm:$0xff]  }
0x1110   :  { %v15264_v2 = vadd.f32 %v15243_v4, %v15190_v21  ;;  %v15266_v34 = vadd.f32 %v15251_v56, %v15233_v63  ;;  %v15192_v19 = vpop.f32.mrb[55].mxu0  ;;  %v15235_v30 = vpop.f32.mrb[55].mxu1  ;;  %v15268_v39 = vmax.f32 %v15260_v54, 0.0  ;;  %v15270_v5 = vmax.f32 %v15262_v23, 0.0  ;;  %v21657_v4 = vld [vmem:[#allocation22 + $0x2e0] ss:$16 sps:$4 sm:$0xff]  }
0x1111   :  { %v15265_v52 = vadd.f32 %v15247_v3, %v15192_v19  ;;  %v15267_v41 = vadd.f32 %v15255_v43, %v15235_v30  ;;  %v15269_v61 = vmax.f32 %v15261_v31, 0.0  ;;  %v15271_v1 = vmax.f32 %v15263_v40, 0.0  ;;  %v21660_v56 = vld [vmem:[#allocation22 + $0x2e8] ss:$16 sps:$4 sm:$0xff]   ;;  %v21665_v3 = vld [vmem:[#allocation22 + $0x304] ss:$16 sps:$4 sm:$0xff]  }
0x1112   :  { %v15272_v7 = vmax.f32 %v15264_v2, 0.0  ;;  %v15274_v32 = vmax.f32 %v15266_v34, 0.0  ;;  %v21668_v43 = vld [vmem:[#allocation22 + $0x30c] ss:$16 sps:$4 sm:$0xff]   ;;  %v21671_v54 = vld [vmem:[#allocation22 + $0x324] ss:$16 sps:$4 sm:$0xff]  }
0x1113   :  { %v15273_v12 = vmax.f32 %v15265_v52, 0.0  ;;  %v15275_v49 = vmax.f32 %v15267_v41, 0.0  ;;  %v21674_v23 = vld [vmem:[#allocation22 + $0x32c] ss:$16 sps:$4 sm:$0xff]   ;;  %v21677_v31 = vld [vmem:[#allocation22 + $0x344] ss:$16 sps:$4 sm:$0xff]  }
0x1114   :  { %v15276_v15 = vpack.c.bf16 %v15272_v7, %v15268_v39  ;;  %v23530_v29 = vpack.c.bf16 %v15274_v32, %v15270_v5  ;;  %v21680_v40 = vld [vmem:[#allocation22 + $0x34c] ss:$16 sps:$4 sm:$0xff]   ;;  %v21675_v21 = vld [vmem:[#allocation22 + $0x340] ss:$16 sps:$4 sm:$0xff]   ;;  %v21678_v63 = vld [vmem:[#allocation22 + $0x348] ss:$16 sps:$4 sm:$0xff]  }
0x1115   :  { %v15277_v60 = vpack.c.bf16 %v15273_v12, %v15269_v61  ;;  %v15279_v38 = vpack.c.bf16 %v15275_v49, %v15271_v1  ;;  %v21683_v2 = vld [vmem:[#allocation22 + $0x364] ss:$16 sps:$4 sm:$0xff]   ;;  %v21686_v34 = vld [vmem:[#allocation22 + $0x36c] ss:$16 sps:$4 sm:$0xff]   ;;  %v21681_v19 = vld [vmem:[#allocation22 + $0x360] ss:$16 sps:$4 sm:$0xff]  }
0x1116   :  { %v21684_v30 = vld [vmem:[#allocation22 + $0x368] ss:$16 sps:$4 sm:$0xff]   ;;  %v21689_v52 = vld [vmem:[#allocation22 + $0x384] ss:$16 sps:$4 sm:$0xff]   ;;  %v21692_v41 = vld [vmem:[#allocation22 + $0x38c] ss:$16 sps:$4 sm:$0xff]  }
0x1117   :  { %16102 = vmatprep.mubr.bf16.mxu0 %v15277_v60  ;;  %16188 = vmatprep.mubr.bf16.mxu1 %v15277_v60  ;;  %v21687_v39 = vld [vmem:[#allocation22 + $0x380] ss:$16 sps:$4 sm:$0xff]   ;;  %v21690_v5 = vld [vmem:[#allocation22 + $0x388] ss:$16 sps:$4 sm:$0xff]   ;;  %v21695_v7 = vld [vmem:[#allocation22 + $0x3a4] ss:$16 sps:$4 sm:$0xff]  }
0x1118   :  { %16103 = vmatmul.mubr.bf16.vlgmr.msra.gmra.mrb[56].mxu0 %v15276_v15  ;;  %16189 = vmatmul.mubr.bf16.vlgmr.msra.gmra.mrb[56].mxu1 %v15276_v15  ;;  %v21698_v32 = vld [vmem:[#allocation22 + $0x3ac] ss:$16 sps:$4 sm:$0xff]   ;;  %v21693_v61 = vld [vmem:[#allocation22 + $0x3a0] ss:$16 sps:$4 sm:$0xff]   ;;  %v21696_v1 = vld [vmem:[#allocation22 + $0x3a8] ss:$16 sps:$4 sm:$0xff]  }
0x1119   :  { %16114 = vmatpush1.bf16.msra.mxu0 %v21615_v42  ;;  %16200 = vmatpush1.bf16.msra.mxu1 %v21618_v35  ;;  %v21701_v12 = vld [vmem:[#allocation22 + $0x3c4] ss:$16 sps:$4 sm:$0xff]   ;;  %v21704_v49 = vld [vmem:[#allocation22 + $0x3cc] ss:$16 sps:$4 sm:$0xff]   ;;  %v21699_v15 = vld [vmem:[#allocation22 + $0x3c0] ss:$16 sps:$4 sm:$0xff]  }
0x111a   :  { %16145 = vmatprep.mubr.bf16.mxu0 %v15279_v38  ;;  %16231 = vmatprep.mubr.bf16.mxu1 %v15279_v38  ;;  %v21702_v60 = vld [vmem:[#allocation22 + $0x3c8] ss:$16 sps:$4 sm:$0xff]   ;;  %v21707_v38 = vld [vmem:[#allocation22 + $0x3e4] ss:$16 sps:$4 sm:$0xff]   ;;  %v21710_v42 = vld [vmem:[#allocation22 + $0x3ec] ss:$16 sps:$4 sm:$0xff]  }
0x111b   :  { %16115 = vmatprep.subr.bf16.mxu0 %v21623_v36  ;;  %16201 = vmatprep.subr.bf16.mxu1 %v21626_v62  ;;  %v21705_v35 = vld [vmem:[#allocation22 + $0x3e0] ss:$16 sps:$4 sm:$0xff]   ;;  %v21708_v36 = vld [vmem:[#allocation22 + $0x3e8] ss:$16 sps:$4 sm:$0xff]  }
0x111c   :  { %v21711_v62 = vld [vmem:[%s22491_s5 + $0x40] sm:$0xff]  }
0x111d   :  { %16116 = vmatpush1.bf16.msra.mxu0 %v21621_v48  ;;  %16202 = vmatpush1.bf16.msra.mxu1 %v21624_v10  ;;  %v21712_v48 = vld [vmem:[%s22491_s5 + $0xc0] sm:$0xff]  }
0x111e   :  { %16117 = vmatprep.subr.bf16.mxu0 %v21629_v14  ;;  %16203 = vmatprep.subr.bf16.mxu1 %v21632_v53  ;;  %v21713_v10 = vld [vmem:[%s22491_s5] sm:$0xff]   ;;  %v21715_v53 = vld [vmem:[%s22491_s5 + $0x48] sm:$0xff]  }
0x111f   :  { %v21714_v14 = vld [vmem:[%s22491_s5 + $0x80] sm:$0xff]  }
0x1121   :  { %16118 = vmatpush1.bf16.msra.mxu0 %v21627_v18  ;;  %16204 = vmatpush1.bf16.msra.mxu1 %v21630_v8  ;;  %v21716_v18 = vld [vmem:[%s22491_s5 + $0xc8] sm:$0xff]  }
0x1122   :  { %16119 = vmatprep.subr.bf16.mxu0 %v21635_v0  ;;  %16205 = vmatprep.subr.bf16.mxu1 %v21638_v45  ;;  %v21717_v8 = vld [vmem:[%s22491_s5 + $0x8] sm:$0xff]   ;;  %v21719_v45 = vld [vmem:[%s22491_s5 + $0x50] sm:$0xff]  }
0x1123   :  { %v21718_v0 = vld [vmem:[%s22491_s5 + $0x88] sm:$0xff]  }
0x1125   :  { %16120 = vmatpush1.bf16.msra.mxu0 %v21633_v47  ;;  %16206 = vmatpush1.bf16.msra.mxu1 %v21636_v58  ;;  %v21720_v47 = vld [vmem:[%s22491_s5 + $0xd0] sm:$0xff]  }
0x1126   :  { %16121 = vmatprep.subr.bf16.mxu0 %v21641_v44  ;;  %16207 = vmatprep.subr.bf16.mxu1 %v21644_v50  ;;  %v21721_v58 = vld [vmem:[%s22491_s5 + $0x10] sm:$0xff]   ;;  %v21724_v50 = vld [vmem:[%s22491_s5 + $0xd8] sm:$0xff]  }
0x1127   :  { %v21722_v44 = vld [vmem:[%s22491_s5 + $0x90] sm:$0xff]  }
0x1129   :  { %16122 = vmatpush1.bf16.msra.mxu0 %v21639_v22  ;;  %16208 = vmatpush1.bf16.msra.mxu1 %v21642_v55  ;;  %v21725_v22 = vld [vmem:[%s22491_s5 + $0x18] sm:$0xff]  }
0x112a   :  { %16123 = vmatprep.subr.bf16.mxu0 %v21647_v13  ;;  %16209 = vmatprep.subr.bf16.mxu1 %v21650_v24  ;;  %v21726_v55 = vld [vmem:[%s22491_s5 + $0x98] sm:$0xff]   ;;  %v21727_v13 = vld [vmem:[%s22491_s5 + $0x60] sm:$0xff]  }
0x112b   :  { %v21728_v24 = vld [vmem:[%s22491_s5 + $0xe0] sm:$0xff]  }
0x112d   :  { %16124 = vmatpush1.bf16.msra.mxu0 %v21645_v37  ;;  %16210 = vmatpush1.bf16.msra.mxu1 %v21648_v51  ;;  %v21729_v37 = vld [vmem:[%s22491_s5 + $0x20] sm:$0xff]  }
0x112e   :  { %16125 = vmatprep.subr.bf16.mxu0 %v21653_v6  ;;  %16211 = vmatprep.subr.bf16.mxu1 %v21656_v9  ;;  %v21730_v51 = vld [vmem:[%s22491_s5 + $0xa0] sm:$0xff]   ;;  %v21731_v6 = vld [vmem:[%s22491_s5 + $0x68] sm:$0xff]  }
0x112f   :  { %v21732_v9 = vld [vmem:[%s22491_s5 + $0xe8] sm:$0xff]  }
0x1131   :  { %16126 = vmatpush1.bf16.msra.mxu0 %v21651_v17  ;;  %16212 = vmatpush1.bf16.msra.mxu1 %v21654_v59  ;;  %v21733_v17 = vld [vmem:[%s22491_s5 + $0x28] sm:$0xff]  }
0x1132   :  { %16127 = vmatprep.subr.bf16.mxu0 %v21659_v20  ;;  %16213 = vmatprep.subr.bf16.mxu1 %v21662_v33  ;;  %v21734_v59 = vld [vmem:[%s22491_s5 + $0xa8] sm:$0xff]   ;;  %v21735_v20 = vld [vmem:[%s22491_s5 + $0x70] sm:$0xff]  }
0x1133   :  { %v21736_v33 = vld [vmem:[%s22491_s5 + $0xf0] sm:$0xff]  }
0x1135   :  { %16128 = vmatpush1.bf16.msra.mxu0 %v21657_v4  ;;  %16214 = vmatpush1.bf16.msra.mxu1 %v21660_v56  ;;  %v21737_v4 = vld [vmem:[%s22491_s5 + $0x30] sm:$0xff]  }
0x1136   :  { %16129 = vmatprep.subr.bf16.mxu0 %v21665_v3  ;;  %16215 = vmatprep.subr.bf16.mxu1 %v21668_v43  ;;  %v21738_v56 = vld [vmem:[%s22491_s5 + $0xb0] sm:$0xff]   ;;  %v21739_v3 = vld [vmem:[%s22491_s5 + $0x78] sm:$0xff]  }
0x1137   :  { %v21740_v43 = vld [vmem:[%s22491_s5 + $0xf8] sm:$0xff]  }
0x1139   :  { %16130 = vmatpush1.bf16.msra.mxu0 %v21663_v46  ;;  %16216 = vmatpush1.bf16.msra.mxu1 %v21666_v57  ;;  %v21741_v46 = vld [vmem:[%s22491_s5 + $0x38] sm:$0xff]  }
0x113a   :  { %16131 = vmatprep.subr.bf16.mxu0 %v21671_v54  ;;  %16217 = vmatprep.subr.bf16.mxu1 %v21674_v23  ;;  %v21742_v57 = vld [vmem:[%s22491_s5 + $0xb8] sm:$0xff]   ;;  %v15408_v54 = vld [vmem:[%s23650_s28] sm:$0xf] }
0x113b   :  { %v15413_v23 = vrot.slane %v15408_v54, %v22680_v25 }
0x113d   :  { %16132 = vmatpush1.bf16.msra.mxu0 %v21669_v16  ;;  %16218 = vmatpush1.bf16.msra.mxu1 %v21672_v11  ;;  %v15421_v16 = vrot.slane %v15408_v54, %v22686_v27  ;;  %v15417_v11 = vrot.slane %v15408_v54, %v22683_v26 }
0x113e   :  { %16133 = vmatprep.subr.bf16.mxu0 %v21677_v31  ;;  %16219 = vmatprep.subr.bf16.mxu1 %v21680_v40  ;;  %v15425_v31 = vrot.slane %v15408_v54, %v22689_v28 }
0x1141   :  { %16134 = vmatpush1.bf16.msra.mxu0 %v21675_v21  ;;  %16220 = vmatpush1.bf16.msra.mxu1 %v21678_v63 }
0x1142   :  { %16135 = vmatprep.subr.bf16.mxu0 %v21683_v2  ;;  %16221 = vmatprep.subr.bf16.mxu1 %v21686_v34 }
0x1145   :  { %16136 = vmatpush1.bf16.msra.mxu0 %v21681_v19  ;;  %16222 = vmatpush1.bf16.msra.mxu1 %v21684_v30 }
0x1146   :  { %16137 = vmatprep.subr.bf16.mxu0 %v21689_v52  ;;  %16223 = vmatprep.subr.bf16.mxu1 %v21692_v41 }
0x1149   :  { %16138 = vmatpush1.bf16.msra.mxu0 %v21687_v39  ;;  %16224 = vmatpush1.bf16.msra.mxu1 %v21690_v5 }
0x114a   :  { %16139 = vmatprep.subr.bf16.mxu0 %v21695_v7  ;;  %16225 = vmatprep.subr.bf16.mxu1 %v21698_v32 }
0x114d   :  { %16140 = vmatpush1.bf16.msra.mxu0 %v21693_v61  ;;  %16226 = vmatpush1.bf16.msra.mxu1 %v21696_v1 }
0x114e   :  { %16141 = vmatprep.subr.bf16.mxu0 %v21701_v12  ;;  %16227 = vmatprep.subr.bf16.mxu1 %v21704_v49 }
0x1151   :  { %16142 = vmatpush1.bf16.msra.mxu0 %v21699_v15  ;;  %16228 = vmatpush1.bf16.msra.mxu1 %v21702_v60 }
0x1152   :  { %16143 = vmatprep.subr.bf16.mxu0 %v21707_v38  ;;  %16229 = vmatprep.subr.bf16.mxu1 %v21710_v42 }
0x1155   :  { %16144 = vmatpush1.bf16.msra.mxu0 %v21705_v35  ;;  %16230 = vmatpush1.bf16.msra.mxu1 %v21708_v36 }
0x1156   :  { %18649 = vmatprep.subr.bf16.mxu0 %v21711_v62  ;;  %18671 = vmatprep.subr.bf16.mxu1 %v21712_v48 }
0x1158   :  { %16146 = vmatmul.mubr.bf16.vlgmr.msra.gmra.mrb[56].mxu0 %v23530_v29  ;;  %16232 = vmatmul.mubr.bf16.vlgmr.msra.gmra.mrb[56].mxu1 %v23530_v29  ;;  %v21723_v29 = vld [vmem:[%s22491_s5 + $0x58] sm:$0xff]  }
0x1159   :  { %18650 = vmatpush3.bf16.msra.mxu0 %v21713_v10  ;;  %18672 = vmatpush3.bf16.msra.mxu1 %v21714_v14  ;;  %v18572_v14 = vld [vmem:[%s22496_s13] ss:$0 sm:$0xff] }
0x115a   :  { %18651 = vmatprep.subr.bf16.mxu0 %v21715_v53  ;;  %18673 = vmatprep.subr.bf16.mxu1 %v21716_v18 }
0x115d   :  { %18652 = vmatpush3.bf16.msra.mxu0 %v21717_v8  ;;  %18674 = vmatpush3.bf16.msra.mxu1 %v21718_v0 }
0x115e   :  { %18653 = vmatprep.subr.bf16.mxu0 %v21719_v45  ;;  %18675 = vmatprep.subr.bf16.mxu1 %v21720_v47 }
0x1161   :  { %18654 = vmatpush3.bf16.msra.mxu0 %v21721_v58  ;;  %18676 = vmatpush3.bf16.msra.mxu1 %v21722_v44 }
0x1162   :  { %18655 = vmatprep.subr.bf16.mxu0 %v21723_v29  ;;  %18677 = vmatprep.subr.bf16.mxu1 %v21724_v50 }
0x1165   :  { %18656 = vmatpush3.bf16.msra.mxu0 %v21725_v22  ;;  %18678 = vmatpush3.bf16.msra.mxu1 %v21726_v55 }
0x1166   :  { %18657 = vmatprep.subr.bf16.mxu0 %v21727_v13  ;;  %18679 = vmatprep.subr.bf16.mxu1 %v21728_v24  ;;  %v21913_v24 = vld [vmem:[%s23608_s2] sm:$0xff] }
0x1169   :  { %18658 = vmatpush3.bf16.msra.mxu0 %v21729_v37  ;;  %18680 = vmatpush3.bf16.msra.mxu1 %v21730_v51 }
0x116a   :  { %18659 = vmatprep.subr.bf16.mxu0 %v21731_v6  ;;  %18681 = vmatprep.subr.bf16.mxu1 %v21732_v9  ;;  %v21914_v6 = vld [vmem:[%s23608_s2 + $0x8] sm:$0xf] }
0x116d   :  { %18660 = vmatpush3.bf16.msra.mxu0 %v21733_v17  ;;  %18682 = vmatpush3.bf16.msra.mxu1 %v21734_v59 }
0x116e   :  { %18661 = vmatprep.subr.bf16.mxu0 %v21735_v20  ;;  %18683 = vmatprep.subr.bf16.mxu1 %v21736_v33 }
0x1171   :  { %18662 = vmatpush3.bf16.msra.mxu0 %v21737_v4  ;;  %18684 = vmatpush3.bf16.msra.mxu1 %v21738_v56 }
0x1172   :  { %18663 = vmatprep.subr.bf16.mxu0 %v21739_v3  ;;  %18685 = vmatprep.subr.bf16.mxu1 %v21740_v43 }
0x1175   :  { %18664 = vmatpush3.bf16.msra.mxu0 %v21741_v46  ;;  %18686 = vmatpush3.bf16.msra.mxu1 %v21742_v57 }
0x122b   :  { %v16147_v40 = vpop.f32.mrb[56].mxu0  ;;  %v16233_v21 = vpop.f32.mrb[56].mxu1 }
0x122c   :  { %v18749_v63 = vadd.f32 %v16147_v40, %v15413_v23  ;;  %v18753_v2 = vadd.f32 %v16233_v21, %v15421_v16  ;;  %v16149_v34 = vpop.f32.mrb[57].mxu0  ;;  %v16235_v19 = vpop.f32.mrb[57].mxu1 }
0x122d   :  { %v18750_v30 = vadd.f32 %v16149_v34, %v15417_v11  ;;  %v18754_v52 = vadd.f32 %v16235_v19, %v15425_v31  ;;  %v16151_v41 = vpop.f32.mrb[58].mxu0  ;;  %v16237_v39 = vpop.f32.mrb[58].mxu1 }
0x122e   :  { %v18751_v5 = vadd.f32 %v16151_v41, %v15413_v23  ;;  %v18755_v7 = vadd.f32 %v16237_v39, %v15421_v16  ;;  %v16153_v32 = vpop.f32.mrb[59].mxu0  ;;  %v16239_v25 = vpop.f32.mrb[59].mxu1  ;;  %v16242_v1 = vmax.f32 %v18749_v63, 0.0  ;;  %v16244_v26 = vmax.f32 %v18753_v2, 0.0 }
0x122f   :  { %v18752_v61 = vadd.f32 %v16153_v32, %v15417_v11  ;;  %v18756_v27 = vadd.f32 %v16239_v25, %v15425_v31  ;;  %v16243_v49 = vmax.f32 %v18750_v30, 0.0  ;;  %v16245_v15 = vmax.f32 %v18754_v52, 0.0 }
0x1230   :  { %v16246_v12 = vmax.f32 %v18751_v5, 0.0  ;;  %v16248_v28 = vmax.f32 %v18755_v7, 0.0 }
0x1231   :  { %v16247_v60 = vmax.f32 %v18752_v61, 0.0  ;;  %v16249_v38 = vmax.f32 %v18756_v27, 0.0 }
0x1232   :  { %v16250_v42 = vpack.c.bf16 %v16246_v12, %v16242_v1  ;;  %v16252_v35 = vpack.c.bf16 %v16248_v28, %v16244_v26 }
0x1233   :  { %v16251_v36 = vpack.c.bf16 %v16247_v60, %v16243_v49  ;;  %v16253_v62 = vpack.c.bf16 %v16249_v38, %v16245_v15 }
0x1235   :  { %16549 = vmatprep.mubr.bf16.mxu0 %v16251_v36  ;;  %16590 = vmatprep.mubr.bf16.mxu1 %v16253_v62 }
0x1236   :  { %16550 = vmatmul.mubr.bf16.vlgmr.msra.gmra.mrb[60].mxu0 %v16250_v42  ;;  %16591 = vmatmul.mubr.bf16.vlgmr.msra.gmra.mrb[60].mxu1 %v16252_v35 }
0x1309   :  { %v18665_v48 = vpop.f32.mrb[60].mxu0  ;;  %v18687_v10 = vpop.f32.mrb[60].mxu1 }
0x130a   :  { %v18666_v53 = vpop.f32.mrb[61].mxu0  ;;  %v18688_v18 = vpop.f32.mrb[61].mxu1 }
0x130b   :  { %v18667_v8 = vadd.f32 %v18666_v53, %v18665_v48  ;;  %v18689_v0 = vadd.f32 %v18688_v18, %v18687_v10  ;;  %v18668_v45 = vpop.f32.mrb[62].mxu0  ;;  %v18690_v47 = vpop.f32.mrb[62].mxu1 }
0x130c   :  { %v18669_v58 = vpop.f32.mrb[63].mxu0  ;;  %v18691_v44 = vpop.f32.mrb[63].mxu1 }
0x130d   :  { %v16552_v29 = vadd.f32 %v18667_v8, %v18572_v14  ;;  %v18670_v50 = vadd.f32 %v18669_v58, %v18668_v45  ;;  %v18692_v22 = vadd.f32 %v18691_v44, %v18690_v47 }
0x130f   :  { %v16593_v55 = vadd.f32 %v18689_v0, %v16552_v29  ;;  %v16555_v13 = vadd.f32 %v18670_v50, %v18572_v14 }
0x1311   :  { %v16599_v37 = vadd.f32 %v21913_v24, %v16593_v55  ;;  %v16596_v51 = vadd.f32 %v18692_v22, %v16555_v13 }
0x1313   :  { %16601 = vst.msk [vmem:[%s22506_s14] sm:$0xff] %vm23651_vm13, %v16599_v37  ;;  %v16600_v9 = vadd.f32 %v21914_v6, %v16596_v51 }
0x1315   :  { %16602 = vst.msk [vmem:[%s22506_s14 + $0x8] sm:$0xf] %vm11520_vm3, %v16600_v9 }
0x1316   :  { %16611 = vsyncpa [#allocation3], 1 }
0x1317   :  { %16612 = vsyncpa [#allocation5], 1 }
0x1318   :  { %16613 = vsyncpa [#allocation8], 1 }
0x1319   :  { %16614 = vsyncpa [#allocation11], 1 }
0x131a   :  { %16615 = vsyncpa [#allocation14], 1 }
0x131b   :  { %16616 = vsyncpa [#allocation17], 1 }
0x131c   :  { %16617 = vsyncpa [#allocation20], 1 }
0x131d   :  { %16618 = vsyncpa [#allocation23], 1 }

</bundles_post_ra>
